<compile_context>
chip_gen: v5e
topology: v5e:2x2
jax: 0.10.0
libtpu: 0.0.40
codegen_flags: <defaults>
</compile_context>

<pallas_src>
import functools

import jax
import jax.numpy as jnp
from jax.experimental import pallas as pl
from jax.experimental.pallas import tpu as pltpu

NEG_SLOPE = -0.0412   # x4 = where(x1 > 0, x1, x1 * -0.0412)
CO_BLK = 128          # output-channel lanes per grid step


def _round_up(a, b):
    return (a + b - 1) // b * b


def _convt_leaky_softmax_kernel(x_ref, w_ref, o_ref, *, K, R, w_blk, w_out):
    # x_ref: (1, H_slab, W_slab, C_in)   per-batch zero-padded slab (resident)
    # w_ref: (K, K, C_in, CO_BLK)        flipped taps, one 128-lane C_out chunk
    # o_ref: (1, R, W_blk, CO_BLK)       R output rows, channels-last
    c_in = x_ref.shape[3]
    co = o_ref.shape[3]
    m = R * w_blk
    oh0 = pl.multiple_of(pl.program_id(2) * R, R)   # first output row of this block

    acc = jnp.zeros((m, co), jnp.float32)
    # ConvTranspose (stride 1, pad 0) == valid correlation of the zero-padded input
    # with the flipped kernel.  Hoist the width-shifted slice out of the kh loop:
    # only K sublane-offset slices per grid step; kh taps reuse them via a cheap
    # leading-dim window.  Chained sum of dots -> small resident accumulator.
    for kw in range(K):
        xw = x_ref[0, pl.ds(oh0, R + K - 1), pl.ds(kw, w_blk), :]   # (R+K-1, W_blk, C_in)
        for kh in range(K):
            xs = xw[kh:kh + R].reshape(m, c_in)     # layout-trivial (W_blk % 8 == 0)
            acc = acc + jnp.dot(xs, w_ref[kh, kw],
                                preferred_element_type=jnp.float32)

    y = acc.reshape(R, w_blk, co)
    # leaky-style select (dense lanes: the 128-wide C_out chunk sits on the lane axis)
    y = jnp.where(y > 0, y, y * NEG_SLOPE)
    # keep padded width columns out of the softmax reduction
    if w_blk != w_out:
        col = jax.lax.broadcasted_iota(jnp.int32, (R, w_blk, co), 1)
        y = jnp.where(col < w_out, y, -jnp.inf)
    # softmax over the width axis (sublane direction); one exact reciprocal per
    # (row, channel) instead of m*co divides, still exact within f32 tolerance.
    mx = jnp.max(y, axis=1, keepdims=True)
    e = jnp.exp(y - mx)
    s = jnp.sum(e, axis=1, keepdims=True)
    o_ref[0] = (e * pl.reciprocal(s, approx=False)).astype(o_ref.dtype)


def model_forward(x, weight, rows_per_step=None):
    """x: (N, C_in, H, W) float32 NCHW; weight: (C_in, C_out, K, K) PyTorch layout.
    Returns NCHW (N, C_out, H_out, W_out)."""
    N, C_in, H, W = x.shape
    C_out, K = weight.shape[1], weight.shape[-1]
    H_out, W_out = H + K - 1, W + K - 1

    # lane-/sublane-dense padded sizes
    C_out_pad = _round_up(C_out, CO_BLK)
    W_blk = _round_up(W_out, 8)

    # rows per grid step: target m = R*W_blk around 256-384 (keeps the f32 acc tile
    # small enough to stay register/MRB resident after C_out chunking)
    if rows_per_step is None:
        R = max(1, min(H_out, 384 // W_blk))
    else:
        R = int(rows_per_step)
    H_out_pad = _round_up(H_out, R)

    H_slab = H_out_pad + K - 1
    W_slab = W_blk + K - 1

    # flipped taps, channels-last, zero-padded to C_out_pad lanes:
    #   wt[kh, kw, ci, co] = weight[ci, co, K-1-kh, K-1-kw]
    wt = jnp.transpose(weight[:, :, ::-1, ::-1], (2, 3, 0, 1))
    wt = jnp.pad(wt, ((0, 0), (0, 0), (0, 0), (0, C_out_pad - C_out)))

    # channels-last zero-padded input slab: (N, H_slab, W_slab, C_in)
    xp = jnp.transpose(x, (0, 2, 3, 1))
    xp = jnp.pad(xp, ((0, 0),
                      (K - 1, K - 1 + (H_out_pad - H_out)),
                      (K - 1, K - 1 + (W_blk - W_out)),
                      (0, 0)))

    kernel = functools.partial(_convt_leaky_softmax_kernel,
                               K=K, R=R, w_blk=W_blk, w_out=W_out)
    out = pl.pallas_call(
        kernel,
        out_shape=jax.ShapeDtypeStruct((N, H_out_pad, W_blk, C_out_pad), x.dtype),
        grid=(N, C_out_pad // CO_BLK, H_out_pad // R),
        in_specs=[
            pl.BlockSpec((1, H_slab, W_slab, C_in), lambda n, c, r: (n, 0, 0, 0)),
            pl.BlockSpec((K, K, C_in, CO_BLK), lambda n, c, r: (0, 0, 0, c)),
        ],
        out_specs=pl.BlockSpec((1, R, W_blk, CO_BLK), lambda n, c, r: (n, r, 0, c)),
        compiler_params=pltpu.CompilerParams(
            # every output block written exactly once -> all axes megacore-shardable
            dimension_semantics=("parallel", "parallel", "parallel"),
            # explicit budget so the full-size (96x64) slab + weight chunk + output
            # blocks fit even where the default scoped limit is 16 MiB (v5e).
            vmem_limit_bytes=48 * 1024 * 1024,
        ),
    )(xp, wt)

    out = out[:, :H_out, :W_out, :C_out]
    return jnp.transpose(out, (0, 3, 1, 2))        # -> NCHW


def _reference(x, weight):
    """Pure-JAX reference of the PyTorch forward (for correctness check)."""
    K = weight.shape[-1]
    ker = jnp.transpose(weight[:, :, ::-1, ::-1], (1, 0, 2, 3))  # (C_out, C_in, K, K)
    x1 = jax.lax.conv_general_dilated(
        x, ker, window_strides=(1, 1),
        padding=[(K - 1, K - 1), (K - 1, K - 1)],
        dimension_numbers=("NCHW", "OIHW", "NCHW"))
    x4 = jnp.where(x1 > 0, x1, x1 * NEG_SLOPE)
    return jax.nn.softmax(x4, axis=-1)


if __name__ == "__main__":
    # Channels / kernel fixed by the module (105 -> 277, k=5); spatial shrunk from
    # 96x64 to keep the example small.
    key = jax.random.PRNGKey(0)
    kx, kwt, kx2 = jax.random.split(key, 3)
    weight = jax.random.normal(kwt, (105, 277, 5, 5), dtype=jnp.float32) * 0.05

    x = jax.random.normal(kx, (2, 105, 12, 12), dtype=jnp.float32)
    out = jax.block_until_ready(model_forward(x, weight))
    assert out.shape == (2, 277, 16, 16), out.shape
    ref = jax.block_until_ready(_reference(x, weight))
    assert jnp.allclose(out, ref, atol=1e-5, rtol=1e-4), float(jnp.max(jnp.abs(out - ref)))

    # odd spatial size: exercises the W_out->W_blk softmax mask and H_out row-padding paths
    x2 = jax.random.normal(kx2, (1, 105, 9, 10), dtype=jnp.float32)
    out2 = jax.block_until_ready(model_forward(x2, weight, rows_per_step=8))
    assert out2.shape == (1, 277, 13, 14), out2.shape
    ref2 = jax.block_until_ready(_reference(x2, weight))
    assert jnp.allclose(out2, ref2, atol=1e-5, rtol=1e-4), float(jnp.max(jnp.abs(out2 - ref2)))

    print("KERNEL_OK")
</pallas_src>

<mosaic_0001>
module attributes {stable_mosaic.version = 11 : i64} {
  func.func @_convt_leaky_softmax_kernel(%arg0: i32, %arg1: i32, %arg2: i32, %arg3: memref<1x20x20x105xf32, #tpu.memory_space<vmem>>, %arg4: memref<5x5x105x128xf32, #tpu.memory_space<vmem>>, %arg5: memref<1x16x16x128xf32, #tpu.memory_space<vmem>>) attributes {dimension_semantics = [#tpu.dimension_semantics<parallel>, #tpu.dimension_semantics<parallel>, #tpu.dimension_semantics<parallel>], iteration_bounds = array<i64: 2, 3, 1>, scalar_prefetch = 0 : i64, scratch_operands = 0 : i64, tpu.core_type = #tpu.core_type<tc>, window_params = [{transform_indices = @transform_0, window_bounds = array<i64: 1, 20, 20, 105>}, {transform_indices = @transform_1, window_bounds = array<i64: 5, 5, 105, 128>}, {transform_indices = @transform_2, window_bounds = array<i64: 1, 16, 16, 128>}]} {
    %c16_i32 = arith.constant 16 : i32
    %0 = arith.muli %arg2, %c16_i32 : i32
    %1 = tpu.assume_multiple %0, 16 : i32
    %cst = arith.constant 0.000000e+00 : f32
    %2 = vector.broadcast %cst : f32 to vector<256x128xf32>
    %c0 = arith.constant 0 : index
    %3 = arith.index_cast %1 : i32 to index
    %c0_0 = arith.constant 0 : index
    %c0_1 = arith.constant 0 : index
    %4 = vector.load %arg3[%c0, %3, %c0_0, %c0_1] : memref<1x20x20x105xf32, #tpu.memory_space<vmem>>, vector<1x20x16x105xf32>
    %5 = vector.shape_cast %4 : vector<1x20x16x105xf32> to vector<20x16x105xf32>
    %6 = vector.extract_strided_slice %5 {offsets = [0, 0, 0], sizes = [16, 16, 105], strides = [1, 1, 1]} : vector<20x16x105xf32> to vector<16x16x105xf32>
    %7 = vector.shape_cast %6 : vector<16x16x105xf32> to vector<256x105xf32>
    %c0_2 = arith.constant 0 : index
    %c0_3 = arith.constant 0 : index
    %c0_4 = arith.constant 0 : index
    %c0_5 = arith.constant 0 : index
    %8 = vector.load %arg4[%c0_2, %c0_3, %c0_4, %c0_5] : memref<5x5x105x128xf32, #tpu.memory_space<vmem>>, vector<1x1x105x128xf32>
    %9 = vector.shape_cast %8 : vector<1x1x105x128xf32> to vector<105x128xf32>
    %cst_6 = arith.constant dense<0.000000e+00> : vector<256x128xf32>
    %10 = tpu.matmul %7, %9, %cst_6 {dimension_numbers = #tpu.dot_dimension_numbers<[1], [0], [0], [1], [0, 0, 1, 1], [], []>} : vector<256x105xf32>, vector<105x128xf32>, vector<256x128xf32> -> vector<256x128xf32>
    %11 = arith.addf %2, %10 : vector<256x128xf32>
    %12 = vector.extract_strided_slice %5 {offsets = [1, 0, 0], sizes = [16, 16, 105], strides = [1, 1, 1]} : vector<20x16x105xf32> to vector<16x16x105xf32>
    %13 = vector.shape_cast %12 : vector<16x16x105xf32> to vector<256x105xf32>
    %c1 = arith.constant 1 : index
    %c0_7 = arith.constant 0 : index
    %c0_8 = arith.constant 0 : index
    %c0_9 = arith.constant 0 : index
    %14 = vector.load %arg4[%c1, %c0_7, %c0_8, %c0_9] : memref<5x5x105x128xf32, #tpu.memory_space<vmem>>, vector<1x1x105x128xf32>
    %15 = vector.shape_cast %14 : vector<1x1x105x128xf32> to vector<105x128xf32>
    %cst_10 = arith.constant dense<0.000000e+00> : vector<256x128xf32>
    %16 = tpu.matmul %13, %15, %cst_10 {dimension_numbers = #tpu.dot_dimension_numbers<[1], [0], [0], [1], [0, 0, 1, 1], [], []>} : vector<256x105xf32>, vector<105x128xf32>, vector<256x128xf32> -> vector<256x128xf32>
    %17 = arith.addf %11, %16 : vector<256x128xf32>
    %18 = vector.extract_strided_slice %5 {offsets = [2, 0, 0], sizes = [16, 16, 105], strides = [1, 1, 1]} : vector<20x16x105xf32> to vector<16x16x105xf32>
    %19 = vector.shape_cast %18 : vector<16x16x105xf32> to vector<256x105xf32>
    %c2 = arith.constant 2 : index
    %c0_11 = arith.constant 0 : index
    %c0_12 = arith.constant 0 : index
    %c0_13 = arith.constant 0 : index
    %20 = vector.load %arg4[%c2, %c0_11, %c0_12, %c0_13] : memref<5x5x105x128xf32, #tpu.memory_space<vmem>>, vector<1x1x105x128xf32>
    %21 = vector.shape_cast %20 : vector<1x1x105x128xf32> to vector<105x128xf32>
    %cst_14 = arith.constant dense<0.000000e+00> : vector<256x128xf32>
    %22 = tpu.matmul %19, %21, %cst_14 {dimension_numbers = #tpu.dot_dimension_numbers<[1], [0], [0], [1], [0, 0, 1, 1], [], []>} : vector<256x105xf32>, vector<105x128xf32>, vector<256x128xf32> -> vector<256x128xf32>
    %23 = arith.addf %17, %22 : vector<256x128xf32>
    %24 = vector.extract_strided_slice %5 {offsets = [3, 0, 0], sizes = [16, 16, 105], strides = [1, 1, 1]} : vector<20x16x105xf32> to vector<16x16x105xf32>
    %25 = vector.shape_cast %24 : vector<16x16x105xf32> to vector<256x105xf32>
    %c3 = arith.constant 3 : index
    %c0_15 = arith.constant 0 : index
    %c0_16 = arith.constant 0 : index
    %c0_17 = arith.constant 0 : index
    %26 = vector.load %arg4[%c3, %c0_15, %c0_16, %c0_17] : memref<5x5x105x128xf32, #tpu.memory_space<vmem>>, vector<1x1x105x128xf32>
    %27 = vector.shape_cast %26 : vector<1x1x105x128xf32> to vector<105x128xf32>
    %cst_18 = arith.constant dense<0.000000e+00> : vector<256x128xf32>
    %28 = tpu.matmul %25, %27, %cst_18 {dimension_numbers = #tpu.dot_dimension_numbers<[1], [0], [0], [1], [0, 0, 1, 1], [], []>} : vector<256x105xf32>, vector<105x128xf32>, vector<256x128xf32> -> vector<256x128xf32>
    %29 = arith.addf %23, %28 : vector<256x128xf32>
    %30 = vector.extract_strided_slice %5 {offsets = [4, 0, 0], sizes = [16, 16, 105], strides = [1, 1, 1]} : vector<20x16x105xf32> to vector<16x16x105xf32>
    %31 = vector.shape_cast %30 : vector<16x16x105xf32> to vector<256x105xf32>
    %c4 = arith.constant 4 : index
    %c0_19 = arith.constant 0 : index
    %c0_20 = arith.constant 0 : index
    %c0_21 = arith.constant 0 : index
    %32 = vector.load %arg4[%c4, %c0_19, %c0_20, %c0_21] : memref<5x5x105x128xf32, #tpu.memory_space<vmem>>, vector<1x1x105x128xf32>
    %33 = vector.shape_cast %32 : vector<1x1x105x128xf32> to vector<105x128xf32>
    %cst_22 = arith.constant dense<0.000000e+00> : vector<256x128xf32>
    %34 = tpu.matmul %31, %33, %cst_22 {dimension_numbers = #tpu.dot_dimension_numbers<[1], [0], [0], [1], [0, 0, 1, 1], [], []>} : vector<256x105xf32>, vector<105x128xf32>, vector<256x128xf32> -> vector<256x128xf32>
    %35 = arith.addf %29, %34 : vector<256x128xf32>
    %c0_23 = arith.constant 0 : index
    %36 = arith.index_cast %1 : i32 to index
    %c1_24 = arith.constant 1 : index
    %c0_25 = arith.constant 0 : index
    %37 = vector.load %arg3[%c0_23, %36, %c1_24, %c0_25] : memref<1x20x20x105xf32, #tpu.memory_space<vmem>>, vector<1x20x16x105xf32>
    %38 = vector.shape_cast %37 : vector<1x20x16x105xf32> to vector<20x16x105xf32>
    %39 = vector.extract_strided_slice %38 {offsets = [0, 0, 0], sizes = [16, 16, 105], strides = [1, 1, 1]} : vector<20x16x105xf32> to vector<16x16x105xf32>
    %40 = vector.shape_cast %39 : vector<16x16x105xf32> to vector<256x105xf32>
    %c0_26 = arith.constant 0 : index
    %c1_27 = arith.constant 1 : index
    %c0_28 = arith.constant 0 : index
    %c0_29 = arith.constant 0 : index
    %41 = vector.load %arg4[%c0_26, %c1_27, %c0_28, %c0_29] : memref<5x5x105x128xf32, #tpu.memory_space<vmem>>, vector<1x1x105x128xf32>
    %42 = vector.shape_cast %41 : vector<1x1x105x128xf32> to vector<105x128xf32>
    %cst_30 = arith.constant dense<0.000000e+00> : vector<256x128xf32>
    %43 = tpu.matmul %40, %42, %cst_30 {dimension_numbers = #tpu.dot_dimension_numbers<[1], [0], [0], [1], [0, 0, 1, 1], [], []>} : vector<256x105xf32>, vector<105x128xf32>, vector<256x128xf32> -> vector<256x128xf32>
    %44 = arith.addf %35, %43 : vector<256x128xf32>
    %45 = vector.extract_strided_slice %38 {offsets = [1, 0, 0], sizes = [16, 16, 105], strides = [1, 1, 1]} : vector<20x16x105xf32> to vector<16x16x105xf32>
    %46 = vector.shape_cast %45 : vector<16x16x105xf32> to vector<256x105xf32>
    %c1_31 = arith.constant 1 : index
    %c1_32 = arith.constant 1 : index
    %c0_33 = arith.constant 0 : index
    %c0_34 = arith.constant 0 : index
    %47 = vector.load %arg4[%c1_31, %c1_32, %c0_33, %c0_34] : memref<5x5x105x128xf32, #tpu.memory_space<vmem>>, vector<1x1x105x128xf32>
    %48 = vector.shape_cast %47 : vector<1x1x105x128xf32> to vector<105x128xf32>
    %cst_35 = arith.constant dense<0.000000e+00> : vector<256x128xf32>
    %49 = tpu.matmul %46, %48, %cst_35 {dimension_numbers = #tpu.dot_dimension_numbers<[1], [0], [0], [1], [0, 0, 1, 1], [], []>} : vector<256x105xf32>, vector<105x128xf32>, vector<256x128xf32> -> vector<256x128xf32>
    %50 = arith.addf %44, %49 : vector<256x128xf32>
    %51 = vector.extract_strided_slice %38 {offsets = [2, 0, 0], sizes = [16, 16, 105], strides = [1, 1, 1]} : vector<20x16x105xf32> to vector<16x16x105xf32>
    %52 = vector.shape_cast %51 : vector<16x16x105xf32> to vector<256x105xf32>
    %c2_36 = arith.constant 2 : index
    %c1_37 = arith.constant 1 : index
    %c0_38 = arith.constant 0 : index
    %c0_39 = arith.constant 0 : index
    %53 = vector.load %arg4[%c2_36, %c1_37, %c0_38, %c0_39] : memref<5x5x105x128xf32, #tpu.memory_space<vmem>>, vector<1x1x105x128xf32>
    %54 = vector.shape_cast %53 : vector<1x1x105x128xf32> to vector<105x128xf32>
    %cst_40 = arith.constant dense<0.000000e+00> : vector<256x128xf32>
    %55 = tpu.matmul %52, %54, %cst_40 {dimension_numbers = #tpu.dot_dimension_numbers<[1], [0], [0], [1], [0, 0, 1, 1], [], []>} : vector<256x105xf32>, vector<105x128xf32>, vector<256x128xf32> -> vector<256x128xf32>
    %56 = arith.addf %50, %55 : vector<256x128xf32>
    %57 = vector.extract_strided_slice %38 {offsets = [3, 0, 0], sizes = [16, 16, 105], strides = [1, 1, 1]} : vector<20x16x105xf32> to vector<16x16x105xf32>
    %58 = vector.shape_cast %57 : vector<16x16x105xf32> to vector<256x105xf32>
    %c3_41 = arith.constant 3 : index
    %c1_42 = arith.constant 1 : index
    %c0_43 = arith.constant 0 : index
    %c0_44 = arith.constant 0 : index
    %59 = vector.load %arg4[%c3_41, %c1_42, %c0_43, %c0_44] : memref<5x5x105x128xf32, #tpu.memory_space<vmem>>, vector<1x1x105x128xf32>
    %60 = vector.shape_cast %59 : vector<1x1x105x128xf32> to vector<105x128xf32>
    %cst_45 = arith.constant dense<0.000000e+00> : vector<256x128xf32>
    %61 = tpu.matmul %58, %60, %cst_45 {dimension_numbers = #tpu.dot_dimension_numbers<[1], [0], [0], [1], [0, 0, 1, 1], [], []>} : vector<256x105xf32>, vector<105x128xf32>, vector<256x128xf32> -> vector<256x128xf32>
    %62 = arith.addf %56, %61 : vector<256x128xf32>
    %63 = vector.extract_strided_slice %38 {offsets = [4, 0, 0], sizes = [16, 16, 105], strides = [1, 1, 1]} : vector<20x16x105xf32> to vector<16x16x105xf32>
    %64 = vector.shape_cast %63 : vector<16x16x105xf32> to vector<256x105xf32>
    %c4_46 = arith.constant 4 : index
    %c1_47 = arith.constant 1 : index
    %c0_48 = arith.constant 0 : index
    %c0_49 = arith.constant 0 : index
    %65 = vector.load %arg4[%c4_46, %c1_47, %c0_48, %c0_49] : memref<5x5x105x128xf32, #tpu.memory_space<vmem>>, vector<1x1x105x128xf32>
    %66 = vector.shape_cast %65 : vector<1x1x105x128xf32> to vector<105x128xf32>
    %cst_50 = arith.constant dense<0.000000e+00> : vector<256x128xf32>
    %67 = tpu.matmul %64, %66, %cst_50 {dimension_numbers = #tpu.dot_dimension_numbers<[1], [0], [0], [1], [0, 0, 1, 1], [], []>} : vector<256x105xf32>, vector<105x128xf32>, vector<256x128xf32> -> vector<256x128xf32>
    %68 = arith.addf %62, %67 : vector<256x128xf32>
    %c0_51 = arith.constant 0 : index
    %69 = arith.index_cast %1 : i32 to index
    %c2_52 = arith.constant 2 : index
    %c0_53 = arith.constant 0 : index
    %70 = vector.load %arg3[%c0_51, %69, %c2_52, %c0_53] : memref<1x20x20x105xf32, #tpu.memory_space<vmem>>, vector<1x20x16x105xf32>
    %71 = vector.shape_cast %70 : vector<1x20x16x105xf32> to vector<20x16x105xf32>
    %72 = vector.extract_strided_slice %71 {offsets = [0, 0, 0], sizes = [16, 16, 105], strides = [1, 1, 1]} : vector<20x16x105xf32> to vector<16x16x105xf32>
    %73 = vector.shape_cast %72 : vector<16x16x105xf32> to vector<256x105xf32>
    %c0_54 = arith.constant 0 : index
    %c2_55 = arith.constant 2 : index
    %c0_56 = arith.constant 0 : index
    %c0_57 = arith.constant 0 : index
    %74 = vector.load %arg4[%c0_54, %c2_55, %c0_56, %c0_57] : memref<5x5x105x128xf32, #tpu.memory_space<vmem>>, vector<1x1x105x128xf32>
    %75 = vector.shape_cast %74 : vector<1x1x105x128xf32> to vector<105x128xf32>
    %cst_58 = arith.constant dense<0.000000e+00> : vector<256x128xf32>
    %76 = tpu.matmul %73, %75, %cst_58 {dimension_numbers = #tpu.dot_dimension_numbers<[1], [0], [0], [1], [0, 0, 1, 1], [], []>} : vector<256x105xf32>, vector<105x128xf32>, vector<256x128xf32> -> vector<256x128xf32>
    %77 = arith.addf %68, %76 : vector<256x128xf32>
    %78 = vector.extract_strided_slice %71 {offsets = [1, 0, 0], sizes = [16, 16, 105], strides = [1, 1, 1]} : vector<20x16x105xf32> to vector<16x16x105xf32>
    %79 = vector.shape_cast %78 : vector<16x16x105xf32> to vector<256x105xf32>
    %c1_59 = arith.constant 1 : index
    %c2_60 = arith.constant 2 : index
    %c0_61 = arith.constant 0 : index
    %c0_62 = arith.constant 0 : index
    %80 = vector.load %arg4[%c1_59, %c2_60, %c0_61, %c0_62] : memref<5x5x105x128xf32, #tpu.memory_space<vmem>>, vector<1x1x105x128xf32>
    %81 = vector.shape_cast %80 : vector<1x1x105x128xf32> to vector<105x128xf32>
    %cst_63 = arith.constant dense<0.000000e+00> : vector<256x128xf32>
    %82 = tpu.matmul %79, %81, %cst_63 {dimension_numbers = #tpu.dot_dimension_numbers<[1], [0], [0], [1], [0, 0, 1, 1], [], []>} : vector<256x105xf32>, vector<105x128xf32>, vector<256x128xf32> -> vector<256x128xf32>
    %83 = arith.addf %77, %82 : vector<256x128xf32>
    %84 = vector.extract_strided_slice %71 {offsets = [2, 0, 0], sizes = [16, 16, 105], strides = [1, 1, 1]} : vector<20x16x105xf32> to vector<16x16x105xf32>
    %85 = vector.shape_cast %84 : vector<16x16x105xf32> to vector<256x105xf32>
    %c2_64 = arith.constant 2 : index
    %c2_65 = arith.constant 2 : index
    %c0_66 = arith.constant 0 : index
    %c0_67 = arith.constant 0 : index
    %86 = vector.load %arg4[%c2_64, %c2_65, %c0_66, %c0_67] : memref<5x5x105x128xf32, #tpu.memory_space<vmem>>, vector<1x1x105x128xf32>
    %87 = vector.shape_cast %86 : vector<1x1x105x128xf32> to vector<105x128xf32>
    %cst_68 = arith.constant dense<0.000000e+00> : vector<256x128xf32>
    %88 = tpu.matmul %85, %87, %cst_68 {dimension_numbers = #tpu.dot_dimension_numbers<[1], [0], [0], [1], [0, 0, 1, 1], [], []>} : vector<256x105xf32>, vector<105x128xf32>, vector<256x128xf32> -> vector<256x128xf32>
    %89 = arith.addf %83, %88 : vector<256x128xf32>
    %90 = vector.extract_strided_slice %71 {offsets = [3, 0, 0], sizes = [16, 16, 105], strides = [1, 1, 1]} : vector<20x16x105xf32> to vector<16x16x105xf32>
    %91 = vector.shape_cast %90 : vector<16x16x105xf32> to vector<256x105xf32>
    %c3_69 = arith.constant 3 : index
    %c2_70 = arith.constant 2 : index
    %c0_71 = arith.constant 0 : index
    %c0_72 = arith.constant 0 : index
    %92 = vector.load %arg4[%c3_69, %c2_70, %c0_71, %c0_72] : memref<5x5x105x128xf32, #tpu.memory_space<vmem>>, vector<1x1x105x128xf32>
    %93 = vector.shape_cast %92 : vector<1x1x105x128xf32> to vector<105x128xf32>
    %cst_73 = arith.constant dense<0.000000e+00> : vector<256x128xf32>
    %94 = tpu.matmul %91, %93, %cst_73 {dimension_numbers = #tpu.dot_dimension_numbers<[1], [0], [0], [1], [0, 0, 1, 1], [], []>} : vector<256x105xf32>, vector<105x128xf32>, vector<256x128xf32> -> vector<256x128xf32>
    %95 = arith.addf %89, %94 : vector<256x128xf32>
    %96 = vector.extract_strided_slice %71 {offsets = [4, 0, 0], sizes = [16, 16, 105], strides = [1, 1, 1]} : vector<20x16x105xf32> to vector<16x16x105xf32>
    %97 = vector.shape_cast %96 : vector<16x16x105xf32> to vector<256x105xf32>
    %c4_74 = arith.constant 4 : index
    %c2_75 = arith.constant 2 : index
    %c0_76 = arith.constant 0 : index
    %c0_77 = arith.constant 0 : index
    %98 = vector.load %arg4[%c4_74, %c2_75, %c0_76, %c0_77] : memref<5x5x105x128xf32, #tpu.memory_space<vmem>>, vector<1x1x105x128xf32>
    %99 = vector.shape_cast %98 : vector<1x1x105x128xf32> to vector<105x128xf32>
    %cst_78 = arith.constant dense<0.000000e+00> : vector<256x128xf32>
    %100 = tpu.matmul %97, %99, %cst_78 {dimension_numbers = #tpu.dot_dimension_numbers<[1], [0], [0], [1], [0, 0, 1, 1], [], []>} : vector<256x105xf32>, vector<105x128xf32>, vector<256x128xf32> -> vector<256x128xf32>
    %101 = arith.addf %95, %100 : vector<256x128xf32>
    %c0_79 = arith.constant 0 : index
    %102 = arith.index_cast %1 : i32 to index
    %c3_80 = arith.constant 3 : index
    %c0_81 = arith.constant 0 : index
    %103 = vector.load %arg3[%c0_79, %102, %c3_80, %c0_81] : memref<1x20x20x105xf32, #tpu.memory_space<vmem>>, vector<1x20x16x105xf32>
    %104 = vector.shape_cast %103 : vector<1x20x16x105xf32> to vector<20x16x105xf32>
    %105 = vector.extract_strided_slice %104 {offsets = [0, 0, 0], sizes = [16, 16, 105], strides = [1, 1, 1]} : vector<20x16x105xf32> to vector<16x16x105xf32>
    %106 = vector.shape_cast %105 : vector<16x16x105xf32> to vector<256x105xf32>
    %c0_82 = arith.constant 0 : index
    %c3_83 = arith.constant 3 : index
    %c0_84 = arith.constant 0 : index
    %c0_85 = arith.constant 0 : index
    %107 = vector.load %arg4[%c0_82, %c3_83, %c0_84, %c0_85] : memref<5x5x105x128xf32, #tpu.memory_space<vmem>>, vector<1x1x105x128xf32>
    %108 = vector.shape_cast %107 : vector<1x1x105x128xf32> to vector<105x128xf32>
    %cst_86 = arith.constant dense<0.000000e+00> : vector<256x128xf32>
    %109 = tpu.matmul %106, %108, %cst_86 {dimension_numbers = #tpu.dot_dimension_numbers<[1], [0], [0], [1], [0, 0, 1, 1], [], []>} : vector<256x105xf32>, vector<105x128xf32>, vector<256x128xf32> -> vector<256x128xf32>
    %110 = arith.addf %101, %109 : vector<256x128xf32>
    %111 = vector.extract_strided_slice %104 {offsets = [1, 0, 0], sizes = [16, 16, 105], strides = [1, 1, 1]} : vector<20x16x105xf32> to vector<16x16x105xf32>
    %112 = vector.shape_cast %111 : vector<16x16x105xf32> to vector<256x105xf32>
    %c1_87 = arith.constant 1 : index
    %c3_88 = arith.constant 3 : index
    %c0_89 = arith.constant 0 : index
    %c0_90 = arith.constant 0 : index
    %113 = vector.load %arg4[%c1_87, %c3_88, %c0_89, %c0_90] : memref<5x5x105x128xf32, #tpu.memory_space<vmem>>, vector<1x1x105x128xf32>
    %114 = vector.shape_cast %113 : vector<1x1x105x128xf32> to vector<105x128xf32>
    %cst_91 = arith.constant dense<0.000000e+00> : vector<256x128xf32>
    %115 = tpu.matmul %112, %114, %cst_91 {dimension_numbers = #tpu.dot_dimension_numbers<[1], [0], [0], [1], [0, 0, 1, 1], [], []>} : vector<256x105xf32>, vector<105x128xf32>, vector<256x128xf32> -> vector<256x128xf32>
    %116 = arith.addf %110, %115 : vector<256x128xf32>
    %117 = vector.extract_strided_slice %104 {offsets = [2, 0, 0], sizes = [16, 16, 105], strides = [1, 1, 1]} : vector<20x16x105xf32> to vector<16x16x105xf32>
    %118 = vector.shape_cast %117 : vector<16x16x105xf32> to vector<256x105xf32>
    %c2_92 = arith.constant 2 : index
    %c3_93 = arith.constant 3 : index
    %c0_94 = arith.constant 0 : index
    %c0_95 = arith.constant 0 : index
    %119 = vector.load %arg4[%c2_92, %c3_93, %c0_94, %c0_95] : memref<5x5x105x128xf32, #tpu.memory_space<vmem>>, vector<1x1x105x128xf32>
    %120 = vector.shape_cast %119 : vector<1x1x105x128xf32> to vector<105x128xf32>
    %cst_96 = arith.constant dense<0.000000e+00> : vector<256x128xf32>
    %121 = tpu.matmul %118, %120, %cst_96 {dimension_numbers = #tpu.dot_dimension_numbers<[1], [0], [0], [1], [0, 0, 1, 1], [], []>} : vector<256x105xf32>, vector<105x128xf32>, vector<256x128xf32> -> vector<256x128xf32>
    %122 = arith.addf %116, %121 : vector<256x128xf32>
    %123 = vector.extract_strided_slice %104 {offsets = [3, 0, 0], sizes = [16, 16, 105], strides = [1, 1, 1]} : vector<20x16x105xf32> to vector<16x16x105xf32>
    %124 = vector.shape_cast %123 : vector<16x16x105xf32> to vector<256x105xf32>
    %c3_97 = arith.constant 3 : index
    %c3_98 = arith.constant 3 : index
    %c0_99 = arith.constant 0 : index
    %c0_100 = arith.constant 0 : index
    %125 = vector.load %arg4[%c3_97, %c3_98, %c0_99, %c0_100] : memref<5x5x105x128xf32, #tpu.memory_space<vmem>>, vector<1x1x105x128xf32>
    %126 = vector.shape_cast %125 : vector<1x1x105x128xf32> to vector<105x128xf32>
    %cst_101 = arith.constant dense<0.000000e+00> : vector<256x128xf32>
    %127 = tpu.matmul %124, %126, %cst_101 {dimension_numbers = #tpu.dot_dimension_numbers<[1], [0], [0], [1], [0, 0, 1, 1], [], []>} : vector<256x105xf32>, vector<105x128xf32>, vector<256x128xf32> -> vector<256x128xf32>
    %128 = arith.addf %122, %127 : vector<256x128xf32>
    %129 = vector.extract_strided_slice %104 {offsets = [4, 0, 0], sizes = [16, 16, 105], strides = [1, 1, 1]} : vector<20x16x105xf32> to vector<16x16x105xf32>
    %130 = vector.shape_cast %129 : vector<16x16x105xf32> to vector<256x105xf32>
    %c4_102 = arith.constant 4 : index
    %c3_103 = arith.constant 3 : index
    %c0_104 = arith.constant 0 : index
    %c0_105 = arith.constant 0 : index
    %131 = vector.load %arg4[%c4_102, %c3_103, %c0_104, %c0_105] : memref<5x5x105x128xf32, #tpu.memory_space<vmem>>, vector<1x1x105x128xf32>
    %132 = vector.shape_cast %131 : vector<1x1x105x128xf32> to vector<105x128xf32>
    %cst_106 = arith.constant dense<0.000000e+00> : vector<256x128xf32>
    %133 = tpu.matmul %130, %132, %cst_106 {dimension_numbers = #tpu.dot_dimension_numbers<[1], [0], [0], [1], [0, 0, 1, 1], [], []>} : vector<256x105xf32>, vector<105x128xf32>, vector<256x128xf32> -> vector<256x128xf32>
    %134 = arith.addf %128, %133 : vector<256x128xf32>
    %c0_107 = arith.constant 0 : index
    %135 = arith.index_cast %1 : i32 to index
    %c4_108 = arith.constant 4 : index
    %c0_109 = arith.constant 0 : index
    %136 = vector.load %arg3[%c0_107, %135, %c4_108, %c0_109] : memref<1x20x20x105xf32, #tpu.memory_space<vmem>>, vector<1x20x16x105xf32>
    %137 = vector.shape_cast %136 : vector<1x20x16x105xf32> to vector<20x16x105xf32>
    %138 = vector.extract_strided_slice %137 {offsets = [0, 0, 0], sizes = [16, 16, 105], strides = [1, 1, 1]} : vector<20x16x105xf32> to vector<16x16x105xf32>
    %139 = vector.shape_cast %138 : vector<16x16x105xf32> to vector<256x105xf32>
    %c0_110 = arith.constant 0 : index
    %c4_111 = arith.constant 4 : index
    %c0_112 = arith.constant 0 : index
    %c0_113 = arith.constant 0 : index
    %140 = vector.load %arg4[%c0_110, %c4_111, %c0_112, %c0_113] : memref<5x5x105x128xf32, #tpu.memory_space<vmem>>, vector<1x1x105x128xf32>
    %141 = vector.shape_cast %140 : vector<1x1x105x128xf32> to vector<105x128xf32>
    %cst_114 = arith.constant dense<0.000000e+00> : vector<256x128xf32>
    %142 = tpu.matmul %139, %141, %cst_114 {dimension_numbers = #tpu.dot_dimension_numbers<[1], [0], [0], [1], [0, 0, 1, 1], [], []>} : vector<256x105xf32>, vector<105x128xf32>, vector<256x128xf32> -> vector<256x128xf32>
    %143 = arith.addf %134, %142 : vector<256x128xf32>
    %144 = vector.extract_strided_slice %137 {offsets = [1, 0, 0], sizes = [16, 16, 105], strides = [1, 1, 1]} : vector<20x16x105xf32> to vector<16x16x105xf32>
    %145 = vector.shape_cast %144 : vector<16x16x105xf32> to vector<256x105xf32>
    %c1_115 = arith.constant 1 : index
    %c4_116 = arith.constant 4 : index
    %c0_117 = arith.constant 0 : index
    %c0_118 = arith.constant 0 : index
    %146 = vector.load %arg4[%c1_115, %c4_116, %c0_117, %c0_118] : memref<5x5x105x128xf32, #tpu.memory_space<vmem>>, vector<1x1x105x128xf32>
    %147 = vector.shape_cast %146 : vector<1x1x105x128xf32> to vector<105x128xf32>
    %cst_119 = arith.constant dense<0.000000e+00> : vector<256x128xf32>
    %148 = tpu.matmul %145, %147, %cst_119 {dimension_numbers = #tpu.dot_dimension_numbers<[1], [0], [0], [1], [0, 0, 1, 1], [], []>} : vector<256x105xf32>, vector<105x128xf32>, vector<256x128xf32> -> vector<256x128xf32>
    %149 = arith.addf %143, %148 : vector<256x128xf32>
    %150 = vector.extract_strided_slice %137 {offsets = [2, 0, 0], sizes = [16, 16, 105], strides = [1, 1, 1]} : vector<20x16x105xf32> to vector<16x16x105xf32>
    %151 = vector.shape_cast %150 : vector<16x16x105xf32> to vector<256x105xf32>
    %c2_120 = arith.constant 2 : index
    %c4_121 = arith.constant 4 : index
    %c0_122 = arith.constant 0 : index
    %c0_123 = arith.constant 0 : index
    %152 = vector.load %arg4[%c2_120, %c4_121, %c0_122, %c0_123] : memref<5x5x105x128xf32, #tpu.memory_space<vmem>>, vector<1x1x105x128xf32>
    %153 = vector.shape_cast %152 : vector<1x1x105x128xf32> to vector<105x128xf32>
    %cst_124 = arith.constant dense<0.000000e+00> : vector<256x128xf32>
    %154 = tpu.matmul %151, %153, %cst_124 {dimension_numbers = #tpu.dot_dimension_numbers<[1], [0], [0], [1], [0, 0, 1, 1], [], []>} : vector<256x105xf32>, vector<105x128xf32>, vector<256x128xf32> -> vector<256x128xf32>
    %155 = arith.addf %149, %154 : vector<256x128xf32>
    %156 = vector.extract_strided_slice %137 {offsets = [3, 0, 0], sizes = [16, 16, 105], strides = [1, 1, 1]} : vector<20x16x105xf32> to vector<16x16x105xf32>
    %157 = vector.shape_cast %156 : vector<16x16x105xf32> to vector<256x105xf32>
    %c3_125 = arith.constant 3 : index
    %c4_126 = arith.constant 4 : index
    %c0_127 = arith.constant 0 : index
    %c0_128 = arith.constant 0 : index
    %158 = vector.load %arg4[%c3_125, %c4_126, %c0_127, %c0_128] : memref<5x5x105x128xf32, #tpu.memory_space<vmem>>, vector<1x1x105x128xf32>
    %159 = vector.shape_cast %158 : vector<1x1x105x128xf32> to vector<105x128xf32>
    %cst_129 = arith.constant dense<0.000000e+00> : vector<256x128xf32>
    %160 = tpu.matmul %157, %159, %cst_129 {dimension_numbers = #tpu.dot_dimension_numbers<[1], [0], [0], [1], [0, 0, 1, 1], [], []>} : vector<256x105xf32>, vector<105x128xf32>, vector<256x128xf32> -> vector<256x128xf32>
    %161 = arith.addf %155, %160 : vector<256x128xf32>
    %162 = vector.extract_strided_slice %137 {offsets = [4, 0, 0], sizes = [16, 16, 105], strides = [1, 1, 1]} : vector<20x16x105xf32> to vector<16x16x105xf32>
    %163 = vector.shape_cast %162 : vector<16x16x105xf32> to vector<256x105xf32>
    %c4_130 = arith.constant 4 : index
    %c4_131 = arith.constant 4 : index
    %c0_132 = arith.constant 0 : index
    %c0_133 = arith.constant 0 : index
    %164 = vector.load %arg4[%c4_130, %c4_131, %c0_132, %c0_133] : memref<5x5x105x128xf32, #tpu.memory_space<vmem>>, vector<1x1x105x128xf32>
    %165 = vector.shape_cast %164 : vector<1x1x105x128xf32> to vector<105x128xf32>
    %cst_134 = arith.constant dense<0.000000e+00> : vector<256x128xf32>
    %166 = tpu.matmul %163, %165, %cst_134 {dimension_numbers = #tpu.dot_dimension_numbers<[1], [0], [0], [1], [0, 0, 1, 1], [], []>} : vector<256x105xf32>, vector<105x128xf32>, vector<256x128xf32> -> vector<256x128xf32>
    %167 = arith.addf %161, %166 : vector<256x128xf32>
    %168 = vector.shape_cast %167 : vector<256x128xf32> to vector<16x16x128xf32>
    %cst_135 = arith.constant 0.000000e+00 : f32
    %169 = vector.broadcast %cst_135 : f32 to vector<16x16x128xf32>
    %170 = arith.cmpf ogt, %168, %169 : vector<16x16x128xf32>
    %cst_136 = arith.constant -4.120000e-02 : f32
    %171 = vector.broadcast %cst_136 : f32 to vector<16x16x128xf32>
    %172 = arith.mulf %168, %171 : vector<16x16x128xf32>
    %173 = arith.select %170, %168, %172 : vector<16x16x128xi1>, vector<16x16x128xf32>
    %cst_137 = arith.constant dense<0xFF800000> : vector<16x128xf32>
    %174 = vector.multi_reduction <maximumf>, %173, %cst_137 [1] : vector<16x16x128xf32> to vector<16x128xf32>
    %175 = vector.shape_cast %174 : vector<16x128xf32> to vector<16x1x128xf32>
    %176 = vector.broadcast %175 : vector<16x1x128xf32> to vector<16x16x128xf32>
    %177 = arith.subf %173, %176 : vector<16x16x128xf32>
    %178 = math.exp %177 : vector<16x16x128xf32>
    %cst_138 = arith.constant dense<0.000000e+00> : vector<16x128xf32>
    %179 = vector.multi_reduction <add>, %178, %cst_138 [1] : vector<16x16x128xf32> to vector<16x128xf32>
    %180 = vector.shape_cast %179 : vector<16x128xf32> to vector<16x1x128xf32>
    %181 = tpu.reciprocal %180 : vector<16x1x128xf32> -> vector<16x1x128xf32>
    %182 = vector.broadcast %181 : vector<16x1x128xf32> to vector<16x16x128xf32>
    %183 = arith.mulf %178, %182 : vector<16x16x128xf32>
    %c0_139 = arith.constant 0 : index
    %c0_140 = arith.constant 0 : index
    %c0_141 = arith.constant 0 : index
    %c0_142 = arith.constant 0 : index
    %184 = vector.load %arg5[%c0_139, %c0_140, %c0_141, %c0_142] : memref<1x16x16x128xf32, #tpu.memory_space<vmem>>, vector<1x16x16x128xf32>
    %185 = vector.shape_cast %184 : vector<1x16x16x128xf32> to vector<16x16x128xf32>
    %186 = vector.shape_cast %183 : vector<16x16x128xf32> to vector<1x16x16x128xf32>
    tpu.vector_store %arg5[%c0_139, %c0_140, %c0_141, %c0_142], %186 {strides = array<i32>} : memref<1x16x16x128xf32, #tpu.memory_space<vmem>>, vector<1x16x16x128xf32>,
    return
  }
  func.func @transform_0(%arg0: i32, %arg1: i32, %arg2: i32) -> (i32, i32, i32, i32) {
    %c0_i32 = arith.constant 0 : i32
    %c0_i32_0 = arith.constant 0 : i32
    %c0_i32_1 = arith.constant 0 : i32
    %c0_i32_2 = arith.constant 0 : i32
    return %arg0, %c0_i32, %c0_i32_0, %c0_i32_1 : i32, i32, i32, i32
  }
  func.func @transform_1(%arg0: i32, %arg1: i32, %arg2: i32) -> (i32, i32, i32, i32) {
    %c0_i32 = arith.constant 0 : i32
    %c0_i32_0 = arith.constant 0 : i32
    %c0_i32_1 = arith.constant 0 : i32
    %c0_i32_2 = arith.constant 0 : i32
    return %c0_i32, %c0_i32_0, %c0_i32_1, %arg1 : i32, i32, i32, i32
  }
  func.func @transform_2(%arg0: i32, %arg1: i32, %arg2: i32) -> (i32, i32, i32, i32) {
    %c0_i32 = arith.constant 0 : i32
    %c0_i32_0 = arith.constant 0 : i32
    return %arg0, %arg2, %c0_i32, %arg1 : i32, i32, i32, i32
  }
}

</mosaic_0001>

<bundles_post_ra>
// kernel: tpu_custom_call.1
= control target key start
LH: loop header
LB: loop body
LE: loop exit
PB: predicated region body
PF: predicated region fallthrough
CT: control target
= control target key end

     0   :  { %7 = vsyncpa [#allocation3], 0  ;;  %s10999_s0 = inlined_call_operand.vmem [shape: f32[2,20,20,105], index: 0, kind: input, shape index: {}]   ;;  %s11000_s1 = inlined_call_operand.hbm [shape: f32[5,5,105,384], index: 1, kind: input, shape index: {}]   ;;  %s11001_s2 = inlined_call_operand.hbm [shape: f32[2,16,16,384], index: 2, kind: output, shape index: {}]  }
   0x1   :  { %9 = vsyncpa [#allocation3 + $0x1], 0 }
   0x2   :  { %10 = vsyncpa [#allocation4], 0 }
   0x3   :  { %12 = vsyncpa [#allocation4 + $0x1], 0  ;;  %s7451_s9 = smov 0   ;;  %s7453_s10 = smov 0  }
   0x4   :  { %s7455_s11 = smov 0   ;;  %s7457_s12 = smov 0  }
   0x5   :  { %s7459_s13 = smov 0   ;;  %s7461_s14 = smov 0  }
   0x6   :  { %s7463_s15 = smov 0   ;;  %s7465_s16 = smov 0  }
   0x7   :  { %s7467_s17 = smov 0   ;;  %s7469_s18 = smov 0  }
   0x8   :  { %s7471_s19 = smov 0  }
   0x9 LB: > { %11016 = sst [smem:[#allocation8_spill]] %s7420_s17  ;;  %s5851_s20 = sadd.s32 4294967295, %s7428_s19   ;;  %s7428_s19 = sphi %s7471_s19, %s18_s19   ;;  %s7424_s18 = sphi %s7469_s18, %s11111_s18   ;;  %s7420_s17 = sphi %s7467_s17, %s11110_s17   ;;  %s7416_s16 = sphi %s7465_s16, %s11109_s16   ;;  %s7412_s15 = sphi %s7463_s15, %s11108_s15   ;;  %s7408_s14 = sphi %s7461_s14, %s11117_s14   ;;  %s7404_s13 = sphi %s7459_s13, %s11116_s13   ;;  %s7400_s12 = sphi %s7457_s12, %s11115_s12   ;;  %s7396_s11 = sphi %s7455_s11, %s11114_s11   ;;  %s7392_s10 = sphi %s7453_s10, %s11113_s10   ;;  %s7388_s9 = sphi %s7451_s9, %s11112_s9  }
   0xa   : > { %11017 = sst [smem:[#allocation9_spill]] %s7424_s18  ;;  %s5852_s21 = sadd.s32 4294967294, %s7428_s19  }
   0xb   : > { %s33_s22 = sadd.s32 1, %s7420_s17  ;;  %s37_s23 = sadd.s32 1, %s7424_s18 }
   0xc   : > { %p35_p0 = scmp.ge.s32.totalorder %s33_s22, 3  ;;  %s70_s24 = sadd.s32 1, %s7408_s14 }
   0xd   : > { %p77_p1 = scmp.ne.s32.totalorder %s7408_s14, %s7404_s13  ;;  %p78_p2 = scmp.eq.s32.totalorder %s7428_s19, 0 }
   0xe   : > { %s11119_s22 = smov (%p35_p0, %s33_s22), 0  ;;  %s11121_s23 = smov (!%p35_p0, %s37_s23), %s7424_s18 }
   0xf   : > { %11018 = sst [smem:[#allocation10_spill]] %s11119_s22  ;;  %s67_s25 = ssub.s32 %s7420_s17, %s11119_s22 }
  0x10   : > { %p7517_p3 = por %p78_p2, %p77_p1  ;;  %p39_p4 = scmp.ge.s32.totalorder %s11121_s23, 2 }
  0x11   : > { %p68_p5 = scmp.eq.s32.totalorder %s67_s25, 0  ;;  %p83_p6 = scmp.ne.s32.totalorder %s7404_s13, %s7400_s12 }
  0x12   : > { %p84_p7 = scmp.eq.s32.totalorder %s5851_s20, 0  ;;  %s11123_s23 = smov (%p39_p4, %s11121_s23), 0 }
  0x13   : > { %11020 = sst [smem:[#allocation11_spill]] %s11123_s23  ;;  %s93_s29 = ssub.s32 %s7424_s18, %s11123_s23 }
  0x14   : > { %s7525_s27 = scalar_select %p68_p5, %s7408_s14, %s70_s24  }
  0x15   : > { %p7527_p8 = por %p84_p7, %p83_p6  ;;  %s97_s30 = sor.u32 %s93_s29, %s67_s25 }
  0x16   : > { %s100_s3 = sadd.s32 1, %s7396_s11  ;;  %p98_p9 = scmp.eq.s32.totalorder %s97_s30, 0 }
  0x17   : > { %p110_p10 = scmp.ne.s32.totalorder %s7396_s11, %s7392_s10  ;;  %p111_p11 = scmp.eq.s32.totalorder %s5851_s20, 5 }
  0x18   : > { %p116_p12 = scmp.ne.s32.totalorder %s7392_s10, %s7388_s9  ;;  %p117_p0 = scmp.eq.s32.totalorder %s5852_s21, 5 }
  0x19   : > { %s7539_s4 = scalar_select %p98_p9, %s7396_s11, %s100_s3  }
  0x1a   : > { %p7541_p13 = por %p111_p11, %p110_p10  ;;  %p7082_p1 = scmp.lt.s32.totalorder %s7428_s19, 6 }
  0x1b   : > { %p7546_p2 = por %p117_p0, %p116_p12  ;;  %s145_s7 = sand.u32 1, %s7408_s14  }
  0x1c   : > { %s7066_s8 = smul.u32 2800, %s145_s7  ;;  %s5855_s12 = sshll.u32 %s7420_s17, 3 }
  0x1d   : > { %p7075_p4 = pnand %p7082_p1, %p7517_p3  ;;  %s153_s25 = scalar_lea.hbm %s11000_s1, %s5855_s12 }
  0x1e   : > { %s154_s29 = sshll.u32 %s153_s25, 4  ;;  %s149_s30 = scalar_lea.vmem [#allocation2], %s7066_s8  ;;  %s155_s29 = int_to_ptr.hbm [resolvable:$true] %s154_s29 }
  0x1f   : > { %s156_s3 = sshll.u32 %s149_s30, 4  ;;  %s146_s21 = scalar_lea.sflag [#allocation3], %s145_s7  ;;  %s157_s3 = int_to_ptr.vmem [resolvable:$true] %s156_s3 }
  0x20   : > { %s7430_s23 = smov 384   ;;  %s7431_s22 = smov 128  }
  0x21   : > { %s7432_s18 = smov 8   ;;  %p5856_p5 = scmp.ge.s32.totalorder %s7428_s19, 1 }
  0x22   : > { %7077 = dma.hbm_to_vmem [thread:$0]  (!%p7075_p4), %s155_s29, 44800, %s157_s3, %s146_s21, %s7430_s23, %s7431_s22, %s7432_s18  }
  0x23   : > { %p164_p6 = scmp.lt.s32.totalorder %s7428_s19, 7 }
  0x25   : > { %p165_p7 = pnand %p5856_p5, %p164_p6 }
  0x27   : > { %168 = sbr.rel (%p165_p7) target bundleno = 1876 (0x754), region = 28 }
  0x2c   : > { %s170_s26 = sand.u32 1, %s7404_s13  }
  0x2d   : > { %s7067_s17 = smul.u32 2800, %s170_s26  ;;  %s171_s20 = scalar_lea.sflag [#allocation3], %s170_s26 }
  0x2f   : > { %s7560_s12 = scalar_lea.vmem [#allocation2], %s7067_s17 }
  0x30   : > { %7379 = dma.done.wait (%p7527_p8), %s171_s20, 44800  }
  0x31   : > { %7381 = vsyncadd (%p7527_p8), %s171_s20, 4294922496  ;;  %vm376_vm0 = vcmask 1040384   ;;  %v5872_v0 = vld [vmem:[%s7560_s12 + $0x298] sm:$0x1]  ;;  %v5871_v1 = vld [vmem:[%s7560_s12 + $0x290] sm:$0xff]  ;;  %p201_p3 = scmp.lt.s32.totalorder %s7416_s16, 1 }
  0x32   : > { %7024 = vmatpush.msk.msra.mxu1 %vm376_vm0, %v5872_v0  ;;  %7025 = vmatpush.msk.msra.mxu2 %vm376_vm0, %v5872_v0  ;;  %v5870_v2 = vld [vmem:[%s7560_s12 + $0x288] sm:$0xff]  ;;  %v5869_v3 = vld [vmem:[%s7560_s12 + $0x280] sm:$0xff]  ;;  %v5868_v4 = vld [vmem:[%s7560_s12 + $0x278] sm:$0xff]  ;;  %vm279_vm1 = vcmask 859136   ;;  %s198_s7 = sand.u32 1, %s7392_s10   ;;  %s7069_s25 = smul.u32 96, %s7416_s16 }
  0x33   : > { %7026 = vmatpush.msk.msra.mxu3 %vm376_vm0, %v5872_v0  ;;  %5873 = vmatpush.msk.msra.mxu0 %vm376_vm0, %v5872_v0  ;;  %v5867_v5 = vld [vmem:[%s7560_s12 + $0x270] sm:$0xff]  ;;  %v5866_v6 = vld [vmem:[%s7560_s12 + $0x268] sm:$0xff]  ;;  %v5865_v7 = vld [vmem:[%s7560_s12 + $0x260] sm:$0xff]  ;;  %s202_s17 = scalar_select %p201_p3, %s7416_s16, 1 }
  0x34   : > { %7027 = vmatpush.msra.mxu1 %v5871_v1  ;;  %7028 = vmatpush.msra.mxu2 %v5871_v1  ;;  %v5864_v8 = vld [vmem:[%s7560_s12 + $0x258] sm:$0xff]  ;;  %v5863_v9 = vld [vmem:[%s7560_s12 + $0x250] sm:$0xff]  ;;  %v5862_v10 = vld [vmem:[%s7560_s12 + $0x248] sm:$0xff]  ;;  %s5857_s8 = sshll.u32 %s198_s7, 8  ;;  %s5740_s29 = sadd.s32 %s7412_s15, %s7069_s25 }
  0x35   : > { %7029 = vmatpush.msra.mxu3 %v5871_v1  ;;  %383 = vmatpush.msra.mxu0 %v5871_v1  ;;  %s7068_s18 = smul.u32 480, %s202_s17  ;;  %v5861_v11 = vld [vmem:[%s7560_s12 + $0x240] sm:$0xff]  ;;  %v5860_v12 = vld [vmem:[%s7560_s12 + $0x238] sm:$0xff]  ;;  %v5859_v13 = vld [vmem:[%s7560_s12 + $0x230] sm:$0xff]  ;;  %s10563_s24 = scalar_lea.vmem [#allocation5], %s5857_s8 }
  0x36   : > { %7030 = vmatpush.msra.mxu1 %v5870_v2  ;;  %7031 = vmatpush.msra.mxu2 %v5870_v2  ;;  %v5952_v16 = vld [vmem:[%s7560_s12 + $0x4c8] sm:$0x1]  ;;  %v5999_v19 = vld [vmem:[%s7560_s12 + $0x6f8] sm:$0x1]  ;;  %v5951_v20 = vld [vmem:[%s7560_s12 + $0x4c0] sm:$0xff]  ;;  %s7021_s30 = sshll.u32 %s5740_s29, 3 }
  0x37   : > { %7032 = vmatpush.msra.mxu3 %v5870_v2  ;;  %384 = vmatpush.msra.mxu0 %v5870_v2  ;;  %s7588_s28 = scalar_lea.vmem %s10999_s0, %s7068_s18  ;;  %v263_v18 = vld [vmem:[%s7560_s12 + $0x68] sm:$0x1]  ;;  %v262_v21 = vld [vmem:[%s7560_s12 + $0x60] sm:$0xff]  ;;  %v5998_v22 = vld [vmem:[%s7560_s12 + $0x6f0] sm:$0xff]  ;;  %s5742_s16 = scalar_lea.hbm %s11001_s2, %s7021_s30 }
  0x38   : > { %7033 = vmatpush.msra.mxu1 %v5869_v3  ;;  %7034 = vmatpush.msra.mxu2 %v5869_v3  ;;  %v7592_v14 = vld [vmem:[%s7588_s28 + $0x78] sm:$0xff]  ;;  %v7623_v28 = vld [vmem:[%s7588_s28 + $0x80] sm:$0xff]  ;;  %v7656_v44 = vld [vmem:[%s7588_s28 + $0x90] sm:$0xff]  ;;  %s5743_s26 = sshll.u32 %s10563_s24, 4  ;;  %s5745_s15 = sshll.u32 %s5742_s16, 4  ;;  %s5744_s26 = int_to_ptr.vmem [resolvable:$true] %s5743_s26  ;;  %s5746_s15 = int_to_ptr.hbm [resolvable:$true] %s5745_s15 }
  0x39   : > { %7035 = vmatpush.msra.mxu3 %v5869_v3  ;;  %385 = vmatpush.msra.mxu0 %v5869_v3  ;;  %v7595_v15 = vld [vmem:[%s7588_s28 + $0xd8] sm:$0xff]  ;;  %v7626_v29 = vld [vmem:[%s7588_s28 + $0xe0] sm:$0xff]  ;;  %v7659_v45 = vld [vmem:[%s7588_s28 + $0xf0] sm:$0xff]  ;;  %s5727_s20 = scalar_lea.sflag [#allocation4], %s198_s7  ;;  %s7326_s23 = scalar_lea.hbm %s11001_s2, 1536 }
  0x3a   : > { %7036 = vmatpush.msra.mxu1 %v5868_v4  ;;  %7037 = vmatpush.msra.mxu2 %v5868_v4  ;;  %v7599_v17 = vld [vmem:[%s7588_s28 + $0x138] sm:$0xff]  ;;  %v5949_v30 = vld [vmem:[%s7560_s12 + $0x4b0] sm:$0xff]  ;;  %v6045_v31 = vld [vmem:[%s7560_s12 + $0x920] sm:$0xff] }
  0x3b   : > { %7038 = vmatpush.msra.mxu3 %v5868_v4  ;;  %386 = vmatpush.msra.mxu0 %v5868_v4  ;;  %v7615_v23 = vld [vmem:[%s7588_s28 + $0x18] sm:$0xff]  ;;  %v7634_v32 = vld [vmem:[%s7588_s28 + $0x140] sm:$0xff]  ;;  %v7666_v48 = vld [vmem:[%s7588_s28 + $0x150] sm:$0xff] }
  0x3c   : > { %7039 = vmatpush.msra.mxu1 %v5867_v5  ;;  %7040 = vmatpush.msra.mxu2 %v5867_v5  ;;  %v5950_v24 = vld [vmem:[%s7560_s12 + $0x4b8] sm:$0xff]  ;;  %v6046_v25 = vld [vmem:[%s7560_s12 + $0x928] sm:$0x1]  ;;  %v260_v33 = vld [vmem:[%s7560_s12 + $0x50] sm:$0xff] }
  0x3d   : > { %7041 = vmatpush.msra.mxu3 %v5867_v5  ;;  %387 = vmatpush.msra.mxu0 %v5867_v5  ;;  %v5997_v26 = vld [vmem:[%s7560_s12 + $0x6e8] sm:$0xff]  ;;  %v261_v27 = vld [vmem:[%s7560_s12 + $0x58] sm:$0xff]  ;;  %v5996_v34 = vld [vmem:[%s7560_s12 + $0x6e0] sm:$0xff] }
  0x3e   : > { %7042 = vmatpush.msra.mxu1 %v5866_v6  ;;  %7043 = vmatpush.msra.mxu2 %v5866_v6  ;;  %v5948_v35 = vld [vmem:[%s7560_s12 + $0x4a8] sm:$0xff]  ;;  %v6044_v36 = vld [vmem:[%s7560_s12 + $0x918] sm:$0xff]  ;;  %v7648_v38 = vld [vmem:[%s7588_s28 + $0x20] sm:$0xff] }
  0x3f   : > { %7044 = vmatpush.msra.mxu3 %v5866_v6  ;;  %388 = vmatpush.msra.mxu0 %v5866_v6  ;;  %v259_v37 = vld [vmem:[%s7560_s12 + $0x48] sm:$0xff]  ;;  %v5995_v39 = vld [vmem:[%s7560_s12 + $0x6d8] sm:$0xff]  ;;  %v5947_v40 = vld [vmem:[%s7560_s12 + $0x4a0] sm:$0xff] }
  0x40   : > { %7045 = vmatpush.msra.mxu1 %v5865_v7  ;;  %7046 = vmatpush.msra.mxu2 %v5865_v7  ;;  %v6043_v41 = vld [vmem:[%s7560_s12 + $0x910] sm:$0xff]  ;;  %v258_v43 = vld [vmem:[%s7560_s12 + $0x40] sm:$0xff]  ;;  %v5946_v46 = vld [vmem:[%s7560_s12 + $0x498] sm:$0xff] }
  0x41   : > { %7047 = vmatpush.msra.mxu3 %v5865_v7  ;;  %389 = vmatpush.msra.mxu0 %v5865_v7  ;;  %v5994_v42 = vld [vmem:[%s7560_s12 + $0x6d0] sm:$0xff]  ;;  %v6042_v47 = vld [vmem:[%s7560_s12 + $0x908] sm:$0xff]  ;;  %v257_v49 = vld [vmem:[%s7560_s12 + $0x38] sm:$0xff] }
  0x42   : > { %7048 = vmatpush.msra.mxu1 %v5864_v8  ;;  %7049 = vmatpush.msra.mxu2 %v5864_v8  ;;  %v5993_v50 = vld [vmem:[%s7560_s12 + $0x6c8] sm:$0xff]  ;;  %v5945_v51 = vld [vmem:[%s7560_s12 + $0x490] sm:$0xff]  ;;  %v6041_v52 = vld [vmem:[%s7560_s12 + $0x900] sm:$0xff] }
  0x43   : > { %7050 = vmatpush.msra.mxu3 %v5864_v8  ;;  %390 = vmatpush.msra.mxu0 %v5864_v8  ;;  %v256_v53 = vld [vmem:[%s7560_s12 + $0x30] sm:$0xff]  ;;  %v5992_v55 = vld [vmem:[%s7560_s12 + $0x6c0] sm:$0xff]  ;;  %v5944_v56 = vld [vmem:[%s7560_s12 + $0x488] sm:$0xff] }
  0x44   : > { %7051 = vmatpush.msra.mxu1 %v5863_v9  ;;  %7052 = vmatpush.msra.mxu2 %v5863_v9  ;;  %v7680_v54 = vld [vmem:[%s7588_s28 + $0x30] sm:$0xff]  ;;  %v6040_v57 = vld [vmem:[%s7560_s12 + $0x8f8] sm:$0xff]  ;;  %v255_v59 = vld [vmem:[%s7560_s12 + $0x28] sm:$0xff] }
  0x45   : > { %7053 = vmatpush.msra.mxu3 %v5863_v9  ;;  %391 = vmatpush.msra.mxu0 %v5863_v9  ;;  %v5991_v58 = vld [vmem:[%s7560_s12 + $0x6b8] sm:$0xff]  ;;  %v5943_v62 = vld [vmem:[%s7560_s12 + $0x480] sm:$0xff]  ;;  %v6039_v63 = vld [vmem:[%s7560_s12 + $0x8f0] sm:$0xff] }
  0x46   : > { %7054 = vmatpush.msra.mxu1 %v5862_v10  ;;  %7055 = vmatpush.msra.mxu2 %v5862_v10  ;;  %v7688_v60 = vld [vmem:[%s7588_s28 + $0x98] sm:$0xff]  ;;  %v254_v1 = vld [vmem:[%s7560_s12 + $0x20] sm:$0xff]  ;;  %v5990_v2 = vld [vmem:[%s7560_s12 + $0x6b0] sm:$0xff] }
  0x47   : > { %7056 = vmatpush.msra.mxu3 %v5862_v10  ;;  %392 = vmatpush.msra.mxu0 %v5862_v10  ;;  %v7691_v61 = vld [vmem:[%s7588_s28 + $0xf8] sm:$0xff]  ;;  %v5941_v8 = vld [vmem:[%s7560_s12 + $0x470] sm:$0xff]  ;;  %v6037_v9 = vld [vmem:[%s7560_s12 + $0x8e0] sm:$0xff] }
  0x48   : > { %7057 = vmatpush.msra.mxu1 %v5861_v11  ;;  %7058 = vmatpush.msra.mxu2 %v5861_v11  ;;  %v7698_v0 = vld [vmem:[%s7588_s28 + $0x158] sm:$0xff]  ;;  %v5988_v10 = vld [vmem:[%s7560_s12 + $0x6a0] sm:$0xff] }
  0x49   : > { %7059 = vmatpush.msra.mxu3 %v5861_v11  ;;  %393 = vmatpush.msra.mxu0 %v5861_v11  ;;  %v5942_v3 = vld [vmem:[%s7560_s12 + $0x478] sm:$0xff]  ;;  %v6038_v4 = vld [vmem:[%s7560_s12 + $0x8e8] sm:$0xff]  ;;  %v252_v11 = vld [vmem:[%s7560_s12 + $0x10] sm:$0xff] }
  0x4a   : > { %7060 = vmatpush.msra.mxu1 %v5860_v12  ;;  %7061 = vmatpush.msra.mxu2 %v5860_v12  ;;  %v253_v5 = vld [vmem:[%s7560_s12 + $0x18] sm:$0xff]  ;;  %v5989_v7 = vld [vmem:[%s7560_s12 + $0x6a8] sm:$0xff] }
  0x4b   : > { %7062 = vmatpush.msra.mxu3 %v5860_v12  ;;  %394 = vmatpush.msra.mxu0 %v5860_v12  ;;  %v7712_v6 = vld [vmem:[%s7588_s28 + $0x38] sm:$0xff]  ;;  %v7720_v12 = vld [vmem:[%s7588_s28 + $0xa8] sm:$0xff] }
  0x4c   : > { %7063 = vmatpush.msra.mxu1 %v5859_v13  ;;  %7064 = vmatpush.msra.mxu2 %v5859_v13 }
  0x4d   : > { %5882 = vmatmul.msk.f32.vlgmr.msra.gmra.mxu1 %vm279_vm1, %v7592_v14  ;;  %5890 = vmatmul.msk.f32.vlgmr.msra.gmra.mxu2 %vm279_vm1, %v7595_v15 }
  0x4e   : > { %5953 = vmatpush.msk.msrb.mxu2 %vm376_vm0, %v5952_v16  ;;  %7065 = vmatpush.msra.mxu3 %v5859_v13  ;;  %v5940_v16 = vld [vmem:[%s7560_s12 + $0x468] sm:$0xff] }
  0x4f   : > { %5898 = vmatmul.msk.f32.vlgmr.msra.gmra.mxu3 %vm279_vm1, %v7599_v17  ;;  %5906 = vmatpush.msk.msrb.mxu1 %vm376_vm0, %v263_v18  ;;  %v6036_v18 = vld [vmem:[%s7560_s12 + $0x8d8] sm:$0xff] }
  0x50   : > { %6000 = vmatpush.msk.msrb.mxu3 %vm376_vm0, %v5999_v19  ;;  %642 = vmatpush.msrb.mxu2 %v5951_v20  ;;  %v7730_v19 = vld [vmem:[%s7588_s28 + $0x168] sm:$0xff] }
  0x51   : > { %395 = vmatpush.msra.mxu0 %v5859_v13  ;;  %505 = vmatpush.msrb.mxu1 %v262_v21  ;;  %v7723_v13 = vld [vmem:[%s7588_s28 + $0x108] sm:$0xff] }
  0x52   : > { %811 = vmatpush.msrb.mxu3 %v5998_v22  ;;  %5874 = vmatmul.msk.f32.vlgmr.msra.gmra.mxu0 %vm279_vm1, %v7615_v23  ;;  %v251_v20 = vld [vmem:[%s7560_s12 + $0x8] sm:$0xff]  ;;  %v5987_v21 = vld [vmem:[%s7560_s12 + $0x698] sm:$0xff]  ;;  %v5939_v22 = vld [vmem:[%s7560_s12 + $0x460] sm:$0xff] }
  0x53   : > { %643 = vmatpush.msrb.mxu2 %v5950_v24  ;;  %6047 = vmatpush.msk.msrb.mxu0 %vm376_vm0, %v6046_v25  ;;  %v6035_v24 = vld [vmem:[%s7560_s12 + $0x8d0] sm:$0xff]  ;;  %v250_v25 = vld [vmem:[%s7560_s12] sm:$0xff] }
  0x54   : > { %812 = vmatpush.msrb.mxu3 %v5997_v26  ;;  %506 = vmatpush.msrb.mxu1 %v261_v27  ;;  %v7744_v26 = vld [vmem:[%s7588_s28 + $0x48] sm:$0xff]  ;;  %v5986_v27 = vld [vmem:[%s7560_s12 + $0x690] sm:$0xff] }
  0x55   : > { %5883 = vmatmul.msk.f32.gmra.mxu1 %vm279_vm1, %v7623_v28  ;;  %5891 = vmatmul.msk.f32.gmra.mxu2 %vm279_vm1, %v7626_v29 }
  0x56   : > { %644 = vmatpush.msrb.mxu2 %v5949_v30  ;;  %980 = vmatpush.msrb.mxu0 %v6045_v31  ;;  %v6140_v30 = vld [vmem:[%s7560_s12 + $0x308] sm:$0x1] }
  0x57   : > { %5899 = vmatmul.msk.f32.gmra.mxu3 %vm279_vm1, %v7634_v32  ;;  %507 = vmatpush.msrb.mxu1 %v260_v33  ;;  %v6034_v31 = vld [vmem:[%s7560_s12 + $0x8c8] sm:$0xff]  ;;  %v6187_v33 = vld [vmem:[%s7560_s12 + $0x538] sm:$0x1] }
  0x58   : > { %813 = vmatpush.msrb.mxu3 %v5996_v34  ;;  %645 = vmatpush.msrb.mxu2 %v5948_v35  ;;  %v6093_v34 = vld [vmem:[%s7560_s12 + $0xd8] sm:$0x1]  ;;  %v7752_v35 = vld [vmem:[%s7588_s28 + $0xb0] sm:$0xff] }
  0x59   : > { %981 = vmatpush.msrb.mxu0 %v6044_v36  ;;  %508 = vmatpush.msrb.mxu1 %v259_v37  ;;  %v7755_v36 = vld [vmem:[%s7588_s28 + $0x110] sm:$0xff] }
  0x5a   : > { %5875 = vmatmul.msk.f32.gmra.mxu0 %vm279_vm1, %v7648_v38  ;;  %814 = vmatpush.msrb.mxu3 %v5995_v39  ;;  %v6033_v37 = vld [vmem:[%s7560_s12 + $0x8c0] sm:$0xff] }
  0x5b   : > { %646 = vmatpush.msrb.mxu2 %v5947_v40  ;;  %982 = vmatpush.msrb.mxu0 %v6043_v41  ;;  %v7762_v39 = vld [vmem:[%s7588_s28 + $0x170] sm:$0xff]  ;;  %v6234_v41 = vld [vmem:[%s7560_s12 + $0x768] sm:$0x1] }
  0x5c   : > { %815 = vmatpush.msrb.mxu3 %v5994_v42  ;;  %509 = vmatpush.msrb.mxu1 %v258_v43  ;;  %v7773_v40 = vld [vmem:[%s7588_s28 + $0x50] sm:$0xff]  ;;  %v7778_v42 = vld [vmem:[%s7588_s28 + $0xc0] sm:$0xff] }
  0x5d   : > { %5884 = vmatmul.msk.f32.gmra.mxu1 %vm279_vm1, %v7656_v44  ;;  %5892 = vmatmul.msk.f32.gmra.mxu2 %vm279_vm1, %v7659_v45  ;;  %v7781_v43 = vld [vmem:[%s7588_s28 + $0x120] sm:$0xff] }
  0x5e   : > { %647 = vmatpush.msrb.mxu2 %v5946_v46  ;;  %983 = vmatpush.msrb.mxu0 %v6042_v47  ;;  %v7786_v46 = vld [vmem:[%s7588_s28 + $0x180] sm:$0xff] }
  0x5f   : > { %5900 = vmatmul.msk.f32.gmra.mxu3 %vm279_vm1, %v7666_v48  ;;  %510 = vmatpush.msrb.mxu1 %v257_v49  ;;  %v7793_v47 = vld [vmem:[%s7588_s28 + $0x60] sm:$0xff] }
  0x60   : > { %816 = vmatpush.msrb.mxu3 %v5993_v50  ;;  %648 = vmatpush.msrb.mxu2 %v5945_v51  ;;  %v6139_v49 = vld [vmem:[%s7560_s12 + $0x300] sm:$0xff]  ;;  %v6186_v50 = vld [vmem:[%s7560_s12 + $0x530] sm:$0xff] }
  0x61   : > { %984 = vmatpush.msrb.mxu0 %v6041_v52  ;;  %511 = vmatpush.msrb.mxu1 %v256_v53  ;;  %v6092_v51 = vld [vmem:[%s7560_s12 + $0xd0] sm:$0xff]  ;;  %v7801_v52 = vld [vmem:[%s7588_s28 + $0xc8] sm:$0xff] }
  0x62   : > { %5876 = vmatmul.msk.f32.gmra.mxu0 %vm279_vm1, %v7680_v54  ;;  %817 = vmatpush.msrb.mxu3 %v5992_v55  ;;  %v7804_v53 = vld [vmem:[%s7588_s28 + $0x128] sm:$0xff] }
  0x63   : > { %649 = vmatpush.msrb.mxu2 %v5944_v56  ;;  %985 = vmatpush.msrb.mxu0 %v6040_v57  ;;  %v7809_v55 = vld [vmem:[%s7588_s28 + $0x188] sm:$0xff]  ;;  %v6233_v57 = vld [vmem:[%s7560_s12 + $0x760] sm:$0xff] }
  0x64   : > { %818 = vmatpush.msrb.mxu3 %v5991_v58  ;;  %512 = vmatpush.msrb.mxu1 %v255_v59  ;;  %v7818_v56 = vld [vmem:[%s7588_s28 + $0x68] sm:$0xff]  ;;  %v210_v58 = vld [vmem:[%s7588_s28] sm:$0xff] }
  0x65   : > { %5885 = vmatmul.msk.f32.gmra.mxu1 %vm279_vm1, %v7688_v60  ;;  %5893 = vmatmul.msk.f32.gmra.mxu2 %vm279_vm1, %v7691_v61  ;;  %v6138_v59 = vld [vmem:[%s7560_s12 + $0x2f8] sm:$0xff] }
  0x66   : > { %650 = vmatpush.msrb.mxu2 %v5943_v62  ;;  %986 = vmatpush.msrb.mxu0 %v6039_v63  ;;  %v6185_v62 = vld [vmem:[%s7560_s12 + $0x528] sm:$0xff] }
  0x67   : > { %5901 = vmatmul.msk.f32.gmra.mxu3 %vm279_vm1, %v7698_v0  ;;  %513 = vmatpush.msrb.mxu1 %v254_v1  ;;  %v211_v63 = vld [vmem:[%s7588_s28 + $0x8] sm:$0xff] }
  0x68   : > { %819 = vmatpush.msrb.mxu3 %v5990_v2  ;;  %651 = vmatpush.msrb.mxu2 %v5942_v3  ;;  %v6091_v1 = vld [vmem:[%s7560_s12 + $0xc8] sm:$0xff]  ;;  %v6232_v2 = vld [vmem:[%s7560_s12 + $0x758] sm:$0xff]  ;;  %v6137_v3 = vld [vmem:[%s7560_s12 + $0x2f0] sm:$0xff] }
  0x69   : > { %987 = vmatpush.msrb.mxu0 %v6038_v4  ;;  %514 = vmatpush.msrb.mxu1 %v253_v5  ;;  %v6090_v4 = vld [vmem:[%s7560_s12 + $0xc0] sm:$0xff]  ;;  %v6183_v5 = vld [vmem:[%s7560_s12 + $0x518] sm:$0xff] }
  0x6a   : > { %5877 = vmatmul.msk.f32.gmra.mxu0 %vm279_vm1, %v7712_v6  ;;  %820 = vmatpush.msrb.mxu3 %v5989_v7  ;;  %v6089_v7 = vld [vmem:[%s7560_s12 + $0xb8] sm:$0xff] }
  0x6b   : > { %652 = vmatpush.msrb.mxu2 %v5941_v8  ;;  %988 = vmatpush.msrb.mxu0 %v6037_v9  ;;  %v6135_v8 = vld [vmem:[%s7560_s12 + $0x2e0] sm:$0xff] }
  0x6c   : > { %821 = vmatpush.msrb.mxu3 %v5988_v10  ;;  %515 = vmatpush.msrb.mxu1 %v252_v11  ;;  %v6182_v10 = vld [vmem:[%s7560_s12 + $0x510] sm:$0xff] }
  0x6d   : > { %5886 = vmatmul.msk.f32.gmra.mxu1 %vm279_vm1, %v7720_v12  ;;  %5894 = vmatmul.msk.f32.gmra.mxu2 %vm279_vm1, %v7723_v13  ;;  %v6088_v11 = vld [vmem:[%s7560_s12 + $0xb0] sm:$0xff] }
  0x6e   : > { %653 = vmatpush.msrb.mxu2 %v5940_v16  ;;  %989 = vmatpush.msrb.mxu0 %v6036_v18 }
  0x6f   : > { %5902 = vmatmul.msk.f32.gmra.mxu3 %vm279_vm1, %v7730_v19  ;;  %516 = vmatpush.msrb.mxu1 %v251_v20 }
  0x70   : > { %822 = vmatpush.msrb.mxu3 %v5987_v21  ;;  %654 = vmatpush.msrb.mxu2 %v5939_v22  ;;  %v6229_v22 = vld [vmem:[%s7560_s12 + $0x740] sm:$0xff] }
  0x71   : > { %990 = vmatpush.msrb.mxu0 %v6035_v24  ;;  %517 = vmatpush.msrb.mxu1 %v250_v25 }
  0x72   : > { %5878 = vmatmul.msk.f32.gmra.mxu0 %vm279_vm1, %v7744_v26  ;;  %823 = vmatpush.msrb.mxu3 %v5986_v27 }
  0x73   : > { %6141 = vmatpush.msk.msra.mxu2 %vm376_vm0, %v6140_v30  ;;  %991 = vmatpush.msrb.mxu0 %v6034_v31  ;;  %v6134_v30 = vld [vmem:[%s7560_s12 + $0x2d8] sm:$0xff]  ;;  %v6181_v31 = vld [vmem:[%s7560_s12 + $0x508] sm:$0xff] }
  0x74   : > { %6188 = vmatpush.msk.msra.mxu3 %vm376_vm0, %v6187_v33  ;;  %6094 = vmatpush.msk.msra.mxu1 %vm376_vm0, %v6093_v34  ;;  %v6087_v34 = vld [vmem:[%s7560_s12 + $0xa8] sm:$0xff] }
  0x75   : > { %5887 = vmatmul.msk.f32.gmra.mxu1 %vm279_vm1, %v7752_v35  ;;  %5895 = vmatmul.msk.f32.gmra.mxu2 %vm279_vm1, %v7755_v36 }
  0x76   : > { %992 = vmatpush.msrb.mxu0 %v6033_v37  ;;  %1448 = vmatpush.msra.mxu2 %v6139_v49 }
  0x77   : > { %5903 = vmatmul.msk.f32.gmra.mxu3 %vm279_vm1, %v7762_v39  ;;  %1279 = vmatpush.msra.mxu1 %v6092_v51 }
  0x78   : > { %6235 = vmatpush.msk.msra.mxu0 %vm376_vm0, %v6234_v41  ;;  %1617 = vmatpush.msra.mxu3 %v6186_v50 }
  0x79   : > { %1449 = vmatpush.msra.mxu2 %v6138_v59  ;;  %1280 = vmatpush.msra.mxu1 %v6091_v1  ;;  %v6086_v59 = vld [vmem:[%s7560_s12 + $0xa0] sm:$0xff]  ;;  %v6227_v1 = vld [vmem:[%s7560_s12 + $0x730] sm:$0xff] }
  0x7a   : > { %5879 = vmatmul.msk.f32.gmra.mxu0 %vm279_vm1, %v7773_v40  ;;  %1618 = vmatpush.msra.mxu3 %v6185_v62 }
  0x7b   : > { %1786 = vmatpush.msra.mxu0 %v6233_v57  ;;  %1450 = vmatpush.msra.mxu2 %v6137_v3  ;;  %v6180_v57 = vld [vmem:[%s7560_s12 + $0x500] sm:$0xff] }
  0x7c   : > { %1281 = vmatpush.msra.mxu1 %v6090_v4 }
  0x7d   : > { %5888 = vmatmul.msk.f32.gmra.mxu1 %vm279_vm1, %v7778_v42  ;;  %5896 = vmatmul.msk.f32.gmra.mxu2 %vm279_vm1, %v7781_v43 }
  0x7e   : > { %1787 = vmatpush.msra.mxu0 %v6232_v2  ;;  %1282 = vmatpush.msra.mxu1 %v6089_v7  ;;  %v6085_v7 = vld [vmem:[%s7560_s12 + $0x98] sm:$0xff] }
  0x7f   : > { %5904 = vmatmul.msk.f32.gmra.mxu3 %vm279_vm1, %v7786_v46 }
  0x80   : > { %1283 = vmatpush.msra.mxu1 %v6088_v11 }
  0x82   : > { %5880 = vmatmul.msk.f32.gmra.mxu0 %vm279_vm1, %v7793_v47  ;;  %1284 = vmatpush.msra.mxu1 %v6087_v34 }
  0x84   : > { %1285 = vmatpush.msra.mxu1 %v6086_v59 }
  0x85   : > { %5889 = vmatmul.msk.f32.gmra.mxu1 %vm279_vm1, %v7801_v52  ;;  %5897 = vmatmul.msk.f32.gmra.mxu2 %vm279_vm1, %v7804_v53 }
  0x86   : > { %1286 = vmatpush.msra.mxu1 %v6085_v7 }
  0x87   : > { %5905 = vmatmul.msk.f32.gmra.mxu3 %vm279_vm1, %v7809_v55 }
  0x8a   : > { %5881 = vmatmul.msk.f32.gmra.mxu0 %vm279_vm1, %v7818_v56 }
  0x8d   : > { %5907 = vmatmul.msk.f32.vlgmr.msrb.gmra.mxu1 %vm279_vm1, %v210_v58  ;;  %5954 = vmatmul.msk.f32.vlgmr.msrb.gmra.mxu2 %vm279_vm1, %v7680_v54 }
  0x8f   : > { %6001 = vmatmul.msk.f32.vlgmr.msrb.gmra.mxu3 %vm279_vm1, %v7744_v26 }
  0x92   : > { %6048 = vmatmul.msk.f32.vlgmr.msrb.gmra.mxu0 %vm279_vm1, %v7793_v47 }
  0x95   : > { %5908 = vmatmul.msk.f32.gmra.mxu1 %vm279_vm1, %v211_v63  ;;  %5955 = vmatmul.msk.f32.gmra.mxu2 %vm279_vm1, %v7712_v6 }
  0x97   : > { %6002 = vmatmul.msk.f32.gmra.mxu3 %vm279_vm1, %v7773_v40 }
  0x9a   : > { %6049 = vmatmul.msk.f32.gmra.mxu0 %vm279_vm1, %v7818_v56 }
  0x9d   : > { %5909 = vmatmul.msk.f32.gmra.mxu1 %vm279_vm1, %v7615_v23  ;;  %5956 = vmatmul.msk.f32.gmra.mxu2 %vm279_vm1, %v7744_v26  ;;  %v6184_v23 = vld [vmem:[%s7560_s12 + $0x520] sm:$0xff] }
  0x9e   : > { %1619 = vmatpush.msra.mxu3 %v6184_v23 }
  0x9f   : > { %6003 = vmatmul.msk.f32.gmra.mxu3 %vm279_vm1, %v7793_v47 }
  0xa0   : > { %1620 = vmatpush.msra.mxu3 %v6183_v5 }
  0xa2   : > { %6050 = vmatmul.msk.f32.gmra.mxu0 %vm279_vm1, %v7592_v14  ;;  %1621 = vmatpush.msra.mxu3 %v6182_v10 }
  0xa4   : > { %1622 = vmatpush.msra.mxu3 %v6181_v31 }
  0xa5   : > { %5910 = vmatmul.msk.f32.gmra.mxu1 %vm279_vm1, %v7648_v38  ;;  %5957 = vmatmul.msk.f32.gmra.mxu2 %vm279_vm1, %v7773_v40  ;;  %v6231_v38 = vld [vmem:[%s7560_s12 + $0x750] sm:$0xff] }
  0xa6   : > { %1788 = vmatpush.msra.mxu0 %v6231_v38  ;;  %1623 = vmatpush.msra.mxu3 %v6180_v57  ;;  %v6132_v38 = vld [vmem:[%s7560_s12 + $0x2c8] sm:$0xff] }
  0xa7   : > { %6004 = vmatmul.msk.f32.gmra.mxu3 %vm279_vm1, %v7818_v56 }
  0xaa   : > { %6051 = vmatmul.msk.f32.gmra.mxu0 %vm279_vm1, %v7623_v28 }
  0xad   : > { %5911 = vmatmul.msk.f32.gmra.mxu1 %vm279_vm1, %v7680_v54  ;;  %5958 = vmatmul.msk.f32.gmra.mxu2 %vm279_vm1, %v7793_v47  ;;  %v6136_v54 = vld [vmem:[%s7560_s12 + $0x2e8] sm:$0xff] }
  0xae   : > { %1451 = vmatpush.msra.mxu2 %v6136_v54 }
  0xaf   : > { %6005 = vmatmul.msk.f32.gmra.mxu3 %vm279_vm1, %v7592_v14 }
  0xb0   : > { %1452 = vmatpush.msra.mxu2 %v6135_v8 }
  0xb2   : > { %6052 = vmatmul.msk.f32.gmra.mxu0 %vm279_vm1, %v7656_v44  ;;  %1453 = vmatpush.msra.mxu2 %v6134_v30 }
  0xb5   : > { %5912 = vmatmul.msk.f32.gmra.mxu1 %vm279_vm1, %v7712_v6  ;;  %5959 = vmatmul.msk.f32.gmra.mxu2 %vm279_vm1, %v7818_v56  ;;  %v6230_v6 = vld [vmem:[%s7560_s12 + $0x748] sm:$0xff] }
  0xb6   : > { %1789 = vmatpush.msra.mxu0 %v6230_v6 }
  0xb7   : > { %6006 = vmatmul.msk.f32.gmra.mxu3 %vm279_vm1, %v7623_v28 }
  0xb8   : > { %1790 = vmatpush.msra.mxu0 %v6229_v22 }
  0xba   : > { %6053 = vmatmul.msk.f32.gmra.mxu0 %vm279_vm1, %v7688_v60 }
  0xbd   : > { %5913 = vmatmul.msk.f32.gmra.mxu1 %vm279_vm1, %v7744_v26  ;;  %5960 = vmatmul.msk.f32.gmra.mxu2 %vm279_vm1, %v7592_v14 }
  0xbf   : > { %6007 = vmatmul.msk.f32.gmra.mxu3 %vm279_vm1, %v7656_v44 }
  0xc2   : > { %6054 = vmatmul.msk.f32.gmra.mxu0 %vm279_vm1, %v7720_v12 }
  0xc5   : > { %5914 = vmatmul.msk.f32.gmra.mxu1 %vm279_vm1, %v7773_v40  ;;  %5961 = vmatmul.msk.f32.gmra.mxu2 %vm279_vm1, %v7623_v28 }
  0xc7   : > { %6008 = vmatmul.msk.f32.gmra.mxu3 %vm279_vm1, %v7688_v60 }
  0xca   : > { %v7898_v9 = vpop.f32.mrf.mxu1  ;;  %6055 = vmatmul.msk.f32.gmra.mxu0 %vm279_vm1, %v7752_v35 }
  0xcd   : > { %5915 = vmatmul.msk.f32.gmra.mxu1 %vm279_vm1, %v7793_v47  ;;  %5962 = vmatmul.msk.f32.gmra.mxu2 %vm279_vm1, %v7656_v44 }
  0xcf   : > { %6009 = vmatmul.msk.f32.gmra.mxu3 %vm279_vm1, %v7720_v12  ;;  %v7910_v16 = vpop.f32.mrf.mxu0 }
  0xd0   : > { %v7912_v18 = vpop.f32.mrf.mxu2 }
  0xd2   : > { %v7914_v20 = vpop.f32.mrf.mxu1  ;;  %v7916_v21 = vpop.f32.mrf.mxu3  ;;  %6056 = vmatmul.msk.f32.gmra.mxu0 %vm279_vm1, %v7778_v42 }
  0xd5   : > { %5916 = vmatmul.msk.f32.gmra.mxu1 %vm279_vm1, %v7818_v56  ;;  %5963 = vmatmul.msk.f32.gmra.mxu2 %vm279_vm1, %v7688_v60 }
  0xd7   : > { %6010 = vmatmul.msk.f32.gmra.mxu3 %vm279_vm1, %v7752_v35  ;;  %v7927_v24 = vpop.f32.mrf.mxu0 }
  0xd8   : > { %v7929_v25 = vpop.f32.mrf.mxu2 }
  0xda   : > { %v7931_v26 = vpop.f32.mrf.mxu1  ;;  %v7933_v27 = vpop.f32.mrf.mxu3  ;;  %6057 = vmatmul.msk.f32.gmra.mxu0 %vm279_vm1, %v7801_v52 }
  0xdd   : > { %5917 = vmatmul.msk.f32.gmra.mxu1 %vm279_vm1, %v7592_v14  ;;  %5964 = vmatmul.msk.f32.gmra.mxu2 %vm279_vm1, %v7720_v12  ;;  %v6228_v14 = vld [vmem:[%s7560_s12 + $0x738] sm:$0xff] }
  0xde   : > { %1791 = vmatpush.msra.mxu0 %v6228_v14 }
  0xdf   : > { %6011 = vmatmul.msk.f32.gmra.mxu3 %vm279_vm1, %v7778_v42  ;;  %v7945_v33 = vpop.f32.mrf.mxu0 }
  0xe0   : > { %v7948_v37 = vpop.f32.mrf.mxu2  ;;  %1792 = vmatpush.msra.mxu0 %v6227_v1  ;;  %v6084_v1 = vld [vmem:[%s7560_s12 + $0x90] sm:$0xff] }
  0xe1   : > { %1287 = vmatpush.msra.mxu1 %v6084_v1  ;;  %v6177_v1 = vld [vmem:[%s7560_s12 + $0x4e8] sm:$0xff] }
  0xe2   : > { %v7950_v40 = vpop.f32.mrf.mxu1  ;;  %v7952_v41 = vpop.f32.mrf.mxu3  ;;  %6058 = vmatmul.msk.f32.gmra.mxu0 %vm279_vm1, %v7595_v15 }
  0xe5   : > { %5918 = vmatmul.msk.f32.gmra.mxu1 %vm279_vm1, %v7623_v28  ;;  %5965 = vmatmul.msk.f32.gmra.mxu2 %vm279_vm1, %v7752_v35  ;;  %v6133_v28 = vld [vmem:[%s7560_s12 + $0x2d0] sm:$0xff] }
  0xe6   : > { %1454 = vmatpush.msra.mxu2 %v6133_v28 }
  0xe7   : > { %6012 = vmatmul.msk.f32.gmra.mxu3 %vm279_vm1, %v7801_v52  ;;  %v7963_v47 = vpop.f32.mrf.mxu0 }
  0xe8   : > { %v7965_v49 = vpop.f32.mrf.mxu2  ;;  %1455 = vmatpush.msra.mxu2 %v6132_v38 }
  0xea   : > { %v7967_v50 = vpop.f32.mrf.mxu1  ;;  %v7969_v51 = vpop.f32.mrf.mxu3  ;;  %6059 = vmatmul.msk.f32.gmra.mxu0 %vm279_vm1, %v7626_v29 }
  0xed   : > { %5919 = vmatmul.msk.f32.gmra.mxu1 %vm279_vm1, %v7656_v44  ;;  %5966 = vmatmul.msk.f32.gmra.mxu2 %vm279_vm1, %v7778_v42 }
  0xef   : > { %6013 = vmatmul.msk.f32.gmra.mxu3 %vm279_vm1, %v7595_v15  ;;  %v7980_v56 = vpop.f32.mrf.mxu0 }
  0xf0   : > { %v7983_v58 = vpop.f32.mrf.mxu2 }
  0xf2   : > { %v7986_v62 = vpop.f32.mrf.mxu1  ;;  %v7988_v63 = vpop.f32.mrf.mxu3  ;;  %6060 = vmatmul.msk.f32.gmra.mxu0 %vm279_vm1, %v7659_v45 }
  0xf5   : > { %5920 = vmatmul.msk.f32.gmra.mxu1 %vm279_vm1, %v7688_v60  ;;  %5967 = vmatmul.msk.f32.gmra.mxu2 %vm279_vm1, %v7801_v52 }
  0xf7   : > { %6014 = vmatmul.msk.f32.gmra.mxu3 %vm279_vm1, %v7626_v29  ;;  %v7998_v44 = vpop.f32.mrf.mxu0 }
  0xf8   : > { %v8001_v2 = vpop.f32.mrf.mxu2 }
  0xfa   : > { %v8003_v3 = vpop.f32.mrf.mxu1  ;;  %v8005_v23 = vpop.f32.mrf.mxu3  ;;  %6061 = vmatmul.msk.f32.gmra.mxu0 %vm279_vm1, %v7691_v61 }
  0xfd   : > { %5921 = vmatmul.msk.f32.gmra.mxu1 %vm279_vm1, %v7720_v12  ;;  %5968 = vmatmul.msk.f32.gmra.mxu2 %vm279_vm1, %v7595_v15  ;;  %v6179_v12 = vld [vmem:[%s7560_s12 + $0x4f8] sm:$0xff] }
  0xfe   : > { %1624 = vmatpush.msra.mxu3 %v6179_v12 }
  0xff   : > { %6015 = vmatmul.msk.f32.gmra.mxu3 %vm279_vm1, %v7659_v45  ;;  %v8015_v60 = vpop.f32.mrf.mxu0 }
 0x100   : > { %v8017_v4 = vpop.f32.mrf.mxu2 }
 0x102   : > { %v8020_v54 = vpop.f32.mrf.mxu1  ;;  %v8022_v5 = vpop.f32.mrf.mxu3  ;;  %6062 = vmatmul.msk.f32.gmra.mxu0 %vm279_vm1, %v7723_v13 }
 0x105   : > { %5922 = vmatmul.msk.f32.gmra.mxu1 %vm279_vm1, %v7752_v35  ;;  %5969 = vmatmul.msk.f32.gmra.mxu2 %vm279_vm1, %v7626_v29  ;;  %v6226_v35 = vld [vmem:[%s7560_s12 + $0x728] sm:$0xff] }
 0x106   : > { %1793 = vmatpush.msra.mxu0 %v6226_v35 }
 0x107   : > { %6016 = vmatmul.msk.f32.gmra.mxu3 %vm279_vm1, %v7691_v61  ;;  %v8034_v6 = vpop.f32.mrf.mxu0 }
 0x108   : > { %v8036_v8 = vpop.f32.mrf.mxu2 }
 0x10a   : > { %v8038_v10 = vpop.f32.mrf.mxu3  ;;  %v519_v11 = vpop.f32.mrf.mxu1  ;;  %6063 = vmatmul.msk.f32.gmra.mxu0 %vm279_vm1, %v7755_v36 }
 0x10b   : > { %v520_v22 = vadd.f32 %v519_v11, %v7910_v16  ;;  %v6178_v16 = vld [vmem:[%s7560_s12 + $0x4f0] sm:$0xff] }
 0x10c   : > { %1625 = vmatpush.msra.mxu3 %v6178_v16 }
 0x10d   : > { %5923 = vmatmul.msk.f32.gmra.mxu1 %vm279_vm1, %v7778_v42  ;;  %5970 = vmatmul.msk.f32.gmra.mxu2 %vm279_vm1, %v7659_v45  ;;  %v6131_v42 = vld [vmem:[%s7560_s12 + $0x2c0] sm:$0xff] }
 0x10e   : > { %1456 = vmatpush.msra.mxu2 %v6131_v42  ;;  %1626 = vmatpush.msra.mxu3 %v6177_v1  ;;  %v6129_v1 = vld [vmem:[%s7560_s12 + $0x2b0] sm:$0xff] }
 0x10f   : > { %6017 = vmatmul.msk.f32.gmra.mxu3 %vm279_vm1, %v7723_v13  ;;  %v994_v30 = vpop.f32.mrf.mxu0 }
 0x110   : > { %v656_v31 = vpop.f32.mrf.mxu2 }
 0x111   : > { %v752_v34 = vadd.f32 %v656_v31, %v520_v22 }
 0x112   : > { %v522_v14 = vpop.f32.mrf.mxu1  ;;  %v825_v28 = vpop.f32.mrf.mxu3  ;;  %6064 = vmatmul.msk.f32.gmra.mxu0 %vm279_vm1, %v7781_v43 }
 0x113   : > { %v921_v57 = vadd.f32 %v825_v28, %v752_v34  ;;  %v523_v38 = vadd.f32 %v522_v14, %v7927_v24  ;;  %v6225_v24 = vld [vmem:[%s7560_s12 + $0x720] sm:$0xff] }
 0x114   : > { %1794 = vmatpush.msra.mxu0 %v6225_v24 }
 0x115   : > { %v8053_v59 = vadd.f32 %v994_v30, %v921_v57  ;;  %5924 = vmatmul.msk.f32.gmra.mxu1 %vm279_vm1, %v7801_v52  ;;  %5971 = vmatmul.msk.f32.gmra.mxu2 %vm279_vm1, %v7691_v61 }
 0x117   : > { %6018 = vmatmul.msk.f32.gmra.mxu3 %vm279_vm1, %v7755_v36  ;;  %v997_v12 = vpop.f32.mrf.mxu0 }
 0x118   : > { %v659_v7 = vpop.f32.mrf.mxu2 }
 0x119   : > { %v753_v11 = vadd.f32 %v659_v7, %v523_v38 }
 0x11a   : > { %v525_v35 = vpop.f32.mrf.mxu1  ;;  %v828_v22 = vpop.f32.mrf.mxu3  ;;  %6065 = vmatmul.msk.f32.gmra.mxu0 %vm279_vm1, %v7804_v53 }
 0x11b   : > { %v922_v52 = vadd.f32 %v828_v22, %v753_v11  ;;  %v526_v31 = vadd.f32 %v525_v35, %v7945_v33  ;;  %v6130_v33 = vld [vmem:[%s7560_s12 + $0x2b8] sm:$0xff]  ;;  %v6083_v35 = vld [vmem:[%s7560_s12 + $0x88] sm:$0xff] }
 0x11c   : > { %1457 = vmatpush.msra.mxu2 %v6130_v33  ;;  %1288 = vmatpush.msra.mxu1 %v6083_v35 }
 0x11d   : > { %v8066_v30 = vadd.f32 %v997_v12, %v922_v52  ;;  %5925 = vmatmul.msk.f32.gmra.mxu1 %vm279_vm1, %v7595_v15  ;;  %5972 = vmatmul.msk.f32.gmra.mxu2 %vm279_vm1, %v7723_v13 }
 0x11e   : > { %1458 = vmatpush.msra.mxu2 %v6129_v1 }
 0x11f   : > { %6019 = vmatmul.msk.f32.gmra.mxu3 %vm279_vm1, %v7781_v43  ;;  %v1000_v34 = vpop.f32.mrf.mxu0 }
 0x120   : > { %v662_v14 = vpop.f32.mrf.mxu2 }
 0x121   : > { %v754_v28 = vadd.f32 %v662_v14, %v526_v31 }
 0x122   : > { %v528_v57 = vpop.f32.mrf.mxu1  ;;  %v831_v42 = vpop.f32.mrf.mxu3  ;;  %6066 = vmatmul.msk.f32.gmra.mxu0 %vm279_vm1, %v7599_v17 }
 0x123   : > { %v923_v15 = vadd.f32 %v831_v42, %v754_v28  ;;  %v529_v38 = vadd.f32 %v528_v57, %v7963_v47  ;;  %v6224_v47 = vld [vmem:[%s7560_s12 + $0x718] sm:$0xff] }
 0x124   : > { %1795 = vmatpush.msra.mxu0 %v6224_v47 }
 0x125   : > { %v8078_v16 = vadd.f32 %v1000_v34, %v923_v15  ;;  %5926 = vmatmul.msk.f32.gmra.mxu1 %vm279_vm1, %v7626_v29  ;;  %5973 = vmatmul.msk.f32.gmra.mxu2 %vm279_vm1, %v7755_v36 }
 0x127   : > { %6020 = vmatmul.msk.f32.gmra.mxu3 %vm279_vm1, %v7804_v53  ;;  %v1003_v12 = vpop.f32.mrf.mxu0 }
 0x128   : > { %v665_v7 = vpop.f32.mrf.mxu2 }
 0x129   : > { %v755_v11 = vadd.f32 %v665_v7, %v529_v38  ;;  %v6176_v7 = vld [vmem:[%s7560_s12 + $0x4e0] sm:$0xff] }
 0x12a   : > { %v531_v22 = vpop.f32.mrf.mxu1  ;;  %v834_v52 = vpop.f32.mrf.mxu3  ;;  %6067 = vmatmul.msk.f32.gmra.mxu0 %vm279_vm1, %v7634_v32  ;;  %1627 = vmatpush.msra.mxu3 %v6176_v7 }
 0x12b   : > { %v924_v29 = vadd.f32 %v834_v52, %v755_v11  ;;  %v532_v31 = vadd.f32 %v531_v22, %v7980_v56  ;;  %v6082_v22 = vld [vmem:[%s7560_s12 + $0x80] sm:$0xff] }
 0x12c   : > { %1289 = vmatpush.msra.mxu1 %v6082_v22 }
 0x12d   : > { %v8092_v24 = vadd.f32 %v1003_v12, %v924_v29  ;;  %5927 = vmatmul.msk.f32.gmra.mxu1 %vm279_vm1, %v7659_v45  ;;  %5974 = vmatmul.msk.f32.gmra.mxu2 %vm279_vm1, %v7781_v43 }
 0x12f   : > { %6021 = vmatmul.msk.f32.gmra.mxu3 %vm279_vm1, %v7599_v17  ;;  %v1006_v34 = vpop.f32.mrf.mxu0 }
 0x130   : > { %v668_v14 = vpop.f32.mrf.mxu2 }
 0x131   : > { %v756_v28 = vadd.f32 %v668_v14, %v532_v31 }
 0x132   : > { %v534_v57 = vpop.f32.mrf.mxu1  ;;  %v837_v42 = vpop.f32.mrf.mxu3  ;;  %6068 = vmatmul.msk.f32.gmra.mxu0 %vm279_vm1, %v7666_v48 }
 0x133   : > { %v925_v45 = vadd.f32 %v837_v42, %v756_v28  ;;  %v535_v56 = vadd.f32 %v534_v57, %v7998_v44 }
 0x135   : > { %v8104_v15 = vadd.f32 %v1006_v34, %v925_v45  ;;  %5928 = vmatmul.msk.f32.gmra.mxu1 %vm279_vm1, %v7691_v61  ;;  %5975 = vmatmul.msk.f32.gmra.mxu2 %vm279_vm1, %v7804_v53  ;;  %v6223_v34 = vld [vmem:[%s7560_s12 + $0x710] sm:$0xff] }
 0x136   : > { %1796 = vmatpush.msra.mxu0 %v6223_v34 }
 0x137   : > { %6022 = vmatmul.msk.f32.gmra.mxu3 %vm279_vm1, %v7634_v32  ;;  %v1009_v33 = vpop.f32.mrf.mxu0 }
 0x138   : > { %v671_v38 = vpop.f32.mrf.mxu2 }
 0x139   : > { %v757_v12 = vadd.f32 %v671_v38, %v535_v56 }
 0x13a   : > { %v537_v11 = vpop.f32.mrf.mxu1  ;;  %v840_v35 = vpop.f32.mrf.mxu3  ;;  %6069 = vmatmul.msk.f32.gmra.mxu0 %vm279_vm1, %v7698_v0 }
 0x13b   : > { %v926_v61 = vadd.f32 %v840_v35, %v757_v12  ;;  %v538_v52 = vadd.f32 %v537_v11, %v8015_v60  ;;  %v6175_v12 = vld [vmem:[%s7560_s12 + $0x4d8] sm:$0xff] }
 0x13c   : > { %1628 = vmatpush.msra.mxu3 %v6175_v12 }
 0x13d   : > { %v8118_v44 = vadd.f32 %v1009_v33, %v926_v61  ;;  %5929 = vmatmul.msk.f32.gmra.mxu1 %vm279_vm1, %v7723_v13  ;;  %5976 = vmatmul.msk.f32.gmra.mxu2 %vm279_vm1, %v7599_v17  ;;  %v6128_v33 = vld [vmem:[%s7560_s12 + $0x2a8] sm:$0xff] }
 0x13e   : > { %1459 = vmatpush.msra.mxu2 %v6128_v33 }
 0x13f   : > { %6023 = vmatmul.msk.f32.gmra.mxu3 %vm279_vm1, %v7666_v48  ;;  %v1012_v29 = vpop.f32.mrf.mxu0 }
 0x140   : > { %v674_v47 = vpop.f32.mrf.mxu2 }
 0x141   : > { %v758_v31 = vadd.f32 %v674_v47, %v538_v52  ;;  %v6222_v47 = vld [vmem:[%s7560_s12 + $0x708] sm:$0xff] }
 0x142   : > { %v540_v14 = vpop.f32.mrf.mxu1  ;;  %v843_v28 = vpop.f32.mrf.mxu3  ;;  %6070 = vmatmul.msk.f32.gmra.mxu0 %vm279_vm1, %v7730_v19 }
 0x143   : > { %v927_v57 = vadd.f32 %v843_v28, %v758_v31  ;;  %v541_v60 = vadd.f32 %v540_v14, %v8034_v6  ;;  %v6081_v6 = vld [vmem:[%s7560_s12 + $0x78] sm:$0xff]  ;;  %1797 = vmatpush.msra.mxu0 %v6222_v47 }
 0x144   : > { %1290 = vmatpush.msra.mxu1 %v6081_v6 }
 0x145   : > { %v8130_v13 = vadd.f32 %v1012_v29, %v927_v57  ;;  %5930 = vmatmul.msk.f32.gmra.mxu1 %vm279_vm1, %v7755_v36  ;;  %5977 = vmatmul.msk.f32.gmra.mxu2 %vm279_vm1, %v7634_v32 }
 0x147   : > { %6024 = vmatmul.msk.f32.gmra.mxu3 %vm279_vm1, %v7698_v0  ;;  %v1015_v42 = vpop.f32.mrf.mxu0 }
 0x148   : > { %v677_v45 = vpop.f32.mrf.mxu2 }
 0x149   : > { %v759_v56 = vadd.f32 %v677_v45, %v541_v60 }
 0x14a   : > { %v543_v1 = vpop.f32.mrf.mxu1  ;;  %v846_v38 = vpop.f32.mrf.mxu3  ;;  %6071 = vmatmul.msk.f32.gmra.mxu0 %vm279_vm1, %v7762_v39 }
 0x14b   : > { %v928_v36 = vadd.f32 %v846_v38, %v759_v56  ;;  %v544_v11 = vadd.f32 %v543_v1, %v7898_v9  ;;  %v244_v1 = vld [vmem:[%s7588_s28 + $0x198] sm:$0xff]  ;;  %v6080_v38 = vld [vmem:[%s7560_s12 + $0x70] sm:$0xff] }
 0x14c   : > { %1291 = vmatpush.msra.mxu1 %v6080_v38 }
 0x14d   : > { %v8143_v7 = vadd.f32 %v1015_v42, %v928_v36  ;;  %5931 = vmatmul.msk.f32.gmra.mxu1 %vm279_vm1, %v7781_v43  ;;  %5978 = vmatmul.msk.f32.gmra.mxu2 %vm279_vm1, %v7666_v48  ;;  %v6127_v42 = vld [vmem:[%s7560_s12 + $0x2a0] sm:$0xff] }
 0x14e   : > { %1460 = vmatpush.msra.mxu2 %v6127_v42 }
 0x14f   : > { %6025 = vmatmul.msk.f32.gmra.mxu3 %vm279_vm1, %v7730_v19  ;;  %v1018_v35 = vpop.f32.mrf.mxu0 }
 0x150   : > { %v680_v61 = vpop.f32.mrf.mxu2 }
 0x151   : > { %v760_v22 = vadd.f32 %v680_v61, %v544_v11 }
 0x152   : > { %v546_v52 = vpop.f32.mrf.mxu1  ;;  %v849_v29 = vpop.f32.mrf.mxu3  ;;  %6072 = vmatmul.msk.f32.gmra.mxu0 %vm279_vm1, %v7786_v46 }
 0x153   : > { %v929_v43 = vadd.f32 %v849_v29, %v760_v22  ;;  %v547_v9 = vadd.f32 %v546_v52, %v7914_v20  ;;  %v6174_v20 = vld [vmem:[%s7560_s12 + $0x4d0] sm:$0xff] }
 0x154   : > { %1629 = vmatpush.msra.mxu3 %v6174_v20  ;;  %v245_v52 = vld [vmem:[%s7588_s28 + $0x1a0] sm:$0xff] }
 0x155   : > { %v8156_v31 = vadd.f32 %v1018_v35, %v929_v43  ;;  %5932 = vmatmul.msk.f32.gmra.mxu1 %vm279_vm1, %v7804_v53  ;;  %5979 = vmatmul.msk.f32.gmra.mxu2 %vm279_vm1, %v7698_v0 }
 0x157   : > { %6026 = vmatmul.msk.f32.gmra.mxu3 %vm279_vm1, %v7762_v39  ;;  %v1021_v34 = vpop.f32.mrf.mxu0 }
 0x158   : > { %v683_v14 = vpop.f32.mrf.mxu2 }
 0x159   : > { %v761_v28 = vadd.f32 %v683_v14, %v547_v9 }
 0x15a   : > { %v549_v57 = vpop.f32.mrf.mxu1  ;;  %v852_v60 = vpop.f32.mrf.mxu3  ;;  %6073 = vmatmul.msk.f32.gmra.mxu0 %vm279_vm1, %v7809_v55 }
 0x15b   : > { %v930_v53 = vadd.f32 %v852_v60, %v761_v28  ;;  %v550_v56 = vadd.f32 %v549_v57, %v7931_v26  ;;  %v6221_v26 = vld [vmem:[%s7560_s12 + $0x700] sm:$0xff]  ;;  %v6375_v60 = vld [vmem:[%s7560_s12 + $0x378] sm:$0x1] }
 0x15c   : > { %1798 = vmatpush.msra.mxu0 %v6221_v26  ;;  %v246_v57 = vld [vmem:[%s7588_s28 + $0x1b0] sm:$0xff]  ;;  %6376 = vmatpush.msk.msrb.mxu3 %vm376_vm0, %v6375_v60 }
 0x15d   : > { %v8168_v45 = vadd.f32 %v1021_v34, %v930_v53  ;;  %5933 = vmatmul.msk.f32.gmra.mxu1 %vm279_vm1, %v7599_v17  ;;  %5980 = vmatmul.msk.f32.gmra.mxu2 %vm279_vm1, %v7730_v19 }
 0x15f   : > { %6027 = vmatmul.msk.f32.gmra.mxu3 %vm279_vm1, %v7786_v46  ;;  %v1024_v33 = vpop.f32.mrf.mxu0 }
 0x160   : > { %v686_v36 = vpop.f32.mrf.mxu2 }
 0x161   : > { %v762_v12 = vadd.f32 %v686_v36, %v550_v56  ;;  %v247_v36 = vld [vmem:[%s7588_s28 + $0x1b8] sm:$0xff] }
 0x162   : > { %v552_v6 = vpop.f32.mrf.mxu1  ;;  %v855_v17 = vpop.f32.mrf.mxu3  ;;  %6074 = vmatmul.msk.f32.gmra.mxu0 %vm279_vm1, %v244_v1 }
 0x163   : > { %v931_v11 = vadd.f32 %v855_v17, %v762_v12  ;;  %v553_v61 = vadd.f32 %v552_v6, %v7950_v40  ;;  %v6328_v40 = vld [vmem:[%s7560_s12 + $0x148] sm:$0x1] }
 0x164   : > { %6329 = vmatpush.msk.msrb.mxu2 %vm376_vm0, %v6328_v40  ;;  %v6422_v12 = vld [vmem:[%s7560_s12 + $0x5a8] sm:$0x1] }
 0x165   : > { %v8181_v35 = vadd.f32 %v1024_v33, %v931_v11  ;;  %5934 = vmatmul.msk.f32.gmra.mxu1 %vm279_vm1, %v7634_v32  ;;  %5981 = vmatmul.msk.f32.gmra.mxu2 %vm279_vm1, %v7762_v39 }
 0x166   : > { %6423 = vmatpush.msk.msrb.mxu0 %vm376_vm0, %v6422_v12 }
 0x167   : > { %6028 = vmatmul.msk.f32.gmra.mxu3 %vm279_vm1, %v7809_v55  ;;  %v1027_v22 = vpop.f32.mrf.mxu0 }
 0x168   : > { %v689_v29 = vpop.f32.mrf.mxu2 }
 0x169   : > { %v763_v43 = vadd.f32 %v689_v29, %v553_v61 }
 0x16a   : > { %v555_v47 = vpop.f32.mrf.mxu1  ;;  %v858_v9 = vpop.f32.mrf.mxu3  ;;  %6075 = vmatmul.msk.f32.gmra.mxu0 %vm279_vm1, %v245_v52 }
 0x16b   : > { %v932_v32 = vadd.f32 %v858_v9, %v763_v43  ;;  %v556_v14 = vadd.f32 %v555_v47, %v7967_v50  ;;  %v6327_v47 = vld [vmem:[%s7560_s12 + $0x140] sm:$0xff] }
 0x16c   : > { %2254 = vmatpush.msrb.mxu2 %v6327_v47 }
 0x16d   : > { %v8193_v34 = vadd.f32 %v1027_v22, %v932_v32  ;;  %5935 = vmatmul.msk.f32.gmra.mxu1 %vm279_vm1, %v7666_v48  ;;  %5982 = vmatmul.msk.f32.gmra.mxu2 %vm279_vm1, %v7786_v46  ;;  %v6281_v48 = vld [vmem:[%s7560_s12 + $0x998] sm:$0x1] }
 0x16e   : > { %6282 = vmatpush.msk.msrb.mxu1 %vm376_vm0, %v6281_v48  ;;  %v248_v22 = vld [vmem:[%s7588_s28 + $0x1c8] sm:$0xff] }
 0x16f   : > { %6029 = vmatmul.msk.f32.gmra.mxu3 %vm279_vm1, %v244_v1  ;;  %v1030_v28 = vpop.f32.mrf.mxu0 }
 0x170   : > { %v692_v53 = vpop.f32.mrf.mxu2 }
 0x171   : > { %v764_v42 = vadd.f32 %v692_v53, %v556_v14 }
 0x172   : > { %v558_v20 = vpop.f32.mrf.mxu1  ;;  %v861_v56 = vpop.f32.mrf.mxu3  ;;  %6076 = vmatmul.msk.f32.gmra.mxu0 %vm279_vm1, %v246_v57 }
 0x173   : > { %v933_v46 = vadd.f32 %v861_v56, %v764_v42  ;;  %v559_v33 = vadd.f32 %v558_v20, %v7986_v62  ;;  %v1122_v20 = vld [vmem:[%s7588_s28 + $0x1] sm:$0xff]  ;;  %v1124_v56 = vld [vmem:[%s7588_s28 + $0x19] sm:$0xff] }
 0x175   : > { %v8209_v50 = vadd.f32 %v1030_v28, %v933_v46  ;;  %5936 = vmatmul.msk.f32.gmra.mxu1 %vm279_vm1, %v7698_v0  ;;  %5983 = vmatmul.msk.f32.gmra.mxu2 %vm279_vm1, %v7809_v55  ;;  %v8246_v46 = vld [vmem:[%s7588_s28 + $0x31] sm:$0xff] }
 0x177   : > { %6030 = vmatmul.msk.f32.gmra.mxu3 %vm279_vm1, %v245_v52  ;;  %v1033_v38 = vpop.f32.mrf.mxu0 }
 0x178   : > { %v695_v6 = vpop.f32.mrf.mxu2 }
 0x179   : > { %v765_v17 = vadd.f32 %v695_v6, %v559_v33 }
 0x17a   : > { %v561_v11 = vpop.f32.mrf.mxu1  ;;  %v864_v26 = vpop.f32.mrf.mxu3  ;;  %6077 = vmatmul.msk.f32.gmra.mxu0 %vm279_vm1, %v247_v36 }
 0x17b   : > { %v934_v0 = vadd.f32 %v864_v26, %v765_v17  ;;  %v562_v62 = vadd.f32 %v561_v11, %v8003_v3  ;;  %v1123_v26 = vld [vmem:[%s7588_s28 + $0x9] sm:$0xff] }
 0x17d   : > { %v8221_v55 = vadd.f32 %v1033_v38, %v934_v0  ;;  %5937 = vmatmul.msk.f32.gmra.mxu1 %vm279_vm1, %v7730_v19  ;;  %5984 = vmatmul.msk.f32.gmra.mxu2 %vm279_vm1, %v244_v1  ;;  %v6374_v19 = vld [vmem:[%s7560_s12 + $0x370] sm:$0xff] }
 0x17e   : > { %2423 = vmatpush.msrb.mxu3 %v6374_v19  ;;  %v6280_v1 = vld [vmem:[%s7560_s12 + $0x990] sm:$0xff] }
 0x17f   : > { %6031 = vmatmul.msk.f32.gmra.mxu3 %vm279_vm1, %v246_v57  ;;  %v1036_v61 = vpop.f32.mrf.mxu0  ;;  %1955 = vmatpush.msrb.mxu1 %v6280_v1  ;;  %v249_v57 = vld [vmem:[%s7588_s28 + $0x1d0] sm:$0xff]  ;;  %v1125_v0 = vld [vmem:[%s7588_s28 + $0x21] sm:$0xff] }
 0x180   : > { %v698_v29 = vpop.f32.mrf.mxu2 }
 0x181   : > { %v766_v43 = vadd.f32 %v698_v29, %v562_v62  ;;  %v6373_v29 = vld [vmem:[%s7560_s12 + $0x368] sm:$0xff] }
 0x182   : > { %v564_v9 = vpop.f32.mrf.mxu1  ;;  %v867_v32 = vpop.f32.mrf.mxu3  ;;  %6078 = vmatmul.msk.f32.gmra.mxu0 %vm279_vm1, %v248_v22  ;;  %2424 = vmatpush.msrb.mxu3 %v6373_v29 }
 0x183   : > { %v935_v40 = vadd.f32 %v867_v32, %v766_v43  ;;  %v565_v14 = vadd.f32 %v564_v9, %v8020_v54  ;;  %v6279_v43 = vld [vmem:[%s7560_s12 + $0x988] sm:$0xff] }
 0x184   : > { %1956 = vmatpush.msrb.mxu1 %v6279_v43  ;;  %v8276_v32 = vld [vmem:[%s7588_s28 + $0x51] sm:$0xff] }
 0x185   : > { %v8232_v3 = vadd.f32 %v1036_v61, %v935_v40  ;;  %5938 = vmatmul.msk.f32.gmra.mxu1 %vm279_vm1, %v7762_v39  ;;  %5985 = vmatmul.msk.f32.gmra.mxu2 %vm279_vm1, %v245_v52  ;;  %v6421_v52 = vld [vmem:[%s7560_s12 + $0x5a0] sm:$0xff] }
 0x186   : > { %2592 = vmatpush.msrb.mxu0 %v6421_v52  ;;  %v8264_v61 = vld [vmem:[%s7588_s28 + $0x39] sm:$0xff] }
 0x187   : > { %6032 = vmatmul.msk.f32.gmra.mxu3 %vm279_vm1, %v247_v36  ;;  %v1039_v28 = vpop.f32.mrf.mxu0  ;;  %v8256_v36 = vld [vmem:[%s7588_s28 + $0x49] sm:$0xff] }
 0x188   : > { %v701_v60 = vpop.f32.mrf.mxu2 }
 0x189   : > { %v767_v53 = vadd.f32 %v701_v60, %v565_v14 }
 0x18a   : > { %v567_v42 = vpop.f32.mrf.mxu1  ;;  %v870_v48 = vpop.f32.mrf.mxu3  ;;  %6079 = vmatmul.msk.f32.gmra.mxu0 %vm279_vm1, %v249_v57 }
 0x18b   : > { %v936_v39 = vadd.f32 %v870_v48, %v767_v53  ;;  %v568_v33 = vadd.f32 %v567_v42, %v7912_v18  ;;  %v6326_v18 = vld [vmem:[%s7560_s12 + $0x138] sm:$0xff] }
 0x18c   : > { %2255 = vmatpush.msrb.mxu2 %v6326_v18  ;;  %v8290_v42 = vld [vmem:[%s7588_s28 + $0x61] sm:$0xff] }
 0x18d   : > { %v8248_v54 = vadd.f32 %v1039_v28, %v936_v39  ;;  %6095 = vmatmul.msk.f32.vlgmr.msra.gmra.mxu1 %vm279_vm1, %v1122_v20  ;;  %6142 = vmatmul.msk.f32.vlgmr.msra.gmra.mxu2 %vm279_vm1, %v1124_v56 }
 0x18f   : > { %6189 = vmatmul.msk.f32.vlgmr.msra.gmra.mxu3 %vm279_vm1, %v8246_v46  ;;  %v1042_v38 = vpop.f32.mrf.mxu0 }
 0x190   : > { %v704_v12 = vpop.f32.mrf.mxu2 }
 0x191   : > { %v768_v6 = vadd.f32 %v704_v12, %v568_v33 }
 0x192   : > { %v570_v17 = vpop.f32.mrf.mxu1  ;;  %v873_v11 = vpop.f32.mrf.mxu3  ;;  %6236 = vmatmul.msk.f32.vlgmr.msra.gmra.mxu0 %vm279_vm1, %v8256_v36 }
 0x193   : > { %v937_v62 = vadd.f32 %v873_v11, %v768_v6  ;;  %v571_v47 = vadd.f32 %v570_v17, %v7929_v25  ;;  %v6420_v25 = vld [vmem:[%s7560_s12 + $0x598] sm:$0xff] }
 0x194   : > { %2593 = vmatpush.msrb.mxu0 %v6420_v25  ;;  %v8305_v17 = vld [vmem:[%s7588_s28 + $0x69] sm:$0xff] }
 0x195   : > { %v8266_v22 = vadd.f32 %v1042_v38, %v937_v62  ;;  %6096 = vmatmul.msk.f32.gmra.mxu1 %vm279_vm1, %v1123_v26  ;;  %6143 = vmatmul.msk.f32.gmra.mxu2 %vm279_vm1, %v1125_v0  ;;  %v6372_v38 = vld [vmem:[%s7560_s12 + $0x360] sm:$0xff] }
 0x196   : > { %2425 = vmatpush.msrb.mxu3 %v6372_v38 }
 0x197   : > { %6190 = vmatmul.msk.f32.gmra.mxu3 %vm279_vm1, %v8264_v61  ;;  %v1045_v9 = vpop.f32.mrf.mxu0 }
 0x198   : > { %v707_v40 = vpop.f32.mrf.mxu2 }
 0x199   : > { %v769_v19 = vadd.f32 %v707_v40, %v571_v47  ;;  %v8321_v40 = vld [vmem:[%s7588_s28 + $0x79] sm:$0xff] }
 0x19a   : > { %v573_v1 = vpop.f32.mrf.mxu1  ;;  %v876_v14 = vpop.f32.mrf.mxu3  ;;  %6237 = vmatmul.msk.f32.gmra.mxu0 %vm279_vm1, %v8276_v32 }
 0x19b   : > { %v938_v28 = vadd.f32 %v876_v14, %v769_v19  ;;  %v574_v60 = vadd.f32 %v573_v1, %v7948_v37  ;;  %v6325_v37 = vld [vmem:[%s7560_s12 + $0x130] sm:$0xff] }
 0x19c   : > { %2256 = vmatpush.msrb.mxu2 %v6325_v37  ;;  %v6277_v37 = vld [vmem:[%s7560_s12 + $0x978] sm:$0xff] }
 0x19d   : > { %v8280_v57 = vadd.f32 %v1045_v9, %v938_v28  ;;  %6097 = vmatmul.msk.f32.gmra.mxu1 %vm279_vm1, %v1124_v56  ;;  %6144 = vmatmul.msk.f32.gmra.mxu2 %vm279_vm1, %v8246_v46 }
 0x19f   : > { %6191 = vmatmul.msk.f32.gmra.mxu3 %vm279_vm1, %v8256_v36  ;;  %v1048_v53 = vpop.f32.mrf.mxu0 }
 0x1a0   : > { %v710_v48 = vpop.f32.mrf.mxu2 }
 0x1a1   : > { %v770_v20 = vadd.f32 %v710_v48, %v574_v60  ;;  %v6324_v48 = vld [vmem:[%s7560_s12 + $0x128] sm:$0xff] }
 0x1a2   : > { %v576_v39 = vpop.f32.mrf.mxu1  ;;  %v879_v56 = vpop.f32.mrf.mxu3  ;;  %6238 = vmatmul.msk.f32.gmra.mxu0 %vm279_vm1, %v8290_v42  ;;  %2257 = vmatpush.msrb.mxu2 %v6324_v48 }
 0x1a3   : > { %v939_v52 = vadd.f32 %v879_v56, %v770_v20  ;;  %v577_v12 = vadd.f32 %v576_v39, %v7965_v49  ;;  %v6419_v49 = vld [vmem:[%s7560_s12 + $0x590] sm:$0xff]  ;;  %v6371_v56 = vld [vmem:[%s7560_s12 + $0x358] sm:$0xff] }
 0x1a4   : > { %2594 = vmatpush.msrb.mxu0 %v6419_v49  ;;  %2426 = vmatpush.msrb.mxu3 %v6371_v56 }
 0x1a5   : > { %v8294_v33 = vadd.f32 %v1048_v53, %v939_v52  ;;  %6098 = vmatmul.msk.f32.gmra.mxu1 %vm279_vm1, %v1125_v0  ;;  %6145 = vmatmul.msk.f32.gmra.mxu2 %vm279_vm1, %v8264_v61  ;;  %v6278_v0 = vld [vmem:[%s7560_s12 + $0x980] sm:$0xff] }
 0x1a6   : > { %1957 = vmatpush.msrb.mxu1 %v6278_v0  ;;  %v8335_v53 = vld [vmem:[%s7588_s28 + $0x81] sm:$0xff] }
 0x1a7   : > { %6192 = vmatmul.msk.f32.gmra.mxu3 %vm279_vm1, %v8276_v32  ;;  %v1051_v6 = vpop.f32.mrf.mxu0 }
 0x1a8   : > { %v713_v11 = vpop.f32.mrf.mxu2  ;;  %1958 = vmatpush.msrb.mxu1 %v6277_v37 }
 0x1a9   : > { %v771_v26 = vadd.f32 %v713_v11, %v577_v12  ;;  %v8352_v11 = vld [vmem:[%s7588_s28 + $0x91] sm:$0xff] }
 0x1aa   : > { %v579_v62 = vpop.f32.mrf.mxu1  ;;  %v882_v18 = vpop.f32.mrf.mxu3  ;;  %6239 = vmatmul.msk.f32.gmra.mxu0 %vm279_vm1, %v8305_v17 }
 0x1ab   : > { %v940_v29 = vadd.f32 %v882_v18, %v771_v26  ;;  %v580_v47 = vadd.f32 %v579_v62, %v7983_v58  ;;  %v6418_v62 = vld [vmem:[%s7560_s12 + $0x588] sm:$0xff] }
 0x1ac   : > { %2595 = vmatpush.msrb.mxu0 %v6418_v62 }
 0x1ad   : > { %v8310_v43 = vadd.f32 %v1051_v6, %v940_v29  ;;  %6099 = vmatmul.msk.f32.gmra.mxu1 %vm279_vm1, %v8246_v46  ;;  %6146 = vmatmul.msk.f32.gmra.mxu2 %vm279_vm1, %v8256_v36 }
 0x1af   : > { %6193 = vmatmul.msk.f32.gmra.mxu3 %vm279_vm1, %v8290_v42  ;;  %v1054_v9 = vpop.f32.mrf.mxu0 }
 0x1b0   : > { %v716_v19 = vpop.f32.mrf.mxu2 }
 0x1b1   : > { %v772_v1 = vadd.f32 %v716_v19, %v580_v47 }
 0x1b2   : > { %v582_v14 = vpop.f32.mrf.mxu1  ;;  %v885_v46 = vpop.f32.mrf.mxu3  ;;  %6240 = vmatmul.msk.f32.gmra.mxu0 %vm279_vm1, %v8321_v40 }
 0x1b3   : > { %v941_v28 = vadd.f32 %v885_v46, %v772_v1  ;;  %v583_v58 = vadd.f32 %v582_v14, %v8001_v2  ;;  %v6323_v14 = vld [vmem:[%s7560_s12 + $0x120] sm:$0xff] }
 0x1b4   : > { %2258 = vmatpush.msrb.mxu2 %v6323_v14 }
 0x1b5   : > { %v8325_v25 = vadd.f32 %v1054_v9, %v941_v28  ;;  %6100 = vmatmul.msk.f32.gmra.mxu1 %vm279_vm1, %v8264_v61  ;;  %6147 = vmatmul.msk.f32.gmra.mxu2 %vm279_vm1, %v8276_v32  ;;  %v8367_v9 = vld [vmem:[%s7588_s28 + $0x99] sm:$0xff] }
 0x1b7   : > { %6194 = vmatmul.msk.f32.gmra.mxu3 %vm279_vm1, %v8305_v17  ;;  %v1057_v60 = vpop.f32.mrf.mxu0 }
 0x1b8   : > { %v719_v20 = vpop.f32.mrf.mxu2 }
 0x1b9   : > { %v773_v39 = vadd.f32 %v719_v20, %v583_v58  ;;  %v6370_v58 = vld [vmem:[%s7560_s12 + $0x350] sm:$0xff] }
 0x1ba   : > { %v585_v52 = vpop.f32.mrf.mxu1  ;;  %v888_v61 = vpop.f32.mrf.mxu3  ;;  %6241 = vmatmul.msk.f32.gmra.mxu0 %vm279_vm1, %v8335_v53  ;;  %2427 = vmatpush.msrb.mxu3 %v6370_v58 }
 0x1bb   : > { %v942_v2 = vadd.f32 %v888_v61, %v773_v39  ;;  %v586_v12 = vadd.f32 %v585_v52, %v8017_v4  ;;  %v8384_v39 = vld [vmem:[%s7588_s28 + $0xa9] sm:$0xff] }
 0x1bd   : > { %v8342_v38 = vadd.f32 %v1057_v60, %v942_v2  ;;  %6101 = vmatmul.msk.f32.gmra.mxu1 %vm279_vm1, %v8256_v36  ;;  %6148 = vmatmul.msk.f32.gmra.mxu2 %vm279_vm1, %v8290_v42  ;;  %v6276_v60 = vld [vmem:[%s7560_s12 + $0x970] sm:$0xff] }
 0x1be   : > { %1959 = vmatpush.msrb.mxu1 %v6276_v60 }
 0x1bf   : > { %6195 = vmatmul.msk.f32.gmra.mxu3 %vm279_vm1, %v8321_v40  ;;  %v1060_v6 = vpop.f32.mrf.mxu0 }
 0x1c0   : > { %v722_v26 = vpop.f32.mrf.mxu2 }
 0x1c1   : > { %v774_v0 = vadd.f32 %v722_v26, %v586_v12  ;;  %v6417_v12 = vld [vmem:[%s7560_s12 + $0x580] sm:$0xff] }
 0x1c2   : > { %v588_v18 = vpop.f32.mrf.mxu1  ;;  %v891_v29 = vpop.f32.mrf.mxu3  ;;  %6242 = vmatmul.msk.f32.gmra.mxu0 %vm279_vm1, %v8352_v11 }
 0x1c3   : > { %v943_v36 = vadd.f32 %v891_v29, %v774_v0  ;;  %v589_v49 = vadd.f32 %v588_v18, %v8036_v8  ;;  %2596 = vmatpush.msrb.mxu0 %v6417_v12  ;;  %v8399_v0 = vld [vmem:[%s7588_s28 + $0xb1] sm:$0xff] }
 0x1c5   : > { %v8357_v4 = vadd.f32 %v1060_v6, %v943_v36  ;;  %6102 = vmatmul.msk.f32.gmra.mxu1 %vm279_vm1, %v8276_v32  ;;  %6149 = vmatmul.msk.f32.gmra.mxu2 %vm279_vm1, %v8305_v17 }
 0x1c7   : > { %6196 = vmatmul.msk.f32.gmra.mxu3 %vm279_vm1, %v8335_v53  ;;  %v1063_v47 = vpop.f32.mrf.mxu0 }
 0x1c8   : > { %v725_v19 = vpop.f32.mrf.mxu2 }
 0x1c9   : > { %v775_v1 = vadd.f32 %v725_v19, %v589_v49 }
 0x1ca   : > { %v591_v46 = vpop.f32.mrf.mxu1  ;;  %v894_v28 = vpop.f32.mrf.mxu3  ;;  %6243 = vmatmul.msk.f32.gmra.mxu0 %vm279_vm1, %v8367_v9 }
 0x1cb   : > { %v944_v32 = vadd.f32 %v894_v28, %v775_v1  ;;  %v592_v48 = vadd.f32 %v591_v46, %v7916_v21  ;;  %v8415_v46 = vld [vmem:[%s7588_s28 + $0xc1] sm:$0xff] }
 0x1cc   : > { %v6275_v28 = vld [vmem:[%s7560_s12 + $0x968] sm:$0xff] }
 0x1cd   : > { %v8373_v8 = vadd.f32 %v1063_v47, %v944_v32  ;;  %6103 = vmatmul.msk.f32.gmra.mxu1 %vm279_vm1, %v8290_v42  ;;  %6150 = vmatmul.msk.f32.gmra.mxu2 %vm279_vm1, %v8321_v40  ;;  %v6322_v47 = vld [vmem:[%s7560_s12 + $0x118] sm:$0xff] }
 0x1ce   : > { %2259 = vmatpush.msrb.mxu2 %v6322_v47  ;;  %1960 = vmatpush.msrb.mxu1 %v6275_v28  ;;  %v6368_v47 = vld [vmem:[%s7560_s12 + $0x340] sm:$0xff] }
 0x1cf   : > { %6197 = vmatmul.msk.f32.gmra.mxu3 %vm279_vm1, %v8352_v11  ;;  %v1066_v20 = vpop.f32.mrf.mxu0 }
 0x1d0   : > { %v728_v56 = vpop.f32.mrf.mxu2 }
 0x1d1   : > { %v776_v52 = vadd.f32 %v728_v56, %v592_v48 }
 0x1d2   : > { %v594_v61 = vpop.f32.mrf.mxu1  ;;  %v897_v2 = vpop.f32.mrf.mxu3  ;;  %6244 = vmatmul.msk.f32.gmra.mxu0 %vm279_vm1, %v8384_v39 }
 0x1d3   : > { %v945_v37 = vadd.f32 %v897_v2, %v776_v52  ;;  %v595_v21 = vadd.f32 %v594_v61, %v7933_v27  ;;  %v6369_v27 = vld [vmem:[%s7560_s12 + $0x348] sm:$0xff] }
 0x1d4   : > { %2428 = vmatpush.msrb.mxu3 %v6369_v27  ;;  %v8431_v2 = vld [vmem:[%s7588_s28 + $0xc9] sm:$0xff] }
 0x1d5   : > { %v8389_v6 = vadd.f32 %v1066_v20, %v945_v37  ;;  %6104 = vmatmul.msk.f32.gmra.mxu1 %vm279_vm1, %v8305_v17  ;;  %6151 = vmatmul.msk.f32.gmra.mxu2 %vm279_vm1, %v8335_v53 }
 0x1d6   : > { %2429 = vmatpush.msrb.mxu3 %v6368_v47  ;;  %v6320_v47 = vld [vmem:[%s7560_s12 + $0x108] sm:$0xff] }
 0x1d7   : > { %6198 = vmatmul.msk.f32.gmra.mxu3 %vm279_vm1, %v8367_v9  ;;  %v1069_v26 = vpop.f32.mrf.mxu0 }
 0x1d8   : > { %v731_v62 = vpop.f32.mrf.mxu2 }
 0x1d9   : > { %v777_v18 = vadd.f32 %v731_v62, %v595_v21 }
 0x1da   : > { %v597_v29 = vpop.f32.mrf.mxu1  ;;  %v900_v36 = vpop.f32.mrf.mxu3  ;;  %6245 = vmatmul.msk.f32.gmra.mxu0 %vm279_vm1, %v8399_v0 }
 0x1db   : > { %v946_v49 = vadd.f32 %v900_v36, %v777_v18  ;;  %v598_v1 = vadd.f32 %v597_v29, %v7952_v41  ;;  %v6416_v41 = vld [vmem:[%s7560_s12 + $0x578] sm:$0xff] }
 0x1dc   : > { %2597 = vmatpush.msrb.mxu0 %v6416_v41  ;;  %v6415_v41 = vld [vmem:[%s7560_s12 + $0x570] sm:$0xff] }
 0x1dd   : > { %v8404_v19 = vadd.f32 %v1069_v26, %v946_v49  ;;  %6105 = vmatmul.msk.f32.gmra.mxu1 %vm279_vm1, %v8321_v40  ;;  %6152 = vmatmul.msk.f32.gmra.mxu2 %vm279_vm1, %v8352_v11  ;;  %v8446_v49 = vld [vmem:[%s7588_s28 + $0xd9] sm:$0xff] }
 0x1de   : > { %2598 = vmatpush.msrb.mxu0 %v6415_v41 }
 0x1df   : > { %6199 = vmatmul.msk.f32.gmra.mxu3 %vm279_vm1, %v8384_v39  ;;  %v1072_v14 = vpop.f32.mrf.mxu0 }
 0x1e0   : > { %v734_v32 = vpop.f32.mrf.mxu2 }
 0x1e1   : > { %v778_v58 = vadd.f32 %v734_v32, %v598_v1 }
 0x1e2   : > { %v600_v60 = vpop.f32.mrf.mxu1  ;;  %v903_v48 = vpop.f32.mrf.mxu3  ;;  %6246 = vmatmul.msk.f32.gmra.mxu0 %vm279_vm1, %v8415_v46 }
 0x1e3   : > { %v947_v20 = vadd.f32 %v903_v48, %v778_v58  ;;  %v601_v52 = vadd.f32 %v600_v60, %v7969_v51  ;;  %v6321_v51 = vld [vmem:[%s7560_s12 + $0x110] sm:$0xff] }
 0x1e4   : > { %2260 = vmatpush.msrb.mxu2 %v6321_v51  ;;  %v8477_v51 = vld [vmem:[%s7588_s28 + $0xf1] sm:$0xff] }
 0x1e5   : > { %v8420_v56 = vadd.f32 %v1072_v14, %v947_v20  ;;  %6106 = vmatmul.msk.f32.gmra.mxu1 %vm279_vm1, %v8335_v53  ;;  %6153 = vmatmul.msk.f32.gmra.mxu2 %vm279_vm1, %v8367_v9  ;;  %v6274_v14 = vld [vmem:[%s7560_s12 + $0x960] sm:$0xff] }
 0x1e6   : > { %1961 = vmatpush.msrb.mxu1 %v6274_v14  ;;  %v8462_v20 = vld [vmem:[%s7588_s28 + $0xe1] sm:$0xff]  ;;  %2261 = vmatpush.msrb.mxu2 %v6320_v47 }
 0x1e7   : > { %6200 = vmatmul.msk.f32.gmra.mxu3 %vm279_vm1, %v8399_v0  ;;  %v1075_v61 = vpop.f32.mrf.mxu0 }
 0x1e8   : > { %v737_v37 = vpop.f32.mrf.mxu2 }
 0x1e9   : > { %v779_v12 = vadd.f32 %v737_v37, %v601_v52 }
 0x1ea   : > { %v603_v21 = vpop.f32.mrf.mxu1  ;;  %v906_v26 = vpop.f32.mrf.mxu3  ;;  %6247 = vmatmul.msk.f32.gmra.mxu0 %vm279_vm1, %v8431_v2 }
 0x1eb   : > { %v948_v62 = vadd.f32 %v906_v26, %v779_v12  ;;  %v604_v29 = vadd.f32 %v603_v21, %v7988_v63 }
 0x1ed   : > { %v8435_v18 = vadd.f32 %v1075_v61, %v948_v62  ;;  %6107 = vmatmul.msk.f32.gmra.mxu1 %vm279_vm1, %v8352_v11  ;;  %6154 = vmatmul.msk.f32.gmra.mxu2 %vm279_vm1, %v8384_v39 }
 0x1ef   : > { %6201 = vmatmul.msk.f32.gmra.mxu3 %vm279_vm1, %v8415_v46  ;;  %v1078_v36 = vpop.f32.mrf.mxu0 }
 0x1f0   : > { %v740_v27 = vpop.f32.mrf.mxu2 }
 0x1f1   : > { %v780_v1 = vadd.f32 %v740_v27, %v604_v29 }
 0x1f2   : > { %v606_v28 = vpop.f32.mrf.mxu1  ;;  %v909_v32 = vpop.f32.mrf.mxu3  ;;  %6248 = vmatmul.msk.f32.gmra.mxu0 %vm279_vm1, %v8446_v49 }
 0x1f3   : > { %v949_v63 = vadd.f32 %v909_v32, %v780_v1  ;;  %v607_v60 = vadd.f32 %v606_v28, %v8005_v23  ;;  %v6367_v28 = vld [vmem:[%s7560_s12 + $0x338] sm:$0xff] }
 0x1f4   : > { %2430 = vmatpush.msrb.mxu3 %v6367_v28  ;;  %v6273_v32 = vld [vmem:[%s7560_s12 + $0x958] sm:$0xff]  ;;  %v6319_v28 = vld [vmem:[%s7560_s12 + $0x100] sm:$0xff] }
 0x1f5   : > { %v8452_v58 = vadd.f32 %v1078_v36, %v949_v63  ;;  %6108 = vmatmul.msk.f32.gmra.mxu1 %vm279_vm1, %v8367_v9  ;;  %6155 = vmatmul.msk.f32.gmra.mxu2 %vm279_vm1, %v8399_v0 }
 0x1f6   : > { %1962 = vmatpush.msrb.mxu1 %v6273_v32  ;;  %2262 = vmatpush.msrb.mxu2 %v6319_v28 }
 0x1f7   : > { %6202 = vmatmul.msk.f32.gmra.mxu3 %vm279_vm1, %v8431_v2  ;;  %v1081_v48 = vpop.f32.mrf.mxu0 }
 0x1f8   : > { %v743_v52 = vpop.f32.mrf.mxu2 }
 0x1f9   : > { %v781_v61 = vadd.f32 %v743_v52, %v607_v60 }
 0x1fa   : > { %v609_v37 = vpop.f32.mrf.mxu1  ;;  %v912_v12 = vpop.f32.mrf.mxu3  ;;  %6249 = vmatmul.msk.f32.gmra.mxu0 %vm279_vm1, %v8462_v20 }
 0x1fb   : > { %v950_v21 = vadd.f32 %v912_v12, %v781_v61  ;;  %v610_v26 = vadd.f32 %v609_v37, %v8022_v5 }
 0x1fd   : > { %v8467_v23 = vadd.f32 %v1081_v48, %v950_v21  ;;  %6109 = vmatmul.msk.f32.gmra.mxu1 %vm279_vm1, %v8384_v39  ;;  %6156 = vmatmul.msk.f32.gmra.mxu2 %vm279_vm1, %v8415_v46  ;;  %v8494_v48 = vld [vmem:[%s7588_s28 + $0xf9] sm:$0xff] }
 0x1fe   : > { %v6414_v21 = vld [vmem:[%s7560_s12 + $0x568] sm:$0xff] }
 0x1ff   : > { %6203 = vmatmul.msk.f32.gmra.mxu3 %vm279_vm1, %v8446_v49  ;;  %v1084_v62 = vpop.f32.mrf.mxu0  ;;  %2599 = vmatpush.msrb.mxu0 %v6414_v21 }
 0x200   : > { %v746_v29 = vpop.f32.mrf.mxu2 }
 0x201   : > { %v782_v36 = vadd.f32 %v746_v29, %v610_v26  ;;  %v8509_v29 = vld [vmem:[%s7588_s28 + $0x109] sm:$0xff] }
 0x202   : > { %v612_v27 = vpop.f32.mrf.mxu1  ;;  %v915_v1 = vpop.f32.mrf.mxu3  ;;  %6250 = vmatmul.msk.f32.gmra.mxu0 %vm279_vm1, %v8477_v51 }
 0x203   : > { %v951_v14 = vadd.f32 %v915_v1, %v782_v36  ;;  %v613_v63 = vadd.f32 %v612_v27, %v8038_v10 }
 0x205   : > { %v8483_v5 = vadd.f32 %v1084_v62, %v951_v14  ;;  %6110 = vmatmul.msk.f32.gmra.mxu1 %vm279_vm1, %v8399_v0  ;;  %6157 = vmatmul.msk.f32.gmra.mxu2 %vm279_vm1, %v8431_v2 }
 0x207   : > { %6204 = vmatmul.msk.f32.gmra.mxu3 %vm279_vm1, %v8462_v20  ;;  %v1087_v60 = vpop.f32.mrf.mxu0 }
 0x208   : > { %v749_v41 = vpop.f32.mrf.mxu2 }
 0x209   : > { %v783_v52 = vadd.f32 %v749_v41, %v613_v63  ;;  %v6272_v63 = vld [vmem:[%s7560_s12 + $0x950] sm:$0xff] }
 0x20a   : > { %v918_v61 = vpop.f32.mrf.mxu3  ;;  %v1293_v37 = vpop.f32.mrf.mxu1  ;;  %6251 = vmatmul.msk.f32.gmra.mxu0 %vm279_vm1, %v8494_v48  ;;  %1963 = vmatpush.msrb.mxu1 %v6272_v63 }
 0x20b   : > { %v952_v12 = vadd.f32 %v918_v61, %v783_v52  ;;  %v1389_v10 = vadd.f32 %v1293_v37, %v8053_v59  ;;  %v6366_v59 = vld [vmem:[%s7560_s12 + $0x330] sm:$0xff] }
 0x20c   : > { %2431 = vmatpush.msrb.mxu3 %v6366_v59  ;;  %v8526_v52 = vld [vmem:[%s7588_s28 + $0x111] sm:$0xff] }
 0x20d   : > { %v8499_v26 = vadd.f32 %v1087_v60, %v952_v12  ;;  %6111 = vmatmul.msk.f32.gmra.mxu1 %vm279_vm1, %v8415_v46  ;;  %6158 = vmatmul.msk.f32.gmra.mxu2 %vm279_vm1, %v8446_v49 }
 0x20f   : > { %6205 = vmatmul.msk.f32.gmra.mxu3 %vm279_vm1, %v8477_v51  ;;  %v1800_v62 = vpop.f32.mrf.mxu0 }
 0x210   : > { %v1462_v36 = vpop.f32.mrf.mxu2 }
 0x211   : > { %v1558_v47 = vadd.f32 %v1462_v36, %v1389_v10 }
 0x212   : > { %v1296_v27 = vpop.f32.mrf.mxu1  ;;  %v1631_v1 = vpop.f32.mrf.mxu3  ;;  %6252 = vmatmul.msk.f32.gmra.mxu0 %vm279_vm1, %v8509_v29 }
 0x213   : > { %v1727_v14 = vadd.f32 %v1631_v1, %v1558_v47  ;;  %v1390_v60 = vadd.f32 %v1296_v27, %v8066_v30  ;;  %v6413_v30 = vld [vmem:[%s7560_s12 + $0x560] sm:$0xff] }
 0x214   : > { %2600 = vmatpush.msrb.mxu0 %v6413_v30  ;;  %v8541_v27 = vld [vmem:[%s7588_s28 + $0x121] sm:$0xff] }
 0x215   : > { %v8514_v32 = vadd.f32 %v1800_v62, %v1727_v14  ;;  %6112 = vmatmul.msk.f32.gmra.mxu1 %vm279_vm1, %v8431_v2  ;;  %6159 = vmatmul.msk.f32.gmra.mxu2 %vm279_vm1, %v8462_v20  ;;  %v6271_v30 = vld [vmem:[%s7560_s12 + $0x948] sm:$0xff] }
 0x216   : > { %1964 = vmatpush.msrb.mxu1 %v6271_v30 }
 0x217   : > { %6206 = vmatmul.msk.f32.gmra.mxu3 %vm279_vm1, %v8494_v48  ;;  %v1803_v41 = vpop.f32.mrf.mxu0 }
 0x218   : > { %v1465_v61 = vpop.f32.mrf.mxu2 }
 0x219   : > { %v1559_v37 = vadd.f32 %v1465_v61, %v1390_v60 }
 0x21a   : > { %v1299_v12 = vpop.f32.mrf.mxu1  ;;  %v1634_v21 = vpop.f32.mrf.mxu3  ;;  %6253 = vmatmul.msk.f32.gmra.mxu0 %vm279_vm1, %v8526_v52 }
 0x21b   : > { %v1728_v10 = vadd.f32 %v1634_v21, %v1559_v37  ;;  %v1391_v36 = vadd.f32 %v1299_v12, %v8078_v16  ;;  %v6318_v16 = vld [vmem:[%s7560_s12 + $0xf8] sm:$0xff] }
 0x21c   : > { %2263 = vmatpush.msrb.mxu2 %v6318_v16  ;;  %v8557_v12 = vld [vmem:[%s7588_s28 + $0x129] sm:$0xff] }
 0x21d   : > { %v8530_v62 = vadd.f32 %v1803_v41, %v1728_v10  ;;  %6113 = vmatmul.msk.f32.gmra.mxu1 %vm279_vm1, %v8446_v49  ;;  %6160 = vmatmul.msk.f32.gmra.mxu2 %vm279_vm1, %v8477_v51  ;;  %v6365_v41 = vld [vmem:[%s7560_s12 + $0x328] sm:$0xff] }
 0x21e   : > { %2432 = vmatpush.msrb.mxu3 %v6365_v41 }
 0x21f   : > { %6207 = vmatmul.msk.f32.gmra.mxu3 %vm279_vm1, %v8509_v29  ;;  %v1806_v47 = vpop.f32.mrf.mxu0 }
 0x220   : > { %v1468_v1 = vpop.f32.mrf.mxu2 }
 0x221   : > { %v1560_v14 = vadd.f32 %v1468_v1, %v1391_v36 }
 0x222   : > { %v1302_v28 = vpop.f32.mrf.mxu1  ;;  %v1637_v59 = vpop.f32.mrf.mxu3  ;;  %6254 = vmatmul.msk.f32.gmra.mxu0 %vm279_vm1, %v8541_v27 }
 0x223   : > { %v1729_v63 = vadd.f32 %v1637_v59, %v1560_v14  ;;  %v1392_v61 = vadd.f32 %v1302_v28, %v8092_v24  ;;  %v6412_v24 = vld [vmem:[%s7560_s12 + $0x558] sm:$0xff] }
 0x224   : > { %2601 = vmatpush.msrb.mxu0 %v6412_v24 }
 0x225   : > { %v8545_v60 = vadd.f32 %v1806_v47, %v1729_v63  ;;  %6114 = vmatmul.msk.f32.gmra.mxu1 %vm279_vm1, %v8462_v20  ;;  %6161 = vmatmul.msk.f32.gmra.mxu2 %vm279_vm1, %v8494_v48  ;;  %v8573_v63 = vld [vmem:[%s7588_s28 + $0x139] sm:$0xff] }
 0x227   : > { %6208 = vmatmul.msk.f32.gmra.mxu3 %vm279_vm1, %v8526_v52  ;;  %v1809_v37 = vpop.f32.mrf.mxu0 }
 0x228   : > { %v1471_v21 = vpop.f32.mrf.mxu2 }
 0x229   : > { %v1561_v10 = vadd.f32 %v1471_v21, %v1392_v61 }
 0x22a   : > { %v1305_v36 = vpop.f32.mrf.mxu1  ;;  %v1640_v47 = vpop.f32.mrf.mxu3  ;;  %6255 = vmatmul.msk.f32.gmra.mxu0 %vm279_vm1, %v8557_v12 }
 0x22b   : > { %v1730_v1 = vadd.f32 %v1640_v47, %v1561_v10  ;;  %v1393_v28 = vadd.f32 %v1305_v36, %v8104_v15  ;;  %v8587_v36 = vld [vmem:[%s7588_s28 + $0x141] sm:$0xff] }
 0x22c   : > { %v6317_v47 = vld [vmem:[%s7560_s12 + $0xf0] sm:$0xff] }
 0x22d   : > { %v8562_v14 = vadd.f32 %v1809_v37, %v1730_v1  ;;  %6115 = vmatmul.msk.f32.gmra.mxu1 %vm279_vm1, %v8477_v51  ;;  %6162 = vmatmul.msk.f32.gmra.mxu2 %vm279_vm1, %v8509_v29 }
 0x22e   : > { %2264 = vmatpush.msrb.mxu2 %v6317_v47 }
 0x22f   : > { %6209 = vmatmul.msk.f32.gmra.mxu3 %vm279_vm1, %v8541_v27  ;;  %v1812_v59 = vpop.f32.mrf.mxu0 }
 0x230   : > { %v1474_v16 = vpop.f32.mrf.mxu2 }
 0x231   : > { %v1562_v41 = vadd.f32 %v1474_v16, %v1393_v28  ;;  %v6364_v28 = vld [vmem:[%s7560_s12 + $0x320] sm:$0xff] }
 0x232   : > { %v1308_v61 = vpop.f32.mrf.mxu1  ;;  %v1643_v37 = vpop.f32.mrf.mxu3  ;;  %6256 = vmatmul.msk.f32.gmra.mxu0 %vm279_vm1, %v8573_v63  ;;  %2433 = vmatpush.msrb.mxu3 %v6364_v28 }
 0x233   : > { %v1731_v21 = vadd.f32 %v1643_v37, %v1562_v41  ;;  %v1394_v15 = vadd.f32 %v1308_v61, %v8118_v44  ;;  %v6270_v41 = vld [vmem:[%s7560_s12 + $0x940] sm:$0xff] }
 0x234   : > { %1965 = vmatpush.msrb.mxu1 %v6270_v41  ;;  %v8619_v41 = vld [vmem:[%s7588_s28 + $0x159] sm:$0xff] }
 0x235   : > { %v8577_v10 = vadd.f32 %v1812_v59, %v1731_v21  ;;  %6116 = vmatmul.msk.f32.gmra.mxu1 %vm279_vm1, %v8494_v48  ;;  %6163 = vmatmul.msk.f32.gmra.mxu2 %vm279_vm1, %v8526_v52 }
 0x237   : > { %6210 = vmatmul.msk.f32.gmra.mxu3 %vm279_vm1, %v8557_v12  ;;  %v1815_v30 = vpop.f32.mrf.mxu0 }
 0x238   : > { %v1477_v1 = vpop.f32.mrf.mxu2 }
 0x239   : > { %v1563_v24 = vadd.f32 %v1477_v1, %v1394_v15  ;;  %v8604_v15 = vld [vmem:[%s7588_s28 + $0x151] sm:$0xff] }
 0x23a   : > { %v1311_v59 = vpop.f32.mrf.mxu1  ;;  %v1646_v16 = vpop.f32.mrf.mxu3  ;;  %6257 = vmatmul.msk.f32.gmra.mxu0 %vm279_vm1, %v8587_v36 }
 0x23b   : > { %v1732_v44 = vadd.f32 %v1646_v16, %v1563_v24  ;;  %v1395_v37 = vadd.f32 %v1311_v59, %v8130_v13 }
 0x23d   : > { %v8594_v61 = vadd.f32 %v1815_v30, %v1732_v44  ;;  %6117 = vmatmul.msk.f32.gmra.mxu1 %vm279_vm1, %v8509_v29  ;;  %6164 = vmatmul.msk.f32.gmra.mxu2 %vm279_vm1, %v8541_v27  ;;  %v6411_v30 = vld [vmem:[%s7560_s12 + $0x550] sm:$0xff] }
 0x23e   : > { %2602 = vmatpush.msrb.mxu0 %v6411_v30 }
 0x23f   : > { %6211 = vmatmul.msk.f32.gmra.mxu3 %vm279_vm1, %v8573_v63  ;;  %v1818_v21 = vpop.f32.mrf.mxu0 }
 0x240   : > { %v1480_v47 = vpop.f32.mrf.mxu2 }
 0x241   : > { %v1564_v1 = vadd.f32 %v1480_v47, %v1395_v37 }
 0x242   : > { %v1314_v24 = vpop.f32.mrf.mxu1  ;;  %v1649_v28 = vpop.f32.mrf.mxu3  ;;  %6258 = vmatmul.msk.f32.gmra.mxu0 %vm279_vm1, %v8604_v15 }
 0x243   : > { %v1733_v16 = vadd.f32 %v1649_v28, %v1564_v1  ;;  %v1396_v59 = vadd.f32 %v1314_v24, %v8143_v7  ;;  %v6316_v1 = vld [vmem:[%s7560_s12 + $0xe8] sm:$0xff]  ;;  %v6269_v24 = vld [vmem:[%s7560_s12 + $0x938] sm:$0xff] }
 0x244   : > { %2265 = vmatpush.msrb.mxu2 %v6316_v1  ;;  %1966 = vmatpush.msrb.mxu1 %v6269_v24 }
 0x245   : > { %v8609_v13 = vadd.f32 %v1818_v21, %v1733_v16  ;;  %6118 = vmatmul.msk.f32.gmra.mxu1 %vm279_vm1, %v8526_v52  ;;  %6165 = vmatmul.msk.f32.gmra.mxu2 %vm279_vm1, %v8557_v12  ;;  %v6363_v16 = vld [vmem:[%s7560_s12 + $0x318] sm:$0xff] }
 0x246   : > { %2434 = vmatpush.msrb.mxu3 %v6363_v16 }
 0x247   : > { %6212 = vmatmul.msk.f32.gmra.mxu3 %vm279_vm1, %v8587_v36  ;;  %v1821_v44 = vpop.f32.mrf.mxu0 }
 0x248   : > { %v1483_v37 = vpop.f32.mrf.mxu2 }
 0x249   : > { %v1565_v47 = vadd.f32 %v1483_v37, %v1396_v59 }
 0x24a   : > { %v1317_v21 = vpop.f32.mrf.mxu1  ;;  %v1652_v30 = vpop.f32.mrf.mxu3  ;;  %6259 = vmatmul.msk.f32.gmra.mxu0 %vm279_vm1, %v8619_v41 }
 0x24b   : > { %v1734_v28 = vadd.f32 %v1652_v30, %v1565_v47  ;;  %v1397_v59 = vadd.f32 %v1317_v21, %v8156_v31  ;;  %v8636_v47 = vld [vmem:[%s7588_s28 + $0x169] sm:$0xff] }
 0x24d   : > { %v8625_v7 = vadd.f32 %v1821_v44, %v1734_v28  ;;  %6119 = vmatmul.msk.f32.gmra.mxu1 %vm279_vm1, %v8541_v27  ;;  %6166 = vmatmul.msk.f32.gmra.mxu2 %vm279_vm1, %v8573_v63 }
 0x24f   : > { %11024 = vst [vmem:[#allocation12_spill] sm:$0xff] %v8625_v7  ;;  %6213 = vmatmul.msk.f32.gmra.mxu3 %vm279_vm1, %v8604_v15  ;;  %v1824_v37 = vpop.f32.mrf.mxu0  ;;  %v6410_v7 = vld [vmem:[%s7560_s12 + $0x548] sm:$0xff] }
 0x250   : > { %v1486_v1 = vpop.f32.mrf.mxu2  ;;  %2603 = vmatpush.msrb.mxu0 %v6410_v7 }
 0x251   : > { %v1566_v44 = vadd.f32 %v1486_v1, %v1397_v59  ;;  %v8651_v59 = vld [vmem:[%s7588_s28 + $0x171] sm:$0xff] }
 0x252   : > { %v1320_v30 = vpop.f32.mrf.mxu1  ;;  %v1655_v28 = vpop.f32.mrf.mxu3  ;;  %6260 = vmatmul.msk.f32.gmra.mxu0 %vm279_vm1, %v8636_v47 }
 0x253   : > { %v1735_v16 = vadd.f32 %v1655_v28, %v1566_v44  ;;  %v1398_v31 = vadd.f32 %v1320_v30, %v8168_v45  ;;  %v6362_v45 = vld [vmem:[%s7560_s12 + $0x310] sm:$0xff] }
 0x254   : > { %2435 = vmatpush.msrb.mxu3 %v6362_v45 }
 0x255   : > { %v8641_v24 = vadd.f32 %v1824_v37, %v1735_v16  ;;  %6120 = vmatmul.msk.f32.gmra.mxu1 %vm279_vm1, %v8557_v12  ;;  %6167 = vmatmul.msk.f32.gmra.mxu2 %vm279_vm1, %v8587_v36  ;;  %v6315_v16 = vld [vmem:[%s7560_s12 + $0xe0] sm:$0xff] }
 0x256   : > { %2266 = vmatpush.msrb.mxu2 %v6315_v16 }
 0x257   : > { %11025 = vst [vmem:[#allocation13_spill] sm:$0xff] %v8641_v24  ;;  %6214 = vmatmul.msk.f32.gmra.mxu3 %vm279_vm1, %v8619_v41  ;;  %v1827_v21 = vpop.f32.mrf.mxu0 }
 0x258   : > { %v1489_v1 = vpop.f32.mrf.mxu2 }
 0x259   : > { %v1567_v7 = vadd.f32 %v1489_v1, %v1398_v31  ;;  %v8667_v1 = vld [vmem:[%s7588_s28 + $0x181] sm:$0xff] }
 0x25a   : > { %v1323_v37 = vpop.f32.mrf.mxu1  ;;  %v1658_v44 = vpop.f32.mrf.mxu3  ;;  %6261 = vmatmul.msk.f32.gmra.mxu0 %vm279_vm1, %v8651_v59 }
 0x25b   : > { %v1736_v28 = vadd.f32 %v1658_v44, %v1567_v7  ;;  %v1399_v30 = vadd.f32 %v1323_v37, %v8181_v35  ;;  %v6268_v7 = vld [vmem:[%s7560_s12 + $0x930] sm:$0xff]  ;;  %v6409_v35 = vld [vmem:[%s7560_s12 + $0x540] sm:$0xff] }
 0x25c   : > { %1967 = vmatpush.msrb.mxu1 %v6268_v7  ;;  %2604 = vmatpush.msrb.mxu0 %v6409_v35  ;;  %v8683_v7 = vld [vmem:[%s7588_s28 + $0x189] sm:$0xff] }
 0x25d   : > { %v8656_v24 = vadd.f32 %v1827_v21, %v1736_v28  ;;  %6121 = vmatmul.msk.f32.gmra.mxu1 %vm279_vm1, %v8573_v63  ;;  %6168 = vmatmul.msk.f32.gmra.mxu2 %vm279_vm1, %v8604_v15 }
 0x25f   : > { %11026 = vst [vmem:[#allocation14_spill] sm:$0xff] %v8656_v24  ;;  %6215 = vmatmul.msk.f32.gmra.mxu3 %vm279_vm1, %v8636_v47  ;;  %v1830_v31 = vpop.f32.mrf.mxu0 }
 0x260   : > { %v1492_v21 = vpop.f32.mrf.mxu2 }
 0x261   : > { %v1568_v44 = vadd.f32 %v1492_v21, %v1399_v30 }
 0x262   : > { %v1326_v28 = vpop.f32.mrf.mxu1  ;;  %v1661_v16 = vpop.f32.mrf.mxu3  ;;  %6262 = vmatmul.msk.f32.gmra.mxu0 %vm279_vm1, %v8667_v1 }
 0x263   : > { %v1737_v45 = vadd.f32 %v1661_v16, %v1568_v44  ;;  %v1400_v37 = vadd.f32 %v1326_v28, %v8193_v34  ;;  %v6516_v34 = vld [vmem:[%s7560_s12 + $0xa08] sm:$0x1] }
 0x264   : > { %6517 = vmatpush.msk.msra.mxu2 %vm376_vm0, %v6516_v34 }
 0x265   : > { %v8672_v24 = vadd.f32 %v1830_v31, %v1737_v45  ;;  %6122 = vmatmul.msk.f32.gmra.mxu1 %vm279_vm1, %v8587_v36  ;;  %6169 = vmatmul.msk.f32.gmra.mxu2 %vm279_vm1, %v8619_v41 }
 0x267   : > { %11027 = vst [vmem:[#allocation15_spill] sm:$0xff] %v8672_v24  ;;  %6216 = vmatmul.msk.f32.gmra.mxu3 %vm279_vm1, %v8651_v59  ;;  %v1833_v30 = vpop.f32.mrf.mxu0 }
 0x268   : > { %v1495_v31 = vpop.f32.mrf.mxu2 }
 0x269   : > { %v1569_v21 = vadd.f32 %v1495_v31, %v1400_v37  ;;  %v8699_v31 = vld [vmem:[%s7588_s28 + $0x199] sm:$0xff] }
 0x26a   : > { %v1329_v44 = vpop.f32.mrf.mxu1  ;;  %v1664_v16 = vpop.f32.mrf.mxu3  ;;  %6263 = vmatmul.msk.f32.gmra.mxu0 %vm279_vm1, %v8683_v7 }
 0x26b   : > { %v1738_v45 = vadd.f32 %v1664_v16, %v1569_v21  ;;  %v1401_v28 = vadd.f32 %v1329_v44, %v8209_v50  ;;  %v6563_v21 = vld [vmem:[%s7560_s12 + $0x1b8] sm:$0x1] }
 0x26c   : > { %6564 = vmatpush.msk.msra.mxu3 %vm376_vm0, %v6563_v21  ;;  %v8717_v21 = vld [vmem:[%s7588_s28 + $0x1a1] sm:$0xff] }
 0x26d   : > { %v8687_v35 = vadd.f32 %v1833_v30, %v1738_v45  ;;  %6123 = vmatmul.msk.f32.gmra.mxu1 %vm279_vm1, %v8604_v15  ;;  %6170 = vmatmul.msk.f32.gmra.mxu2 %vm279_vm1, %v8636_v47  ;;  %v6469_v45 = vld [vmem:[%s7560_s12 + $0x7d8] sm:$0x1] }
 0x26e   : > { %6470 = vmatpush.msk.msra.mxu1 %vm376_vm0, %v6469_v45 }
 0x26f   : > { %11028 = vst [vmem:[#allocation16_spill] sm:$0xff] %v8687_v35  ;;  %6217 = vmatmul.msk.f32.gmra.mxu3 %vm279_vm1, %v8667_v1  ;;  %v1836_v37 = vpop.f32.mrf.mxu0 }
 0x270   : > { %v1498_v30 = vpop.f32.mrf.mxu2 }
 0x271   : > { %v1570_v16 = vadd.f32 %v1498_v30, %v1401_v28  ;;  %v6610_v30 = vld [vmem:[%s7560_s12 + $0x3e8] sm:$0x1] }
 0x272   : > { %v1332_v35 = vpop.f32.mrf.mxu1  ;;  %v1667_v24 = vpop.f32.mrf.mxu3  ;;  %6264 = vmatmul.msk.f32.gmra.mxu0 %vm279_vm1, %v8699_v31 }
 0x273   : > { %v1739_v50 = vadd.f32 %v1667_v24, %v1570_v16  ;;  %v1402_v34 = vadd.f32 %v1332_v35, %v8221_v55  ;;  %6611 = vmatpush.msk.msra.mxu0 %vm376_vm0, %v6610_v30  ;;  %v8733_v30 = vld [vmem:[%s7588_s28 + $0x1b1] sm:$0xff] }
 0x274   : > { %11031 = vst [vmem:[#allocation19_spill] sm:$0xff] %v8733_v30 }
 0x275   : > { %v8707_v44 = vadd.f32 %v1836_v37, %v1739_v50  ;;  %6124 = vmatmul.msk.f32.gmra.mxu1 %vm279_vm1, %v8619_v41  ;;  %6171 = vmatmul.msk.f32.gmra.mxu2 %vm279_vm1, %v8651_v59 }
 0x277   : > { %11029 = vst [vmem:[#allocation17_spill] sm:$0xff] %v8707_v44  ;;  %6218 = vmatmul.msk.f32.gmra.mxu3 %vm279_vm1, %v8683_v7  ;;  %v1839_v28 = vpop.f32.mrf.mxu0 }
 0x278   : > { %v1501_v45 = vpop.f32.mrf.mxu2 }
 0x279   : > { %v1571_v24 = vadd.f32 %v1501_v45, %v1402_v34 }
 0x27a   : > { %v1335_v37 = vpop.f32.mrf.mxu1  ;;  %v1670_v16 = vpop.f32.mrf.mxu3  ;;  %6265 = vmatmul.msk.f32.gmra.mxu0 %vm279_vm1, %v8717_v21 }
 0x27b   : > { %v1740_v50 = vadd.f32 %v1670_v16, %v1571_v24  ;;  %v1403_v35 = vadd.f32 %v1335_v37, %v8232_v3  ;;  %v6515_v16 = vld [vmem:[%s7560_s12 + $0xa00] sm:$0xff]  ;;  %v6562_v3 = vld [vmem:[%s7560_s12 + $0x1b0] sm:$0xff] }
 0x27c   : > { %2930 = vmatpush.msra.mxu2 %v6515_v16  ;;  %3229 = vmatpush.msra.mxu3 %v6562_v3  ;;  %v8750_v16 = vld [vmem:[%s7588_s28 + $0x1b9] sm:$0xff] }
 0x27d   : > { %v8723_v55 = vadd.f32 %v1839_v28, %v1740_v50  ;;  %6125 = vmatmul.msk.f32.gmra.mxu1 %vm279_vm1, %v8636_v47  ;;  %6172 = vmatmul.msk.f32.gmra.mxu2 %vm279_vm1, %v8667_v1  ;;  %11033 = vst [vmem:[#allocation21_spill] sm:$0xff] %v8750_v16 }
 0x27f   : > { %11030 = vst [vmem:[#allocation18_spill] sm:$0xff] %v8723_v55  ;;  %6219 = vmatmul.msk.f32.gmra.mxu3 %vm279_vm1, %v8699_v31  ;;  %v1842_v34 = vpop.f32.mrf.mxu0 }
 0x280   : > { %v1504_v45 = vpop.f32.mrf.mxu2 }
 0x281   : > { %v1572_v24 = vadd.f32 %v1504_v45, %v1403_v35  ;;  %v6468_v35 = vld [vmem:[%s7560_s12 + $0x7d0] sm:$0xff] }
 0x282   : > { %v1338_v28 = vpop.f32.mrf.mxu1  ;;  %v1673_v50 = vpop.f32.mrf.mxu3  ;;  %6266 = vmatmul.msk.f32.gmra.mxu0 %vm279_vm1, %v8733_v30  ;;  %2761 = vmatpush.msra.mxu1 %v6468_v35  ;;  %v6609_v35 = vld [vmem:[%s7560_s12 + $0x3e0] sm:$0xff] }
 0x283   : > { %v1741_v55 = vadd.f32 %v1673_v50, %v1572_v24  ;;  %v1404_v45 = vadd.f32 %v1338_v28, %v8248_v54  ;;  %v2099_v30 = vld [vmem:[%s7588_s28 + $0x1a] sm:$0xff]  ;;  %3398 = vmatpush.msra.mxu0 %v6609_v35 }
 0x285   : > { %v8739_v37 = vadd.f32 %v1842_v34, %v1741_v55  ;;  %6126 = vmatmul.msk.f32.gmra.mxu1 %vm279_vm1, %v8651_v59  ;;  %6173 = vmatmul.msk.f32.gmra.mxu2 %vm279_vm1, %v8683_v7 }
 0x287   : > { %11032 = vst [vmem:[#allocation20_spill] sm:$0xff] %v8739_v37  ;;  %6220 = vmatmul.msk.f32.gmra.mxu3 %vm279_vm1, %v8717_v21  ;;  %v1845_v24 = vpop.f32.mrf.mxu0  ;;  %v2097_v37 = vld [vmem:[%s7588_s28 + $0x2] sm:$0xff] }
 0x288   : > { %v1507_v55 = vpop.f32.mrf.mxu2 }
 0x289   : > { %v1573_v34 = vadd.f32 %v1507_v55, %v1404_v45  ;;  %v8765_v55 = vld [vmem:[%s7588_s28 + $0x32] sm:$0xff] }
 0x28a   : > { %v1341_v50 = vpop.f32.mrf.mxu1  ;;  %v1676_v3 = vpop.f32.mrf.mxu3  ;;  %6267 = vmatmul.msk.f32.gmra.mxu0 %vm279_vm1, %v8750_v16 }
 0x28b   : > { %v1742_v44 = vadd.f32 %v1676_v3, %v1573_v34  ;;  %v1405_v28 = vadd.f32 %v1341_v50, %v8266_v22  ;;  %v6561_v50 = vld [vmem:[%s7560_s12 + $0x1a8] sm:$0xff] }
 0x28c   : > { %3230 = vmatpush.msra.mxu3 %v6561_v50 }
 0x28d   : > { %v8757_v54 = vadd.f32 %v1845_v24, %v1742_v44  ;;  %6283 = vmatmul.msk.f32.vlgmr.msrb.gmra.mxu1 %vm279_vm1, %v8290_v42  ;;  %6330 = vmatmul.msk.f32.vlgmr.msrb.gmra.mxu2 %vm279_vm1, %v2097_v37  ;;  %v2098_v44 = vld [vmem:[%s7588_s28 + $0xa] sm:$0xff]  ;;  %v2100_v24 = vld [vmem:[%s7588_s28 + $0x22] sm:$0xff] }
 0x28e   : > { %v6514_v37 = vld [vmem:[%s7560_s12 + $0x9f8] sm:$0xff] }
 0x28f   : > { %6377 = vmatmul.msk.f32.vlgmr.msrb.gmra.mxu3 %vm279_vm1, %v2099_v30  ;;  %v1848_v45 = vpop.f32.mrf.mxu0  ;;  %2931 = vmatpush.msra.mxu2 %v6514_v37 }
 0x290   : > { %v1510_v34 = vpop.f32.mrf.mxu2 }
 0x291   : > { %v1574_v3 = vadd.f32 %v1510_v34, %v1405_v28  ;;  %v6467_v28 = vld [vmem:[%s7560_s12 + $0x7c8] sm:$0xff] }
 0x292   : > { %v1344_v35 = vpop.f32.mrf.mxu1  ;;  %v1679_v16 = vpop.f32.mrf.mxu3  ;;  %6424 = vmatmul.msk.f32.vlgmr.msrb.gmra.mxu0 %vm279_vm1, %v8765_v55  ;;  %2762 = vmatpush.msra.mxu1 %v6467_v28  ;;  %v8793_v28 = vld [vmem:[%s7588_s28 + $0x4a] sm:$0xff] }
 0x293   : > { %v1743_v42 = vadd.f32 %v1679_v16, %v1574_v3  ;;  %v1406_v34 = vadd.f32 %v1344_v35, %v8280_v57  ;;  %v2102_v3 = vld [vmem:[%s7588_s28 + $0x3a] sm:$0xff] }
 0x294   : > { %v6608_v57 = vld [vmem:[%s7560_s12 + $0x3d8] sm:$0xff] }
 0x295   : > { %v8772_v22 = vadd.f32 %v1848_v45, %v1743_v42  ;;  %6284 = vmatmul.msk.f32.gmra.mxu1 %vm279_vm1, %v8305_v17  ;;  %6331 = vmatmul.msk.f32.gmra.mxu2 %vm279_vm1, %v2098_v44 }
 0x296   : > { %3399 = vmatpush.msra.mxu0 %v6608_v57  ;;  %v8807_v57 = vld [vmem:[%s7588_s28 + $0x52] sm:$0xff] }
 0x297   : > { %11034 = vst [vmem:[#allocation22_spill] sm:$0xff] %v8772_v22  ;;  %6378 = vmatmul.msk.f32.gmra.mxu3 %vm279_vm1, %v2100_v24  ;;  %v1851_v16 = vpop.f32.mrf.mxu0 }
 0x298   : > { %v1513_v37 = vpop.f32.mrf.mxu2 }
 0x299   : > { %v1575_v45 = vadd.f32 %v1513_v37, %v1406_v34 }
 0x29a   : > { %v1347_v42 = vpop.f32.mrf.mxu1  ;;  %v1682_v22 = vpop.f32.mrf.mxu3  ;;  %6425 = vmatmul.msk.f32.gmra.mxu0 %vm279_vm1, %v2102_v3 }
 0x29b   : > { %v1744_v17 = vadd.f32 %v1682_v22, %v1575_v45  ;;  %v1407_v35 = vadd.f32 %v1347_v42, %v8294_v33  ;;  %v6513_v33 = vld [vmem:[%s7560_s12 + $0x9f0] sm:$0xff]  ;;  %v6560_v45 = vld [vmem:[%s7560_s12 + $0x1a0] sm:$0xff] }
 0x29c   : > { %2932 = vmatpush.msra.mxu2 %v6513_v33  ;;  %3231 = vmatpush.msra.mxu3 %v6560_v45  ;;  %v8823_v33 = vld [vmem:[%s7588_s28 + $0x62] sm:$0xff] }
 0x29d   : > { %v8783_v44 = vadd.f32 %v1851_v16, %v1744_v17  ;;  %6285 = vmatmul.msk.f32.gmra.mxu1 %vm279_vm1, %v8321_v40  ;;  %6332 = vmatmul.msk.f32.gmra.mxu2 %vm279_vm1, %v2099_v30 }
 0x29f   : > { %6379 = vmatmul.msk.f32.gmra.mxu3 %vm279_vm1, %v8765_v55  ;;  %v1854_v50 = vpop.f32.mrf.mxu0 }
 0x2a0   : > { %v1516_v22 = vpop.f32.mrf.mxu2 }
 0x2a1   : > { %v1576_v34 = vadd.f32 %v1516_v22, %v1407_v35  ;;  %v6466_v22 = vld [vmem:[%s7560_s12 + $0x7c0] sm:$0xff] }
 0x2a2   : > { %v1350_v16 = vpop.f32.mrf.mxu1  ;;  %v1685_v37 = vpop.f32.mrf.mxu3  ;;  %6426 = vmatmul.msk.f32.gmra.mxu0 %vm279_vm1, %v8793_v28  ;;  %2763 = vmatpush.msra.mxu1 %v6466_v22  ;;  %v8836_v22 = vld [vmem:[%s7588_s28 + $0x6a] sm:$0xff] }
 0x2a3   : > { %v1745_v40 = vadd.f32 %v1685_v37, %v1576_v34  ;;  %v1408_v42 = vadd.f32 %v1350_v16, %v8310_v43  ;;  %v6607_v43 = vld [vmem:[%s7560_s12 + $0x3d0] sm:$0xff] }
 0x2a4   : > { %3400 = vmatpush.msra.mxu0 %v6607_v43  ;;  %v6559_v43 = vld [vmem:[%s7560_s12 + $0x198] sm:$0xff] }
 0x2a5   : > { %v8797_v30 = vadd.f32 %v1854_v50, %v1745_v40  ;;  %6286 = vmatmul.msk.f32.gmra.mxu1 %vm279_vm1, %v8335_v53  ;;  %6333 = vmatmul.msk.f32.gmra.mxu2 %vm279_vm1, %v2100_v24 }
 0x2a6   : > { %3232 = vmatpush.msra.mxu3 %v6559_v43  ;;  %v8868_v43 = vld [vmem:[%s7588_s28 + $0x82] sm:$0xff] }
 0x2a7   : > { %6380 = vmatmul.msk.f32.gmra.mxu3 %vm279_vm1, %v2102_v3  ;;  %v1857_v17 = vpop.f32.mrf.mxu0 }
 0x2a8   : > { %v1519_v35 = vpop.f32.mrf.mxu2 }
 0x2a9   : > { %v1577_v50 = vadd.f32 %v1519_v35, %v1408_v42 }
 0x2aa   : > { %v1353_v34 = vpop.f32.mrf.mxu1  ;;  %v1688_v53 = vpop.f32.mrf.mxu3  ;;  %6427 = vmatmul.msk.f32.gmra.mxu0 %vm279_vm1, %v8807_v57 }
 0x2ab   : > { %v1746_v24 = vadd.f32 %v1688_v53, %v1577_v50  ;;  %v1409_v16 = vadd.f32 %v1353_v34, %v8325_v25  ;;  %v6512_v34 = vld [vmem:[%s7560_s12 + $0x9e8] sm:$0xff] }
 0x2ac   : > { %2933 = vmatpush.msra.mxu2 %v6512_v34 }
 0x2ad   : > { %v8812_v37 = vadd.f32 %v1857_v17, %v1746_v24  ;;  %6287 = vmatmul.msk.f32.gmra.mxu1 %vm279_vm1, %v8352_v11  ;;  %6334 = vmatmul.msk.f32.gmra.mxu2 %vm279_vm1, %v8765_v55 }
 0x2af   : > { %6381 = vmatmul.msk.f32.gmra.mxu3 %vm279_vm1, %v8793_v28  ;;  %v1860_v40 = vpop.f32.mrf.mxu0 }
 0x2b0   : > { %v1522_v45 = vpop.f32.mrf.mxu2 }
 0x2b1   : > { %v1578_v42 = vadd.f32 %v1522_v45, %v1409_v16 }
 0x2b2   : > { %v1356_v17 = vpop.f32.mrf.mxu1  ;;  %v1691_v11 = vpop.f32.mrf.mxu3  ;;  %6428 = vmatmul.msk.f32.gmra.mxu0 %vm279_vm1, %v8823_v33 }
 0x2b3   : > { %v1747_v55 = vadd.f32 %v1691_v11, %v1578_v42  ;;  %v1410_v25 = vadd.f32 %v1356_v17, %v8342_v38  ;;  %v8853_v17 = vld [vmem:[%s7588_s28 + $0x7a] sm:$0xff] }
 0x2b5   : > { %v8827_v35 = vadd.f32 %v1860_v40, %v1747_v55  ;;  %6288 = vmatmul.msk.f32.gmra.mxu1 %vm279_vm1, %v8367_v9  ;;  %6335 = vmatmul.msk.f32.gmra.mxu2 %vm279_vm1, %v2102_v3  ;;  %v6465_v3 = vld [vmem:[%s7560_s12 + $0x7b8] sm:$0xff] }
 0x2b6   : > { %2764 = vmatpush.msra.mxu1 %v6465_v3 }
 0x2b7   : > { %6382 = vmatmul.msk.f32.gmra.mxu3 %vm279_vm1, %v8807_v57  ;;  %v1863_v50 = vpop.f32.mrf.mxu0 }
 0x2b8   : > { %v1525_v53 = vpop.f32.mrf.mxu2 }
 0x2b9   : > { %v1579_v24 = vadd.f32 %v1525_v53, %v1410_v25  ;;  %v6606_v25 = vld [vmem:[%s7560_s12 + $0x3c8] sm:$0xff] }
 0x2ba   : > { %v1359_v16 = vpop.f32.mrf.mxu1  ;;  %v1694_v9 = vpop.f32.mrf.mxu3  ;;  %6429 = vmatmul.msk.f32.gmra.mxu0 %vm279_vm1, %v8836_v22 }
 0x2bb   : > { %v1748_v38 = vadd.f32 %v1694_v9, %v1579_v24  ;;  %v1411_v45 = vadd.f32 %v1359_v16, %v8357_v4  ;;  %3401 = vmatpush.msra.mxu0 %v6606_v25 }
 0x2bd   : > { %v8843_v40 = vadd.f32 %v1863_v50, %v1748_v38  ;;  %6289 = vmatmul.msk.f32.gmra.mxu1 %vm279_vm1, %v8384_v39  ;;  %6336 = vmatmul.msk.f32.gmra.mxu2 %vm279_vm1, %v8793_v28  ;;  %v6511_v38 = vld [vmem:[%s7560_s12 + $0x9e0] sm:$0xff] }
 0x2be   : > { %2934 = vmatpush.msra.mxu2 %v6511_v38 }
 0x2bf   : > { %6383 = vmatmul.msk.f32.gmra.mxu3 %vm279_vm1, %v8823_v33  ;;  %v1866_v42 = vpop.f32.mrf.mxu0 }
 0x2c0   : > { %v1528_v11 = vpop.f32.mrf.mxu2 }
 0x2c1   : > { %v1580_v55 = vadd.f32 %v1528_v11, %v1411_v45  ;;  %v6464_v11 = vld [vmem:[%s7560_s12 + $0x7b0] sm:$0xff] }
 0x2c2   : > { %v1362_v50 = vpop.f32.mrf.mxu1  ;;  %v1697_v34 = vpop.f32.mrf.mxu3  ;;  %6430 = vmatmul.msk.f32.gmra.mxu0 %vm279_vm1, %v8853_v17  ;;  %2765 = vmatpush.msra.mxu1 %v6464_v11 }
 0x2c3   : > { %v1749_v39 = vadd.f32 %v1697_v34, %v1580_v55  ;;  %v1412_v53 = vadd.f32 %v1362_v50, %v8373_v8  ;;  %v8885_v50 = vld [vmem:[%s7588_s28 + $0x92] sm:$0xff] }
 0x2c5   : > { %v8858_v4 = vadd.f32 %v1866_v42, %v1749_v39  ;;  %6290 = vmatmul.msk.f32.gmra.mxu1 %vm279_vm1, %v8399_v0  ;;  %6337 = vmatmul.msk.f32.gmra.mxu2 %vm279_vm1, %v8807_v57  ;;  %v6558_v42 = vld [vmem:[%s7560_s12 + $0x190] sm:$0xff] }
 0x2c6   : > { %3233 = vmatpush.msra.mxu3 %v6558_v42 }
 0x2c7   : > { %6384 = vmatmul.msk.f32.gmra.mxu3 %vm279_vm1, %v8836_v22  ;;  %v1869_v24 = vpop.f32.mrf.mxu0 }
 0x2c8   : > { %v1531_v16 = vpop.f32.mrf.mxu2 }
 0x2c9   : > { %v1581_v9 = vadd.f32 %v1531_v16, %v1412_v53  ;;  %v6605_v16 = vld [vmem:[%s7560_s12 + $0x3c0] sm:$0xff] }
 0x2ca   : > { %v1365_v3 = vpop.f32.mrf.mxu1  ;;  %v1700_v45 = vpop.f32.mrf.mxu3  ;;  %6431 = vmatmul.msk.f32.gmra.mxu0 %vm279_vm1, %v8868_v43 }
 0x2cb   : > { %v1750_v0 = vadd.f32 %v1700_v45, %v1581_v9  ;;  %v1413_v55 = vadd.f32 %v1365_v3, %v8389_v6  ;;  %3402 = vmatpush.msra.mxu0 %v6605_v16  ;;  %v8900_v3 = vld [vmem:[%s7588_s28 + $0x9a] sm:$0xff] }
 0x2cd   : > { %v8874_v8 = vadd.f32 %v1869_v24, %v1750_v0  ;;  %6291 = vmatmul.msk.f32.gmra.mxu1 %vm279_vm1, %v8415_v46  ;;  %6338 = vmatmul.msk.f32.gmra.mxu2 %vm279_vm1, %v8823_v33 }
 0x2cf   : > { %6385 = vmatmul.msk.f32.gmra.mxu3 %vm279_vm1, %v8853_v17  ;;  %v1872_v25 = vpop.f32.mrf.mxu0 }
 0x2d0   : > { %v1534_v34 = vpop.f32.mrf.mxu2 }
 0x2d1   : > { %v1582_v39 = vadd.f32 %v1534_v34, %v1413_v55  ;;  %v6510_v55 = vld [vmem:[%s7560_s12 + $0x9d8] sm:$0xff] }
 0x2d2   : > { %v1368_v53 = vpop.f32.mrf.mxu1  ;;  %v1703_v24 = vpop.f32.mrf.mxu3  ;;  %6432 = vmatmul.msk.f32.gmra.mxu0 %vm279_vm1, %v8885_v50  ;;  %2935 = vmatpush.msra.mxu2 %v6510_v55 }
 0x2d3   : > { %v1751_v46 = vadd.f32 %v1703_v24, %v1582_v39  ;;  %v1414_v6 = vadd.f32 %v1368_v53, %v8404_v19  ;;  %v6557_v19 = vld [vmem:[%s7560_s12 + $0x188] sm:$0xff] }
 0x2d4   : > { %3234 = vmatpush.msra.mxu3 %v6557_v19  ;;  %v8916_v53 = vld [vmem:[%s7588_s28 + $0xaa] sm:$0xff] }
 0x2d5   : > { %v8890_v9 = vadd.f32 %v1872_v25, %v1751_v46  ;;  %6292 = vmatmul.msk.f32.gmra.mxu1 %vm279_vm1, %v8431_v2  ;;  %6339 = vmatmul.msk.f32.gmra.mxu2 %vm279_vm1, %v8836_v22  ;;  %v6463_v24 = vld [vmem:[%s7560_s12 + $0x7a8] sm:$0xff] }
 0x2d6   : > { %2766 = vmatpush.msra.mxu1 %v6463_v24 }
 0x2d7   : > { %6386 = vmatmul.msk.f32.gmra.mxu3 %vm279_vm1, %v8868_v43  ;;  %v1875_v38 = vpop.f32.mrf.mxu0 }
 0x2d8   : > { %v1537_v45 = vpop.f32.mrf.mxu2 }
 0x2d9   : > { %v1583_v0 = vadd.f32 %v1537_v45, %v1414_v6 }
 0x2da   : > { %v1371_v42 = vpop.f32.mrf.mxu1  ;;  %v1706_v11 = vpop.f32.mrf.mxu3  ;;  %6433 = vmatmul.msk.f32.gmra.mxu0 %vm279_vm1, %v8900_v3 }
 0x2db   : > { %v1752_v2 = vadd.f32 %v1706_v11, %v1583_v0  ;;  %v1415_v34 = vadd.f32 %v1371_v42, %v8420_v56  ;;  %v6604_v56 = vld [vmem:[%s7560_s12 + $0x3b8] sm:$0xff] }
 0x2dc   : > { %3403 = vmatpush.msra.mxu0 %v6604_v56  ;;  %v8932_v11 = vld [vmem:[%s7588_s28 + $0xb2] sm:$0xff] }
 0x2dd   : > { %v8905_v25 = vadd.f32 %v1875_v38, %v1752_v2  ;;  %6293 = vmatmul.msk.f32.gmra.mxu1 %vm279_vm1, %v8446_v49  ;;  %6340 = vmatmul.msk.f32.gmra.mxu2 %vm279_vm1, %v8853_v17 }
 0x2df   : > { %6387 = vmatmul.msk.f32.gmra.mxu3 %vm279_vm1, %v8885_v50  ;;  %v1878_v39 = vpop.f32.mrf.mxu0 }
 0x2e0   : > { %v1540_v46 = vpop.f32.mrf.mxu2 }
 0x2e1   : > { %v1584_v16 = vadd.f32 %v1540_v46, %v1415_v34 }
 0x2e2   : > { %v1374_v49 = vpop.f32.mrf.mxu1  ;;  %v1709_v6 = vpop.f32.mrf.mxu3  ;;  %6434 = vmatmul.msk.f32.gmra.mxu0 %vm279_vm1, %v8916_v53 }
 0x2e3   : > { %v1753_v38 = vadd.f32 %v1709_v6, %v1584_v16  ;;  %v1416_v0 = vadd.f32 %v1374_v49, %v8435_v18  ;;  %v6509_v18 = vld [vmem:[%s7560_s12 + $0x9d0] sm:$0xff]  ;;  %v6556_v49 = vld [vmem:[%s7560_s12 + $0x180] sm:$0xff] }
 0x2e4   : > { %2936 = vmatpush.msra.mxu2 %v6509_v18  ;;  %v8947_v16 = vld [vmem:[%s7588_s28 + $0xc2] sm:$0xff]  ;;  %3235 = vmatpush.msra.mxu3 %v6556_v49 }
 0x2e5   : > { %v8921_v45 = vadd.f32 %v1878_v39, %v1753_v38  ;;  %6294 = vmatmul.msk.f32.gmra.mxu1 %vm279_vm1, %v8462_v20  ;;  %6341 = vmatmul.msk.f32.gmra.mxu2 %vm279_vm1, %v8868_v43 }
 0x2e7   : > { %6388 = vmatmul.msk.f32.gmra.mxu3 %vm279_vm1, %v8900_v3  ;;  %v1881_v42 = vpop.f32.mrf.mxu0 }
 0x2e8   : > { %v1543_v2 = vpop.f32.mrf.mxu2 }
 0x2e9   : > { %v1585_v55 = vadd.f32 %v1543_v2, %v1416_v0 }
 0x2ea   : > { %v1377_v19 = vpop.f32.mrf.mxu1  ;;  %v1712_v20 = vpop.f32.mrf.mxu3  ;;  %6435 = vmatmul.msk.f32.gmra.mxu0 %vm279_vm1, %v8932_v11 }
 0x2eb   : > { %v1754_v34 = vadd.f32 %v1712_v20, %v1585_v55  ;;  %v1417_v24 = vadd.f32 %v1377_v19, %v8452_v58  ;;  %v8963_v19 = vld [vmem:[%s7588_s28 + $0xca] sm:$0xff] }
 0x2ec   : > { %v6603_v20 = vld [vmem:[%s7560_s12 + $0x3b0] sm:$0xff] }
 0x2ed   : > { %v8936_v39 = vadd.f32 %v1881_v42, %v1754_v34  ;;  %6295 = vmatmul.msk.f32.gmra.mxu1 %vm279_vm1, %v8477_v51  ;;  %6342 = vmatmul.msk.f32.gmra.mxu2 %vm279_vm1, %v8885_v50  ;;  %v6462_v51 = vld [vmem:[%s7560_s12 + $0x7a0] sm:$0xff] }
 0x2ee   : > { %2767 = vmatpush.msra.mxu1 %v6462_v51  ;;  %3404 = vmatpush.msra.mxu0 %v6603_v20  ;;  %v6461_v20 = vld [vmem:[%s7560_s12 + $0x798] sm:$0xff] }
 0x2ef   : > { %6389 = vmatmul.msk.f32.gmra.mxu3 %vm279_vm1, %v8916_v53  ;;  %v1884_v46 = vpop.f32.mrf.mxu0 }
 0x2f0   : > { %v1546_v6 = vpop.f32.mrf.mxu2  ;;  %2768 = vmatpush.msra.mxu1 %v6461_v20 }
 0x2f1   : > { %v1586_v38 = vadd.f32 %v1546_v6, %v1417_v24 }
 0x2f2   : > { %v1380_v56 = vpop.f32.mrf.mxu1  ;;  %v1715_v0 = vpop.f32.mrf.mxu3  ;;  %6436 = vmatmul.msk.f32.gmra.mxu0 %vm279_vm1, %v8947_v16 }
 0x2f3   : > { %v1755_v58 = vadd.f32 %v1715_v0, %v1586_v38  ;;  %v1418_v2 = vadd.f32 %v1380_v56, %v8467_v23  ;;  %v8978_v38 = vld [vmem:[%s7588_s28 + $0xda] sm:$0xff] }
 0x2f4   : > { %v6508_v0 = vld [vmem:[%s7560_s12 + $0x9c8] sm:$0xff] }
 0x2f5   : > { %v8953_v42 = vadd.f32 %v1884_v46, %v1755_v58  ;;  %6296 = vmatmul.msk.f32.gmra.mxu1 %vm279_vm1, %v8494_v48  ;;  %6343 = vmatmul.msk.f32.gmra.mxu2 %vm279_vm1, %v8900_v3 }
 0x2f6   : > { %2937 = vmatpush.msra.mxu2 %v6508_v0 }
 0x2f7   : > { %6390 = vmatmul.msk.f32.gmra.mxu3 %vm279_vm1, %v8932_v11  ;;  %v1887_v55 = vpop.f32.mrf.mxu0 }
 0x2f8   : > { %v1549_v34 = vpop.f32.mrf.mxu2 }
 0x2f9   : > { %v1587_v18 = vadd.f32 %v1549_v34, %v1418_v2 }
 0x2fa   : > { %v1383_v24 = vpop.f32.mrf.mxu1  ;;  %v1718_v46 = vpop.f32.mrf.mxu3  ;;  %6437 = vmatmul.msk.f32.gmra.mxu0 %vm279_vm1, %v8963_v19 }
 0x2fb   : > { %v1756_v48 = vadd.f32 %v1718_v46, %v1587_v18  ;;  %v1419_v49 = vadd.f32 %v1383_v24, %v8483_v5  ;;  %v8995_v24 = vld [vmem:[%s7588_s28 + $0xe2] sm:$0xff] }
 0x2fd   : > { %v8968_v23 = vadd.f32 %v1887_v55, %v1756_v48  ;;  %6297 = vmatmul.msk.f32.gmra.mxu1 %vm279_vm1, %v8509_v29  ;;  %6344 = vmatmul.msk.f32.gmra.mxu2 %vm279_vm1, %v8916_v53  ;;  %v6555_v55 = vld [vmem:[%s7560_s12 + $0x178] sm:$0xff] }
 0x2fe   : > { %3236 = vmatpush.msra.mxu3 %v6555_v55 }
 0x2ff   : > { %6391 = vmatmul.msk.f32.gmra.mxu3 %vm279_vm1, %v8947_v16  ;;  %v1890_v6 = vpop.f32.mrf.mxu0 }
 0x300   : > { %v1552_v51 = vpop.f32.mrf.mxu2 }
 0x301   : > { %v1588_v56 = vadd.f32 %v1552_v51, %v1419_v49  ;;  %v6602_v51 = vld [vmem:[%s7560_s12 + $0x3a8] sm:$0xff] }
 0x302   : > { %v1386_v58 = vpop.f32.mrf.mxu1  ;;  %v1721_v2 = vpop.f32.mrf.mxu3  ;;  %6438 = vmatmul.msk.f32.gmra.mxu0 %vm279_vm1, %v8978_v38 }
 0x303   : > { %v1757_v29 = vadd.f32 %v1721_v2, %v1588_v56  ;;  %v1420_v34 = vadd.f32 %v1386_v58, %v8499_v26  ;;  %3405 = vmatpush.msra.mxu0 %v6602_v51  ;;  %v9010_v58 = vld [vmem:[%s7588_s28 + $0xf2] sm:$0xff] }
 0x305   : > { %v8984_v5 = vadd.f32 %v1890_v6, %v1757_v29  ;;  %6298 = vmatmul.msk.f32.gmra.mxu1 %vm279_vm1, %v8526_v52  ;;  %6345 = vmatmul.msk.f32.gmra.mxu2 %vm279_vm1, %v8932_v11 }
 0x307   : > { %6392 = vmatmul.msk.f32.gmra.mxu3 %vm279_vm1, %v8963_v19  ;;  %v1893_v18 = vpop.f32.mrf.mxu0 }
 0x308   : > { %v1555_v46 = vpop.f32.mrf.mxu2 }
 0x309   : > { %v1589_v48 = vadd.f32 %v1555_v46, %v1420_v34  ;;  %v6507_v34 = vld [vmem:[%s7560_s12 + $0x9c0] sm:$0xff]  ;;  %v6460_v46 = vld [vmem:[%s7560_s12 + $0x790] sm:$0xff] }
 0x30a   : > { %v1724_v49 = vpop.f32.mrf.mxu3  ;;  %v1969_v6 = vpop.f32.mrf.mxu1  ;;  %6439 = vmatmul.msk.f32.gmra.mxu0 %vm279_vm1, %v8995_v24  ;;  %2938 = vmatpush.msra.mxu2 %v6507_v34 }
 0x30b   : > { %v1758_v52 = vadd.f32 %v1724_v49, %v1589_v48  ;;  %v2065_v26 = vadd.f32 %v1969_v6, %v8514_v32  ;;  %v6554_v32 = vld [vmem:[%s7560_s12 + $0x170] sm:$0xff]  ;;  %2769 = vmatpush.msra.mxu1 %v6460_v46 }
 0x30c   : > { %3237 = vmatpush.msra.mxu3 %v6554_v32  ;;  %v9027_v6 = vld [vmem:[%s7588_s28 + $0xfa] sm:$0xff] }
 0x30d   : > { %v9000_v56 = vadd.f32 %v1893_v18, %v1758_v52  ;;  %6299 = vmatmul.msk.f32.gmra.mxu1 %vm279_vm1, %v8541_v27  ;;  %6346 = vmatmul.msk.f32.gmra.mxu2 %vm279_vm1, %v8947_v16 }
 0x30f   : > { %6393 = vmatmul.msk.f32.gmra.mxu3 %vm279_vm1, %v8978_v38  ;;  %v2606_v0 = vpop.f32.mrf.mxu0 }
 0x310   : > { %v2268_v2 = vpop.f32.mrf.mxu2 }
 0x311   : > { %v2364_v29 = vadd.f32 %v2268_v2, %v2065_v26 }
 0x312   : > { %v1972_v55 = vpop.f32.mrf.mxu1  ;;  %v2437_v20 = vpop.f32.mrf.mxu3  ;;  %6440 = vmatmul.msk.f32.gmra.mxu0 %vm279_vm1, %v9010_v58 }
 0x313   : > { %v2533_v27 = vadd.f32 %v2437_v20, %v2364_v29  ;;  %v2066_v48 = vadd.f32 %v1972_v55, %v8530_v62  ;;  %v6601_v62 = vld [vmem:[%s7560_s12 + $0x3a0] sm:$0xff] }
 0x314   : > { %3406 = vmatpush.msra.mxu0 %v6601_v62  ;;  %v9042_v20 = vld [vmem:[%s7588_s28 + $0x10a] sm:$0xff] }
 0x315   : > { %v9015_v18 = vadd.f32 %v2606_v0, %v2533_v27  ;;  %6300 = vmatmul.msk.f32.gmra.mxu1 %vm279_vm1, %v8557_v12  ;;  %6347 = vmatmul.msk.f32.gmra.mxu2 %vm279_vm1, %v8963_v19 }
 0x317   : > { %6394 = vmatmul.msk.f32.gmra.mxu3 %vm279_vm1, %v8995_v24  ;;  %v2609_v49 = vpop.f32.mrf.mxu0 }
 0x318   : > { %v2271_v52 = vpop.f32.mrf.mxu2 }
 0x319   : > { %v2365_v51 = vadd.f32 %v2271_v52, %v2066_v48 }
 0x31a   : > { %v1975_v12 = vpop.f32.mrf.mxu1  ;;  %v2440_v26 = vpop.f32.mrf.mxu3  ;;  %6441 = vmatmul.msk.f32.gmra.mxu0 %vm279_vm1, %v9027_v6 }
 0x31b   : > { %v2534_v0 = vadd.f32 %v2440_v26, %v2365_v51  ;;  %v2067_v29 = vadd.f32 %v1975_v12, %v8545_v60  ;;  %v6506_v60 = vld [vmem:[%s7560_s12 + $0x9b8] sm:$0xff] }
 0x31c   : > { %2939 = vmatpush.msra.mxu2 %v6506_v60  ;;  %v9058_v12 = vld [vmem:[%s7588_s28 + $0x112] sm:$0xff] }
 0x31d   : > { %v9031_v2 = vadd.f32 %v2609_v49, %v2534_v0  ;;  %6301 = vmatmul.msk.f32.gmra.mxu1 %vm279_vm1, %v8573_v63  ;;  %6348 = vmatmul.msk.f32.gmra.mxu2 %vm279_vm1, %v8978_v38  ;;  %v6553_v49 = vld [vmem:[%s7560_s12 + $0x168] sm:$0xff] }
 0x31e   : > { %3238 = vmatpush.msra.mxu3 %v6553_v49 }
 0x31f   : > { %6395 = vmatmul.msk.f32.gmra.mxu3 %vm279_vm1, %v9010_v58  ;;  %v2612_v55 = vpop.f32.mrf.mxu0 }
 0x320   : > { %v2274_v27 = vpop.f32.mrf.mxu2 }
 0x321   : > { %v2366_v34 = vadd.f32 %v2274_v27, %v2067_v29 }
 0x322   : > { %v1978_v32 = vpop.f32.mrf.mxu1  ;;  %v2443_v63 = vpop.f32.mrf.mxu3  ;;  %6442 = vmatmul.msk.f32.gmra.mxu0 %vm279_vm1, %v9042_v20 }
 0x323   : > { %v2535_v46 = vadd.f32 %v2443_v63, %v2366_v34  ;;  %v2068_v52 = vadd.f32 %v1978_v32, %v8562_v14  ;;  %v6600_v14 = vld [vmem:[%s7560_s12 + $0x398] sm:$0xff] }
 0x324   : > { %3407 = vmatpush.msra.mxu0 %v6600_v14  ;;  %v9074_v63 = vld [vmem:[%s7588_s28 + $0x122] sm:$0xff] }
 0x325   : > { %v9046_v48 = vadd.f32 %v2612_v55, %v2535_v46  ;;  %6302 = vmatmul.msk.f32.gmra.mxu1 %vm279_vm1, %v8587_v36  ;;  %6349 = vmatmul.msk.f32.gmra.mxu2 %vm279_vm1, %v8995_v24  ;;  %v6459_v36 = vld [vmem:[%s7560_s12 + $0x788] sm:$0xff] }
 0x326   : > { %2770 = vmatpush.msra.mxu1 %v6459_v36  ;;  %v6505_v36 = vld [vmem:[%s7560_s12 + $0x9b0] sm:$0xff] }
 0x327   : > { %6396 = vmatmul.msk.f32.gmra.mxu3 %vm279_vm1, %v9027_v6  ;;  %v2615_v51 = vpop.f32.mrf.mxu0  ;;  %2940 = vmatpush.msra.mxu2 %v6505_v36 }
 0x328   : > { %v2277_v26 = vpop.f32.mrf.mxu2 }
 0x329   : > { %v2367_v0 = vadd.f32 %v2277_v26, %v2068_v52 }
 0x32a   : > { %v1981_v62 = vpop.f32.mrf.mxu1  ;;  %v2446_v29 = vpop.f32.mrf.mxu3  ;;  %6443 = vmatmul.msk.f32.gmra.mxu0 %vm279_vm1, %v9058_v12 }
 0x32b   : > { %v2536_v55 = vadd.f32 %v2446_v29, %v2367_v0  ;;  %v2069_v34 = vadd.f32 %v1981_v62, %v8577_v10  ;;  %v9088_v0 = vld [vmem:[%s7588_s28 + $0x12a] sm:$0xff] }
 0x32d   : > { %v9063_v27 = vadd.f32 %v2615_v51, %v2536_v55  ;;  %6303 = vmatmul.msk.f32.gmra.mxu1 %vm279_vm1, %v8604_v15  ;;  %6350 = vmatmul.msk.f32.gmra.mxu2 %vm279_vm1, %v9010_v58  ;;  %v6552_v55 = vld [vmem:[%s7560_s12 + $0x160] sm:$0xff] }
 0x32e   : > { %3239 = vmatpush.msra.mxu3 %v6552_v55 }
 0x32f   : > { %6397 = vmatmul.msk.f32.gmra.mxu3 %vm279_vm1, %v9042_v20  ;;  %v2618_v32 = vpop.f32.mrf.mxu0 }
 0x330   : > { %v2280_v46 = vpop.f32.mrf.mxu2 }
 0x331   : > { %v2368_v60 = vadd.f32 %v2280_v46, %v2069_v34  ;;  %v6458_v34 = vld [vmem:[%s7560_s12 + $0x780] sm:$0xff] }
 0x332   : > { %v1984_v49 = vpop.f32.mrf.mxu1  ;;  %v2449_v15 = vpop.f32.mrf.mxu3  ;;  %6444 = vmatmul.msk.f32.gmra.mxu0 %vm279_vm1, %v9074_v63  ;;  %2771 = vmatpush.msra.mxu1 %v6458_v34  ;;  %v6504_v34 = vld [vmem:[%s7560_s12 + $0x9a8] sm:$0xff] }
 0x333   : > { %v2537_v52 = vadd.f32 %v2449_v15, %v2368_v60  ;;  %v2070_v10 = vadd.f32 %v1984_v49, %v8594_v61  ;;  %v9105_v49 = vld [vmem:[%s7588_s28 + $0x13a] sm:$0xff]  ;;  %2941 = vmatpush.msra.mxu2 %v6504_v34 }
 0x334   : > { %v6598_v34 = vld [vmem:[%s7560_s12 + $0x388] sm:$0xff] }
 0x335   : > { %v9078_v51 = vadd.f32 %v2618_v32, %v2537_v52  ;;  %6304 = vmatmul.msk.f32.gmra.mxu1 %vm279_vm1, %v8619_v41  ;;  %6351 = vmatmul.msk.f32.gmra.mxu2 %vm279_vm1, %v9027_v6 }
 0x337   : > { %6398 = vmatmul.msk.f32.gmra.mxu3 %vm279_vm1, %v9058_v12  ;;  %v2621_v26 = vpop.f32.mrf.mxu0 }
 0x338   : > { %v2283_v62 = vpop.f32.mrf.mxu2 }
 0x339   : > { %v2369_v29 = vadd.f32 %v2283_v62, %v2070_v10  ;;  %v6599_v10 = vld [vmem:[%s7560_s12 + $0x390] sm:$0xff] }
 0x33a   : > { %v1987_v14 = vpop.f32.mrf.mxu1  ;;  %v2452_v41 = vpop.f32.mrf.mxu3  ;;  %6445 = vmatmul.msk.f32.gmra.mxu0 %vm279_vm1, %v9088_v0  ;;  %v11035_v62 = vld [vmem:[#allocation12_spill] sm:$0xff] }
 0x33b   : > { %v2538_v61 = vadd.f32 %v2452_v41, %v2369_v29  ;;  %v2071_v46 = vadd.f32 %v1987_v14, %v8609_v13  ;;  %3408 = vmatpush.msra.mxu0 %v6599_v10  ;;  %v9120_v14 = vld [vmem:[%s7588_s28 + $0x142] sm:$0xff] }
 0x33c   : > { %v6457_v10 = vld [vmem:[%s7560_s12 + $0x778] sm:$0xff] }
 0x33d   : > { %v9095_v32 = vadd.f32 %v2621_v26, %v2538_v61  ;;  %6305 = vmatmul.msk.f32.gmra.mxu1 %vm279_vm1, %v8636_v47  ;;  %6352 = vmatmul.msk.f32.gmra.mxu2 %vm279_vm1, %v9042_v20 }
 0x33e   : > { %2772 = vmatpush.msra.mxu1 %v6457_v10  ;;  %3409 = vmatpush.msra.mxu0 %v6598_v34  ;;  %v9152_v10 = vld [vmem:[%s7588_s28 + $0x15a] sm:$0xff] }
 0x33f   : > { %6399 = vmatmul.msk.f32.gmra.mxu3 %vm279_vm1, %v9074_v63  ;;  %v2624_v60 = vpop.f32.mrf.mxu0 }
 0x340   : > { %v2286_v15 = vpop.f32.mrf.mxu2 }
 0x341   : > { %v2370_v52 = vadd.f32 %v2286_v15, %v2071_v46  ;;  %v6551_v15 = vld [vmem:[%s7560_s12 + $0x158] sm:$0xff] }
 0x342   : > { %v1990_v26 = vpop.f32.mrf.mxu1  ;;  %v2455_v36 = vpop.f32.mrf.mxu3  ;;  %6446 = vmatmul.msk.f32.gmra.mxu0 %vm279_vm1, %v9105_v49  ;;  %3240 = vmatpush.msra.mxu3 %v6551_v15 }
 0x343   : > { %v2539_v47 = vadd.f32 %v2455_v36, %v2370_v52  ;;  %v2072_v29 = vadd.f32 %v1990_v26, %v11035_v62  ;;  %v11037_v26 = vld [vmem:[#allocation13_spill] sm:$0xff]  ;;  %v9137_v62 = vld [vmem:[%s7588_s28 + $0x152] sm:$0xff] }
 0x345   : > { %v9110_v13 = vadd.f32 %v2624_v60, %v2539_v47  ;;  %6306 = vmatmul.msk.f32.gmra.mxu1 %vm279_vm1, %v8651_v59  ;;  %6353 = vmatmul.msk.f32.gmra.mxu2 %vm279_vm1, %v9058_v12 }
 0x347   : > { %6400 = vmatmul.msk.f32.gmra.mxu3 %vm279_vm1, %v9088_v0  ;;  %v2627_v55 = vpop.f32.mrf.mxu0 }
 0x348   : > { %v2289_v41 = vpop.f32.mrf.mxu2 }
 0x349   : > { %v2371_v61 = vadd.f32 %v2289_v41, %v2072_v29 }
 0x34a   : > { %v1993_v46 = vpop.f32.mrf.mxu1  ;;  %v2458_v60 = vpop.f32.mrf.mxu3  ;;  %6447 = vmatmul.msk.f32.gmra.mxu0 %vm279_vm1, %v9120_v14 }
 0x34b   : > { %v2540_v59 = vadd.f32 %v2458_v60, %v2371_v61  ;;  %v2073_v36 = vadd.f32 %v1993_v46, %v11037_v26  ;;  %v11039_v46 = vld [vmem:[#allocation14_spill] sm:$0xff] }
 0x34d   : > { %v9126_v52 = vadd.f32 %v2627_v55, %v2540_v59  ;;  %6307 = vmatmul.msk.f32.gmra.mxu1 %vm279_vm1, %v8667_v1  ;;  %6354 = vmatmul.msk.f32.gmra.mxu2 %vm279_vm1, %v9074_v63 }
 0x34f   : > { %11036 = vst [vmem:[#allocation12_spill] sm:$0xff] %v9126_v52  ;;  %6401 = vmatmul.msk.f32.gmra.mxu3 %vm279_vm1, %v9105_v49  ;;  %v2630_v47 = vpop.f32.mrf.mxu0 }
 0x350   : > { %v2292_v29 = vpop.f32.mrf.mxu2 }
 0x351   : > { %v2372_v55 = vadd.f32 %v2292_v29, %v2073_v36 }
 0x352   : > { %v1996_v41 = vpop.f32.mrf.mxu1  ;;  %v2461_v61 = vpop.f32.mrf.mxu3  ;;  %6448 = vmatmul.msk.f32.gmra.mxu0 %vm279_vm1, %v9137_v62 }
 0x353   : > { %v2541_v1 = vadd.f32 %v2461_v61, %v2372_v55  ;;  %v2074_v59 = vadd.f32 %v1996_v41, %v11039_v46  ;;  %v6503_v55 = vld [vmem:[%s7560_s12 + $0x9a0] sm:$0xff]  ;;  %v6550_v41 = vld [vmem:[%s7560_s12 + $0x150] sm:$0xff] }
 0x354   : > { %2942 = vmatpush.msra.mxu2 %v6503_v55  ;;  %3241 = vmatpush.msra.mxu3 %v6550_v41  ;;  %v11043_v41 = vld [vmem:[#allocation16_spill] sm:$0xff] }
 0x355   : > { %v9142_v60 = vadd.f32 %v2630_v47, %v2541_v1  ;;  %6308 = vmatmul.msk.f32.gmra.mxu1 %vm279_vm1, %v8683_v7  ;;  %6355 = vmatmul.msk.f32.gmra.mxu2 %vm279_vm1, %v9088_v0  ;;  %v11041_v1 = vld [vmem:[#allocation15_spill] sm:$0xff] }
 0x357   : > { %11038 = vst [vmem:[#allocation13_spill] sm:$0xff] %v9142_v60  ;;  %6402 = vmatmul.msk.f32.gmra.mxu3 %vm279_vm1, %v9120_v14  ;;  %v2633_v15 = vpop.f32.mrf.mxu0  ;;  %v6798_v60 = vld [vmem:[%s7560_s12 + $0x228] sm:$0x1] }
 0x358   : > { %v2295_v26 = vpop.f32.mrf.mxu2 }
 0x359   : > { %v2373_v36 = vadd.f32 %v2295_v26, %v2074_v59  ;;  %v9168_v59 = vld [vmem:[%s7588_s28 + $0x16a] sm:$0xff] }
 0x35a   : > { %v1999_v47 = vpop.f32.mrf.mxu1  ;;  %v2464_v29 = vpop.f32.mrf.mxu3  ;;  %6449 = vmatmul.msk.f32.gmra.mxu0 %vm279_vm1, %v9152_v10  ;;  %v6456_v26 = vld [vmem:[%s7560_s12 + $0x770] sm:$0xff] }
 0x35b   : > { %v2542_v7 = vadd.f32 %v2464_v29, %v2373_v36  ;;  %v2075_v34 = vadd.f32 %v1999_v47, %v11041_v1  ;;  %2773 = vmatpush.msra.mxu1 %v6456_v26  ;;  %v6597_v47 = vld [vmem:[%s7560_s12 + $0x380] sm:$0xff] }
 0x35c   : > { %3410 = vmatpush.msra.mxu0 %v6597_v47  ;;  %v9184_v26 = vld [vmem:[%s7588_s28 + $0x172] sm:$0xff] }
 0x35d   : > { %v9157_v61 = vadd.f32 %v2633_v15, %v2542_v7  ;;  %6309 = vmatmul.msk.f32.gmra.mxu1 %vm279_vm1, %v8699_v31  ;;  %6356 = vmatmul.msk.f32.gmra.mxu2 %vm279_vm1, %v9105_v49  ;;  %v6704_v47 = vld [vmem:[%s7560_s12 + $0x848] sm:$0x1] }
 0x35e   : > { %6705 = vmatpush.msk.msrb.mxu2 %vm376_vm0, %v6704_v47  ;;  %6799 = vmatpush.msk.msrb.mxu0 %vm376_vm0, %v6798_v60 }
 0x35f   : > { %11040 = vst [vmem:[#allocation14_spill] sm:$0xff] %v9157_v61  ;;  %6403 = vmatmul.msk.f32.gmra.mxu3 %vm279_vm1, %v9137_v62  ;;  %v2636_v46 = vpop.f32.mrf.mxu0  ;;  %v9218_v61 = vld [vmem:[%s7588_s28 + $0x18a] sm:$0xff] }
 0x360   : > { %v2298_v15 = vpop.f32.mrf.mxu2 }
 0x361   : > { %v2374_v36 = vadd.f32 %v2298_v15, %v2075_v34 }
 0x362   : > { %v2002_v31 = vpop.f32.mrf.mxu1  ;;  %v2467_v29 = vpop.f32.mrf.mxu3  ;;  %6450 = vmatmul.msk.f32.gmra.mxu0 %vm279_vm1, %v9168_v59 }
 0x363   : > { %v2543_v7 = vadd.f32 %v2467_v29, %v2374_v36  ;;  %v2076_v1 = vadd.f32 %v2002_v31, %v11043_v41  ;;  %v11045_v31 = vld [vmem:[#allocation19_spill] sm:$0xff]  ;;  %v11046_v41 = vld [vmem:[#allocation17_spill] sm:$0xff] }
 0x365   : > { %v9173_v55 = vadd.f32 %v2636_v46, %v2543_v7  ;;  %6310 = vmatmul.msk.f32.gmra.mxu1 %vm279_vm1, %v8717_v21  ;;  %6357 = vmatmul.msk.f32.gmra.mxu2 %vm279_vm1, %v9120_v14 }
 0x367   : > { %11042 = vst [vmem:[#allocation15_spill] sm:$0xff] %v9173_v55  ;;  %6404 = vmatmul.msk.f32.gmra.mxu3 %vm279_vm1, %v9152_v10  ;;  %v2639_v34 = vpop.f32.mrf.mxu0  ;;  %v9200_v55 = vld [vmem:[%s7588_s28 + $0x182] sm:$0xff] }
 0x368   : > { %v2301_v46 = vpop.f32.mrf.mxu2 }
 0x369   : > { %v2375_v15 = vadd.f32 %v2301_v46, %v2076_v1 }
 0x36a   : > { %v2005_v36 = vpop.f32.mrf.mxu1  ;;  %v2470_v21 = vpop.f32.mrf.mxu3  ;;  %6451 = vmatmul.msk.f32.gmra.mxu0 %vm279_vm1, %v9184_v26 }
 0x36b   : > { %v2544_v29 = vadd.f32 %v2470_v21, %v2375_v15  ;;  %v2077_v1 = vadd.f32 %v2005_v36, %v11046_v41  ;;  %v6751_v15 = vld [vmem:[%s7560_s12 + $0xa78] sm:$0x1] }
 0x36c   : > { %6752 = vmatpush.msk.msrb.mxu3 %vm376_vm0, %v6751_v15  ;;  %v11048_v41 = vld [vmem:[#allocation21_spill] sm:$0xff]  ;;  %v11049_v15 = vld [vmem:[#allocation18_spill] sm:$0xff] }
 0x36d   : > { %v9188_v7 = vadd.f32 %v2639_v34, %v2544_v29  ;;  %6311 = vmatmul.msk.f32.gmra.mxu1 %vm279_vm1, %v11045_v31  ;;  %6358 = vmatmul.msk.f32.gmra.mxu2 %vm279_vm1, %v9137_v62  ;;  %v6657_v29 = vld [vmem:[%s7560_s12 + $0x618] sm:$0x1] }
 0x36e   : > { %6658 = vmatpush.msk.msrb.mxu1 %vm376_vm0, %v6657_v29 }
 0x36f   : > { %11044 = vst [vmem:[#allocation16_spill] sm:$0xff] %v9188_v7  ;;  %6405 = vmatmul.msk.f32.gmra.mxu3 %vm279_vm1, %v9168_v59  ;;  %v2642_v46 = vpop.f32.mrf.mxu0 }
 0x370   : > { %v2304_v34 = vpop.f32.mrf.mxu2 }
 0x371   : > { %v2376_v21 = vadd.f32 %v2304_v34, %v2077_v1 }
 0x372   : > { %v2008_v31 = vpop.f32.mrf.mxu1  ;;  %v2473_v7 = vpop.f32.mrf.mxu3  ;;  %6452 = vmatmul.msk.f32.gmra.mxu0 %vm279_vm1, %v9200_v55 }
 0x373   : > { %v2545_v36 = vadd.f32 %v2473_v7, %v2376_v21  ;;  %v2078_v1 = vadd.f32 %v2008_v31, %v11049_v15  ;;  %v11051_v15 = vld [vmem:[#allocation20_spill] sm:$0xff] }
 0x375   : > { %v9208_v47 = vadd.f32 %v2642_v46, %v2545_v36  ;;  %6312 = vmatmul.msk.f32.gmra.mxu1 %vm279_vm1, %v11048_v41  ;;  %6359 = vmatmul.msk.f32.gmra.mxu2 %vm279_vm1, %v9152_v10  ;;  %v1160_v36 = vld [vmem:[%s7588_s28 + $0x1c9] sm:$0xff] }
 0x377   : > { %11047 = vst [vmem:[#allocation19_spill] sm:$0xff] %v9208_v47  ;;  %6406 = vmatmul.msk.f32.gmra.mxu3 %vm279_vm1, %v9184_v26  ;;  %v2645_v34 = vpop.f32.mrf.mxu0 }
 0x378   : > { %v2307_v29 = vpop.f32.mrf.mxu2 }
 0x379   : > { %v2377_v7 = vadd.f32 %v2307_v29, %v2078_v1  ;;  %v9234_v29 = vld [vmem:[%s7588_s28 + $0x19a] sm:$0xff] }
 0x37a   : > { %v2011_v46 = vpop.f32.mrf.mxu1  ;;  %v2476_v21 = vpop.f32.mrf.mxu3  ;;  %6453 = vmatmul.msk.f32.gmra.mxu0 %vm279_vm1, %v9218_v61 }
 0x37b   : > { %v2546_v31 = vadd.f32 %v2476_v21, %v2377_v7  ;;  %v2079_v60 = vadd.f32 %v2011_v46, %v11051_v15  ;;  %v6703_v7 = vld [vmem:[%s7560_s12 + $0x840] sm:$0xff]  ;;  %v6750_v46 = vld [vmem:[%s7560_s12 + $0xa70] sm:$0xff] }
 0x37c   : > { %3736 = vmatpush.msrb.mxu2 %v6703_v7  ;;  %3905 = vmatpush.msrb.mxu3 %v6750_v46 }
 0x37d   : > { %v9225_v41 = vadd.f32 %v2645_v34, %v2546_v31  ;;  %6313 = vmatmul.msk.f32.gmra.mxu1 %vm279_vm1, %v1160_v36  ;;  %6360 = vmatmul.msk.f32.gmra.mxu2 %vm279_vm1, %v9168_v59  ;;  %v1161_v31 = vld [vmem:[%s7588_s28 + $0x1d1] sm:$0xff] }
 0x37f   : > { %11050 = vst [vmem:[#allocation17_spill] sm:$0xff] %v9225_v41  ;;  %6407 = vmatmul.msk.f32.gmra.mxu3 %vm279_vm1, %v9200_v55  ;;  %v2648_v1 = vpop.f32.mrf.mxu0 }
 0x380   : > { %v2310_v47 = vpop.f32.mrf.mxu2 }
 0x381   : > { %v2378_v52 = vadd.f32 %v2310_v47, %v2079_v60  ;;  %v6656_v47 = vld [vmem:[%s7560_s12 + $0x610] sm:$0xff] }
 0x382   : > { %v2014_v34 = vpop.f32.mrf.mxu1  ;;  %v2479_v21 = vpop.f32.mrf.mxu3  ;;  %6454 = vmatmul.msk.f32.gmra.mxu0 %vm279_vm1, %v9234_v29  ;;  %3567 = vmatpush.msrb.mxu1 %v6656_v47  ;;  %v3072_v47 = vld [vmem:[%s7588_s28 + $0x3] sm:$0xff] }
 0x383   : > { %v2547_v36 = vadd.f32 %v2479_v21, %v2378_v52  ;;  %v2080_v60 = vadd.f32 %v2014_v34, %v8757_v54  ;;  %v9251_v52 = vld [vmem:[%s7588_s28 + $0x1a2] sm:$0xff]  ;;  %v11055_v34 = vld [vmem:[#allocation22_spill] sm:$0xff] }
 0x384   : > { %11053 = vst [vmem:[#allocation18_spill] sm:$0xff] %v9251_v52 }
 0x385   : > { %v9241_v15 = vadd.f32 %v2648_v1, %v2547_v36  ;;  %6314 = vmatmul.msk.f32.gmra.mxu1 %vm279_vm1, %v1161_v31  ;;  %6361 = vmatmul.msk.f32.gmra.mxu2 %vm279_vm1, %v9184_v26 }
 0x387   : > { %11052 = vst [vmem:[#allocation21_spill] sm:$0xff] %v9241_v15  ;;  %6408 = vmatmul.msk.f32.gmra.mxu3 %vm279_vm1, %v9218_v61  ;;  %v2651_v7 = vpop.f32.mrf.mxu0  ;;  %v6797_v15 = vld [vmem:[%s7560_s12 + $0x220] sm:$0xff] }
 0x388   : > { %v2313_v21 = vpop.f32.mrf.mxu2  ;;  %4204 = vmatpush.msrb.mxu0 %v6797_v15 }
 0x389   : > { %v2379_v1 = vadd.f32 %v2313_v21, %v2080_v60 }
 0x38a   : > { %v2017_v36 = vpop.f32.mrf.mxu1  ;;  %v2482_v46 = vpop.f32.mrf.mxu3  ;;  %6455 = vmatmul.msk.f32.gmra.mxu0 %vm279_vm1, %v9251_v52 }
 0x38b   : > { %v2548_v31 = vadd.f32 %v2482_v46, %v2379_v1  ;;  %v2081_v60 = vadd.f32 %v2017_v36, %v11055_v34  ;;  %v3074_v1 = vld [vmem:[%s7588_s28 + $0x1b] sm:$0xff] }
 0x38c   : > { %v6749_v36 = vld [vmem:[%s7560_s12 + $0xa68] sm:$0xff] }
 0x38d   : > { %v9257_v54 = vadd.f32 %v2651_v7, %v2548_v31  ;;  %6471 = vmatmul.msk.f32.vlgmr.msra.gmra.mxu1 %vm279_vm1, %v8793_v28  ;;  %6518 = vmatmul.msk.f32.vlgmr.msra.gmra.mxu2 %vm279_vm1, %v8823_v33  ;;  %v6702_v28 = vld [vmem:[%s7560_s12 + $0x838] sm:$0xff] }
 0x38e   : > { %v3073_v31 = vld [vmem:[%s7588_s28 + $0xb] sm:$0xff]  ;;  %3737 = vmatpush.msrb.mxu2 %v6702_v28  ;;  %3906 = vmatpush.msrb.mxu3 %v6749_v36  ;;  %v9291_v36 = vld [vmem:[%s7588_s28 + $0x33] sm:$0xff] }
 0x38f   : > { %11054 = vst [vmem:[#allocation20_spill] sm:$0xff] %v9257_v54  ;;  %6565 = vmatmul.msk.f32.vlgmr.msra.gmra.mxu3 %vm279_vm1, %v3072_v47  ;;  %v2654_v21 = vpop.f32.mrf.mxu0  ;;  %v6655_v47 = vld [vmem:[%s7560_s12 + $0x608] sm:$0xff] }
 0x390   : > { %v2316_v46 = vpop.f32.mrf.mxu2  ;;  %3568 = vmatpush.msrb.mxu1 %v6655_v47 }
 0x391   : > { %v2380_v41 = vadd.f32 %v2316_v46, %v2081_v60  ;;  %v3075_v60 = vld [vmem:[%s7588_s28 + $0x23] sm:$0xff] }
 0x392   : > { %v2020_v52 = vpop.f32.mrf.mxu1  ;;  %v2485_v15 = vpop.f32.mrf.mxu3  ;;  %6612 = vmatmul.msk.f32.vlgmr.msra.gmra.mxu0 %vm279_vm1, %v3074_v1 }
 0x393   : > { %v2549_v7 = vadd.f32 %v2485_v15, %v2380_v41  ;;  %v2082_v34 = vadd.f32 %v2020_v52, %v8783_v44  ;;  %v6796_v44 = vld [vmem:[%s7560_s12 + $0x218] sm:$0xff] }
 0x394   : > { %4205 = vmatpush.msrb.mxu0 %v6796_v44 }
 0x395   : > { %v9269_v54 = vadd.f32 %v2654_v21, %v2549_v7  ;;  %6472 = vmatmul.msk.f32.gmra.mxu1 %vm279_vm1, %v8807_v57  ;;  %6519 = vmatmul.msk.f32.gmra.mxu2 %vm279_vm1, %v8836_v22 }
 0x397   : > { %6566 = vmatmul.msk.f32.gmra.mxu3 %vm279_vm1, %v3073_v31  ;;  %v2657_v41 = vpop.f32.mrf.mxu0 }
 0x398   : > { %v2319_v21 = vpop.f32.mrf.mxu2 }
 0x399   : > { %v2381_v46 = vadd.f32 %v2319_v21, %v2082_v34 }
 0x39a   : > { %v2023_v15 = vpop.f32.mrf.mxu1  ;;  %v2488_v7 = vpop.f32.mrf.mxu3  ;;  %6613 = vmatmul.msk.f32.gmra.mxu0 %vm279_vm1, %v3075_v60 }
 0x39b   : > { %v2550_v57 = vadd.f32 %v2488_v7, %v2381_v46  ;;  %v2083_v52 = vadd.f32 %v2023_v15, %v8797_v30  ;;  %v6701_v30 = vld [vmem:[%s7560_s12 + $0x830] sm:$0xff] }
 0x39c   : > { %3738 = vmatpush.msrb.mxu2 %v6701_v30 }
 0x39d   : > { %v9281_v28 = vadd.f32 %v2657_v41, %v2550_v57  ;;  %6473 = vmatmul.msk.f32.gmra.mxu1 %vm279_vm1, %v8823_v33  ;;  %6520 = vmatmul.msk.f32.gmra.mxu2 %vm279_vm1, %v8853_v17  ;;  %v9306_v57 = vld [vmem:[%s7588_s28 + $0x3b] sm:$0xff] }
 0x39f   : > { %6567 = vmatmul.msk.f32.gmra.mxu3 %vm279_vm1, %v3074_v1  ;;  %v2660_v31 = vpop.f32.mrf.mxu0  ;;  %v6748_v1 = vld [vmem:[%s7560_s12 + $0xa60] sm:$0xff] }
 0x3a0   : > { %v2322_v47 = vpop.f32.mrf.mxu2  ;;  %3907 = vmatpush.msrb.mxu3 %v6748_v1 }
 0x3a1   : > { %v2382_v34 = vadd.f32 %v2322_v47, %v2083_v52 }
 0x3a2   : > { %v2026_v41 = vpop.f32.mrf.mxu1  ;;  %v2491_v21 = vpop.f32.mrf.mxu3  ;;  %6614 = vmatmul.msk.f32.gmra.mxu0 %vm279_vm1, %v9291_v36 }
 0x3a3   : > { %v2551_v33 = vadd.f32 %v2491_v21, %v2382_v34  ;;  %v2084_v15 = vadd.f32 %v2026_v41, %v8812_v37  ;;  %v6795_v37 = vld [vmem:[%s7560_s12 + $0x210] sm:$0xff] }
 0x3a4   : > { %4206 = vmatpush.msrb.mxu0 %v6795_v37  ;;  %v6747_v37 = vld [vmem:[%s7560_s12 + $0xa58] sm:$0xff] }
 0x3a5   : > { %v9295_v46 = vadd.f32 %v2660_v31, %v2551_v33  ;;  %6474 = vmatmul.msk.f32.gmra.mxu1 %vm279_vm1, %v8836_v22  ;;  %6521 = vmatmul.msk.f32.gmra.mxu2 %vm279_vm1, %v8868_v43  ;;  %v6654_v31 = vld [vmem:[%s7560_s12 + $0x600] sm:$0xff] }
 0x3a6   : > { %3569 = vmatpush.msrb.mxu1 %v6654_v31  ;;  %v9322_v33 = vld [vmem:[%s7588_s28 + $0x4b] sm:$0xff]  ;;  %v9336_v31 = vld [vmem:[%s7588_s28 + $0x53] sm:$0xff]  ;;  %3908 = vmatpush.msrb.mxu3 %v6747_v37 }
 0x3a7   : > { %6568 = vmatmul.msk.f32.gmra.mxu3 %vm279_vm1, %v3075_v60  ;;  %v2663_v7 = vpop.f32.mrf.mxu0 }
 0x3a8   : > { %v2325_v44 = vpop.f32.mrf.mxu2 }
 0x3a9   : > { %v2383_v52 = vadd.f32 %v2325_v44, %v2084_v15 }
 0x3aa   : > { %v2029_v22 = vpop.f32.mrf.mxu1  ;;  %v2494_v47 = vpop.f32.mrf.mxu3  ;;  %6615 = vmatmul.msk.f32.gmra.mxu0 %vm279_vm1, %v9306_v57 }
 0x3ab   : > { %v2552_v34 = vadd.f32 %v2494_v47, %v2383_v52  ;;  %v2085_v60 = vadd.f32 %v2029_v22, %v8827_v35  ;;  %v6700_v22 = vld [vmem:[%s7560_s12 + $0x828] sm:$0xff] }
 0x3ac   : > { %3739 = vmatpush.msrb.mxu2 %v6700_v22 }
 0x3ad   : > { %v9311_v21 = vadd.f32 %v2663_v7, %v2552_v34  ;;  %6475 = vmatmul.msk.f32.gmra.mxu1 %vm279_vm1, %v8853_v17  ;;  %6522 = vmatmul.msk.f32.gmra.mxu2 %vm279_vm1, %v8885_v50 }
 0x3af   : > { %6569 = vmatmul.msk.f32.gmra.mxu3 %vm279_vm1, %v9291_v36  ;;  %v2666_v41 = vpop.f32.mrf.mxu0 }
 0x3b0   : > { %v2328_v30 = vpop.f32.mrf.mxu2 }
 0x3b1   : > { %v2384_v1 = vadd.f32 %v2328_v30, %v2085_v60 }
 0x3b2   : > { %v2032_v15 = vpop.f32.mrf.mxu1  ;;  %v2497_v17 = vpop.f32.mrf.mxu3  ;;  %6616 = vmatmul.msk.f32.gmra.mxu0 %vm279_vm1, %v9322_v33 }
 0x3b3   : > { %v2553_v7 = vadd.f32 %v2497_v17, %v2384_v1  ;;  %v2086_v35 = vadd.f32 %v2032_v15, %v8843_v40  ;;  %v9353_v17 = vld [vmem:[%s7588_s28 + $0x63] sm:$0xff] }
 0x3b5   : > { %v9326_v44 = vadd.f32 %v2666_v41, %v2553_v7  ;;  %6476 = vmatmul.msk.f32.gmra.mxu1 %vm279_vm1, %v8868_v43  ;;  %6523 = vmatmul.msk.f32.gmra.mxu2 %vm279_vm1, %v8900_v3  ;;  %v6653_v41 = vld [vmem:[%s7560_s12 + $0x5f8] sm:$0xff] }
 0x3b6   : > { %3570 = vmatpush.msrb.mxu1 %v6653_v41  ;;  %v6699_v41 = vld [vmem:[%s7560_s12 + $0x820] sm:$0xff] }
 0x3b7   : > { %6570 = vmatmul.msk.f32.gmra.mxu3 %vm279_vm1, %v9306_v57  ;;  %v2669_v52 = vpop.f32.mrf.mxu0  ;;  %3740 = vmatpush.msrb.mxu2 %v6699_v41 }
 0x3b8   : > { %v2331_v47 = vpop.f32.mrf.mxu2 }
 0x3b9   : > { %v2385_v34 = vadd.f32 %v2331_v47, %v2086_v35 }
 0x3ba   : > { %v2035_v60 = vpop.f32.mrf.mxu1  ;;  %v2500_v43 = vpop.f32.mrf.mxu3  ;;  %6617 = vmatmul.msk.f32.gmra.mxu0 %vm279_vm1, %v9336_v31 }
 0x3bb   : > { %v2554_v40 = vadd.f32 %v2500_v43, %v2385_v34  ;;  %v2087_v1 = vadd.f32 %v2035_v60, %v8858_v4  ;;  %v9368_v60 = vld [vmem:[%s7588_s28 + $0x6b] sm:$0xff] }
 0x3bd   : > { %v9343_v30 = vadd.f32 %v2669_v52, %v2554_v40  ;;  %6477 = vmatmul.msk.f32.gmra.mxu1 %vm279_vm1, %v8885_v50  ;;  %6524 = vmatmul.msk.f32.gmra.mxu2 %vm279_vm1, %v8916_v53  ;;  %v6794_v52 = vld [vmem:[%s7560_s12 + $0x208] sm:$0xff] }
 0x3be   : > { %4207 = vmatpush.msrb.mxu0 %v6794_v52 }
 0x3bf   : > { %6571 = vmatmul.msk.f32.gmra.mxu3 %vm279_vm1, %v9322_v33  ;;  %v2672_v15 = vpop.f32.mrf.mxu0 }
 0x3c0   : > { %v2334_v7 = vpop.f32.mrf.mxu2 }
 0x3c1   : > { %v2386_v35 = vadd.f32 %v2334_v7, %v2087_v1  ;;  %v6746_v7 = vld [vmem:[%s7560_s12 + $0xa50] sm:$0xff] }
 0x3c2   : > { %v2038_v22 = vpop.f32.mrf.mxu1  ;;  %v2503_v47 = vpop.f32.mrf.mxu3  ;;  %6618 = vmatmul.msk.f32.gmra.mxu0 %vm279_vm1, %v9353_v17  ;;  %3909 = vmatpush.msrb.mxu3 %v6746_v7 }
 0x3c3   : > { %v2555_v50 = vadd.f32 %v2503_v47, %v2386_v35  ;;  %v2088_v34 = vadd.f32 %v2038_v22, %v8874_v8  ;;  %v6652_v35 = vld [vmem:[%s7560_s12 + $0x5f0] sm:$0xff] }
 0x3c4   : > { %3571 = vmatpush.msrb.mxu1 %v6652_v35  ;;  %v9385_v47 = vld [vmem:[%s7588_s28 + $0x7b] sm:$0xff] }
 0x3c5   : > { %v9358_v4 = vadd.f32 %v2672_v15, %v2555_v50  ;;  %6478 = vmatmul.msk.f32.gmra.mxu1 %vm279_vm1, %v8900_v3  ;;  %6525 = vmatmul.msk.f32.gmra.mxu2 %vm279_vm1, %v8932_v11 }
 0x3c7   : > { %6572 = vmatmul.msk.f32.gmra.mxu3 %vm279_vm1, %v9336_v31  ;;  %v2675_v37 = vpop.f32.mrf.mxu0 }
 0x3c8   : > { %v2337_v43 = vpop.f32.mrf.mxu2 }
 0x3c9   : > { %v2387_v40 = vadd.f32 %v2337_v43, %v2088_v34 }
 0x3ca   : > { %v2041_v1 = vpop.f32.mrf.mxu1  ;;  %v2506_v15 = vpop.f32.mrf.mxu3  ;;  %6619 = vmatmul.msk.f32.gmra.mxu0 %vm279_vm1, %v9368_v60 }
 0x3cb   : > { %v2556_v3 = vadd.f32 %v2506_v15, %v2387_v40  ;;  %v2089_v52 = vadd.f32 %v2041_v1, %v8890_v9  ;;  %v6793_v40 = vld [vmem:[%s7560_s12 + $0x200] sm:$0xff] }
 0x3cc   : > { %4208 = vmatpush.msrb.mxu0 %v6793_v40  ;;  %v9400_v15 = vld [vmem:[%s7588_s28 + $0x83] sm:$0xff] }
 0x3cd   : > { %v9374_v8 = vadd.f32 %v2675_v37, %v2556_v3  ;;  %6479 = vmatmul.msk.f32.gmra.mxu1 %vm279_vm1, %v8916_v53  ;;  %6526 = vmatmul.msk.f32.gmra.mxu2 %vm279_vm1, %v8947_v16 }
 0x3cf   : > { %6573 = vmatmul.msk.f32.gmra.mxu3 %vm279_vm1, %v9353_v17  ;;  %v2678_v22 = vpop.f32.mrf.mxu0 }
 0x3d0   : > { %v2340_v50 = vpop.f32.mrf.mxu2 }
 0x3d1   : > { %v2388_v34 = vadd.f32 %v2340_v50, %v2089_v52 }
 0x3d2   : > { %v2044_v37 = vpop.f32.mrf.mxu1  ;;  %v2509_v43 = vpop.f32.mrf.mxu3  ;;  %6620 = vmatmul.msk.f32.gmra.mxu0 %vm279_vm1, %v9385_v47 }
 0x3d3   : > { %v2557_v53 = vadd.f32 %v2509_v43, %v2388_v34  ;;  %v2090_v9 = vadd.f32 %v2044_v37, %v8905_v25  ;;  %v6745_v25 = vld [vmem:[%s7560_s12 + $0xa48] sm:$0xff] }
 0x3d4   : > { %3910 = vmatpush.msrb.mxu3 %v6745_v25  ;;  %v9416_v43 = vld [vmem:[%s7588_s28 + $0x93] sm:$0xff] }
 0x3d5   : > { %v9390_v41 = vadd.f32 %v2678_v22, %v2557_v53  ;;  %6480 = vmatmul.msk.f32.gmra.mxu1 %vm279_vm1, %v8932_v11  ;;  %6527 = vmatmul.msk.f32.gmra.mxu2 %vm279_vm1, %v8963_v19  ;;  %v6698_v22 = vld [vmem:[%s7560_s12 + $0x818] sm:$0xff]  ;;  %v6651_v53 = vld [vmem:[%s7560_s12 + $0x5e8] sm:$0xff] }
 0x3d6   : > { %3741 = vmatpush.msrb.mxu2 %v6698_v22  ;;  %3572 = vmatpush.msrb.mxu1 %v6651_v53 }
 0x3d7   : > { %6574 = vmatmul.msk.f32.gmra.mxu3 %vm279_vm1, %v9368_v60  ;;  %v2681_v1 = vpop.f32.mrf.mxu0 }
 0x3d8   : > { %v2343_v3 = vpop.f32.mrf.mxu2 }
 0x3d9   : > { %v2389_v7 = vadd.f32 %v2343_v3, %v2090_v9 }
 0x3da   : > { %v2047_v35 = vpop.f32.mrf.mxu1  ;;  %v2512_v52 = vpop.f32.mrf.mxu3  ;;  %6621 = vmatmul.msk.f32.gmra.mxu0 %vm279_vm1, %v9400_v15 }
 0x3db   : > { %v2558_v11 = vadd.f32 %v2512_v52, %v2389_v7  ;;  %v2091_v34 = vadd.f32 %v2047_v35, %v8921_v45  ;;  %v6792_v45 = vld [vmem:[%s7560_s12 + $0x1f8] sm:$0xff] }
 0x3dc   : > { %4209 = vmatpush.msrb.mxu0 %v6792_v45 }
 0x3dd   : > { %v9405_v50 = vadd.f32 %v2681_v1, %v2558_v11  ;;  %6481 = vmatmul.msk.f32.gmra.mxu1 %vm279_vm1, %v8947_v16  ;;  %6528 = vmatmul.msk.f32.gmra.mxu2 %vm279_vm1, %v8978_v38  ;;  %v9432_v11 = vld [vmem:[%s7588_s28 + $0x9b] sm:$0xff] }
 0x3df   : > { %6575 = vmatmul.msk.f32.gmra.mxu3 %vm279_vm1, %v9385_v47  ;;  %v2684_v37 = vpop.f32.mrf.mxu0 }
 0x3e0   : > { %v2346_v40 = vpop.f32.mrf.mxu2 }
 0x3e1   : > { %v2390_v9 = vadd.f32 %v2346_v40, %v2091_v34 }
 0x3e2   : > { %v2050_v16 = vpop.f32.mrf.mxu1  ;;  %v2515_v1 = vpop.f32.mrf.mxu3  ;;  %6622 = vmatmul.msk.f32.gmra.mxu0 %vm279_vm1, %v9416_v43 }
 0x3e3   : > { %v2559_v3 = vadd.f32 %v2515_v1, %v2390_v9  ;;  %v2092_v35 = vadd.f32 %v2050_v16, %v8936_v39  ;;  %v6697_v39 = vld [vmem:[%s7560_s12 + $0x810] sm:$0xff]  ;;  %v6744_v1 = vld [vmem:[%s7560_s12 + $0xa40] sm:$0xff] }
 0x3e4   : > { %3742 = vmatpush.msrb.mxu2 %v6697_v39  ;;  %v9447_v16 = vld [vmem:[%s7588_s28 + $0xab] sm:$0xff]  ;;  %3911 = vmatpush.msrb.mxu3 %v6744_v1 }
 0x3e5   : > { %v9421_v7 = vadd.f32 %v2684_v37, %v2559_v3  ;;  %6482 = vmatmul.msk.f32.gmra.mxu1 %vm279_vm1, %v8963_v19  ;;  %6529 = vmatmul.msk.f32.gmra.mxu2 %vm279_vm1, %v8995_v24 }
 0x3e7   : > { %6576 = vmatmul.msk.f32.gmra.mxu3 %vm279_vm1, %v9400_v15  ;;  %v2687_v52 = vpop.f32.mrf.mxu0 }
 0x3e8   : > { %v2349_v22 = vpop.f32.mrf.mxu2 }
 0x3e9   : > { %v2391_v25 = vadd.f32 %v2349_v22, %v2092_v35 }
 0x3ea   : > { %v2053_v34 = vpop.f32.mrf.mxu1  ;;  %v2518_v19 = vpop.f32.mrf.mxu3  ;;  %6623 = vmatmul.msk.f32.gmra.mxu0 %vm279_vm1, %v9432_v11 }
 0x3eb   : > { %v2560_v37 = vadd.f32 %v2518_v19, %v2391_v25  ;;  %v2093_v40 = vadd.f32 %v2053_v34, %v8953_v42  ;;  %v9463_v19 = vld [vmem:[%s7588_s28 + $0xb3] sm:$0xff] }
 0x3ed   : > { %v9436_v53 = vadd.f32 %v2687_v52, %v2560_v37  ;;  %6483 = vmatmul.msk.f32.gmra.mxu1 %vm279_vm1, %v8978_v38  ;;  %6530 = vmatmul.msk.f32.gmra.mxu2 %vm279_vm1, %v9010_v58  ;;  %v6650_v38 = vld [vmem:[%s7560_s12 + $0x5e0] sm:$0xff]  ;;  %v6791_v37 = vld [vmem:[%s7560_s12 + $0x1f0] sm:$0xff] }
 0x3ee   : > { %3573 = vmatpush.msrb.mxu1 %v6650_v38  ;;  %4210 = vmatpush.msrb.mxu0 %v6791_v37  ;;  %v9478_v38 = vld [vmem:[%s7588_s28 + $0xc3] sm:$0xff] }
 0x3ef   : > { %6577 = vmatmul.msk.f32.gmra.mxu3 %vm279_vm1, %v9416_v43  ;;  %v2690_v9 = vpop.f32.mrf.mxu0  ;;  %v6743_v37 = vld [vmem:[%s7560_s12 + $0xa38] sm:$0xff] }
 0x3f0   : > { %v2352_v3 = vpop.f32.mrf.mxu2  ;;  %3912 = vmatpush.msrb.mxu3 %v6743_v37 }
 0x3f1   : > { %v2392_v45 = vadd.f32 %v2352_v3, %v2093_v40 }
 0x3f2   : > { %v2056_v35 = vpop.f32.mrf.mxu1  ;;  %v2521_v52 = vpop.f32.mrf.mxu3  ;;  %6624 = vmatmul.msk.f32.gmra.mxu0 %vm279_vm1, %v9447_v16 }
 0x3f3   : > { %v2561_v42 = vadd.f32 %v2521_v52, %v2392_v45  ;;  %v2094_v25 = vadd.f32 %v2056_v35, %v8968_v23 }
 0x3f5   : > { %v9453_v22 = vadd.f32 %v2690_v9, %v2561_v42  ;;  %6484 = vmatmul.msk.f32.gmra.mxu1 %vm279_vm1, %v8995_v24  ;;  %6531 = vmatmul.msk.f32.gmra.mxu2 %vm279_vm1, %v9027_v6  ;;  %v6696_v42 = vld [vmem:[%s7560_s12 + $0x808] sm:$0xff] }
 0x3f6   : > { %3743 = vmatpush.msrb.mxu2 %v6696_v42 }
 0x3f7   : > { %6578 = vmatmul.msk.f32.gmra.mxu3 %vm279_vm1, %v9432_v11  ;;  %v2693_v34 = vpop.f32.mrf.mxu0 }
 0x3f8   : > { %v2355_v39 = vpop.f32.mrf.mxu2 }
 0x3f9   : > { %v2393_v40 = vadd.f32 %v2355_v39, %v2094_v25  ;;  %v6649_v39 = vld [vmem:[%s7560_s12 + $0x5d8] sm:$0xff] }
 0x3fa   : > { %v2059_v9 = vpop.f32.mrf.mxu1  ;;  %v2524_v1 = vpop.f32.mrf.mxu3  ;;  %6625 = vmatmul.msk.f32.gmra.mxu0 %vm279_vm1, %v9463_v19  ;;  %3574 = vmatpush.msrb.mxu1 %v6649_v39 }
 0x3fb   : > { %v2562_v24 = vadd.f32 %v2524_v1, %v2393_v40  ;;  %v2095_v3 = vadd.f32 %v2059_v9, %v8984_v5  ;;  %v9495_v1 = vld [vmem:[%s7588_s28 + $0xcb] sm:$0xff] }
 0x3fd   : > { %v9468_v23 = vadd.f32 %v2693_v34, %v2562_v24  ;;  %6485 = vmatmul.msk.f32.gmra.mxu1 %vm279_vm1, %v9010_v58  ;;  %6532 = vmatmul.msk.f32.gmra.mxu2 %vm279_vm1, %v9042_v20 }
 0x3ff   : > { %6579 = vmatmul.msk.f32.gmra.mxu3 %vm279_vm1, %v9447_v16  ;;  %v2696_v45 = vpop.f32.mrf.mxu0 }
 0x400   : > { %v2358_v35 = vpop.f32.mrf.mxu2 }
 0x401   : > { %v2394_v52 = vadd.f32 %v2358_v35, %v2095_v3 }
 0x402   : > { %v2062_v25 = vpop.f32.mrf.mxu1  ;;  %v2527_v34 = vpop.f32.mrf.mxu3  ;;  %6626 = vmatmul.msk.f32.gmra.mxu0 %vm279_vm1, %v9478_v38 }
 0x403   : > { %v2563_v58 = vadd.f32 %v2527_v34, %v2394_v52  ;;  %v2096_v40 = vadd.f32 %v2062_v25, %v9000_v56  ;;  %v6790_v52 = vld [vmem:[%s7560_s12 + $0x1e8] sm:$0xff] }
 0x404   : > { %4211 = vmatpush.msrb.mxu0 %v6790_v52  ;;  %v9510_v34 = vld [vmem:[%s7588_s28 + $0xdb] sm:$0xff] }
 0x405   : > { %v9484_v5 = vadd.f32 %v2696_v45, %v2563_v58  ;;  %6486 = vmatmul.msk.f32.gmra.mxu1 %vm279_vm1, %v9027_v6  ;;  %6533 = vmatmul.msk.f32.gmra.mxu2 %vm279_vm1, %v9058_v12 }
 0x407   : > { %6580 = vmatmul.msk.f32.gmra.mxu3 %vm279_vm1, %v9463_v19  ;;  %v2699_v9 = vpop.f32.mrf.mxu0 }
 0x408   : > { %v2361_v24 = vpop.f32.mrf.mxu2 }
 0x409   : > { %v2395_v3 = vadd.f32 %v2361_v24, %v2096_v40 }
 0x40a   : > { %v2530_v45 = vpop.f32.mrf.mxu3  ;;  %v2775_v35 = vpop.f32.mrf.mxu1  ;;  %6627 = vmatmul.msk.f32.gmra.mxu0 %vm279_vm1, %v9495_v1 }
 0x40b   : > { %v2564_v6 = vadd.f32 %v2530_v45, %v2395_v3  ;;  %v2871_v56 = vadd.f32 %v2775_v35, %v9015_v18  ;;  %v6742_v18 = vld [vmem:[%s7560_s12 + $0xa30] sm:$0xff] }
 0x40c   : > { %v6648_v3 = vld [vmem:[%s7560_s12 + $0x5d0] sm:$0xff]  ;;  %3913 = vmatpush.msrb.mxu3 %v6742_v18 }
 0x40d   : > { %v9500_v42 = vadd.f32 %v2699_v9, %v2564_v6  ;;  %6487 = vmatmul.msk.f32.gmra.mxu1 %vm279_vm1, %v9042_v20  ;;  %6534 = vmatmul.msk.f32.gmra.mxu2 %vm279_vm1, %v9074_v63  ;;  %v6695_v9 = vld [vmem:[%s7560_s12 + $0x800] sm:$0xff] }
 0x40e   : > { %3744 = vmatpush.msrb.mxu2 %v6695_v9  ;;  %3575 = vmatpush.msrb.mxu1 %v6648_v3  ;;  %v9527_v6 = vld [vmem:[%s7588_s28 + $0xe3] sm:$0xff] }
 0x40f   : > { %6581 = vmatmul.msk.f32.gmra.mxu3 %vm279_vm1, %v9478_v38  ;;  %v3412_v25 = vpop.f32.mrf.mxu0 }
 0x410   : > { %v2944_v58 = vpop.f32.mrf.mxu2 }
 0x411   : > { %v3040_v37 = vadd.f32 %v2944_v58, %v2871_v56 }
 0x412   : > { %v2778_v39 = vpop.f32.mrf.mxu1  ;;  %v3243_v40 = vpop.f32.mrf.mxu3  ;;  %6628 = vmatmul.msk.f32.gmra.mxu0 %vm279_vm1, %v9510_v34 }
 0x413   : > { %v3339_v20 = vadd.f32 %v3243_v40, %v3040_v37  ;;  %v2872_v45 = vadd.f32 %v2778_v39, %v9031_v2  ;;  %v6789_v2 = vld [vmem:[%s7560_s12 + $0x1e0] sm:$0xff] }
 0x414   : > { %4212 = vmatpush.msrb.mxu0 %v6789_v2 }
 0x415   : > { %v9515_v24 = vadd.f32 %v3412_v25, %v3339_v20  ;;  %6488 = vmatmul.msk.f32.gmra.mxu1 %vm279_vm1, %v9058_v12  ;;  %6535 = vmatmul.msk.f32.gmra.mxu2 %vm279_vm1, %v9088_v0  ;;  %v9542_v20 = vld [vmem:[%s7588_s28 + $0xf3] sm:$0xff] }
 0x417   : > { %6582 = vmatmul.msk.f32.gmra.mxu3 %vm279_vm1, %v9495_v1  ;;  %v3415_v35 = vpop.f32.mrf.mxu0 }
 0x418   : > { %v2947_v52 = vpop.f32.mrf.mxu2 }
 0x419   : > { %v3041_v56 = vadd.f32 %v2947_v52, %v2872_v45  ;;  %v6741_v52 = vld [vmem:[%s7560_s12 + $0xa28] sm:$0xff] }
 0x41a   : > { %v2781_v12 = vpop.f32.mrf.mxu1  ;;  %v3246_v25 = vpop.f32.mrf.mxu3  ;;  %6629 = vmatmul.msk.f32.gmra.mxu0 %vm279_vm1, %v9527_v6  ;;  %3914 = vmatpush.msrb.mxu3 %v6741_v52 }
 0x41b   : > { %v3340_v58 = vadd.f32 %v3246_v25, %v3041_v56  ;;  %v2873_v39 = vadd.f32 %v2781_v12, %v9046_v48  ;;  %v6694_v48 = vld [vmem:[%s7560_s12 + $0x7f8] sm:$0xff] }
 0x41c   : > { %3745 = vmatpush.msrb.mxu2 %v6694_v48  ;;  %v9558_v25 = vld [vmem:[%s7588_s28 + $0xfb] sm:$0xff] }
 0x41d   : > { %v9531_v37 = vadd.f32 %v3415_v35, %v3340_v58  ;;  %6489 = vmatmul.msk.f32.gmra.mxu1 %vm279_vm1, %v9074_v63  ;;  %6536 = vmatmul.msk.f32.gmra.mxu2 %vm279_vm1, %v9105_v49 }
 0x41f   : > { %6583 = vmatmul.msk.f32.gmra.mxu3 %vm279_vm1, %v9510_v34  ;;  %v3418_v40 = vpop.f32.mrf.mxu0 }
 0x420   : > { %v2950_v9 = vpop.f32.mrf.mxu2 }
 0x421   : > { %v3042_v18 = vadd.f32 %v2950_v9, %v2873_v39 }
 0x422   : > { %v2784_v3 = vpop.f32.mrf.mxu1  ;;  %v3249_v63 = vpop.f32.mrf.mxu3  ;;  %6630 = vmatmul.msk.f32.gmra.mxu0 %vm279_vm1, %v9542_v20 }
 0x423   : > { %v3341_v45 = vadd.f32 %v3249_v63, %v3042_v18  ;;  %v2874_v56 = vadd.f32 %v2784_v3, %v9063_v27  ;;  %v6788_v27 = vld [vmem:[%s7560_s12 + $0x1d8] sm:$0xff] }
 0x424   : > { %4213 = vmatpush.msrb.mxu0 %v6788_v27  ;;  %v6740_v27 = vld [vmem:[%s7560_s12 + $0xa20] sm:$0xff] }
 0x425   : > { %v9546_v35 = vadd.f32 %v3418_v40, %v3341_v45  ;;  %6490 = vmatmul.msk.f32.gmra.mxu1 %vm279_vm1, %v9088_v0  ;;  %6537 = vmatmul.msk.f32.gmra.mxu2 %vm279_vm1, %v9120_v14  ;;  %v6647_v0 = vld [vmem:[%s7560_s12 + $0x5c8] sm:$0xff] }
 0x426   : > { %3576 = vmatpush.msrb.mxu1 %v6647_v0  ;;  %v9574_v45 = vld [vmem:[%s7588_s28 + $0x10b] sm:$0xff]  ;;  %v9588_v0 = vld [vmem:[%s7588_s28 + $0x113] sm:$0xff]  ;;  %3915 = vmatpush.msrb.mxu3 %v6740_v27 }
 0x427   : > { %6584 = vmatmul.msk.f32.gmra.mxu3 %vm279_vm1, %v9527_v6  ;;  %v3421_v12 = vpop.f32.mrf.mxu0 }
 0x428   : > { %v2953_v58 = vpop.f32.mrf.mxu2 }
 0x429   : > { %v3043_v2 = vadd.f32 %v2953_v58, %v2874_v56 }
 0x42a   : > { %v2787_v39 = vpop.f32.mrf.mxu1  ;;  %v3252_v40 = vpop.f32.mrf.mxu3  ;;  %6631 = vmatmul.msk.f32.gmra.mxu0 %vm279_vm1, %v9558_v25 }
 0x42b   : > { %v3342_v9 = vadd.f32 %v3252_v40, %v3043_v2  ;;  %v2875_v3 = vadd.f32 %v2787_v39, %v9078_v51  ;;  %v6693_v39 = vld [vmem:[%s7560_s12 + $0x7f0] sm:$0xff] }
 0x42c   : > { %3746 = vmatpush.msrb.mxu2 %v6693_v39 }
 0x42d   : > { %v9563_v18 = vadd.f32 %v3421_v12, %v3342_v9  ;;  %6491 = vmatmul.msk.f32.gmra.mxu1 %vm279_vm1, %v9105_v49  ;;  %6538 = vmatmul.msk.f32.gmra.mxu2 %vm279_vm1, %v9137_v62 }
 0x42f   : > { %6585 = vmatmul.msk.f32.gmra.mxu3 %vm279_vm1, %v9542_v20  ;;  %v3424_v63 = vpop.f32.mrf.mxu0 }
 0x430   : > { %v2956_v48 = vpop.f32.mrf.mxu2 }
 0x431   : > { %v3044_v52 = vadd.f32 %v2956_v48, %v2875_v3 }
 0x432   : > { %v2790_v56 = vpop.f32.mrf.mxu1  ;;  %v3255_v49 = vpop.f32.mrf.mxu3  ;;  %6632 = vmatmul.msk.f32.gmra.mxu0 %vm279_vm1, %v9574_v45 }
 0x433   : > { %v3343_v12 = vadd.f32 %v3255_v49, %v3044_v52  ;;  %v2876_v51 = vadd.f32 %v2790_v56, %v9095_v32  ;;  %v9605_v49 = vld [vmem:[%s7588_s28 + $0x123] sm:$0xff] }
 0x435   : > { %v9578_v58 = vadd.f32 %v3424_v63, %v3343_v12  ;;  %6492 = vmatmul.msk.f32.gmra.mxu1 %vm279_vm1, %v9120_v14  ;;  %6539 = vmatmul.msk.f32.gmra.mxu2 %vm279_vm1, %v9152_v10  ;;  %v6646_v63 = vld [vmem:[%s7560_s12 + $0x5c0] sm:$0xff] }
 0x436   : > { %3577 = vmatpush.msrb.mxu1 %v6646_v63 }
 0x437   : > { %6586 = vmatmul.msk.f32.gmra.mxu3 %vm279_vm1, %v9558_v25  ;;  %v3427_v2 = vpop.f32.mrf.mxu0 }
 0x438   : > { %v2959_v40 = vpop.f32.mrf.mxu2 }
 0x439   : > { %v3045_v9 = vadd.f32 %v2959_v40, %v2876_v51 }
 0x43a   : > { %v2793_v3 = vpop.f32.mrf.mxu1  ;;  %v3258_v14 = vpop.f32.mrf.mxu3  ;;  %6633 = vmatmul.msk.f32.gmra.mxu0 %vm279_vm1, %v9588_v0 }
 0x43b   : > { %v3344_v32 = vadd.f32 %v3258_v14, %v3045_v9  ;;  %v2877_v52 = vadd.f32 %v2793_v3, %v9110_v13  ;;  %v11058_v9 = vld [vmem:[#allocation12_spill] sm:$0xff]  ;;  %v9620_v14 = vld [vmem:[%s7588_s28 + $0x12b] sm:$0xff] }
 0x43d   : > { %v9595_v48 = vadd.f32 %v3427_v2, %v3344_v32  ;;  %6493 = vmatmul.msk.f32.gmra.mxu1 %vm279_vm1, %v9137_v62  ;;  %6540 = vmatmul.msk.f32.gmra.mxu2 %vm279_vm1, %v9168_v59  ;;  %v6787_v2 = vld [vmem:[%s7560_s12 + $0x1d0] sm:$0xff] }
 0x43e   : > { %4214 = vmatpush.msrb.mxu0 %v6787_v2 }
 0x43f   : > { %11056 = vst [vmem:[#allocation22_spill] sm:$0xff] %v9595_v48  ;;  %6587 = vmatmul.msk.f32.gmra.mxu3 %vm279_vm1, %v9574_v45  ;;  %v3430_v56 = vpop.f32.mrf.mxu0 }
 0x440   : > { %v2962_v12 = vpop.f32.mrf.mxu2 }
 0x441   : > { %v3046_v51 = vadd.f32 %v2962_v12, %v2877_v52  ;;  %v6692_v52 = vld [vmem:[%s7560_s12 + $0x7e8] sm:$0xff] }
 0x442   : > { %v2796_v39 = vpop.f32.mrf.mxu1  ;;  %v3261_v40 = vpop.f32.mrf.mxu3  ;;  %6634 = vmatmul.msk.f32.gmra.mxu0 %vm279_vm1, %v9605_v49  ;;  %3747 = vmatpush.msrb.mxu2 %v6692_v52 }
 0x443   : > { %v3345_v62 = vadd.f32 %v3261_v40, %v3046_v51  ;;  %v2878_v27 = vadd.f32 %v2796_v39, %v11058_v9  ;;  %v6739_v51 = vld [vmem:[%s7560_s12 + $0xa18] sm:$0xff] }
 0x444   : > { %3916 = vmatpush.msrb.mxu3 %v6739_v51  ;;  %v6645_v39 = vld [vmem:[%s7560_s12 + $0x5b8] sm:$0xff] }
 0x445   : > { %v9610_v13 = vadd.f32 %v3430_v56, %v3345_v62  ;;  %6494 = vmatmul.msk.f32.gmra.mxu1 %vm279_vm1, %v9152_v10  ;;  %6541 = vmatmul.msk.f32.gmra.mxu2 %vm279_vm1, %v9184_v26  ;;  %v11060_v40 = vld [vmem:[#allocation13_spill] sm:$0xff] }
 0x446   : > { %3578 = vmatpush.msrb.mxu1 %v6645_v39 }
 0x447   : > { %11057 = vst [vmem:[#allocation23_spill] sm:$0xff] %v9610_v13  ;;  %6588 = vmatmul.msk.f32.gmra.mxu3 %vm279_vm1, %v9588_v0  ;;  %v3433_v3 = vpop.f32.mrf.mxu0  ;;  %v6986_v13 = vld [vmem:[%s7560_s12 + $0xae8] sm:$0x1] }
 0x448   : > { %v2965_v32 = vpop.f32.mrf.mxu2 }
 0x449   : > { %v3047_v63 = vadd.f32 %v2965_v32, %v2878_v27  ;;  %v9637_v27 = vld [vmem:[%s7588_s28 + $0x13b] sm:$0xff] }
 0x44a   : > { %v2799_v56 = vpop.f32.mrf.mxu1  ;;  %v3264_v12 = vpop.f32.mrf.mxu3  ;;  %6635 = vmatmul.msk.f32.gmra.mxu0 %vm279_vm1, %v9620_v14 }
 0x44b   : > { %v3346_v10 = vadd.f32 %v3264_v12, %v3047_v63  ;;  %v2879_v62 = vadd.f32 %v2799_v56, %v11060_v40  ;;  %v6786_v12 = vld [vmem:[%s7560_s12 + $0x1c8] sm:$0xff]  ;;  %v11062_v56 = vld [vmem:[#allocation14_spill] sm:$0xff] }
 0x44c   : > { %4215 = vmatpush.msrb.mxu0 %v6786_v12  ;;  %v9652_v40 = vld [vmem:[%s7588_s28 + $0x143] sm:$0xff]  ;;  %v11064_v12 = vld [vmem:[#allocation15_spill] sm:$0xff] }
 0x44d   : > { %v9626_v2 = vadd.f32 %v3433_v3, %v3346_v10  ;;  %6495 = vmatmul.msk.f32.gmra.mxu1 %vm279_vm1, %v9168_v59  ;;  %6542 = vmatmul.msk.f32.gmra.mxu2 %vm279_vm1, %v9200_v55 }
 0x44f   : > { %11059 = vst [vmem:[#allocation12_spill] sm:$0xff] %v9626_v2  ;;  %6589 = vmatmul.msk.f32.gmra.mxu3 %vm279_vm1, %v9605_v49  ;;  %v3436_v9 = vpop.f32.mrf.mxu0  ;;  %v2134_v2 = vld [vmem:[%s7588_s28 + $0x1ba] sm:$0xff] }
 0x450   : > { %v2968_v32 = vpop.f32.mrf.mxu2 }
 0x451   : > { %v3048_v3 = vadd.f32 %v2968_v32, %v2879_v62 }
 0x452   : > { %v2802_v63 = vpop.f32.mrf.mxu1  ;;  %v3267_v52 = vpop.f32.mrf.mxu3  ;;  %6636 = vmatmul.msk.f32.gmra.mxu0 %vm279_vm1, %v9637_v27 }
 0x453   : > { %v3347_v59 = vadd.f32 %v3267_v52, %v3048_v3  ;;  %v2880_v51 = vadd.f32 %v2802_v63, %v11062_v56  ;;  %v6691_v52 = vld [vmem:[%s7560_s12 + $0x7e0] sm:$0xff]  ;;  %v6738_v63 = vld [vmem:[%s7560_s12 + $0xa10] sm:$0xff] }
 0x454   : > { %3748 = vmatpush.msrb.mxu2 %v6691_v52  ;;  %3917 = vmatpush.msrb.mxu3 %v6738_v63 }
 0x455   : > { %v9642_v10 = vadd.f32 %v3436_v9, %v3347_v59  ;;  %6496 = vmatmul.msk.f32.gmra.mxu1 %vm279_vm1, %v9184_v26  ;;  %6543 = vmatmul.msk.f32.gmra.mxu2 %vm279_vm1, %v9218_v61 }
 0x457   : > { %11061 = vst [vmem:[#allocation13_spill] sm:$0xff] %v9642_v10  ;;  %6590 = vmatmul.msk.f32.gmra.mxu3 %vm279_vm1, %v9620_v14  ;;  %v3439_v39 = vpop.f32.mrf.mxu0  ;;  %v9700_v10 = vld [vmem:[%s7588_s28 + $0x16b] sm:$0xff] }
 0x458   : > { %v2971_v62 = vpop.f32.mrf.mxu2 }
 0x459   : > { %v3049_v32 = vadd.f32 %v2971_v62, %v2880_v51  ;;  %v9668_v62 = vld [vmem:[%s7588_s28 + $0x153] sm:$0xff] }
 0x45a   : > { %v2805_v9 = vpop.f32.mrf.mxu1  ;;  %v3270_v3 = vpop.f32.mrf.mxu3  ;;  %6637 = vmatmul.msk.f32.gmra.mxu0 %vm279_vm1, %v9652_v40 }
 0x45b   : > { %v3348_v26 = vadd.f32 %v3270_v3, %v3049_v32  ;;  %v2881_v56 = vadd.f32 %v2805_v9, %v11064_v12  ;;  %v6644_v32 = vld [vmem:[%s7560_s12 + $0x5b0] sm:$0xff]  ;;  %v6785_v12 = vld [vmem:[%s7560_s12 + $0x1c0] sm:$0xff] }
 0x45c   : > { %3579 = vmatpush.msrb.mxu1 %v6644_v32  ;;  %v11066_v9 = vld [vmem:[#allocation18_spill] sm:$0xff]  ;;  %4216 = vmatpush.msrb.mxu0 %v6785_v12  ;;  %v11067_v32 = vld [vmem:[#allocation16_spill] sm:$0xff] }
 0x45d   : > { %v9657_v59 = vadd.f32 %v3439_v39, %v3348_v26  ;;  %6497 = vmatmul.msk.f32.gmra.mxu1 %vm279_vm1, %v9200_v55  ;;  %6544 = vmatmul.msk.f32.gmra.mxu2 %vm279_vm1, %v9234_v29 }
 0x45e   : > { %6987 = vmatpush.msk.msra.mxu0 %vm376_vm0, %v6986_v13  ;;  %v9733_v13 = vld [vmem:[%s7588_s28 + $0x183] sm:$0xff] }
 0x45f   : > { %11063 = vst [vmem:[#allocation14_spill] sm:$0xff] %v9657_v59  ;;  %6591 = vmatmul.msk.f32.gmra.mxu3 %vm279_vm1, %v9637_v27  ;;  %v3442_v51 = vpop.f32.mrf.mxu0  ;;  %v9684_v59 = vld [vmem:[%s7588_s28 + $0x15b] sm:$0xff] }
 0x460   : > { %v2974_v39 = vpop.f32.mrf.mxu2  ;;  %11068 = vst [vmem:[#allocation18_spill] sm:$0xff] %v9684_v59 }
 0x461   : > { %v3050_v3 = vadd.f32 %v2974_v39, %v2881_v56 }
 0x462   : > { %v2808_v55 = vpop.f32.mrf.mxu1  ;;  %v3273_v26 = vpop.f32.mrf.mxu3  ;;  %6638 = vmatmul.msk.f32.gmra.mxu0 %vm279_vm1, %v9668_v62 }
 0x463   : > { %v3349_v52 = vadd.f32 %v3273_v26, %v3050_v3  ;;  %v2882_v56 = vadd.f32 %v2808_v55, %v11067_v32  ;;  %v6892_v55 = vld [vmem:[%s7560_s12 + $0x688] sm:$0x1] }
 0x464   : > { %6893 = vmatpush.msk.msra.mxu2 %vm376_vm0, %v6892_v55  ;;  %v11070_v32 = vld [vmem:[#allocation19_spill] sm:$0xff] }
 0x465   : > { %v9673_v63 = vadd.f32 %v3442_v51, %v3349_v52  ;;  %6498 = vmatmul.msk.f32.gmra.mxu1 %vm279_vm1, %v9218_v61  ;;  %6545 = vmatmul.msk.f32.gmra.mxu2 %vm279_vm1, %v11066_v9  ;;  %v2133_v52 = vld [vmem:[%s7588_s28 + $0x1b2] sm:$0xff] }
 0x467   : > { %11065 = vst [vmem:[#allocation15_spill] sm:$0xff] %v9673_v63  ;;  %6592 = vmatmul.msk.f32.gmra.mxu3 %vm279_vm1, %v9652_v40  ;;  %v3445_v39 = vpop.f32.mrf.mxu0 }
 0x468   : > { %v2977_v51 = vpop.f32.mrf.mxu2 }
 0x469   : > { %v3051_v3 = vadd.f32 %v2977_v51, %v2882_v56 }
 0x46a   : > { %v2811_v26 = vpop.f32.mrf.mxu1  ;;  %v3276_v61 = vpop.f32.mrf.mxu3  ;;  %6639 = vmatmul.msk.f32.gmra.mxu0 %vm279_vm1, %v9684_v59 }
 0x46b   : > { %v3350_v12 = vadd.f32 %v3276_v61, %v3051_v3  ;;  %v2883_v56 = vadd.f32 %v2811_v26, %v11070_v32  ;;  %v6939_v3 = vld [vmem:[%s7560_s12 + $0x8b8] sm:$0x1] }
 0x46c   : > { %6940 = vmatpush.msk.msra.mxu3 %vm376_vm0, %v6939_v3  ;;  %v6845_v61 = vld [vmem:[%s7560_s12 + $0x458] sm:$0x1] }
 0x46d   : > { %v9689_v63 = vadd.f32 %v3445_v39, %v3350_v12  ;;  %6499 = vmatmul.msk.f32.gmra.mxu1 %vm279_vm1, %v9234_v29  ;;  %6546 = vmatmul.msk.f32.gmra.mxu2 %vm279_vm1, %v2133_v52  ;;  %v11072_v32 = vld [vmem:[#allocation17_spill] sm:$0xff] }
 0x46e   : > { %6846 = vmatpush.msk.msra.mxu1 %vm376_vm0, %v6845_v61 }
 0x46f   : > { %11069 = vst [vmem:[#allocation16_spill] sm:$0xff] %v9689_v63  ;;  %6593 = vmatmul.msk.f32.gmra.mxu3 %vm279_vm1, %v9668_v62  ;;  %v3448_v51 = vpop.f32.mrf.mxu0 }
 0x470   : > { %v2980_v39 = vpop.f32.mrf.mxu2 }
 0x471   : > { %v3052_v29 = vadd.f32 %v2980_v39, %v2883_v56  ;;  %v9718_v39 = vld [vmem:[%s7588_s28 + $0x173] sm:$0xff] }
 0x472   : > { %v2814_v12 = vpop.f32.mrf.mxu1  ;;  %v3279_v63 = vpop.f32.mrf.mxu3  ;;  %6640 = vmatmul.msk.f32.gmra.mxu0 %vm279_vm1, %v9700_v10 }
 0x473   : > { %v3351_v26 = vadd.f32 %v3279_v63, %v3052_v29  ;;  %v2884_v56 = vadd.f32 %v2814_v12, %v11072_v32 }
 0x475   : > { %v9709_v55 = vadd.f32 %v3448_v51, %v3351_v26  ;;  %6500 = vmatmul.msk.f32.gmra.mxu1 %vm279_vm1, %v11066_v9  ;;  %6547 = vmatmul.msk.f32.gmra.mxu2 %vm279_vm1, %v2134_v2  ;;  %v2135_v9 = vld [vmem:[%s7588_s28 + $0x1ca] sm:$0xff] }
 0x476   : > { %v11073_v26 = vld [vmem:[#allocation21_spill] sm:$0xff] }
 0x477   : > { %11071 = vst [vmem:[#allocation19_spill] sm:$0xff] %v9709_v55  ;;  %6594 = vmatmul.msk.f32.gmra.mxu3 %vm279_vm1, %v9684_v59  ;;  %v3451_v3 = vpop.f32.mrf.mxu0  ;;  %v6891_v59 = vld [vmem:[%s7560_s12 + $0x680] sm:$0xff] }
 0x478   : > { %v2983_v48 = vpop.f32.mrf.mxu2  ;;  %4542 = vmatpush.msra.mxu2 %v6891_v59  ;;  %v9749_v59 = vld [vmem:[%s7588_s28 + $0x18b] sm:$0xff] }
 0x479   : > { %v3053_v63 = vadd.f32 %v2983_v48, %v2884_v56 }
 0x47a   : > { %v2817_v51 = vpop.f32.mrf.mxu1  ;;  %v3282_v29 = vpop.f32.mrf.mxu3  ;;  %6641 = vmatmul.msk.f32.gmra.mxu0 %vm279_vm1, %v9718_v39 }
 0x47b   : > { %v3352_v61 = vadd.f32 %v3282_v29, %v3053_v63  ;;  %v2885_v32 = vadd.f32 %v2817_v51, %v11073_v26  ;;  %v2136_v29 = vld [vmem:[%s7588_s28 + $0x1d2] sm:$0xff]  ;;  %v11074_v26 = vld [vmem:[#allocation20_spill] sm:$0xff] }
 0x47c   : > { %v6938_v51 = vld [vmem:[%s7560_s12 + $0x8b0] sm:$0xff] }
 0x47d   : > { %v9725_v12 = vadd.f32 %v3451_v3, %v3352_v61  ;;  %6501 = vmatmul.msk.f32.gmra.mxu1 %vm279_vm1, %v2133_v52  ;;  %6548 = vmatmul.msk.f32.gmra.mxu2 %vm279_vm1, %v2135_v9  ;;  %v6844_v61 = vld [vmem:[%s7560_s12 + $0x450] sm:$0xff] }
 0x47e   : > { %4711 = vmatpush.msra.mxu3 %v6938_v51  ;;  %4373 = vmatpush.msra.mxu1 %v6844_v61 }
 0x47f   : > { %6595 = vmatmul.msk.f32.gmra.mxu3 %vm279_vm1, %v9700_v10  ;;  %v3454_v48 = vpop.f32.mrf.mxu0 }
 0x480   : > { %v2986_v56 = vpop.f32.mrf.mxu2 }
 0x481   : > { %v3054_v55 = vadd.f32 %v2986_v56, %v2885_v32 }
 0x482   : > { %v2820_v63 = vpop.f32.mrf.mxu1  ;;  %v3285_v3 = vpop.f32.mrf.mxu3  ;;  %6642 = vmatmul.msk.f32.gmra.mxu0 %vm279_vm1, %v9733_v13 }
 0x483   : > { %v3353_v52 = vadd.f32 %v3285_v3, %v3054_v55  ;;  %v2886_v32 = vadd.f32 %v2820_v63, %v11074_v26  ;;  %v4047_v26 = vld [vmem:[%s7588_s28 + $0x4] sm:$0xff] }
 0x485   : > { %v9740_v9 = vadd.f32 %v3454_v48, %v3353_v52  ;;  %6502 = vmatmul.msk.f32.gmra.mxu1 %vm279_vm1, %v2134_v2  ;;  %6549 = vmatmul.msk.f32.gmra.mxu2 %vm279_vm1, %v2136_v29  ;;  %v6985_v29 = vld [vmem:[%s7560_s12 + $0xae0] sm:$0xff] }
 0x486   : > { %4880 = vmatpush.msra.mxu0 %v6985_v29 }
 0x487   : > { %6596 = vmatmul.msk.f32.gmra.mxu3 %vm279_vm1, %v9718_v39  ;;  %v3457_v56 = vpop.f32.mrf.mxu0 }
 0x488   : > { %v2989_v55 = vpop.f32.mrf.mxu2 }
 0x489   : > { %v3055_v3 = vadd.f32 %v2989_v55, %v2886_v32 }
 0x48a   : > { %v2823_v51 = vpop.f32.mrf.mxu1  ;;  %v3288_v48 = vpop.f32.mrf.mxu3  ;;  %6643 = vmatmul.msk.f32.gmra.mxu0 %vm279_vm1, %v9749_v59 }
 0x48b   : > { %v3354_v2 = vadd.f32 %v3288_v48, %v3055_v3  ;;  %v2887_v63 = vadd.f32 %v2823_v51, %v9269_v54  ;;  %v6890_v48 = vld [vmem:[%s7560_s12 + $0x678] sm:$0xff]  ;;  %v6937_v54 = vld [vmem:[%s7560_s12 + $0x8a8] sm:$0xff] }
 0x48c   : > { %4543 = vmatpush.msra.mxu2 %v6890_v48  ;;  %v6843_v51 = vld [vmem:[%s7560_s12 + $0x448] sm:$0xff]  ;;  %4712 = vmatpush.msra.mxu3 %v6937_v54 }
 0x48d   : > { %v9754_v52 = vadd.f32 %v3457_v56, %v3354_v2  ;;  %6659 = vmatmul.msk.f32.vlgmr.msrb.gmra.mxu1 %vm279_vm1, %v9291_v36  ;;  %6706 = vmatmul.msk.f32.vlgmr.msrb.gmra.mxu2 %vm279_vm1, %v9322_v33  ;;  %v9790_v54 = vld [vmem:[%s7588_s28 + $0x1c] sm:$0xff] }
 0x48e   : > { %4374 = vmatpush.msra.mxu1 %v6843_v51 }
 0x48f   : > { %6753 = vmatmul.msk.f32.vlgmr.msrb.gmra.mxu3 %vm279_vm1, %v9353_v17  ;;  %v3460_v61 = vpop.f32.mrf.mxu0 }
 0x490   : > { %v2992_v32 = vpop.f32.mrf.mxu2 }
 0x491   : > { %v3056_v55 = vadd.f32 %v2992_v32, %v2887_v63 }
 0x492   : > { %v2826_v3 = vpop.f32.mrf.mxu1  ;;  %v3291_v56 = vpop.f32.mrf.mxu3  ;;  %6800 = vmatmul.msk.f32.vlgmr.msrb.gmra.mxu0 %vm279_vm1, %v4047_v26 }
 0x493   : > { %v3355_v36 = vadd.f32 %v3291_v56, %v3056_v55  ;;  %v2888_v29 = vadd.f32 %v2826_v3, %v9281_v28  ;;  %v6984_v28 = vld [vmem:[%s7560_s12 + $0xad8] sm:$0xff] }
 0x494   : > { %4881 = vmatpush.msra.mxu0 %v6984_v28 }
 0x495   : > { %v9766_v2 = vadd.f32 %v3460_v61, %v3355_v36  ;;  %6660 = vmatmul.msk.f32.gmra.mxu1 %vm279_vm1, %v9306_v57  ;;  %6707 = vmatmul.msk.f32.gmra.mxu2 %vm279_vm1, %v9336_v31  ;;  %v4048_v61 = vld [vmem:[%s7588_s28 + $0xc] sm:$0xff] }
 0x497   : > { %6754 = vmatmul.msk.f32.gmra.mxu3 %vm279_vm1, %v9368_v60  ;;  %v3463_v63 = vpop.f32.mrf.mxu0 }
 0x498   : > { %v2995_v26 = vpop.f32.mrf.mxu2 }
 0x499   : > { %v3057_v32 = vadd.f32 %v2995_v26, %v2888_v29 }
 0x49a   : > { %v2829_v55 = vpop.f32.mrf.mxu1  ;;  %v3294_v57 = vpop.f32.mrf.mxu3  ;;  %6801 = vmatmul.msk.f32.gmra.mxu0 %vm279_vm1, %v4048_v61 }
 0x49b   : > { %v3356_v56 = vadd.f32 %v3294_v57, %v3057_v32  ;;  %v2889_v3 = vadd.f32 %v2829_v55, %v9295_v46  ;;  %v6889_v46 = vld [vmem:[%s7560_s12 + $0x670] sm:$0xff]  ;;  %v6936_v32 = vld [vmem:[%s7560_s12 + $0x8a0] sm:$0xff] }
 0x49c   : > { %4544 = vmatpush.msra.mxu2 %v6889_v46  ;;  %4713 = vmatpush.msra.mxu3 %v6936_v32  ;;  %v9822_v46 = vld [vmem:[%s7588_s28 + $0x34] sm:$0xff] }
 0x49d   : > { %v9779_v36 = vadd.f32 %v3463_v63, %v3356_v56  ;;  %6661 = vmatmul.msk.f32.gmra.mxu1 %vm279_vm1, %v9322_v33  ;;  %6708 = vmatmul.msk.f32.gmra.mxu2 %vm279_vm1, %v9353_v17  ;;  %v9806_v56 = vld [vmem:[%s7588_s28 + $0x24] sm:$0xff] }
 0x49f   : > { %6755 = vmatmul.msk.f32.gmra.mxu3 %vm279_vm1, %v9385_v47  ;;  %v3466_v48 = vpop.f32.mrf.mxu0 }
 0x4a0   : > { %v2998_v51 = vpop.f32.mrf.mxu2 }
 0x4a1   : > { %v3058_v29 = vadd.f32 %v2998_v51, %v2889_v3 }
 0x4a2   : > { %v2832_v63 = vpop.f32.mrf.mxu1  ;;  %v3297_v33 = vpop.f32.mrf.mxu3  ;;  %6802 = vmatmul.msk.f32.gmra.mxu0 %vm279_vm1, %v9790_v54 }
 0x4a3   : > { %v3357_v61 = vadd.f32 %v3297_v33, %v3058_v29  ;;  %v2890_v55 = vadd.f32 %v2832_v63, %v9311_v21  ;;  %v6983_v21 = vld [vmem:[%s7560_s12 + $0xad0] sm:$0xff] }
 0x4a4   : > { %4882 = vmatpush.msra.mxu0 %v6983_v21 }
 0x4a5   : > { %v9794_v26 = vadd.f32 %v3466_v48, %v3357_v61  ;;  %6662 = vmatmul.msk.f32.gmra.mxu1 %vm279_vm1, %v9336_v31  ;;  %6709 = vmatmul.msk.f32.gmra.mxu2 %vm279_vm1, %v9368_v60  ;;  %v6842_v31 = vld [vmem:[%s7560_s12 + $0x440] sm:$0xff] }
 0x4a6   : > { %4375 = vmatpush.msra.mxu1 %v6842_v31 }
 0x4a7   : > { %6756 = vmatmul.msk.f32.gmra.mxu3 %vm279_vm1, %v9400_v15  ;;  %v3469_v57 = vpop.f32.mrf.mxu0 }
 0x4a8   : > { %v3001_v28 = vpop.f32.mrf.mxu2 }
 0x4a9   : > { %v3059_v3 = vadd.f32 %v3001_v28, %v2890_v55 }
 0x4aa   : > { %v2835_v48 = vpop.f32.mrf.mxu1  ;;  %v3300_v51 = vpop.f32.mrf.mxu3  ;;  %6803 = vmatmul.msk.f32.gmra.mxu0 %vm279_vm1, %v9806_v56 }
 0x4ab   : > { %v3358_v29 = vadd.f32 %v3300_v51, %v3059_v3  ;;  %v2891_v63 = vadd.f32 %v2835_v48, %v9326_v44  ;;  %v9836_v48 = vld [vmem:[%s7588_s28 + $0x3c] sm:$0xff] }
 0x4ac   : > { %v6888_v51 = vld [vmem:[%s7560_s12 + $0x668] sm:$0xff] }
 0x4ad   : > { %v9811_v33 = vadd.f32 %v3469_v57, %v3358_v29  ;;  %6663 = vmatmul.msk.f32.gmra.mxu1 %vm279_vm1, %v9353_v17  ;;  %6710 = vmatmul.msk.f32.gmra.mxu2 %vm279_vm1, %v9385_v47 }
 0x4ae   : > { %4545 = vmatpush.msra.mxu2 %v6888_v51 }
 0x4af   : > { %6757 = vmatmul.msk.f32.gmra.mxu3 %vm279_vm1, %v9416_v43  ;;  %v3472_v61 = vpop.f32.mrf.mxu0 }
 0x4b0   : > { %v3004_v32 = vpop.f32.mrf.mxu2 }
 0x4b1   : > { %v3060_v55 = vadd.f32 %v3004_v32, %v2891_v63  ;;  %v6935_v63 = vld [vmem:[%s7560_s12 + $0x898] sm:$0xff] }
 0x4b2   : > { %v2838_v57 = vpop.f32.mrf.mxu1  ;;  %v3303_v17 = vpop.f32.mrf.mxu3  ;;  %6804 = vmatmul.msk.f32.gmra.mxu0 %vm279_vm1, %v9822_v46  ;;  %4714 = vmatpush.msra.mxu3 %v6935_v63  ;;  %v6841_v32 = vld [vmem:[%s7560_s12 + $0x438] sm:$0xff] }
 0x4b3   : > { %v3359_v28 = vadd.f32 %v3303_v17, %v3060_v55  ;;  %v2892_v44 = vadd.f32 %v2838_v57, %v9343_v30  ;;  %4376 = vmatpush.msra.mxu1 %v6841_v32 }
 0x4b5   : > { %v9826_v3 = vadd.f32 %v3472_v61, %v3359_v28  ;;  %6664 = vmatmul.msk.f32.gmra.mxu1 %vm279_vm1, %v9368_v60  ;;  %6711 = vmatmul.msk.f32.gmra.mxu2 %vm279_vm1, %v9400_v15  ;;  %v9853_v28 = vld [vmem:[%s7588_s28 + $0x4c] sm:$0xff] }
 0x4b7   : > { %6758 = vmatmul.msk.f32.gmra.mxu3 %vm279_vm1, %v9432_v11  ;;  %v3475_v31 = vpop.f32.mrf.mxu0 }
 0x4b8   : > { %v3007_v29 = vpop.f32.mrf.mxu2 }
 0x4b9   : > { %v3061_v21 = vadd.f32 %v3007_v29, %v2892_v44 }
 0x4ba   : > { %v2841_v61 = vpop.f32.mrf.mxu1  ;;  %v3306_v60 = vpop.f32.mrf.mxu3  ;;  %6805 = vmatmul.msk.f32.gmra.mxu0 %vm279_vm1, %v9836_v48 }
 0x4bb   : > { %v3360_v30 = vadd.f32 %v3306_v60, %v3061_v21  ;;  %v2893_v57 = vadd.f32 %v2841_v61, %v9358_v4  ;;  %v9868_v60 = vld [vmem:[%s7588_s28 + $0x54] sm:$0xff] }
 0x4bd   : > { %v9843_v55 = vadd.f32 %v3475_v31, %v3360_v30  ;;  %6665 = vmatmul.msk.f32.gmra.mxu1 %vm279_vm1, %v9385_v47  ;;  %6712 = vmatmul.msk.f32.gmra.mxu2 %vm279_vm1, %v9416_v43  ;;  %v6982_v31 = vld [vmem:[%s7560_s12 + $0xac8] sm:$0xff] }
 0x4be   : > { %4883 = vmatpush.msra.mxu0 %v6982_v31  ;;  %v6840_v31 = vld [vmem:[%s7560_s12 + $0x430] sm:$0xff] }
 0x4bf   : > { %6759 = vmatmul.msk.f32.gmra.mxu3 %vm279_vm1, %v9447_v16  ;;  %v3478_v17 = vpop.f32.mrf.mxu0  ;;  %4377 = vmatpush.msra.mxu1 %v6840_v31 }
 0x4c0   : > { %v3010_v44 = vpop.f32.mrf.mxu2 }
 0x4c1   : > { %v3062_v51 = vadd.f32 %v3010_v44, %v2893_v57  ;;  %v6887_v57 = vld [vmem:[%s7560_s12 + $0x660] sm:$0xff] }
 0x4c2   : > { %v2844_v29 = vpop.f32.mrf.mxu1  ;;  %v3309_v21 = vpop.f32.mrf.mxu3  ;;  %6806 = vmatmul.msk.f32.gmra.mxu0 %vm279_vm1, %v9853_v28  ;;  %4546 = vmatpush.msra.mxu2 %v6887_v57  ;;  %v6981_v57 = vld [vmem:[%s7560_s12 + $0xac0] sm:$0xff] }
 0x4c3   : > { %v3361_v47 = vadd.f32 %v3309_v21, %v3062_v51  ;;  %v2894_v63 = vadd.f32 %v2844_v29, %v9374_v8  ;;  %v6934_v51 = vld [vmem:[%s7560_s12 + $0x890] sm:$0xff]  ;;  %4884 = vmatpush.msra.mxu0 %v6981_v57  ;;  %v6839_v57 = vld [vmem:[%s7560_s12 + $0x428] sm:$0xff] }
 0x4c4   : > { %4715 = vmatpush.msra.mxu3 %v6934_v51  ;;  %4378 = vmatpush.msra.mxu1 %v6839_v57 }
 0x4c5   : > { %v9858_v4 = vadd.f32 %v3478_v17, %v3361_v47  ;;  %6666 = vmatmul.msk.f32.gmra.mxu1 %vm279_vm1, %v9400_v15  ;;  %6713 = vmatmul.msk.f32.gmra.mxu2 %vm279_vm1, %v9432_v11  ;;  %v9885_v47 = vld [vmem:[%s7588_s28 + $0x64] sm:$0xff] }
 0x4c7   : > { %6760 = vmatmul.msk.f32.gmra.mxu3 %vm279_vm1, %v9463_v19  ;;  %v3481_v61 = vpop.f32.mrf.mxu0 }
 0x4c8   : > { %v3013_v30 = vpop.f32.mrf.mxu2 }
 0x4c9   : > { %v3063_v32 = vadd.f32 %v3013_v30, %v2894_v63 }
 0x4ca   : > { %v2847_v17 = vpop.f32.mrf.mxu1  ;;  %v3312_v44 = vpop.f32.mrf.mxu3  ;;  %6807 = vmatmul.msk.f32.gmra.mxu0 %vm279_vm1, %v9868_v60 }
 0x4cb   : > { %v3362_v15 = vadd.f32 %v3312_v44, %v3063_v32  ;;  %v2895_v29 = vadd.f32 %v2847_v17, %v9390_v41 }
 0x4cd   : > { %v9874_v8 = vadd.f32 %v3481_v61, %v3362_v15  ;;  %6667 = vmatmul.msk.f32.gmra.mxu1 %vm279_vm1, %v9416_v43  ;;  %6714 = vmatmul.msk.f32.gmra.mxu2 %vm279_vm1, %v9447_v16  ;;  %v9900_v15 = vld [vmem:[%s7588_s28 + $0x6c] sm:$0xff] }
 0x4cf   : > { %6761 = vmatmul.msk.f32.gmra.mxu3 %vm279_vm1, %v9478_v38  ;;  %v3484_v21 = vpop.f32.mrf.mxu0 }
 0x4d0   : > { %v3016_v63 = vpop.f32.mrf.mxu2 }
 0x4d1   : > { %v3064_v61 = vadd.f32 %v3016_v63, %v2895_v29  ;;  %v6886_v63 = vld [vmem:[%s7560_s12 + $0x658] sm:$0xff] }
 0x4d2   : > { %v2850_v30 = vpop.f32.mrf.mxu1  ;;  %v3315_v32 = vpop.f32.mrf.mxu3  ;;  %6808 = vmatmul.msk.f32.gmra.mxu0 %vm279_vm1, %v9885_v47  ;;  %4547 = vmatpush.msra.mxu2 %v6886_v63  ;;  %v9932_v63 = vld [vmem:[%s7588_s28 + $0x84] sm:$0xff] }
 0x4d3   : > { %v3363_v43 = vadd.f32 %v3315_v32, %v3064_v61  ;;  %v2896_v41 = vadd.f32 %v2850_v30, %v9405_v50  ;;  %v6933_v50 = vld [vmem:[%s7560_s12 + $0x888] sm:$0xff] }
 0x4d4   : > { %4716 = vmatpush.msra.mxu3 %v6933_v50 }
 0x4d5   : > { %v9890_v44 = vadd.f32 %v3484_v21, %v3363_v43  ;;  %6668 = vmatmul.msk.f32.gmra.mxu1 %vm279_vm1, %v9432_v11  ;;  %6715 = vmatmul.msk.f32.gmra.mxu2 %vm279_vm1, %v9463_v19  ;;  %v9916_v43 = vld [vmem:[%s7588_s28 + $0x7c] sm:$0xff] }
 0x4d7   : > { %6762 = vmatmul.msk.f32.gmra.mxu3 %vm279_vm1, %v9495_v1  ;;  %v3487_v17 = vpop.f32.mrf.mxu0 }
 0x4d8   : > { %v3019_v51 = vpop.f32.mrf.mxu2 }
 0x4d9   : > { %v3065_v31 = vadd.f32 %v3019_v51, %v2896_v41 }
 0x4da   : > { %v2853_v29 = vpop.f32.mrf.mxu1  ;;  %v3318_v21 = vpop.f32.mrf.mxu3  ;;  %6809 = vmatmul.msk.f32.gmra.mxu0 %vm279_vm1, %v9900_v15 }
 0x4db   : > { %v3364_v11 = vadd.f32 %v3318_v21, %v3065_v31  ;;  %v2897_v30 = vadd.f32 %v2853_v29, %v9421_v7  ;;  %v6980_v7 = vld [vmem:[%s7560_s12 + $0xab8] sm:$0xff] }
 0x4dc   : > { %4885 = vmatpush.msra.mxu0 %v6980_v7 }
 0x4dd   : > { %v9905_v61 = vadd.f32 %v3487_v17, %v3364_v11  ;;  %6669 = vmatmul.msk.f32.gmra.mxu1 %vm279_vm1, %v9447_v16  ;;  %6716 = vmatmul.msk.f32.gmra.mxu2 %vm279_vm1, %v9478_v38 }
 0x4df   : > { %6763 = vmatmul.msk.f32.gmra.mxu3 %vm279_vm1, %v9510_v34  ;;  %v3490_v32 = vpop.f32.mrf.mxu0 }
 0x4e0   : > { %v3022_v41 = vpop.f32.mrf.mxu2 }
 0x4e1   : > { %v3066_v17 = vadd.f32 %v3022_v41, %v2897_v30 }
 0x4e2   : > { %v2856_v16 = vpop.f32.mrf.mxu1  ;;  %v3321_v51 = vpop.f32.mrf.mxu3  ;;  %6810 = vmatmul.msk.f32.gmra.mxu0 %vm279_vm1, %v9916_v43 }
 0x4e3   : > { %v3365_v31 = vadd.f32 %v3321_v51, %v3066_v17  ;;  %v2898_v29 = vadd.f32 %v2856_v16, %v9436_v53  ;;  %v6885_v53 = vld [vmem:[%s7560_s12 + $0x650] sm:$0xff] }
 0x4e4   : > { %4548 = vmatpush.msra.mxu2 %v6885_v53  ;;  %v9947_v51 = vld [vmem:[%s7588_s28 + $0x94] sm:$0xff] }
 0x4e5   : > { %v9921_v21 = vadd.f32 %v3490_v32, %v3365_v31  ;;  %6670 = vmatmul.msk.f32.gmra.mxu1 %vm279_vm1, %v9463_v19  ;;  %6717 = vmatmul.msk.f32.gmra.mxu2 %vm279_vm1, %v9495_v1  ;;  %v6932_v31 = vld [vmem:[%s7560_s12 + $0x880] sm:$0xff]  ;;  %v6979_v53 = vld [vmem:[%s7560_s12 + $0xab0] sm:$0xff] }
 0x4e6   : > { %4717 = vmatpush.msra.mxu3 %v6932_v31  ;;  %4886 = vmatpush.msra.mxu0 %v6979_v53 }
 0x4e7   : > { %6764 = vmatmul.msk.f32.gmra.mxu3 %vm279_vm1, %v9527_v6  ;;  %v3493_v11 = vpop.f32.mrf.mxu0 }
 0x4e8   : > { %v3025_v50 = vpop.f32.mrf.mxu2 }
 0x4e9   : > { %v3067_v30 = vadd.f32 %v3025_v50, %v2898_v29 }
 0x4ea   : > { %v2859_v32 = vpop.f32.mrf.mxu1  ;;  %v3324_v19 = vpop.f32.mrf.mxu3  ;;  %6811 = vmatmul.msk.f32.gmra.mxu0 %vm279_vm1, %v9932_v63 }
 0x4eb   : > { %v3366_v57 = vadd.f32 %v3324_v19, %v3067_v30  ;;  %v2899_v17 = vadd.f32 %v2859_v32, %v9453_v22 }
 0x4ed   : > { %v9936_v41 = vadd.f32 %v3493_v11, %v3366_v57  ;;  %6671 = vmatmul.msk.f32.gmra.mxu1 %vm279_vm1, %v9478_v38  ;;  %6718 = vmatmul.msk.f32.gmra.mxu2 %vm279_vm1, %v9510_v34  ;;  %v6838_v38 = vld [vmem:[%s7560_s12 + $0x420] sm:$0xff] }
 0x4ee   : > { %4379 = vmatpush.msra.mxu1 %v6838_v38  ;;  %v9963_v57 = vld [vmem:[%s7588_s28 + $0x9c] sm:$0xff] }
 0x4ef   : > { %6765 = vmatmul.msk.f32.gmra.mxu3 %vm279_vm1, %v9542_v20  ;;  %v3496_v16 = vpop.f32.mrf.mxu0 }
 0x4f0   : > { %v3028_v7 = vpop.f32.mrf.mxu2 }
 0x4f1   : > { %v3068_v29 = vadd.f32 %v3028_v7, %v2899_v17 }
 0x4f2   : > { %v2862_v11 = vpop.f32.mrf.mxu1  ;;  %v3327_v50 = vpop.f32.mrf.mxu3  ;;  %6812 = vmatmul.msk.f32.gmra.mxu0 %vm279_vm1, %v9947_v51 }
 0x4f3   : > { %v3367_v22 = vadd.f32 %v3327_v50, %v3068_v29  ;;  %v2900_v32 = vadd.f32 %v2862_v11, %v9468_v23  ;;  %v9978_v11 = vld [vmem:[%s7588_s28 + $0xac] sm:$0xff] }
 0x4f5   : > { %v9953_v30 = vadd.f32 %v3496_v16, %v3367_v22  ;;  %6672 = vmatmul.msk.f32.gmra.mxu1 %vm279_vm1, %v9495_v1  ;;  %6719 = vmatmul.msk.f32.gmra.mxu2 %vm279_vm1, %v9527_v6 }
 0x4f7   : > { %6766 = vmatmul.msk.f32.gmra.mxu3 %vm279_vm1, %v9558_v25  ;;  %v3499_v19 = vpop.f32.mrf.mxu0 }
 0x4f8   : > { %v3031_v17 = vpop.f32.mrf.mxu2 }
 0x4f9   : > { %v3069_v16 = vadd.f32 %v3031_v17, %v2900_v32  ;;  %v6884_v32 = vld [vmem:[%s7560_s12 + $0x648] sm:$0xff]  ;;  %v6931_v17 = vld [vmem:[%s7560_s12 + $0x878] sm:$0xff] }
 0x4fa   : > { %v2865_v31 = vpop.f32.mrf.mxu1  ;;  %v3330_v7 = vpop.f32.mrf.mxu3  ;;  %6813 = vmatmul.msk.f32.gmra.mxu0 %vm279_vm1, %v9963_v57  ;;  %4549 = vmatpush.msra.mxu2 %v6884_v32  ;;  %v6978_v32 = vld [vmem:[%s7560_s12 + $0xaa8] sm:$0xff] }
 0x4fb   : > { %v3368_v1 = vadd.f32 %v3330_v7, %v3069_v16  ;;  %v2901_v29 = vadd.f32 %v2865_v31, %v9484_v5  ;;  %4718 = vmatpush.msra.mxu3 %v6931_v17  ;;  %v6837_v16 = vld [vmem:[%s7560_s12 + $0x418] sm:$0xff]  ;;  %4887 = vmatpush.msra.mxu0 %v6978_v32 }
 0x4fc   : > { %4380 = vmatpush.msra.mxu1 %v6837_v16  ;;  %v10027_v32 = vld [vmem:[%s7588_s28 + $0xcc] sm:$0xff] }
 0x4fd   : > { %v9968_v23 = vadd.f32 %v3499_v19, %v3368_v1  ;;  %6673 = vmatmul.msk.f32.gmra.mxu1 %vm279_vm1, %v9510_v34  ;;  %6720 = vmatmul.msk.f32.gmra.mxu2 %vm279_vm1, %v9542_v20  ;;  %v9995_v1 = vld [vmem:[%s7588_s28 + $0xb4] sm:$0xff] }
 0x4ff   : > { %6767 = vmatmul.msk.f32.gmra.mxu3 %vm279_vm1, %v9574_v45  ;;  %v3502_v38 = vpop.f32.mrf.mxu0 }
 0x500   : > { %v3034_v50 = vpop.f32.mrf.mxu2 }
 0x501   : > { %v3070_v22 = vadd.f32 %v3034_v50, %v2901_v29 }
 0x502   : > { %v2868_v19 = vpop.f32.mrf.mxu1  ;;  %v3333_v53 = vpop.f32.mrf.mxu3  ;;  %6814 = vmatmul.msk.f32.gmra.mxu0 %vm279_vm1, %v9978_v11 }
 0x503   : > { %v3369_v34 = vadd.f32 %v3333_v53, %v3070_v22  ;;  %v2902_v31 = vadd.f32 %v2868_v19, %v9500_v42 }
 0x505   : > { %v9984_v5 = vadd.f32 %v3502_v38, %v3369_v34  ;;  %6674 = vmatmul.msk.f32.gmra.mxu1 %vm279_vm1, %v9527_v6  ;;  %6721 = vmatmul.msk.f32.gmra.mxu2 %vm279_vm1, %v9558_v25  ;;  %v10010_v34 = vld [vmem:[%s7588_s28 + $0xc4] sm:$0xff] }
 0x507   : > { %6768 = vmatmul.msk.f32.gmra.mxu3 %vm279_vm1, %v9588_v0  ;;  %v3505_v7 = vpop.f32.mrf.mxu0 }
 0x508   : > { %v3037_v29 = vpop.f32.mrf.mxu2 }
 0x509   : > { %v3071_v38 = vadd.f32 %v3037_v29, %v2902_v31  ;;  %v6883_v29 = vld [vmem:[%s7560_s12 + $0x640] sm:$0xff] }
 0x50a   : > { %v3336_v50 = vpop.f32.mrf.mxu3  ;;  %v3581_v22 = vpop.f32.mrf.mxu1  ;;  %6815 = vmatmul.msk.f32.gmra.mxu0 %vm279_vm1, %v9995_v1  ;;  %4550 = vmatpush.msra.mxu2 %v6883_v29  ;;  %v10042_v29 = vld [vmem:[%s7588_s28 + $0xdc] sm:$0xff] }
 0x50b   : > { %v3370_v6 = vadd.f32 %v3336_v50, %v3071_v38  ;;  %v3677_v42 = vadd.f32 %v3581_v22, %v9515_v24  ;;  %v6930_v24 = vld [vmem:[%s7560_s12 + $0x870] sm:$0xff] }
 0x50c   : > { %v6836_v50 = vld [vmem:[%s7560_s12 + $0x410] sm:$0xff]  ;;  %4719 = vmatpush.msra.mxu3 %v6930_v24 }
 0x50d   : > { %v10000_v53 = vadd.f32 %v3505_v7, %v3370_v6  ;;  %6675 = vmatmul.msk.f32.gmra.mxu1 %vm279_vm1, %v9542_v20  ;;  %6722 = vmatmul.msk.f32.gmra.mxu2 %vm279_vm1, %v9574_v45 }
 0x50e   : > { %4381 = vmatpush.msra.mxu1 %v6836_v50 }
 0x50f   : > { %6769 = vmatmul.msk.f32.gmra.mxu3 %vm279_vm1, %v9605_v49  ;;  %v4218_v19 = vpop.f32.mrf.mxu0 }
 0x510   : > { %v3750_v17 = vpop.f32.mrf.mxu2 }
 0x511   : > { %v3846_v16 = vadd.f32 %v3750_v17, %v3677_v42 }
 0x512   : > { %v3584_v31 = vpop.f32.mrf.mxu1  ;;  %v3919_v7 = vpop.f32.mrf.mxu3  ;;  %6816 = vmatmul.msk.f32.gmra.mxu0 %vm279_vm1, %v10010_v34 }
 0x513   : > { %v4015_v20 = vadd.f32 %v3919_v7, %v3846_v16  ;;  %v3678_v22 = vadd.f32 %v3584_v31, %v9531_v37  ;;  %v6977_v37 = vld [vmem:[%s7560_s12 + $0xaa0] sm:$0xff] }
 0x514   : > { %4888 = vmatpush.msra.mxu0 %v6977_v37 }
 0x515   : > { %v10015_v38 = vadd.f32 %v4218_v19, %v4015_v20  ;;  %6676 = vmatmul.msk.f32.gmra.mxu1 %vm279_vm1, %v9558_v25  ;;  %6723 = vmatmul.msk.f32.gmra.mxu2 %vm279_vm1, %v9588_v0 }
 0x517   : > { %6770 = vmatmul.msk.f32.gmra.mxu3 %vm279_vm1, %v9620_v14  ;;  %v4221_v6 = vpop.f32.mrf.mxu0 }
 0x518   : > { %v3753_v42 = vpop.f32.mrf.mxu2 }
 0x519   : > { %v3847_v19 = vadd.f32 %v3753_v42, %v3678_v22 }
 0x51a   : > { %v3587_v25 = vpop.f32.mrf.mxu1  ;;  %v3922_v17 = vpop.f32.mrf.mxu3  ;;  %6817 = vmatmul.msk.f32.gmra.mxu0 %vm279_vm1, %v10027_v32 }
 0x51b   : > { %v4016_v16 = vadd.f32 %v3922_v17, %v3847_v19  ;;  %v3679_v31 = vadd.f32 %v3587_v25, %v9546_v35  ;;  %v6882_v35 = vld [vmem:[%s7560_s12 + $0x638] sm:$0xff]  ;;  %v6929_v19 = vld [vmem:[%s7560_s12 + $0x868] sm:$0xff] }
 0x51c   : > { %4551 = vmatpush.msra.mxu2 %v6882_v35  ;;  %4720 = vmatpush.msra.mxu3 %v6929_v19  ;;  %v10074_v35 = vld [vmem:[%s7588_s28 + $0xf4] sm:$0xff] }
 0x51d   : > { %v10031_v7 = vadd.f32 %v4221_v6, %v4016_v16  ;;  %6677 = vmatmul.msk.f32.gmra.mxu1 %vm279_vm1, %v9574_v45  ;;  %6724 = vmatmul.msk.f32.gmra.mxu2 %vm279_vm1, %v9605_v49  ;;  %v10058_v16 = vld [vmem:[%s7588_s28 + $0xe4] sm:$0xff] }
 0x51f   : > { %6771 = vmatmul.msk.f32.gmra.mxu3 %vm279_vm1, %v9637_v27  ;;  %v4224_v20 = vpop.f32.mrf.mxu0 }
 0x520   : > { %v3756_v24 = vpop.f32.mrf.mxu2 }
 0x521   : > { %v3848_v50 = vadd.f32 %v3756_v24, %v3679_v31 }
 0x522   : > { %v3590_v22 = vpop.f32.mrf.mxu1  ;;  %v3925_v45 = vpop.f32.mrf.mxu3  ;;  %6818 = vmatmul.msk.f32.gmra.mxu0 %vm279_vm1, %v10042_v29 }
 0x523   : > { %v4017_v6 = vadd.f32 %v3925_v45, %v3848_v50  ;;  %v3680_v25 = vadd.f32 %v3590_v22, %v9563_v18  ;;  %v6976_v18 = vld [vmem:[%s7560_s12 + $0xa98] sm:$0xff] }
 0x524   : > { %4889 = vmatpush.msra.mxu0 %v6976_v18  ;;  %v6881_v18 = vld [vmem:[%s7560_s12 + $0x630] sm:$0xff] }
 0x525   : > { %v10046_v42 = vadd.f32 %v4224_v20, %v4017_v6  ;;  %6678 = vmatmul.msk.f32.gmra.mxu1 %vm279_vm1, %v9588_v0  ;;  %6725 = vmatmul.msk.f32.gmra.mxu2 %vm279_vm1, %v9620_v14  ;;  %v6835_v0 = vld [vmem:[%s7560_s12 + $0x408] sm:$0xff] }
 0x526   : > { %4382 = vmatpush.msra.mxu1 %v6835_v0  ;;  %4552 = vmatpush.msra.mxu2 %v6881_v18 }
 0x527   : > { %6772 = vmatmul.msk.f32.gmra.mxu3 %vm279_vm1, %v9652_v40  ;;  %v4227_v17 = vpop.f32.mrf.mxu0 }
 0x528   : > { %v3759_v37 = vpop.f32.mrf.mxu2 }
 0x529   : > { %v3849_v31 = vadd.f32 %v3759_v37, %v3680_v25 }
 0x52a   : > { %v3593_v20 = vpop.f32.mrf.mxu1  ;;  %v3928_v24 = vpop.f32.mrf.mxu3  ;;  %6819 = vmatmul.msk.f32.gmra.mxu0 %vm279_vm1, %v10058_v16 }
 0x52b   : > { %v4018_v50 = vadd.f32 %v3928_v24, %v3849_v31  ;;  %v3681_v22 = vadd.f32 %v3593_v20, %v9578_v58  ;;  %v11077_v58 = vld [vmem:[#allocation22_spill] sm:$0xff] }
 0x52c   : > { %v11078_v20 = vld [vmem:[#allocation18_spill] sm:$0xff] }
 0x52d   : > { %v10063_v45 = vadd.f32 %v4227_v17, %v4018_v50  ;;  %6679 = vmatmul.msk.f32.gmra.mxu1 %vm279_vm1, %v9605_v49  ;;  %6726 = vmatmul.msk.f32.gmra.mxu2 %vm279_vm1, %v9637_v27  ;;  %v10088_v50 = vld [vmem:[%s7588_s28 + $0xfc] sm:$0xff] }
 0x52f   : > { %11075 = vst [vmem:[#allocation17_spill] sm:$0xff] %v10063_v45  ;;  %6773 = vmatmul.msk.f32.gmra.mxu3 %vm279_vm1, %v9668_v62  ;;  %v4230_v6 = vpop.f32.mrf.mxu0 }
 0x530   : > { %v3762_v19 = vpop.f32.mrf.mxu2 }
 0x531   : > { %v3850_v25 = vadd.f32 %v3762_v19, %v3681_v22  ;;  %v6928_v19 = vld [vmem:[%s7560_s12 + $0x860] sm:$0xff] }
 0x532   : > { %v3596_v17 = vpop.f32.mrf.mxu1  ;;  %v3931_v49 = vpop.f32.mrf.mxu3  ;;  %6820 = vmatmul.msk.f32.gmra.mxu0 %vm279_vm1, %v10074_v35  ;;  %4721 = vmatpush.msra.mxu3 %v6928_v19 }
 0x533   : > { %v4019_v37 = vadd.f32 %v3931_v49, %v3850_v25  ;;  %v3682_v0 = vadd.f32 %v3596_v17, %v11077_v58  ;;  %v6834_v49 = vld [vmem:[%s7560_s12 + $0x400] sm:$0xff]  ;;  %v11080_v58 = vld [vmem:[#allocation23_spill] sm:$0xff] }
 0x534   : > { %4383 = vmatpush.msra.mxu1 %v6834_v49  ;;  %v11082_v49 = vld [vmem:[#allocation12_spill] sm:$0xff] }
 0x535   : > { %v10078_v31 = vadd.f32 %v4230_v6, %v4019_v37  ;;  %6680 = vmatmul.msk.f32.gmra.mxu1 %vm279_vm1, %v9620_v14  ;;  %6727 = vmatmul.msk.f32.gmra.mxu2 %vm279_vm1, %v9652_v40 }
 0x537   : > { %11076 = vst [vmem:[#allocation21_spill] sm:$0xff] %v10078_v31  ;;  %6774 = vmatmul.msk.f32.gmra.mxu3 %vm279_vm1, %v11078_v20  ;;  %v4233_v24 = vpop.f32.mrf.mxu0  ;;  %v10187_v31 = vld [vmem:[%s7588_s28 + $0x144] sm:$0xff] }
 0x538   : > { %v3765_v22 = vpop.f32.mrf.mxu2 }
 0x539   : > { %v3851_v6 = vadd.f32 %v3765_v22, %v3682_v0  ;;  %v10105_v22 = vld [vmem:[%s7588_s28 + $0x10c] sm:$0xff] }
 0x53a   : > { %v3599_v25 = vpop.f32.mrf.mxu1  ;;  %v3934_v14 = vpop.f32.mrf.mxu3  ;;  %6821 = vmatmul.msk.f32.gmra.mxu0 %vm279_vm1, %v10088_v50 }
 0x53b   : > { %v4020_v17 = vadd.f32 %v3934_v14, %v3851_v6  ;;  %v3683_v0 = vadd.f32 %v3599_v25, %v11080_v58 }
 0x53d   : > { %v10095_v37 = vadd.f32 %v4233_v24, %v4020_v17  ;;  %6681 = vmatmul.msk.f32.gmra.mxu1 %vm279_vm1, %v9637_v27  ;;  %6728 = vmatmul.msk.f32.gmra.mxu2 %vm279_vm1, %v9668_v62  ;;  %v6975_v24 = vld [vmem:[%s7560_s12 + $0xa90] sm:$0xff] }
 0x53e   : > { %4890 = vmatpush.msra.mxu0 %v6975_v24 }
 0x53f   : > { %11079 = vst [vmem:[#allocation20_spill] sm:$0xff] %v10095_v37  ;;  %6775 = vmatmul.msk.f32.gmra.mxu3 %vm279_vm1, %v9700_v10  ;;  %v4236_v18 = vpop.f32.mrf.mxu0  ;;  %v3107_v37 = vld [vmem:[%s7588_s28 + $0x1a3] sm:$0xff] }
 0x540   : > { %v3768_v6 = vpop.f32.mrf.mxu2 }
 0x541   : > { %v3852_v19 = vadd.f32 %v3768_v6, %v3683_v0  ;;  %v10120_v6 = vld [vmem:[%s7588_s28 + $0x114] sm:$0xff] }
 0x542   : > { %v3602_v14 = vpop.f32.mrf.mxu1  ;;  %v3937_v17 = vpop.f32.mrf.mxu3  ;;  %6822 = vmatmul.msk.f32.gmra.mxu0 %vm279_vm1, %v10105_v22 }
 0x543   : > { %v4021_v27 = vadd.f32 %v3937_v17, %v3852_v19  ;;  %v3684_v58 = vadd.f32 %v3602_v14, %v11082_v49  ;;  %v6880_v17 = vld [vmem:[%s7560_s12 + $0x628] sm:$0xff]  ;;  %v6833_v49 = vld [vmem:[%s7560_s12 + $0x3f8] sm:$0xff] }
 0x544   : > { %4553 = vmatpush.msra.mxu2 %v6880_v17  ;;  %4384 = vmatpush.msra.mxu1 %v6833_v49  ;;  %v11086_v49 = vld [vmem:[#allocation14_spill] sm:$0xff] }
 0x545   : > { %v10110_v25 = vadd.f32 %v4236_v18, %v4021_v27  ;;  %6682 = vmatmul.msk.f32.gmra.mxu1 %vm279_vm1, %v9652_v40  ;;  %6729 = vmatmul.msk.f32.gmra.mxu2 %vm279_vm1, %v11078_v20  ;;  %11091 = vst [vmem:[#allocation14_spill] sm:$0xff] %v10187_v31 }
 0x547   : > { %11081 = vst [vmem:[#allocation22_spill] sm:$0xff] %v10110_v25  ;;  %6776 = vmatmul.msk.f32.gmra.mxu3 %vm279_vm1, %v9718_v39  ;;  %v4239_v0 = vpop.f32.mrf.mxu0  ;;  %v6927_v25 = vld [vmem:[%s7560_s12 + $0x858] sm:$0xff] }
 0x548   : > { %v3771_v19 = vpop.f32.mrf.mxu2  ;;  %4722 = vmatpush.msra.mxu3 %v6927_v25 }
 0x549   : > { %v3853_v24 = vadd.f32 %v3771_v19, %v3684_v58  ;;  %v11084_v58 = vld [vmem:[#allocation13_spill] sm:$0xff] }
 0x54a   : > { %v3605_v18 = vpop.f32.mrf.mxu1  ;;  %v3940_v27 = vpop.f32.mrf.mxu3  ;;  %6823 = vmatmul.msk.f32.gmra.mxu0 %vm279_vm1, %v10120_v6 }
 0x54b   : > { %v4022_v40 = vadd.f32 %v3940_v27, %v3853_v24  ;;  %v3685_v19 = vadd.f32 %v3605_v18, %v11084_v58  ;;  %v10137_v24 = vld [vmem:[%s7588_s28 + $0x124] sm:$0xff] }
 0x54d   : > { %v10126_v14 = vadd.f32 %v4239_v0, %v4022_v40  ;;  %6683 = vmatmul.msk.f32.gmra.mxu1 %vm279_vm1, %v9668_v62  ;;  %6730 = vmatmul.msk.f32.gmra.mxu2 %vm279_vm1, %v9700_v10 }
 0x54f   : > { %11083 = vst [vmem:[#allocation18_spill] sm:$0xff] %v10126_v14  ;;  %6777 = vmatmul.msk.f32.gmra.mxu3 %vm279_vm1, %v9733_v13  ;;  %v4242_v17 = vpop.f32.mrf.mxu0  ;;  %v6974_v14 = vld [vmem:[%s7560_s12 + $0xa88] sm:$0xff] }
 0x550   : > { %v3774_v25 = vpop.f32.mrf.mxu2  ;;  %4891 = vmatpush.msra.mxu0 %v6974_v14 }
 0x551   : > { %v3854_v0 = vadd.f32 %v3774_v25, %v3685_v19  ;;  %v10152_v25 = vld [vmem:[%s7588_s28 + $0x12c] sm:$0xff] }
 0x552   : > { %v3608_v27 = vpop.f32.mrf.mxu1  ;;  %v3943_v40 = vpop.f32.mrf.mxu3  ;;  %6824 = vmatmul.msk.f32.gmra.mxu0 %vm279_vm1, %v10137_v24 }
 0x553   : > { %v4023_v62 = vadd.f32 %v3943_v40, %v3854_v0  ;;  %v3686_v58 = vadd.f32 %v3608_v27, %v11086_v49  ;;  %v6926_v49 = vld [vmem:[%s7560_s12 + $0x850] sm:$0xff] }
 0x554   : > { %4723 = vmatpush.msra.mxu3 %v6926_v49 }
 0x555   : > { %v10142_v18 = vadd.f32 %v4242_v17, %v4023_v62  ;;  %6684 = vmatmul.msk.f32.gmra.mxu1 %vm279_vm1, %v11078_v20  ;;  %6731 = vmatmul.msk.f32.gmra.mxu2 %vm279_vm1, %v9718_v39  ;;  %v6879_v62 = vld [vmem:[%s7560_s12 + $0x620] sm:$0xff] }
 0x556   : > { %4554 = vmatpush.msra.mxu2 %v6879_v62 }
 0x557   : > { %11085 = vst [vmem:[#allocation23_spill] sm:$0xff] %v10142_v18  ;;  %6778 = vmatmul.msk.f32.gmra.mxu3 %vm279_vm1, %v9749_v59  ;;  %v4245_v19 = vpop.f32.mrf.mxu0  ;;  %v10158_v18 = vld [vmem:[%s7588_s28 + $0x19b] sm:$0xff] }
 0x558   : > { %v3777_v0 = vpop.f32.mrf.mxu2 }
 0x559   : > { %v3855_v40 = vadd.f32 %v3777_v0, %v3686_v58  ;;  %v11088_v58 = vld [vmem:[#allocation15_spill] sm:$0xff] }
 0x55a   : > { %v3611_v14 = vpop.f32.mrf.mxu1  ;;  %v3946_v17 = vpop.f32.mrf.mxu3  ;;  %6825 = vmatmul.msk.f32.gmra.mxu0 %vm279_vm1, %v10152_v25 }
 0x55b   : > { %v4024_v20 = vadd.f32 %v3946_v17, %v3855_v40  ;;  %v3687_v0 = vadd.f32 %v3611_v14, %v11088_v58  ;;  %v10171_v17 = vld [vmem:[%s7588_s28 + $0x13c] sm:$0xff] }
 0x55c   : > { %v6973_v58 = vld [vmem:[%s7560_s12 + $0xa80] sm:$0xff] }
 0x55d   : > { %v10160_v27 = vadd.f32 %v4245_v19, %v4024_v20  ;;  %6685 = vmatmul.msk.f32.gmra.mxu1 %vm279_vm1, %v9700_v10  ;;  %6732 = vmatmul.msk.f32.gmra.mxu2 %vm279_vm1, %v9733_v13  ;;  %v6832_v19 = vld [vmem:[%s7560_s12 + $0x3f0] sm:$0xff]  ;;  %s7320_s12 = sshra.s32 %s5746_s15, 4  ;;  %s7321_s12 = int_to_ptr.hbm [resolvable:$true] %s7320_s12 }
 0x55e   : > { %4385 = vmatpush.msra.mxu1 %v6832_v19  ;;  %4892 = vmatpush.msra.mxu0 %v6973_v58  ;;  %v11090_v19 = vld [vmem:[#allocation16_spill] sm:$0xff]  ;;  %s7322_s17 = scalar_lea.hbm %s7321_s12, 256  ;;  %p7327_p11 = scmp.lt.s32.totalorder %s7321_s12, %s11001_s2 }
 0x55f   : > { %11087 = vst [vmem:[#allocation12_spill] sm:$0xff] %v10160_v27  ;;  %6779 = vmatmul.msk.f32.gmra.mxu3 %vm279_vm1, %v10158_v18  ;;  %v4248_v40 = vpop.f32.mrf.mxu0  ;;  %p7323_p8 = scmp.ne.s32.totalorder %s7321_s12, %s7322_s17  ;;  %p7328_p12 = scmp.lt.s32.totalorder %s7326_s23, %s7322_s17 }
 0x560   : > { %v3780_v20 = vpop.f32.mrf.mxu2 }
 0x561   : > { %v3856_v10 = vadd.f32 %v3780_v20, %v3687_v0  ;;  %p7324_p9 = pnand %p7323_p8, %p7541_p13  ;;  %p7329_p0 = por %p7328_p12, %p7327_p11 }
 0x562   : > { %v3614_v62 = vpop.f32.mrf.mxu1  ;;  %v3949_v27 = vpop.f32.mrf.mxu3  ;;  %6826 = vmatmul.msk.f32.gmra.mxu0 %vm279_vm1, %v10171_v17 }
 0x563   : > { %v4025_v49 = vadd.f32 %v3949_v27, %v3856_v10  ;;  %v3688_v0 = vadd.f32 %v3614_v62, %v11090_v19  ;;  %v11093_v62 = vld [vmem:[#allocation19_spill] sm:$0xff]  ;;  %p7325_p10 = pneg %p7324_p9 }
 0x565   : > { %v10177_v14 = vadd.f32 %v4248_v40, %v4025_v49  ;;  %6686 = vmatmul.msk.f32.gmra.mxu1 %vm279_vm1, %v9718_v39  ;;  %6733 = vmatmul.msk.f32.gmra.mxu2 %vm279_vm1, %v9749_v59  ;;  %p7330_p1 = pnand %p7329_p0, %p7325_p10 }
 0x567   : > { %11089 = vst [vmem:[#allocation13_spill] sm:$0xff] %v10177_v14  ;;  %6780 = vmatmul.msk.f32.gmra.mxu3 %vm279_vm1, %v3107_v37  ;;  %v4251_v20 = vpop.f32.mrf.mxu0  ;;  %v3108_v14 = vld [vmem:[%s7588_s28 + $0x1b3] sm:$0xff] }
 0x568   : > { %v3783_v27 = vpop.f32.mrf.mxu2 }
 0x569   : > { %v3857_v10 = vadd.f32 %v3783_v27, %v3688_v0  ;;  %v10201_v0 = vld [vmem:[%s7588_s28 + $0x154] sm:$0xff] }
 0x56a   : > { %v3617_v40 = vpop.f32.mrf.mxu1  ;;  %v3952_v49 = vpop.f32.mrf.mxu3  ;;  %6827 = vmatmul.msk.f32.gmra.mxu0 %vm279_vm1, %v10187_v31  ;;  %11094 = vst [vmem:[#allocation16_spill] sm:$0xff] %v10201_v0 }
 0x56b   : > { %v4026_v39 = vadd.f32 %v3952_v49, %v3857_v10  ;;  %v3689_v58 = vadd.f32 %v3617_v40, %v11093_v62 }
 0x56d   : > { %v10192_v45 = vadd.f32 %v4251_v20, %v4026_v39  ;;  %6687 = vmatmul.msk.f32.gmra.mxu1 %vm279_vm1, %v9733_v13  ;;  %6734 = vmatmul.msk.f32.gmra.mxu2 %vm279_vm1, %v10158_v18  ;;  %v3109_v20 = vld [vmem:[%s7588_s28 + $0x1bb] sm:$0xff] }
 0x56f   : > { %11092 = vst [vmem:[#allocation15_spill] sm:$0xff] %v10192_v45  ;;  %6781 = vmatmul.msk.f32.gmra.mxu3 %vm279_vm1, %v3108_v14  ;;  %v4254_v19 = vpop.f32.mrf.mxu0 }
 0x570   : > { %v3786_v27 = vpop.f32.mrf.mxu2 }
 0x571   : > { %v3858_v31 = vadd.f32 %v3786_v27, %v3689_v58  ;;  %v10214_v58 = vld [vmem:[%s7588_s28 + $0x15c] sm:$0xff] }
 0x572   : > { %v3620_v10 = vpop.f32.mrf.mxu1  ;;  %v3955_v49 = vpop.f32.mrf.mxu3  ;;  %6828 = vmatmul.msk.f32.gmra.mxu0 %vm279_vm1, %v10201_v0 }
 0x573   : > { %v4027_v13 = vadd.f32 %v3955_v49, %v3858_v31  ;;  %v3690_v40 = vadd.f32 %v3620_v10, %v9725_v12 }
 0x575   : > { %v10206_v39 = vadd.f32 %v4254_v19, %v4027_v13  ;;  %6688 = vmatmul.msk.f32.gmra.mxu1 %vm279_vm1, %v9749_v59  ;;  %6735 = vmatmul.msk.f32.gmra.mxu2 %vm279_vm1, %v3107_v37  ;;  %v3110_v59 = vld [vmem:[%s7588_s28 + $0x1cb] sm:$0xff] }
 0x576   : > { %v10227_v13 = vld [vmem:[%s7588_s28 + $0x16c] sm:$0xff] }
 0x577   : > { %11095 = vst [vmem:[#allocation19_spill] sm:$0xff] %v10206_v39  ;;  %6782 = vmatmul.msk.f32.gmra.mxu3 %vm279_vm1, %v3109_v20  ;;  %v4257_v62 = vpop.f32.mrf.mxu0 }
 0x578   : > { %v3789_v27 = vpop.f32.mrf.mxu2 }
 0x579   : > { %v3859_v45 = vadd.f32 %v3789_v27, %v3690_v40 }
 0x57a   : > { %v3623_v0 = vpop.f32.mrf.mxu1  ;;  %v3958_v31 = vpop.f32.mrf.mxu3  ;;  %6829 = vmatmul.msk.f32.gmra.mxu0 %vm279_vm1, %v10214_v58 }
 0x57b   : > { %v4028_v19 = vadd.f32 %v3958_v31, %v3859_v45  ;;  %v3691_v12 = vadd.f32 %v3623_v0, %v9740_v9  ;;  %v3111_v31 = vld [vmem:[%s7588_s28 + $0x1d3] sm:$0xff] }
 0x57c   : > { %v10239_v0 = vld [vmem:[%s7588_s28 + $0x174] sm:$0xff] }
 0x57d   : > { %v10219_v49 = vadd.f32 %v4257_v62, %v4028_v19  ;;  %6689 = vmatmul.msk.f32.gmra.mxu1 %vm279_vm1, %v10158_v18  ;;  %6736 = vmatmul.msk.f32.gmra.mxu2 %vm279_vm1, %v3108_v14 }
 0x57f   : > { %6783 = vmatmul.msk.f32.gmra.mxu3 %vm279_vm1, %v3110_v59  ;;  %v4260_v10 = vpop.f32.mrf.mxu0 }
 0x580   : > { %v3792_v40 = vpop.f32.mrf.mxu2 }
 0x581   : > { %v3860_v27 = vadd.f32 %v3792_v40, %v3691_v12 }
 0x582   : > { %v3626_v39 = vpop.f32.mrf.mxu1  ;;  %v3961_v45 = vpop.f32.mrf.mxu3  ;;  %6830 = vmatmul.msk.f32.gmra.mxu0 %vm279_vm1, %v10227_v13 }
 0x583   : > { %v4029_v62 = vadd.f32 %v3961_v45, %v3860_v27  ;;  %v3692_v9 = vadd.f32 %v3626_v39, %v9754_v52 }
 0x585   : > { %v10232_v18 = vadd.f32 %v4260_v10, %v4029_v62  ;;  %6690 = vmatmul.msk.f32.gmra.mxu1 %vm279_vm1, %v3107_v37  ;;  %6737 = vmatmul.msk.f32.gmra.mxu2 %vm279_vm1, %v3109_v20 }
 0x587   : > { %6784 = vmatmul.msk.f32.gmra.mxu3 %vm279_vm1, %v3111_v31  ;;  %v4263_v14 = vpop.f32.mrf.mxu0 }
 0x588   : > { %v3795_v19 = vpop.f32.mrf.mxu2 }
 0x589   : > { %v3861_v59 = vadd.f32 %v3795_v19, %v3692_v9 }
 0x58a   : > { %v3629_v12 = vpop.f32.mrf.mxu1  ;;  %v3964_v40 = vpop.f32.mrf.mxu3  ;;  %6831 = vmatmul.msk.f32.gmra.mxu0 %vm279_vm1, %v10239_v0 }
 0x58b   : > { %v4030_v10 = vadd.f32 %v3964_v40, %v3861_v59  ;;  %v3693_v52 = vadd.f32 %v3629_v12, %v9766_v2 }
 0x58d   : > { %v10243_v27 = vadd.f32 %v4263_v14, %v4030_v10  ;;  %6847 = vmatmul.msk.f32.vlgmr.msra.gmra.mxu1 %vm279_vm1, %v9790_v54  ;;  %6894 = vmatmul.msk.f32.vlgmr.msra.gmra.mxu2 %vm279_vm1, %v9822_v46 }
 0x58f   : > { %6941 = vmatmul.msk.f32.vlgmr.msra.gmra.mxu3 %vm279_vm1, %v9853_v28  ;;  %v4266_v37 = vpop.f32.mrf.mxu0 }
 0x590   : > { %v3798_v20 = vpop.f32.mrf.mxu2 }
 0x591   : > { %v3862_v39 = vadd.f32 %v3798_v20, %v3693_v52 }
 0x592   : > { %v3632_v45 = vpop.f32.mrf.mxu1  ;;  %v3967_v62 = vpop.f32.mrf.mxu3  ;;  %6988 = vmatmul.msk.f32.vlgmr.msra.gmra.mxu0 %vm279_vm1, %v9885_v47 }
 0x593   : > { %v4031_v31 = vadd.f32 %v3967_v62, %v3862_v39  ;;  %v3694_v2 = vadd.f32 %v3632_v45, %v9779_v36 }
 0x595   : > { %v10254_v9 = vadd.f32 %v4266_v37, %v4031_v31  ;;  %6848 = vmatmul.msk.f32.gmra.mxu1 %vm279_vm1, %v9806_v56  ;;  %6895 = vmatmul.msk.f32.gmra.mxu2 %vm279_vm1, %v9836_v48 }
 0x597   : > { %6942 = vmatmul.msk.f32.gmra.mxu3 %vm279_vm1, %v9868_v60  ;;  %v4269_v54 = vpop.f32.mrf.mxu0 }
 0x598   : > { %v3801_v14 = vpop.f32.mrf.mxu2 }
 0x599   : > { %v3863_v19 = vadd.f32 %v3801_v14, %v3694_v2 }
 0x59a   : > { %v3635_v59 = vpop.f32.mrf.mxu1  ;;  %v3970_v12 = vpop.f32.mrf.mxu3  ;;  %6989 = vmatmul.msk.f32.gmra.mxu0 %vm279_vm1, %v9900_v15 }
 0x59b   : > { %v4032_v40 = vadd.f32 %v3970_v12, %v3863_v19  ;;  %v3695_v36 = vadd.f32 %v3635_v59, %v9794_v26 }
 0x59d   : > { %v10265_v10 = vadd.f32 %v4269_v54, %v4032_v40  ;;  %6849 = vmatmul.msk.f32.gmra.mxu1 %vm279_vm1, %v9822_v46  ;;  %6896 = vmatmul.msk.f32.gmra.mxu2 %vm279_vm1, %v9853_v28 }
 0x59f   : > { %6943 = vmatmul.msk.f32.gmra.mxu3 %vm279_vm1, %v9885_v47  ;;  %v4272_v56 = vpop.f32.mrf.mxu0 }
 0x5a0   : > { %v3804_v52 = vpop.f32.mrf.mxu2 }
 0x5a1   : > { %v3864_v37 = vadd.f32 %v3804_v52, %v3695_v36 }
 0x5a2   : > { %v3638_v20 = vpop.f32.mrf.mxu1  ;;  %v3973_v39 = vpop.f32.mrf.mxu3  ;;  %6990 = vmatmul.msk.f32.gmra.mxu0 %vm279_vm1, %v9916_v43 }
 0x5a3   : > { %v4033_v45 = vadd.f32 %v3973_v39, %v3864_v37  ;;  %v3696_v26 = vadd.f32 %v3638_v20, %v9811_v33 }
 0x5a5   : > { %v10276_v62 = vadd.f32 %v4272_v56, %v4033_v45  ;;  %6850 = vmatmul.msk.f32.gmra.mxu1 %vm279_vm1, %v9836_v48  ;;  %6897 = vmatmul.msk.f32.gmra.mxu2 %vm279_vm1, %v9868_v60 }
 0x5a7   : > { %6944 = vmatmul.msk.f32.gmra.mxu3 %vm279_vm1, %v9900_v15  ;;  %v4275_v46 = vpop.f32.mrf.mxu0 }
 0x5a8   : > { %v3807_v31 = vpop.f32.mrf.mxu2 }
 0x5a9   : > { %v3865_v2 = vadd.f32 %v3807_v31, %v3696_v26 }
 0x5aa   : > { %v3641_v54 = vpop.f32.mrf.mxu1  ;;  %v3976_v14 = vpop.f32.mrf.mxu3  ;;  %6991 = vmatmul.msk.f32.gmra.mxu0 %vm279_vm1, %v9932_v63 }
 0x5ab   : > { %v4034_v19 = vadd.f32 %v3976_v14, %v3865_v2  ;;  %v3697_v33 = vadd.f32 %v3641_v54, %v9826_v3 }
 0x5ad   : > { %v10287_v59 = vadd.f32 %v4275_v46, %v4034_v19  ;;  %6851 = vmatmul.msk.f32.gmra.mxu1 %vm279_vm1, %v9853_v28  ;;  %6898 = vmatmul.msk.f32.gmra.mxu2 %vm279_vm1, %v9885_v47 }
 0x5af   : > { %6945 = vmatmul.msk.f32.gmra.mxu3 %vm279_vm1, %v9916_v43  ;;  %v4278_v48 = vpop.f32.mrf.mxu0 }
 0x5b0   : > { %v3810_v12 = vpop.f32.mrf.mxu2 }
 0x5b1   : > { %v3866_v40 = vadd.f32 %v3810_v12, %v3697_v33 }
 0x5b2   : > { %v3644_v36 = vpop.f32.mrf.mxu1  ;;  %v3979_v56 = vpop.f32.mrf.mxu3  ;;  %6992 = vmatmul.msk.f32.gmra.mxu0 %vm279_vm1, %v9947_v51 }
 0x5b3   : > { %v4035_v52 = vadd.f32 %v3979_v56, %v3866_v40  ;;  %v3698_v3 = vadd.f32 %v3644_v36, %v9843_v55 }
 0x5b5   : > { %v10298_v37 = vadd.f32 %v4278_v48, %v4035_v52  ;;  %6852 = vmatmul.msk.f32.gmra.mxu1 %vm279_vm1, %v9868_v60  ;;  %6899 = vmatmul.msk.f32.gmra.mxu2 %vm279_vm1, %v9900_v15 }
 0x5b7   : > { %6946 = vmatmul.msk.f32.gmra.mxu3 %vm279_vm1, %v9932_v63  ;;  %v4281_v28 = vpop.f32.mrf.mxu0 }
 0x5b8   : > { %v3813_v20 = vpop.f32.mrf.mxu2 }
 0x5b9   : > { %v3867_v39 = vadd.f32 %v3813_v20, %v3698_v3 }
 0x5ba   : > { %v3647_v45 = vpop.f32.mrf.mxu1  ;;  %v3982_v26 = vpop.f32.mrf.mxu3  ;;  %6993 = vmatmul.msk.f32.gmra.mxu0 %vm279_vm1, %v9963_v57 }
 0x5bb   : > { %v4036_v46 = vadd.f32 %v3982_v26, %v3867_v39  ;;  %v3699_v55 = vadd.f32 %v3647_v45, %v9858_v4 }
 0x5bd   : > { %v10309_v31 = vadd.f32 %v4281_v28, %v4036_v46  ;;  %6853 = vmatmul.msk.f32.gmra.mxu1 %vm279_vm1, %v9885_v47  ;;  %6900 = vmatmul.msk.f32.gmra.mxu2 %vm279_vm1, %v9916_v43 }
 0x5bf   : > { %6947 = vmatmul.msk.f32.gmra.mxu3 %vm279_vm1, %v9947_v51  ;;  %v4284_v60 = vpop.f32.mrf.mxu0 }
 0x5c0   : > { %v3816_v2 = vpop.f32.mrf.mxu2 }
 0x5c1   : > { %v3868_v54 = vadd.f32 %v3816_v2, %v3699_v55 }
 0x5c2   : > { %v3650_v14 = vpop.f32.mrf.mxu1  ;;  %v3985_v19 = vpop.f32.mrf.mxu3  ;;  %6994 = vmatmul.msk.f32.gmra.mxu0 %vm279_vm1, %v9978_v11 }
 0x5c3   : > { %v4037_v33 = vadd.f32 %v3985_v19, %v3868_v54  ;;  %v3700_v4 = vadd.f32 %v3650_v14, %v9874_v8 }
 0x5c5   : > { %v10320_v48 = vadd.f32 %v4284_v60, %v4037_v33  ;;  %6854 = vmatmul.msk.f32.gmra.mxu1 %vm279_vm1, %v9900_v15  ;;  %6901 = vmatmul.msk.f32.gmra.mxu2 %vm279_vm1, %v9932_v63 }
 0x5c7   : > { %6948 = vmatmul.msk.f32.gmra.mxu3 %vm279_vm1, %v9963_v57  ;;  %v4287_v47 = vpop.f32.mrf.mxu0 }
 0x5c8   : > { %v3819_v12 = vpop.f32.mrf.mxu2 }
 0x5c9   : > { %v3869_v40 = vadd.f32 %v3819_v12, %v3700_v4 }
 0x5ca   : > { %v3653_v36 = vpop.f32.mrf.mxu1  ;;  %v3988_v56 = vpop.f32.mrf.mxu3  ;;  %6995 = vmatmul.msk.f32.gmra.mxu0 %vm279_vm1, %v9995_v1 }
 0x5cb   : > { %v4038_v52 = vadd.f32 %v3988_v56, %v3869_v40  ;;  %v3701_v8 = vadd.f32 %v3653_v36, %v9890_v44 }
 0x5cd   : > { %v10331_v3 = vadd.f32 %v4287_v47, %v4038_v52  ;;  %6855 = vmatmul.msk.f32.gmra.mxu1 %vm279_vm1, %v9916_v43  ;;  %6902 = vmatmul.msk.f32.gmra.mxu2 %vm279_vm1, %v9947_v51 }
 0x5cf   : > { %6949 = vmatmul.msk.f32.gmra.mxu3 %vm279_vm1, %v9978_v11  ;;  %v4290_v15 = vpop.f32.mrf.mxu0 }
 0x5d0   : > { %v3822_v28 = vpop.f32.mrf.mxu2 }
 0x5d1   : > { %v3870_v20 = vadd.f32 %v3822_v28, %v3701_v8 }
 0x5d2   : > { %v3656_v39 = vpop.f32.mrf.mxu1  ;;  %v3991_v45 = vpop.f32.mrf.mxu3  ;;  %6996 = vmatmul.msk.f32.gmra.mxu0 %vm279_vm1, %v10010_v34 }
 0x5d3   : > { %v4039_v26 = vadd.f32 %v3991_v45, %v3870_v20  ;;  %v3702_v44 = vadd.f32 %v3656_v39, %v9905_v61 }
 0x5d5   : > { %v10342_v46 = vadd.f32 %v4290_v15, %v4039_v26  ;;  %6856 = vmatmul.msk.f32.gmra.mxu1 %vm279_vm1, %v9932_v63  ;;  %6903 = vmatmul.msk.f32.gmra.mxu2 %vm279_vm1, %v9963_v57 }
 0x5d7   : > { %6950 = vmatmul.msk.f32.gmra.mxu3 %vm279_vm1, %v9995_v1  ;;  %v4293_v43 = vpop.f32.mrf.mxu0 }
 0x5d8   : > { %v3825_v55 = vpop.f32.mrf.mxu2 }
 0x5d9   : > { %v3871_v60 = vadd.f32 %v3825_v55, %v3702_v44 }
 0x5da   : > { %v3659_v2 = vpop.f32.mrf.mxu1  ;;  %v3994_v54 = vpop.f32.mrf.mxu3  ;;  %6997 = vmatmul.msk.f32.gmra.mxu0 %vm279_vm1, %v10027_v32 }
 0x5db   : > { %v4040_v14 = vadd.f32 %v3994_v54, %v3871_v60  ;;  %v3703_v61 = vadd.f32 %v3659_v2, %v9921_v21 }
 0x5dd   : > { %v10353_v19 = vadd.f32 %v4293_v43, %v4040_v14  ;;  %6857 = vmatmul.msk.f32.gmra.mxu1 %vm279_vm1, %v9947_v51  ;;  %6904 = vmatmul.msk.f32.gmra.mxu2 %vm279_vm1, %v9978_v11 }
 0x5df   : > { %6951 = vmatmul.msk.f32.gmra.mxu3 %vm279_vm1, %v10010_v34  ;;  %v4296_v63 = vpop.f32.mrf.mxu0 }
 0x5e0   : > { %v3828_v33 = vpop.f32.mrf.mxu2 }
 0x5e1   : > { %v3872_v4 = vadd.f32 %v3828_v33, %v3703_v61 }
 0x5e2   : > { %v3662_v47 = vpop.f32.mrf.mxu1  ;;  %v3997_v12 = vpop.f32.mrf.mxu3  ;;  %6998 = vmatmul.msk.f32.gmra.mxu0 %vm279_vm1, %v10042_v29 }
 0x5e3   : > { %v4041_v40 = vadd.f32 %v3997_v12, %v3872_v4  ;;  %v3704_v21 = vadd.f32 %v3662_v47, %v9936_v41 }
 0x5e5   : > { %v10364_v36 = vadd.f32 %v4296_v63, %v4041_v40  ;;  %6858 = vmatmul.msk.f32.gmra.mxu1 %vm279_vm1, %v9963_v57  ;;  %6905 = vmatmul.msk.f32.gmra.mxu2 %vm279_vm1, %v9995_v1 }
 0x5e7   : > { %6952 = vmatmul.msk.f32.gmra.mxu3 %vm279_vm1, %v10027_v32  ;;  %v4299_v51 = vpop.f32.mrf.mxu0 }
 0x5e8   : > { %v3831_v56 = vpop.f32.mrf.mxu2 }
 0x5e9   : > { %v3873_v52 = vadd.f32 %v3831_v56, %v3704_v21 }
 0x5ea   : > { %v3665_v8 = vpop.f32.mrf.mxu1  ;;  %v4000_v15 = vpop.f32.mrf.mxu3  ;;  %6999 = vmatmul.msk.f32.gmra.mxu0 %vm279_vm1, %v10058_v16 }
 0x5eb   : > { %v4042_v28 = vadd.f32 %v4000_v15, %v3873_v52  ;;  %v3705_v41 = vadd.f32 %v3665_v8, %v9953_v30 }
 0x5ed   : > { %v10375_v20 = vadd.f32 %v4299_v51, %v4042_v28  ;;  %6859 = vmatmul.msk.f32.gmra.mxu1 %vm279_vm1, %v9978_v11  ;;  %6906 = vmatmul.msk.f32.gmra.mxu2 %vm279_vm1, %v10010_v34 }
 0x5ef   : > { %6953 = vmatmul.msk.f32.gmra.mxu3 %vm279_vm1, %v10042_v29  ;;  %v4302_v57 = vpop.f32.mrf.mxu0 }
 0x5f0   : > { %v3834_v39 = vpop.f32.mrf.mxu2 }
 0x5f1   : > { %v3874_v45 = vadd.f32 %v3834_v39, %v3705_v41 }
 0x5f2   : > { %v3668_v26 = vpop.f32.mrf.mxu1  ;;  %v4003_v44 = vpop.f32.mrf.mxu3  ;;  %7000 = vmatmul.msk.f32.gmra.mxu0 %vm279_vm1, %v10074_v35 }
 0x5f3   : > { %v4043_v43 = vadd.f32 %v4003_v44, %v3874_v45  ;;  %v3706_v30 = vadd.f32 %v3668_v26, %v9968_v23 }
 0x5f5   : > { %v10386_v55 = vadd.f32 %v4302_v57, %v4043_v43  ;;  %6860 = vmatmul.msk.f32.gmra.mxu1 %vm279_vm1, %v9995_v1  ;;  %6907 = vmatmul.msk.f32.gmra.mxu2 %vm279_vm1, %v10027_v32 }
 0x5f7   : > { %6954 = vmatmul.msk.f32.gmra.mxu3 %vm279_vm1, %v10058_v16  ;;  %v4305_v11 = vpop.f32.mrf.mxu0 }
 0x5f8   : > { %v3837_v60 = vpop.f32.mrf.mxu2 }
 0x5f9   : > { %v3875_v2 = vadd.f32 %v3837_v60, %v3706_v30 }
 0x5fa   : > { %v3671_v54 = vpop.f32.mrf.mxu1  ;;  %v4006_v14 = vpop.f32.mrf.mxu3  ;;  %7001 = vmatmul.msk.f32.gmra.mxu0 %vm279_vm1, %v10088_v50 }
 0x5fb   : > { %v4044_v61 = vadd.f32 %v4006_v14, %v3875_v2  ;;  %v3707_v23 = vadd.f32 %v3671_v54, %v9984_v5 }
 0x5fd   : > { %v10397_v63 = vadd.f32 %v4305_v11, %v4044_v61  ;;  %6861 = vmatmul.msk.f32.gmra.mxu1 %vm279_vm1, %v10010_v34  ;;  %6908 = vmatmul.msk.f32.gmra.mxu2 %vm279_vm1, %v10042_v29 }
 0x5ff   : > { %6955 = vmatmul.msk.f32.gmra.mxu3 %vm279_vm1, %v10074_v35  ;;  %v4308_v1 = vpop.f32.mrf.mxu0 }
 0x600   : > { %v3840_v33 = vpop.f32.mrf.mxu2 }
 0x601   : > { %v3876_v4 = vadd.f32 %v3840_v33, %v3707_v23 }
 0x602   : > { %v3674_v47 = vpop.f32.mrf.mxu1  ;;  %v4009_v12 = vpop.f32.mrf.mxu3  ;;  %7002 = vmatmul.msk.f32.gmra.mxu0 %vm279_vm1, %v10105_v22 }
 0x603   : > { %v4045_v40 = vadd.f32 %v4009_v12, %v3876_v4  ;;  %v3708_v5 = vadd.f32 %v3674_v47, %v10000_v53 }
 0x605   : > { %v10408_v21 = vadd.f32 %v4308_v1, %v4045_v40  ;;  %6862 = vmatmul.msk.f32.gmra.mxu1 %vm279_vm1, %v10027_v32  ;;  %6909 = vmatmul.msk.f32.gmra.mxu2 %vm279_vm1, %v10058_v16 }
 0x607   : > { %6956 = vmatmul.msk.f32.gmra.mxu3 %vm279_vm1, %v10088_v50  ;;  %v4311_v34 = vpop.f32.mrf.mxu0 }
 0x608   : > { %v3843_v51 = vpop.f32.mrf.mxu2 }
 0x609   : > { %v3877_v56 = vadd.f32 %v3843_v51, %v3708_v5 }
 0x60a   : > { %v4012_v52 = vpop.f32.mrf.mxu3  ;;  %v4387_v8 = vpop.f32.mrf.mxu1  ;;  %7003 = vmatmul.msk.f32.gmra.mxu0 %vm279_vm1, %v10120_v6 }
 0x60b   : > { %v4046_v15 = vadd.f32 %v4012_v52, %v3877_v56  ;;  %v4483_v53 = vadd.f32 %v4387_v8, %v10015_v38 }
 0x60d   : > { %v10419_v28 = vadd.f32 %v4311_v34, %v4046_v15  ;;  %6863 = vmatmul.msk.f32.gmra.mxu1 %vm279_vm1, %v10042_v29  ;;  %6910 = vmatmul.msk.f32.gmra.mxu2 %vm279_vm1, %v10074_v35  ;;  %v11096_v34 = vld [vmem:[#allocation17_spill] sm:$0xff] }
 0x60f   : > { %6957 = vmatmul.msk.f32.gmra.mxu3 %vm279_vm1, %v10105_v22  ;;  %v4894_v32 = vpop.f32.mrf.mxu0 }
 0x610   : > { %v4556_v41 = vpop.f32.mrf.mxu2 }
 0x611   : > { %v4652_v57 = vadd.f32 %v4556_v41, %v4483_v53 }
 0x612   : > { %v4390_v39 = vpop.f32.mrf.mxu1  ;;  %v4725_v45 = vpop.f32.mrf.mxu3  ;;  %7004 = vmatmul.msk.f32.gmra.mxu0 %vm279_vm1, %v10137_v24 }
 0x613   : > { %v4821_v26 = vadd.f32 %v4725_v45, %v4652_v57  ;;  %v4484_v38 = vadd.f32 %v4390_v39, %v10031_v7  ;;  %v11097_v39 = vld [vmem:[#allocation14_spill] sm:$0xff] }
 0x615   : > { %6864 = vmatmul.msk.f32.gmra.mxu1 %vm279_vm1, %v10058_v16  ;;  %6911 = vmatmul.msk.f32.gmra.mxu2 %vm279_vm1, %v10088_v50  ;;  %v4990_v43 = vadd.f32 %v4894_v32, %v4821_v26 }
 0x617   : > { %6958 = vmatmul.msk.f32.gmra.mxu3 %vm279_vm1, %v10120_v6  ;;  %v4897_v29 = vpop.f32.mrf.mxu0  ;;  %v5054_v54 = vmul.f32 -0.0412, %v4990_v43  ;;  %vm5022_vm2 = vcmp.gt.f32.partialorder %v4990_v43, 0.0 }
 0x618   : > { %v4559_v44 = vpop.f32.mrf.mxu2 }
 0x619   : > { %v4653_v30 = vadd.f32 %v4559_v44, %v4484_v38  ;;  %v5086_v1 = vsel %vm5022_vm2, %v4990_v43, %v5054_v54  ;;  %v11098_v44 = vld [vmem:[#allocation21_spill] sm:$0xff] }
 0x61a   : > { %v4393_v11 = vpop.f32.mrf.mxu1  ;;  %v4728_v60 = vpop.f32.mrf.mxu3  ;;  %7005 = vmatmul.msk.f32.gmra.mxu0 %vm279_vm1, %v10152_v25 }
 0x61b   : > { %v4822_v2 = vadd.f32 %v4728_v60, %v4653_v30  ;;  %v4485_v7 = vadd.f32 %v4393_v11, %v10046_v42 }
 0x61d   : > { %v4991_v16 = vadd.f32 %v4897_v29, %v4822_v2  ;;  %6865 = vmatmul.msk.f32.gmra.mxu1 %vm279_vm1, %v10074_v35  ;;  %6912 = vmatmul.msk.f32.gmra.mxu2 %vm279_vm1, %v10105_v22 }
 0x61f   : > { %vm5023_vm3 = vcmp.gt.f32.partialorder %v4991_v16, 0.0  ;;  %v5055_v14 = vmul.f32 -0.0412, %v4991_v16  ;;  %6959 = vmatmul.msk.f32.gmra.mxu3 %vm279_vm1, %v10137_v24  ;;  %v4900_v61 = vpop.f32.mrf.mxu0 }
 0x620   : > { %v4562_v23 = vpop.f32.mrf.mxu2 }
 0x621   : > { %v5087_v33 = vsel %vm5023_vm3, %v4991_v16, %v5055_v14  ;;  %v4654_v4 = vadd.f32 %v4562_v23, %v4485_v7 }
 0x622   : > { %v5118_v47 = vmax.f32 %v5086_v1, %v5087_v33  ;;  %v4396_v12 = vpop.f32.mrf.mxu1  ;;  %v4731_v40 = vpop.f32.mrf.mxu3  ;;  %7006 = vmatmul.msk.f32.gmra.mxu0 %vm279_vm1, %v10171_v17 }
 0x623   : > { %v4823_v5 = vadd.f32 %v4731_v40, %v4654_v4  ;;  %v4486_v51 = vadd.f32 %v4396_v12, %v11096_v34  ;;  %v11099_v12 = vld [vmem:[#allocation16_spill] sm:$0xff] }
 0x624   : > { %v5119_v35 = vrot.slane %v5118_v47, 4 }
 0x625   : > { %6866 = vmatmul.msk.f32.gmra.mxu1 %vm279_vm1, %v10088_v50  ;;  %6913 = vmatmul.msk.f32.gmra.mxu2 %vm279_vm1, %v10120_v6  ;;  %v4992_v15 = vadd.f32 %v4900_v61, %v4823_v5 }
 0x626   : > { %v5120_v42 = vmax.f32 %v5118_v47, %v5119_v35 }
 0x627   : > { %6960 = vmatmul.msk.f32.gmra.mxu3 %vm279_vm1, %v10152_v25  ;;  %v4903_v56 = vpop.f32.mrf.mxu0  ;;  %v5056_v26 = vmul.f32 -0.0412, %v4992_v15  ;;  %vm5024_vm4 = vcmp.gt.f32.partialorder %v4992_v15, 0.0 }
 0x628   : > { %v5121_v52 = vrot.slane %v5120_v42, 2  ;;  %v4565_v8 = vpop.f32.mrf.mxu2 }
 0x629   : > { %v4655_v53 = vadd.f32 %v4565_v8, %v4486_v51  ;;  %v5088_v16 = vsel %vm5024_vm4, %v4992_v15, %v5056_v26 }
 0x62a   : > { %v5122_v32 = vmax.f32 %v5120_v42, %v5121_v52  ;;  %v4399_v41 = vpop.f32.mrf.mxu1  ;;  %v4734_v57 = vpop.f32.mrf.mxu3  ;;  %7007 = vmatmul.msk.f32.gmra.mxu0 %vm279_vm1, %v11097_v39 }
 0x62b   : > { %v4824_v50 = vadd.f32 %v4734_v57, %v4655_v53  ;;  %v4487_v43 = vadd.f32 %v4399_v41, %v11098_v44  ;;  %v11101_v44 = vld [vmem:[#allocation22_spill] sm:$0xff] }
 0x62c   : > { %v5123_v45 = vrot.slane %v5122_v32, 1 }
 0x62d   : > { %v4993_v38 = vadd.f32 %v4903_v56, %v4824_v50  ;;  %6867 = vmatmul.msk.f32.gmra.mxu1 %vm279_vm1, %v10105_v22  ;;  %6914 = vmatmul.msk.f32.gmra.mxu2 %vm279_vm1, %v10137_v24 }
 0x62e   : > { %v5124_v29 = vmax.f32 %v5122_v32, %v5123_v45 }
 0x62f   : > { %vm5025_vm5 = vcmp.gt.f32.partialorder %v4993_v38, 0.0  ;;  %v5057_v30 = vmul.f32 -0.0412, %v4993_v38  ;;  %6961 = vmatmul.msk.f32.gmra.mxu3 %vm279_vm1, %v10171_v17  ;;  %v4906_v11 = vpop.f32.mrf.mxu0 }
 0x630   : > { %v5230_v60 = vsub.f32 %v5086_v1, %v5124_v29  ;;  %v5231_v2 = vsub.f32 %v5087_v33, %v5124_v29  ;;  %v4568_v54 = vpop.f32.mrf.mxu2  ;;  %v11100_v33 = vld [vmem:[#allocation20_spill] sm:$0xff] }
 0x631   : > { %v5089_v7 = vsel %vm5025_vm5, %v4993_v38, %v5057_v30  ;;  %v4656_v14 = vadd.f32 %v4568_v54, %v4487_v43 }
 0x632   : > { %v5262_v22 = vmul.f32 1.442695, %v5230_v60  ;;  %v5264_v61 = vmul.f32 1.442695, %v5231_v2  ;;  %v5125_v23 = vmax.f32 %v5088_v16, %v5089_v7  ;;  %v4402_v4 = vpop.f32.mrf.mxu1  ;;  %v4737_v47 = vpop.f32.mrf.mxu3  ;;  %7008 = vmatmul.msk.f32.gmra.mxu0 %vm279_vm1, %v11099_v12 }
 0x633   : > { %v4825_v35 = vadd.f32 %v4737_v47, %v4656_v14  ;;  %v4488_v5 = vadd.f32 %v4402_v4, %v11100_v33 }
 0x634   : > { %7178 = vpow2.f32 %v5262_v22  ;;  %v5126_v40 = vrot.slane %v5125_v23, 4 }
 0x635   : > { %7180 = vpow2.f32 %v5264_v61  ;;  %6868 = vmatmul.msk.f32.gmra.mxu1 %vm279_vm1, %v10120_v6  ;;  %6915 = vmatmul.msk.f32.gmra.mxu2 %vm279_vm1, %v10152_v25  ;;  %v4994_v56 = vadd.f32 %v4906_v11, %v4825_v35 }
 0x636   : > { %v5127_v1 = vmax.f32 %v5125_v23, %v5126_v40 }
 0x637   : > { %6962 = vmatmul.msk.f32.gmra.mxu3 %vm279_vm1, %v11097_v39  ;;  %v4909_v42 = vpop.f32.mrf.mxu0  ;;  %v5058_v45 = vmul.f32 -0.0412, %v4994_v56  ;;  %vm5026_vm6 = vcmp.gt.f32.partialorder %v4994_v56, 0.0 }
 0x638   : > { %v5128_v34 = vrot.slane %v5127_v1, 2  ;;  %v4571_v51 = vpop.f32.mrf.mxu2 }
 0x639   : > { %v4657_v52 = vadd.f32 %v4571_v51, %v4488_v5  ;;  %v10488_v22 = vsel %vm5026_vm6, %v4994_v56, %v5058_v45 }
 0x63a   : > { %v10473_v8 = vpop.eup %7178  ;;  %v5129_v15 = vmax.f32 %v5127_v1, %v5128_v34  ;;  %v4405_v53 = vpop.f32.mrf.mxu1  ;;  %7009 = vmatmul.msk.f32.gmra.mxu0 %vm279_vm1, %v10214_v58  ;;  %v11102_v34 = vld [vmem:[#allocation18_spill] sm:$0xff] }
 0x63b   : > { %v4740_v32 = vpop.f32.mrf.mxu3  ;;  %v10477_v6 = vpop.eup %7180  ;;  %v4489_v43 = vadd.f32 %v4405_v53, %v11101_v44 }
 0x63c   : > { %v4826_v41 = vadd.f32 %v4740_v32, %v4657_v52  ;;  %v5326_v57 = vadd.f32 %v10477_v6, %v10473_v8  ;;  %v5130_v50 = vrot.slane %v5129_v15, 1 }
 0x63d   : > { %6869 = vmatmul.msk.f32.gmra.mxu1 %vm279_vm1, %v10137_v24  ;;  %6916 = vmatmul.msk.f32.gmra.mxu2 %vm279_vm1, %v10171_v17 }
 0x63e   : > { %v4995_v26 = vadd.f32 %v4909_v42, %v4826_v41  ;;  %v5327_v38 = vrot.slane %v5326_v57, 4  ;;  %v5131_v29 = vmax.f32 %v5129_v15, %v5130_v50 }
 0x63f   : > { %6963 = vmatmul.msk.f32.gmra.mxu3 %vm279_vm1, %v11099_v12  ;;  %v4912_v11 = vpop.f32.mrf.mxu0 }
 0x640   : > { %vm5027_vm7 = vcmp.gt.f32.partialorder %v4995_v26, 0.0  ;;  %v5059_v30 = vmul.f32 -0.0412, %v4995_v26  ;;  %v5328_v60 = vadd.f32 %v5327_v38, %v5326_v57  ;;  %v5232_v2 = vsub.f32 %v5088_v16, %v5131_v29  ;;  %v4574_v14 = vpop.f32.mrf.mxu2 }
 0x641   : > { %v5233_v54 = vsub.f32 %v5089_v7, %v5131_v29  ;;  %v4658_v61 = vadd.f32 %v4574_v14, %v4489_v43  ;;  %v10521_v14 = vld [vmem:[%s7588_s28 + $0x184] sm:$0xff] }
 0x642   : > { %v10490_v24 = vsel %vm5027_vm7, %v4995_v26, %v5059_v30  ;;  %v5329_v23 = vrot.slane %v5328_v60, 2  ;;  %v5266_v4 = vmul.f32 1.442695, %v5232_v2  ;;  %v4408_v35 = vpop.f32.mrf.mxu1  ;;  %7010 = vmatmul.msk.f32.gmra.mxu0 %vm279_vm1, %v10227_v13 }
 0x643   : > { %v5268_v47 = vmul.f32 1.442695, %v5233_v54  ;;  %v5132_v40 = vmax.f32 %v10488_v22, %v10490_v24  ;;  %v4743_v1 = vpop.f32.mrf.mxu3  ;;  %v4490_v51 = vadd.f32 %v4408_v35, %v11102_v34 }
 0x644   : > { %v5330_v33 = vadd.f32 %v5329_v23, %v5328_v60  ;;  %7182 = vpow2.f32 %v5266_v4  ;;  %v4827_v42 = vadd.f32 %v4743_v1, %v4658_v61  ;;  %v11103_v4 = vld [vmem:[#allocation23_spill] sm:$0xff] }
 0x645   : > { %v5133_v16 = vrot.slane %v5132_v40, 4  ;;  %7184 = vpow2.f32 %v5268_v47  ;;  %6870 = vmatmul.msk.f32.gmra.mxu1 %vm279_vm1, %v10152_v25  ;;  %6917 = vmatmul.msk.f32.gmra.mxu2 %vm279_vm1, %v11097_v39 }
 0x646   : > { %v5331_v7 = vrot.slane %v5330_v33, 1  ;;  %v4996_v25 = vadd.f32 %v4912_v11, %v4827_v42 }
 0x647   : > { %v5134_v5 = vmax.f32 %v5132_v40, %v5133_v16  ;;  %6964 = vmatmul.msk.f32.gmra.mxu3 %vm279_vm1, %v10214_v58  ;;  %v4915_v56 = vpop.f32.mrf.mxu0 }
 0x648   : > { %v10503_v52 = vadd.f32 %v5331_v7, %v5330_v33  ;;  %v4577_v53 = vpop.f32.mrf.mxu2  ;;  %v5060_v11 = vmul.f32 -0.0412, %v4996_v25  ;;  %vm5028_vm8 = vcmp.gt.f32.partialorder %v4996_v25, 0.0 }
 0x649   : > { %v5135_v15 = vrot.slane %v5134_v5, 2  ;;  %v4659_v32 = vadd.f32 %v4577_v53, %v4490_v51 }
 0x64a   : > { %v10505_v41 = vpop.eup %7182  ;;  %7186 = vrcp.f32 %v10503_v52  ;;  %v4411_v57 = vpop.f32.mrf.mxu1  ;;  %7011 = vmatmul.msk.f32.gmra.mxu0 %vm279_vm1, %v10239_v0  ;;  %v10527_v16 = vsel %vm5028_vm8, %v4996_v25, %v5060_v11  ;;  %v5449_v53 = vand.u32 2147483648, %v10503_v52  ;;  %vm5443_vm11 = vweird.f32 %v10503_v52  ;;  %v10549_v11 = vld [vmem:[%s7588_s28 + $0x18c] sm:$0xff] }
 0x64b   : > { %v4746_v50 = vpop.f32.mrf.mxu3  ;;  %v10510_v45 = vpop.eup %7184  ;;  %v5136_v26 = vmax.f32 %v5134_v5, %v5135_v15  ;;  %v4491_v47 = vadd.f32 %v4411_v57, %v11103_v4 }
 0x64c   : > { %v4828_v38 = vadd.f32 %v4746_v50, %v4659_v32  ;;  %v5333_v29 = vadd.f32 %v10510_v45, %v10505_v41 }
 0x64d   : > { %v5137_v44 = vrot.slane %v5136_v26, 1  ;;  %6871 = vmatmul.msk.f32.gmra.mxu1 %vm279_vm1, %v10171_v17  ;;  %6918 = vmatmul.msk.f32.gmra.mxu2 %vm279_vm1, %v11099_v12 }
 0x64e   : > { %v4997_v43 = vadd.f32 %v4915_v56, %v4828_v38  ;;  %v5334_v30 = vrot.slane %v5333_v29, 4 }
 0x64f   : > { %v5138_v60 = vmax.f32 %v5136_v26, %v5137_v44  ;;  %6965 = vmatmul.msk.f32.gmra.mxu3 %vm279_vm1, %v10227_v13  ;;  %v4918_v54 = vpop.f32.mrf.mxu0  ;;  %v11104_v44 = vld [vmem:[#allocation12_spill] sm:$0xff] }
 0x650   : > { %vm5029_vm9 = vcmp.gt.f32.partialorder %v4997_v43, 0.0  ;;  %v5061_v2 = vmul.f32 -0.0412, %v4997_v43  ;;  %v7187_v61 = vpop.eup %7186  ;;  %v5335_v23 = vadd.f32 %v5334_v30, %v5333_v29  ;;  %v4580_v17 = vpop.f32.mrf.mxu2 }
 0x651   : > { %v5439_v40 = vmul.f32 %v7187_v61, %v10503_v52  ;;  %v5234_v35 = vsub.f32 %v10488_v22, %v5138_v60  ;;  %v5235_v1 = vsub.f32 %v10490_v24, %v5138_v60  ;;  %v4660_v5 = vadd.f32 %v4580_v17, %v4491_v47 }
 0x652   : > { %v5336_v33 = vrot.slane %v5335_v23, 2  ;;  %v10529_v7 = vsel %vm5029_vm9, %v4997_v43, %v5061_v2  ;;  %v4414_v42 = vpop.f32.mrf.mxu1  ;;  %7012 = vmatmul.msk.f32.gmra.mxu0 %vm279_vm1, %v10521_v14  ;;  %v5447_v24 = vand.u32 2147483647, %v10503_v52  ;;  %vm5444_vm10 = vweird.f32 %v7187_v61 }
 0x653   : > { %v4749_v34 = vpop.f32.mrf.mxu3  ;;  %v5440_v51 = vsub.f32 1.0, %v5439_v40  ;;  %v5270_v56 = vmul.f32 1.442695, %v5234_v35  ;;  %v5272_v15 = vmul.f32 1.442695, %v5235_v1  ;;  %v5139_v22 = vmax.f32 %v10527_v16, %v10529_v7  ;;  %vm5445_vm12 = vmor %vm5443_vm11, %vm5444_vm10 }
 0x654   : > { %v5337_v32 = vadd.f32 %v5336_v33, %v5335_v23  ;;  %v4829_v26 = vadd.f32 %v4749_v34, %v4660_v5  ;;  %v4492_v43 = vadd.f32 %v4414_v42, %v11104_v44  ;;  %vm5448_vm13 = vcmp.eq.f32.partialorder %v5447_v24, 8.507059e+37  ;;  %v10576_v24 = vld [vmem:[%s7588_s28 + $0x19c] sm:$0xff] }
 0x655   : > { %v5441_v25 = vmul.f32 %v7187_v61, %v5440_v51  ;;  %7188 = vpow2.f32 %v5270_v56  ;;  %v5140_v57 = vrot.slane %v5139_v22, 4  ;;  %6872 = vmatmul.msk.f32.gmra.mxu1 %vm279_vm1, %v11097_v39  ;;  %6919 = vmatmul.msk.f32.gmra.mxu2 %vm279_vm1, %v10214_v58  ;;  %v5450_v39 = vor.u32 1.1754944e-38, %v5449_v53 }
 0x656   : > { %v5338_v50 = vrot.slane %v5337_v32, 1  ;;  %7190 = vpow2.f32 %v5272_v15  ;;  %v4998_v17 = vadd.f32 %v4918_v54, %v4829_v26 }
 0x657   : > { %v5442_v38 = vadd.f32 %v7187_v61, %v5441_v25  ;;  %v5141_v29 = vmax.f32 %v5139_v22, %v5140_v57  ;;  %6966 = vmatmul.msk.f32.gmra.mxu3 %vm279_vm1, %v10239_v0  ;;  %v4921_v30 = vpop.f32.mrf.mxu0 }
 0x658   : > { %v10552_v60 = vadd.f32 %v5338_v50, %v5337_v32  ;;  %v4583_v2 = vpop.f32.mrf.mxu2  ;;  %vm5030_vm14 = vcmp.gt.f32.partialorder %v4998_v17, 0.0  ;;  %v11105_v32 = vld [vmem:[#allocation13_spill] sm:$0xff] }
 0x659   : > { %v5446_v23 = vsel %vm5445_vm12, %v7187_v61, %v5442_v38  ;;  %v5142_v4 = vrot.slane %v5141_v29, 2  ;;  %v4661_v47 = vadd.f32 %v4583_v2, %v4492_v43 }
 0x65a   : > { %v5451_v52 = vsel %vm5448_vm13, %v5450_v39, %v5446_v23  ;;  %7192 = vrcp.f32 %v10552_v60  ;;  %v4417_v40 = vpop.f32.mrf.mxu1  ;;  %7013 = vmatmul.msk.f32.gmra.mxu0 %vm279_vm1, %v10549_v11  ;;  %vm5457_vm2 = vweird.f32 %v10552_v60 }
 0x65b   : > { %v4752_v35 = vpop.f32.mrf.mxu3  ;;  %v10557_v1 = vpop.eup %7188  ;;  %v5662_v33 = vmul.f32 %v10473_v8, %v5451_v52  ;;  %v5663_v5 = vmul.f32 %v10477_v6, %v5451_v52  ;;  %v5143_v42 = vmax.f32 %v5141_v29, %v5142_v4  ;;  %v5062_v8 = vmul.f32 -0.0412, %v4998_v17 }
 0x65c   : > { %v10561_v61 = vpop.eup %7190  ;;  %v4830_v34 = vadd.f32 %v4752_v35, %v4661_v47  ;;  %v4493_v25 = vadd.f32 %v4417_v40, %v11105_v32 }
 0x65d   : > { %5694 = vst [vmem:[%s10563_s24] sm:$0xff] %v5662_v33  ;;  %v5340_v54 = vadd.f32 %v10561_v61, %v10557_v1  ;;  %v5144_v51 = vrot.slane %v5143_v42, 1  ;;  %6873 = vmatmul.msk.f32.gmra.mxu1 %vm279_vm1, %v11099_v12  ;;  %6920 = vmatmul.msk.f32.gmra.mxu2 %vm279_vm1, %v10227_v13  ;;  %v10582_v29 = vsel %vm5030_vm14, %v4998_v17, %v5062_v8  ;;  %v11106_v33 = vld [vmem:[#allocation15_spill] sm:$0xff] }
 0x65e   : > { %5695 = vst [vmem:[%s10563_s24 + $0x8] sm:$0xff] %v5663_v5  ;;  %v4999_v6 = vadd.f32 %v4921_v30, %v4830_v34 }
 0x65f   : > { %v5341_v56 = vrot.slane %v5340_v54, 4  ;;  %v5145_v15 = vmax.f32 %v5143_v42, %v5144_v51  ;;  %6967 = vmatmul.msk.f32.gmra.mxu3 %vm279_vm1, %v10521_v14  ;;  %v4924_v22 = vpop.f32.mrf.mxu0 }
 0x660   : > { %v7193_v53 = vpop.eup %7192  ;;  %vm5031_vm15 = vcmp.gt.f32.partialorder %v4999_v6, 0.0  ;;  %v5063_v12 = vmul.f32 -0.0412, %v4999_v6  ;;  %v4586_v57 = vpop.f32.mrf.mxu2 }
 0x661   : > { %v5453_v13 = vmul.f32 %v7193_v53, %v10552_v60  ;;  %v5342_v50 = vadd.f32 %v5341_v56, %v5340_v54  ;;  %v5236_v26 = vsub.f32 %v10527_v16, %v5145_v15  ;;  %v5237_v38 = vsub.f32 %v10529_v7, %v5145_v15 }
 0x662   : > { %v10584_v44 = vsel %vm5031_vm15, %v4999_v6, %v5063_v12  ;;  %v4662_v43 = vadd.f32 %v4586_v57, %v4493_v25  ;;  %v4420_v30 = vpop.f32.mrf.mxu1  ;;  %7014 = vmatmul.msk.f32.gmra.mxu0 %vm279_vm1, %v10576_v24  ;;  %vm5458_vm0 = vweird.f32 %v7193_v53  ;;  %v5461_v16 = vand.u32 2147483647, %v10552_v60  ;;  %v10601_v6 = vld [vmem:[%s7588_s28 + $0x1a4] sm:$0xff] }
 0x663   : > { %v4755_v39 = vpop.f32.mrf.mxu3  ;;  %v5454_v2 = vsub.f32 1.0, %v5453_v13  ;;  %v5343_v23 = vrot.slane %v5342_v50, 2  ;;  %v5274_v4 = vmul.f32 1.442695, %v5236_v26  ;;  %v5146_v47 = vmax.f32 %v10582_v29, %v10584_v44  ;;  %vm5459_vm3 = vmor %vm5457_vm2, %vm5458_vm0 }
 0x664   : > { %v5463_v7 = vand.u32 2147483648, %v10552_v60  ;;  %v5276_v52 = vmul.f32 1.442695, %v5237_v38  ;;  %v4494_v5 = vadd.f32 %v4420_v30, %v11106_v33  ;;  %v4831_v51 = vadd.f32 %v4755_v39, %v4662_v43 }
 0x665   : > { %v5455_v17 = vmul.f32 %v7193_v53, %v5454_v2  ;;  %v5344_v40 = vadd.f32 %v5343_v23, %v5342_v50  ;;  %7194 = vpow2.f32 %v5274_v4  ;;  %v5147_v35 = vrot.slane %v5146_v47, 4  ;;  %6874 = vmatmul.msk.f32.gmra.mxu1 %vm279_vm1, %v10214_v58  ;;  %6921 = vmatmul.msk.f32.gmra.mxu2 %vm279_vm1, %v10239_v0  ;;  %v7274_v2 = vld [vmem:[%s7588_s28 + $0x16c] sm:$0xff] }
 0x666   : > { %7196 = vpow2.f32 %v5276_v52  ;;  %vm5462_vm4 = vcmp.eq.f32.partialorder %v5461_v16, 8.507059e+37  ;;  %v5464_v58 = vor.u32 1.1754944e-38, %v5463_v7 }
 0x667   : > { %v5456_v42 = vadd.f32 %v7193_v53, %v5455_v17  ;;  %v5345_v34 = vrot.slane %v5344_v40, 1  ;;  %v5148_v54 = vmax.f32 %v5146_v47, %v5147_v35  ;;  %6968 = vmatmul.msk.f32.gmra.mxu3 %vm279_vm1, %v10549_v11  ;;  %v4927_v8 = vpop.f32.mrf.mxu0  ;;  %v10626_v47 = vld [vmem:[%s7588_s28 + $0x1b4] sm:$0xff] }
 0x668   : > { %v4589_v0 = vpop.f32.mrf.mxu2 }
 0x669   : > { %v5460_v60 = vsel %vm5459_vm3, %v7193_v53, %v5456_v42  ;;  %v10604_v56 = vadd.f32 %v5345_v34, %v5344_v40  ;;  %v5149_v15 = vrot.slane %v5148_v54, 2  ;;  %v4663_v32 = vadd.f32 %v4589_v0, %v4494_v5  ;;  %v11107_v40 = vld [vmem:[#allocation19_spill] sm:$0xff] }
 0x66a   : > { %v5465_v25 = vsel %vm5462_vm4, %v5464_v58, %v5460_v60  ;;  %v4423_v12 = vpop.f32.mrf.mxu1  ;;  %7015 = vmatmul.msk.f32.gmra.mxu0 %vm279_vm1, %v10601_v6  ;;  %v5000_v53 = vadd.f32 %v4924_v22, %v4831_v51 }
 0x66b   : > { %v4758_v57 = vpop.f32.mrf.mxu3  ;;  %v10608_v13 = vpop.eup %7194  ;;  %v5664_v50 = vmul.f32 %v10505_v41, %v5465_v25  ;;  %v5665_v26 = vmul.f32 %v10510_v45, %v5465_v25  ;;  %7198 = vrcp.f32 %v10604_v56  ;;  %v5150_v43 = vmax.f32 %v5148_v54, %v5149_v15 }
 0x66c   : > { %v10613_v38 = vpop.eup %7196  ;;  %v4832_v39 = vadd.f32 %v4758_v57, %v4663_v32  ;;  %v5064_v23 = vmul.f32 -0.0412, %v5000_v53  ;;  %vm5032_vm5 = vcmp.gt.f32.partialorder %v5000_v53, 0.0  ;;  %v4495_v35 = vadd.f32 %v4423_v12, %v11107_v40 }
 0x66d   : > { %5696 = vst [vmem:[%s10563_s24 + $0x10] sm:$0xff] %v5664_v50  ;;  %v5347_v30 = vadd.f32 %v10613_v38, %v10608_v13  ;;  %6875 = vmatmul.msk.f32.gmra.mxu1 %vm279_vm1, %v7274_v2  ;;  %6922 = vmatmul.msk.f32.gmra.mxu2 %vm279_vm1, %v10521_v14  ;;  %v5151_v41 = vrot.slane %v5150_v43, 1  ;;  %v5475_v12 = vand.u32 2147483647, %v10604_v56  ;;  %v7275_v50 = vld [vmem:[%s7588_s28 + $0x174] sm:$0xff]  ;;  %vm5471_vm8 = vweird.f32 %v10604_v56 }
 0x66e   : > { %5697 = vst [vmem:[%s10563_s24 + $0x18] sm:$0xff] %v5665_v26  ;;  %v5001_v22 = vadd.f32 %v4927_v8, %v4832_v39  ;;  %v10634_v58 = vsel %vm5032_vm5, %v5000_v53, %v5064_v23 }
 0x66f   : > { %v5348_v45 = vrot.slane %v5347_v30, 4  ;;  %6969 = vmatmul.msk.f32.gmra.mxu3 %vm279_vm1, %v10576_v24  ;;  %v4930_v4 = vpop.f32.mrf.mxu0  ;;  %v5152_v16 = vmax.f32 %v5150_v43, %v5151_v41  ;;  %v10650_v41 = vld [vmem:[%s7588_s28 + $0x1bc] sm:$0xff]  ;;  %vm5476_vm10 = vcmp.eq.f32.partialorder %v5475_v12, 8.507059e+37 }
 0x670   : > { %v4592_v7 = vpop.f32.mrf.mxu2  ;;  %vm5033_vm6 = vcmp.gt.f32.partialorder %v5001_v22, 0.0  ;;  %v5065_v33 = vmul.f32 -0.0412, %v5001_v22 }
 0x671   : > { %v7199_v52 = vpop.eup %7198  ;;  %v5349_v17 = vadd.f32 %v5348_v45, %v5347_v30  ;;  %v5238_v42 = vsub.f32 %v10582_v29, %v5152_v16  ;;  %v5239_v34 = vsub.f32 %v10584_v44, %v5152_v16  ;;  %v4664_v60 = vadd.f32 %v4592_v7, %v4495_v35 }
 0x672   : > { %v5467_v5 = vmul.f32 %v7199_v52, %v10604_v56  ;;  %v4426_v54 = vpop.f32.mrf.mxu1  ;;  %7016 = vmatmul.msk.f32.gmra.mxu0 %vm279_vm1, %v10626_v47  ;;  %v10636_v0 = vsel %vm5033_vm6, %v5001_v22, %v5065_v33  ;;  %v5477_v44 = vand.u32 2147483648, %v10604_v56  ;;  %vm5472_vm7 = vweird.f32 %v7199_v52 }
 0x673   : > { %v4761_v51 = vpop.f32.mrf.mxu3  ;;  %v5350_v8 = vrot.slane %v5349_v17, 2  ;;  %v5278_v32 = vmul.f32 1.442695, %v5238_v42  ;;  %v5280_v25 = vmul.f32 1.442695, %v5239_v34  ;;  %v5153_v29 = vmax.f32 %v10634_v58, %v10636_v0  ;;  %vm5473_vm9 = vmor %vm5471_vm8, %vm5472_vm7 }
 0x674   : > { %v5468_v15 = vsub.f32 1.0, %v5467_v5  ;;  %v4496_v30 = vadd.f32 %v4426_v54, %v10219_v49  ;;  %v4833_v39 = vadd.f32 %v4761_v51, %v4664_v60  ;;  %v5478_v16 = vor.u32 1.1754944e-38, %v5477_v44 }
 0x675   : > { %v5351_v57 = vadd.f32 %v5350_v8, %v5349_v17  ;;  %6876 = vmatmul.msk.f32.gmra.mxu1 %vm279_vm1, %v7275_v50  ;;  %6923 = vmatmul.msk.f32.gmra.mxu2 %vm279_vm1, %v10549_v11  ;;  %7200 = vpow2.f32 %v5278_v32  ;;  %v5154_v53 = vrot.slane %v5153_v29, 4 }
 0x676   : > { %v5469_v26 = vmul.f32 %v7199_v52, %v5468_v15  ;;  %7202 = vpow2.f32 %v5280_v25  ;;  %v5002_v56 = vadd.f32 %v4930_v4, %v4833_v39  ;;  %v4085_v25 = vld [vmem:[%s7588_s28 + $0x1cc] sm:$0xff] }
 0x677   : > { %v5352_v43 = vrot.slane %v5351_v57, 1  ;;  %6970 = vmatmul.msk.f32.gmra.mxu3 %vm279_vm1, %v10601_v6  ;;  %v4933_v2 = vpop.f32.mrf.mxu0  ;;  %v5155_v23 = vmax.f32 %v5153_v29, %v5154_v53 }
 0x678   : > { %v5470_v45 = vadd.f32 %v7199_v52, %v5469_v26  ;;  %v4595_v22 = vpop.f32.mrf.mxu2  ;;  %vm5034_vm11 = vcmp.gt.f32.partialorder %v5002_v56, 0.0 }
 0x679   : > { %v10653_v7 = vadd.f32 %v5352_v43, %v5351_v57  ;;  %v4665_v17 = vadd.f32 %v4595_v22, %v4496_v30  ;;  %v5156_v49 = vrot.slane %v5155_v23, 2 }
 0x67a   : > { %v5474_v40 = vsel %vm5473_vm9, %v7199_v52, %v5470_v45  ;;  %v4429_v35 = vpop.f32.mrf.mxu1  ;;  %7017 = vmatmul.msk.f32.gmra.mxu0 %vm279_vm1, %v10650_v41 }
 0x67b   : > { %v4764_v33 = vpop.f32.mrf.mxu3  ;;  %v5479_v5 = vsel %vm5476_vm10, %v5478_v16, %v5474_v40  ;;  %7204 = vrcp.f32 %v10653_v7  ;;  %v10658_v42 = vpop.eup %7200  ;;  %v5157_v54 = vmax.f32 %v5155_v23, %v5156_v49  ;;  %v4497_v15 = vadd.f32 %v4429_v35, %v10232_v18 }
 0x67c   : > { %v5666_v34 = vmul.f32 %v10557_v1, %v5479_v5  ;;  %v5667_v52 = vmul.f32 %v10561_v61, %v5479_v5  ;;  %v10662_v51 = vpop.eup %7202  ;;  %v4834_v8 = vadd.f32 %v4764_v33, %v4665_v17  ;;  %v5066_v1 = vmul.f32 -0.0412, %v5002_v56 }
 0x67d   : > { %6877 = vmatmul.msk.f32.gmra.mxu1 %vm279_vm1, %v10521_v14  ;;  %6924 = vmatmul.msk.f32.gmra.mxu2 %vm279_vm1, %v10576_v24  ;;  %v5354_v4 = vadd.f32 %v10662_v51, %v10658_v42  ;;  %v5158_v60 = vrot.slane %v5157_v54, 1  ;;  %vm5485_vm14 = vweird.f32 %v10653_v7 }
 0x67e   : > { %5698 = vst [vmem:[%s10563_s24 + $0x20] sm:$0xff] %v5666_v34  ;;  %v5003_v61 = vadd.f32 %v4933_v2, %v4834_v8  ;;  %v10681_v39 = vsel %vm5034_vm11, %v5002_v56, %v5066_v1  ;;  %v4086_v56 = vld [vmem:[%s7588_s28 + $0x1d4] sm:$0xff] }
 0x67f   : > { %5699 = vst [vmem:[%s10563_s24 + $0x28] sm:$0xff] %v5667_v52  ;;  %6971 = vmatmul.msk.f32.gmra.mxu3 %vm279_vm1, %v10626_v47  ;;  %v4936_v32 = vpop.f32.mrf.mxu0  ;;  %v5355_v29 = vrot.slane %v5354_v4, 4  ;;  %v5159_v14 = vmax.f32 %v5157_v54, %v5158_v60  ;;  %v5489_v47 = vand.u32 2147483647, %v10653_v7 }
 0x680   : > { %v4598_v12 = vpop.f32.mrf.mxu2  ;;  %vm5035_vm12 = vcmp.gt.f32.partialorder %v5003_v61, 0.0  ;;  %v5067_v44 = vmul.f32 -0.0412, %v5003_v61 }
 0x681   : > { %v7205_v24 = vpop.eup %7204  ;;  %v4666_v57 = vadd.f32 %v4598_v12, %v4497_v15  ;;  %v5356_v26 = vadd.f32 %v5355_v29, %v5354_v4  ;;  %v5240_v53 = vsub.f32 %v10634_v58, %v5159_v14  ;;  %v5241_v30 = vsub.f32 %v10636_v0, %v5159_v14 }
 0x682   : > { %v5481_v50 = vmul.f32 %v7205_v24, %v10653_v7  ;;  %v4432_v18 = vpop.f32.mrf.mxu1  ;;  %7018 = vmatmul.msk.f32.gmra.mxu0 %vm279_vm1, %v4085_v25  ;;  %v10683_v2 = vsel %vm5035_vm12, %v5003_v61, %v5067_v44  ;;  %vm5486_vm13 = vweird.f32 %v7205_v24  ;;  %v5491_v58 = vand.u32 2147483648, %v10653_v7 }
 0x683   : > { %v4767_v43 = vpop.f32.mrf.mxu3  ;;  %v5357_v23 = vrot.slane %v5356_v26, 2  ;;  %v5282_v22 = vmul.f32 1.442695, %v5240_v53  ;;  %v5160_v16 = vmax.f32 %v10681_v39, %v10683_v2  ;;  %v5284_v17 = vmul.f32 1.442695, %v5241_v30  ;;  %vm5487_vm15 = vmor %vm5485_vm14, %vm5486_vm13 }
 0x684   : > { %v5482_v45 = vsub.f32 1.0, %v5481_v50  ;;  %v4835_v40 = vadd.f32 %v4767_v43, %v4666_v57  ;;  %v4498_v33 = vadd.f32 %v4432_v18, %v10243_v27  ;;  %vm5490_vm0 = vcmp.eq.f32.partialorder %v5489_v47, 8.507059e+37 }
 0x685   : > { %6878 = vmatmul.msk.f32.gmra.mxu1 %vm279_vm1, %v10549_v11  ;;  %6925 = vmatmul.msk.f32.gmra.mxu2 %vm279_vm1, %v10601_v6  ;;  %v5358_v49 = vadd.f32 %v5357_v23, %v5356_v26  ;;  %7206 = vpow2.f32 %v5282_v22  ;;  %v5161_v35 = vrot.slane %v5160_v16, 4  ;;  %v5492_v6 = vor.u32 1.1754944e-38, %v5491_v58 }
 0x686   : > { %v5483_v0 = vmul.f32 %v7205_v24, %v5482_v45  ;;  %7208 = vpow2.f32 %v5284_v17  ;;  %v5004_v1 = vadd.f32 %v4936_v32, %v4835_v40 }
 0x687   : > { %6972 = vmatmul.msk.f32.gmra.mxu3 %vm279_vm1, %v10650_v41  ;;  %v4939_v5 = vpop.f32.mrf.mxu0  ;;  %v5359_v52 = vrot.slane %v5358_v49, 1  ;;  %v5162_v11 = vmax.f32 %v5160_v16, %v5161_v35 }
 0x688   : > { %v5484_v34 = vadd.f32 %v7205_v24, %v5483_v0  ;;  %v4601_v54 = vpop.f32.mrf.mxu2  ;;  %v5068_v57 = vmul.f32 -0.0412, %v5004_v1 }
 0x689   : > { %v4667_v8 = vadd.f32 %v4601_v54, %v4498_v33  ;;  %v10698_v60 = vadd.f32 %v5359_v52, %v5358_v49  ;;  %v5163_v27 = vrot.slane %v5162_v11, 2 }
 0x68a   : > { %v5488_v4 = vsel %vm5487_vm15, %v7205_v24, %v5484_v34  ;;  %v4435_v41 = vpop.f32.mrf.mxu1  ;;  %7019 = vmatmul.msk.f32.gmra.mxu0 %vm279_vm1, %v4086_v56  ;;  %vm5036_vm1 = vcmp.gt.f32.partialorder %v5004_v1, 0.0 }
 0x68b   : > { %v4770_v15 = vpop.f32.mrf.mxu3  ;;  %v5493_v7 = vsel %vm5490_vm0, %v5492_v6, %v5488_v4  ;;  %v10701_v25 = vpop.eup %7206  ;;  %7210 = vrcp.f32 %v10698_v60  ;;  %v5164_v24 = vmax.f32 %v5162_v11, %v5163_v27  ;;  %v4499_v43 = vadd.f32 %v4435_v41, %v10254_v9 }
 0x68c   : > { %v4836_v61 = vadd.f32 %v4770_v15, %v4667_v8  ;;  %v5668_v29 = vmul.f32 %v10608_v13, %v5493_v7  ;;  %v5669_v14 = vmul.f32 %v10613_v38, %v5493_v7  ;;  %v10706_v12 = vpop.eup %7208  ;;  %v10713_v45 = vsel %vm5036_vm1, %v5004_v1, %v5068_v57 }
 0x68d   : > { %v5361_v32 = vadd.f32 %v10706_v12, %v10701_v25  ;;  %v5165_v50 = vrot.slane %v5164_v24, 1  ;;  %v5503_v49 = vand.u32 2147483647, %v10698_v60  ;;  %v5505_v34 = vand.u32 2147483648, %v10698_v60 }
 0x68e   : > { %v5005_v44 = vadd.f32 %v4939_v5, %v4836_v61  ;;  %5700 = vst [vmem:[%s10563_s24 + $0x30] sm:$0xff] %v5668_v29  ;;  %vm5499_vm4 = vweird.f32 %v10698_v60 }
 0x68f   : > { %5701 = vst [vmem:[%s10563_s24 + $0x38] sm:$0xff] %v5669_v14  ;;  %v4942_v26 = vpop.f32.mrf.mxu0  ;;  %v5362_v53 = vrot.slane %v5361_v32, 4  ;;  %v5166_v38 = vmax.f32 %v5164_v24, %v5165_v50  ;;  %v5506_v15 = vor.u32 1.1754944e-38, %v5505_v34  ;;  %vm5504_vm6 = vcmp.eq.f32.partialorder %v5503_v49, 8.507059e+37 }
 0x690   : > { %vm5037_vm2 = vcmp.gt.f32.partialorder %v5005_v44, 0.0  ;;  %v5069_v13 = vmul.f32 -0.0412, %v5005_v44  ;;  %v4604_v18 = vpop.f32.mrf.mxu2 }
 0x691   : > { %v7211_v47 = vpop.eup %7210  ;;  %v5363_v30 = vadd.f32 %v5362_v53, %v5361_v32  ;;  %v5242_v17 = vsub.f32 %v10681_v39, %v5166_v38  ;;  %v5243_v40 = vsub.f32 %v10683_v2, %v5166_v38  ;;  %v4668_v0 = vadd.f32 %v4604_v18, %v4499_v43 }
 0x692   : > { %v10715_v23 = vsel %vm5037_vm2, %v5005_v44, %v5069_v13  ;;  %v4438_v22 = vpop.f32.mrf.mxu1  ;;  %v5495_v58 = vmul.f32 %v7211_v47, %v10698_v60  ;;  %vm5500_vm3 = vweird.f32 %v7211_v47 }
 0x693   : > { %v4773_v16 = vpop.f32.mrf.mxu3  ;;  %v5364_v35 = vrot.slane %v5363_v30, 2  ;;  %v5167_v9 = vmax.f32 %v10713_v45, %v10715_v23  ;;  %v5286_v5 = vmul.f32 1.442695, %v5242_v17  ;;  %v5288_v56 = vmul.f32 1.442695, %v5243_v40  ;;  %vm5501_vm5 = vmor %vm5499_vm4, %vm5500_vm3 }
 0x694   : > { %v5496_v33 = vsub.f32 1.0, %v5495_v58  ;;  %v4500_v39 = vadd.f32 %v4438_v22, %v10265_v10  ;;  %v4837_v2 = vadd.f32 %v4773_v16, %v4668_v0 }
 0x695   : > { %v5365_v52 = vadd.f32 %v5364_v35, %v5363_v30  ;;  %v5168_v11 = vrot.slane %v5167_v9, 4  ;;  %7212 = vpow2.f32 %v5286_v5 }
 0x696   : > { %v5497_v54 = vmul.f32 %v7211_v47, %v5496_v33  ;;  %7214 = vpow2.f32 %v5288_v56  ;;  %v5006_v24 = vadd.f32 %v4942_v26, %v4837_v2 }
 0x697   : > { %v4945_v6 = vpop.f32.mrf.mxu0  ;;  %v5366_v8 = vrot.slane %v5365_v52, 1  ;;  %v5169_v4 = vmax.f32 %v5167_v9, %v5168_v11 }
 0x698   : > { %v4607_v27 = vpop.f32.mrf.mxu2  ;;  %v5498_v1 = vadd.f32 %v7211_v47, %v5497_v54  ;;  %v5070_v26 = vmul.f32 -0.0412, %v5006_v24  ;;  %vm5038_vm7 = vcmp.gt.f32.partialorder %v5006_v24, 0.0 }
 0x699   : > { %v4669_v41 = vadd.f32 %v4607_v27, %v4500_v39  ;;  %v10727_v7 = vadd.f32 %v5366_v8, %v5365_v52  ;;  %v5170_v61 = vrot.slane %v5169_v4, 2 }
 0x69a   : > { %v4441_v29 = vpop.f32.mrf.mxu1  ;;  %v5502_v10 = vsel %vm5501_vm5, %v7211_v47, %v5498_v1  ;;  %v10745_v33 = vsel %vm5038_vm7, %v5006_v24, %v5070_v26 }
 0x69b   : > { %v4776_v14 = vpop.f32.mrf.mxu3  ;;  %v5507_v32 = vsel %vm5504_vm6, %v5506_v15, %v5502_v10  ;;  %7216 = vrcp.f32 %v10727_v7  ;;  %v10730_v57 = vpop.eup %7212  ;;  %v5171_v53 = vmax.f32 %v5169_v4, %v5170_v61  ;;  %v5519_v39 = vand.u32 2147483648, %v10727_v7 }
 0x69c   : > { %v4838_v44 = vadd.f32 %v4776_v14, %v4669_v41  ;;  %v5670_v60 = vmul.f32 %v10658_v42, %v5507_v32  ;;  %v5671_v50 = vmul.f32 %v10662_v51, %v5507_v32  ;;  %v10734_v13 = vpop.eup %7214  ;;  %v4501_v51 = vadd.f32 %v4441_v29, %v10276_v62 }
 0x69d   : > { %v5368_v38 = vadd.f32 %v10734_v13, %v10730_v57  ;;  %v5172_v43 = vrot.slane %v5171_v53, 1  ;;  %v5517_v62 = vand.u32 2147483647, %v10727_v7  ;;  %vm5513_vm10 = vweird.f32 %v10727_v7 }
 0x69e   : > { %v5007_v18 = vadd.f32 %v4945_v6, %v4838_v44  ;;  %5702 = vst [vmem:[%s10563_s24 + $0x40] sm:$0xff] %v5670_v60  ;;  %v5520_v14 = vor.u32 1.1754944e-38, %v5519_v39 }
 0x69f   : > { %v4948_v47 = vpop.f32.mrf.mxu0  ;;  %5703 = vst [vmem:[%s10563_s24 + $0x48] sm:$0xff] %v5671_v50  ;;  %v5369_v16 = vrot.slane %v5368_v38, 4  ;;  %v5173_v42 = vmax.f32 %v5171_v53, %v5172_v43  ;;  %vm5518_vm12 = vcmp.eq.f32.partialorder %v5517_v62, 8.507059e+37 }
 0x6a0   : > { %vm5039_vm8 = vcmp.gt.f32.partialorder %v5007_v18, 0.0  ;;  %v5071_v30 = vmul.f32 -0.0412, %v5007_v18  ;;  %v4610_v22 = vpop.f32.mrf.mxu2 }
 0x6a1   : > { %v7217_v58 = vpop.eup %7216  ;;  %v5370_v35 = vadd.f32 %v5369_v16, %v5368_v38  ;;  %v5244_v9 = vsub.f32 %v10713_v45, %v5173_v42  ;;  %v5245_v5 = vsub.f32 %v10715_v23, %v5173_v42  ;;  %v4670_v34 = vadd.f32 %v4610_v22, %v4501_v51 }
 0x6a2   : > { %v10741_v17 = vsel %vm5039_vm8, %v5007_v18, %v5071_v30  ;;  %v4444_v40 = vpop.f32.mrf.mxu1  ;;  %v5509_v49 = vmul.f32 %v7217_v58, %v10727_v7  ;;  %vm5514_vm9 = vweird.f32 %v7217_v58 }
 0x6a3   : > { %v4779_v0 = vpop.f32.mrf.mxu3  ;;  %v5174_v56 = vmax.f32 %v10745_v33, %v10741_v17  ;;  %v5371_v11 = vrot.slane %v5370_v35, 2  ;;  %v5290_v54 = vmul.f32 1.442695, %v5244_v9  ;;  %v5292_v2 = vmul.f32 1.442695, %v5245_v5  ;;  %vm5515_vm11 = vmor %vm5513_vm10, %vm5514_vm9 }
 0x6a4   : > { %v5510_v52 = vsub.f32 1.0, %v5509_v49  ;;  %v4502_v4 = vadd.f32 %v4444_v40, %v10287_v59  ;;  %v4839_v1 = vadd.f32 %v4779_v0, %v4670_v34 }
 0x6a5   : > { %v5175_v6 = vrot.slane %v5174_v56, 4  ;;  %v5372_v45 = vadd.f32 %v5371_v11, %v5370_v35  ;;  %7218 = vpow2.f32 %v5290_v54 }
 0x6a6   : > { %v5511_v8 = vmul.f32 %v7217_v58, %v5510_v52  ;;  %7220 = vpow2.f32 %v5292_v2  ;;  %v5008_v18 = vadd.f32 %v4948_v47, %v4839_v1 }
 0x6a7   : > { %v4951_v23 = vpop.f32.mrf.mxu0  ;;  %v5176_v27 = vmax.f32 %v5174_v56, %v5175_v6  ;;  %v5373_v61 = vrot.slane %v5372_v45, 1 }
 0x6a8   : > { %v4613_v41 = vpop.f32.mrf.mxu2  ;;  %v5512_v15 = vadd.f32 %v7217_v58, %v5511_v8  ;;  %v5072_v47 = vmul.f32 -0.0412, %v5008_v18  ;;  %vm5040_vm14 = vcmp.gt.f32.partialorder %v5008_v18, 0.0 }
 0x6a9   : > { %v4671_v29 = vadd.f32 %v4613_v41, %v4502_v4  ;;  %v5177_v10 = vrot.slane %v5176_v27, 2  ;;  %v10755_v59 = vadd.f32 %v5373_v61, %v5372_v45 }
 0x6aa   : > { %v4447_v24 = vpop.f32.mrf.mxu1  ;;  %v5516_v32 = vsel %vm5515_vm11, %v7217_v58, %v5512_v15  ;;  %v10774_v39 = vsel %vm5040_vm14, %v5008_v18, %v5072_v47 }
 0x6ab   : > { %v4782_v44 = vpop.f32.mrf.mxu3  ;;  %v5521_v50 = vsel %vm5518_vm12, %v5520_v14, %v5516_v32  ;;  %v5178_v53 = vmax.f32 %v5176_v27, %v5177_v10  ;;  %v10757_v38 = vpop.eup %7218  ;;  %7222 = vrcp.f32 %v10755_v59  ;;  %v5531_v1 = vand.u32 2147483647, %v10755_v59 }
 0x6ac   : > { %v4840_v60 = vadd.f32 %v4782_v44, %v4671_v29  ;;  %v5672_v7 = vmul.f32 %v10701_v25, %v5521_v50  ;;  %v5673_v43 = vmul.f32 %v10706_v12, %v5521_v50  ;;  %v10762_v26 = vpop.eup %7220  ;;  %v4503_v25 = vadd.f32 %v4447_v24, %v10298_v37 }
 0x6ad   : > { %v5179_v30 = vrot.slane %v5178_v53, 1  ;;  %v5375_v16 = vadd.f32 %v10762_v26, %v10757_v38  ;;  %vm5527_vm0 = vweird.f32 %v10755_v59  ;;  %vm5532_vm2 = vcmp.eq.f32.partialorder %v5531_v1, 8.507059e+37 }
 0x6ae   : > { %v5009_v22 = vadd.f32 %v4951_v23, %v4840_v60  ;;  %5704 = vst [vmem:[%s10563_s24 + $0x50] sm:$0xff] %v5672_v7 }
 0x6af   : > { %v4954_v42 = vpop.f32.mrf.mxu0  ;;  %5705 = vst [vmem:[%s10563_s24 + $0x58] sm:$0xff] %v5673_v43  ;;  %v5180_v58 = vmax.f32 %v5178_v53, %v5179_v30  ;;  %v5376_v40 = vrot.slane %v5375_v16, 4 }
 0x6b0   : > { %vm5041_vm13 = vcmp.gt.f32.partialorder %v5009_v22, 0.0  ;;  %v4616_v51 = vpop.f32.mrf.mxu2  ;;  %v5073_v12 = vmul.f32 -0.0412, %v5009_v22 }
 0x6b1   : > { %v5246_v0 = vsub.f32 %v10745_v33, %v5180_v58  ;;  %v5247_v49 = vsub.f32 %v10741_v17, %v5180_v58  ;;  %v7223_v5 = vpop.eup %7222  ;;  %v5377_v56 = vadd.f32 %v5376_v40, %v5375_v16  ;;  %v4672_v52 = vadd.f32 %v4616_v51, %v4503_v25 }
 0x6b2   : > { %v4450_v35 = vpop.f32.mrf.mxu1  ;;  %v10771_v34 = vsel %vm5041_vm13, %v5009_v22, %v5073_v12  ;;  %v5523_v62 = vmul.f32 %v7223_v5, %v10755_v59  ;;  %v5533_v17 = vand.u32 2147483648, %v10755_v59  ;;  %vm5528_vm15 = vweird.f32 %v7223_v5 }
 0x6b3   : > { %v4785_v9 = vpop.f32.mrf.mxu3  ;;  %v5294_v11 = vmul.f32 1.442695, %v5246_v0  ;;  %v5296_v54 = vmul.f32 1.442695, %v5247_v49  ;;  %v5378_v2 = vrot.slane %v5377_v56, 2  ;;  %v5181_v37 = vmax.f32 %v10774_v39, %v10771_v34  ;;  %vm5529_vm1 = vmor %vm5527_vm0, %vm5528_vm15 }
 0x6b4   : > { %v5524_v33 = vsub.f32 1.0, %v5523_v62  ;;  %v4504_v6 = vadd.f32 %v4450_v35, %v10309_v31  ;;  %v4841_v4 = vadd.f32 %v4785_v9, %v4672_v52  ;;  %v5534_v10 = vor.u32 1.1754944e-38, %v5533_v17 }
 0x6b5   : > { %7224 = vpow2.f32 %v5294_v11  ;;  %v5379_v8 = vadd.f32 %v5378_v2, %v5377_v56  ;;  %v5182_v45 = vrot.slane %v5181_v37, 4 }
 0x6b6   : > { %7226 = vpow2.f32 %v5296_v54  ;;  %v5525_v27 = vmul.f32 %v7223_v5, %v5524_v33  ;;  %v5010_v60 = vadd.f32 %v4954_v42, %v4841_v4 }
 0x6b7   : > { %v4957_v23 = vpop.f32.mrf.mxu0  ;;  %v5380_v15 = vrot.slane %v5379_v8, 1  ;;  %v5183_v61 = vmax.f32 %v5181_v37, %v5182_v45 }
 0x6b8   : > { %v4619_v41 = vpop.f32.mrf.mxu2  ;;  %v5526_v14 = vadd.f32 %v7223_v5, %v5525_v27  ;;  %v5074_v42 = vmul.f32 -0.0412, %v5010_v60  ;;  %vm5042_vm3 = vcmp.gt.f32.partialorder %v5010_v60, 0.0 }
 0x6b9   : > { %v4673_v29 = vadd.f32 %v4619_v41, %v4504_v6  ;;  %v10782_v31 = vadd.f32 %v5380_v15, %v5379_v8  ;;  %v5184_v32 = vrot.slane %v5183_v61, 2 }
 0x6ba   : > { %v4453_v24 = vpop.f32.mrf.mxu1  ;;  %v5530_v18 = vsel %vm5529_vm1, %v7223_v5, %v5526_v14  ;;  %v10796_v56 = vsel %vm5042_vm3, %v5010_v60, %v5074_v42 }
 0x6bb   : > { %v4788_v44 = vpop.f32.mrf.mxu3  ;;  %v10784_v53 = vpop.eup %7224  ;;  %v5535_v43 = vsel %vm5532_vm2, %v5534_v10, %v5530_v18  ;;  %7228 = vrcp.f32 %v10782_v31  ;;  %v5185_v16 = vmax.f32 %v5183_v61, %v5184_v32  ;;  %v4505_v58 = vadd.f32 %v4453_v24, %v10320_v48 }
 0x6bc   : > { %v4842_v50 = vadd.f32 %v4788_v44, %v4673_v29  ;;  %v10786_v7 = vpop.eup %7226  ;;  %v5674_v59 = vmul.f32 %v10730_v57, %v5535_v43  ;;  %v5675_v30 = vmul.f32 %v10734_v13, %v5535_v43  ;;  %v5545_v2 = vand.u32 2147483647, %v10782_v31 }
 0x6bd   : > { %v5382_v22 = vadd.f32 %v10786_v7, %v10784_v53  ;;  %v5186_v12 = vrot.slane %v5185_v16, 1  ;;  %v5547_v6 = vand.u32 2147483648, %v10782_v31  ;;  %vm5541_vm6 = vweird.f32 %v10782_v31 }
 0x6be   : > { %v5011_v47 = vadd.f32 %v4957_v23, %v4842_v50  ;;  %5706 = vst [vmem:[%s10563_s24 + $0x60] sm:$0xff] %v5674_v59  ;;  %vm5546_vm8 = vcmp.eq.f32.partialorder %v5545_v2, 8.507059e+37 }
 0x6bf   : > { %v4960_v51 = vpop.f32.mrf.mxu0  ;;  %v5383_v40 = vrot.slane %v5382_v22, 4  ;;  %5707 = vst [vmem:[%s10563_s24 + $0x68] sm:$0xff] %v5675_v30  ;;  %v5187_v5 = vmax.f32 %v5185_v16, %v5186_v12 }
 0x6c0   : > { %v4622_v25 = vpop.f32.mrf.mxu2  ;;  %vm5043_vm4 = vcmp.gt.f32.partialorder %v5011_v47, 0.0  ;;  %v5075_v0 = vmul.f32 -0.0412, %v5011_v47 }
 0x6c1   : > { %v4674_v57 = vadd.f32 %v4622_v25, %v4505_v58  ;;  %v5384_v49 = vadd.f32 %v5383_v40, %v5382_v22  ;;  %v7229_v9 = vpop.eup %7228  ;;  %v5248_v37 = vsub.f32 %v10774_v39, %v5187_v5  ;;  %v5249_v33 = vsub.f32 %v10771_v34, %v5187_v5 }
 0x6c2   : > { %v4456_v13 = vpop.f32.mrf.mxu1  ;;  %v10798_v52 = vsel %vm5043_vm4, %v5011_v47, %v5075_v0  ;;  %v5537_v48 = vmul.f32 %v7229_v9, %v10782_v31  ;;  %vm5542_vm5 = vweird.f32 %v7229_v9 }
 0x6c3   : > { %v4791_v35 = vpop.f32.mrf.mxu3  ;;  %v5385_v62 = vrot.slane %v5384_v49, 2  ;;  %v5188_v11 = vmax.f32 %v10796_v56, %v10798_v52  ;;  %v5298_v4 = vmul.f32 1.442695, %v5248_v37  ;;  %v5300_v23 = vmul.f32 1.442695, %v5249_v33  ;;  %vm5543_vm7 = vmor %vm5541_vm6, %vm5542_vm5 }
 0x6c4   : > { %v4843_v54 = vadd.f32 %v4791_v35, %v4674_v57  ;;  %v5538_v17 = vsub.f32 1.0, %v5537_v48  ;;  %v4506_v27 = vadd.f32 %v4456_v13, %v10331_v3  ;;  %v5548_v3 = vor.u32 1.1754944e-38, %v5547_v6 }
 0x6c5   : > { %v5386_v8 = vadd.f32 %v5385_v62, %v5384_v49  ;;  %v5189_v45 = vrot.slane %v5188_v11, 4  ;;  %7230 = vpow2.f32 %v5298_v4 }
 0x6c6   : > { %v5539_v41 = vmul.f32 %v7229_v9, %v5538_v17  ;;  %v5012_v29 = vadd.f32 %v4960_v51, %v4843_v54  ;;  %7232 = vpow2.f32 %v5300_v23 }
 0x6c7   : > { %v4963_v1 = vpop.f32.mrf.mxu0  ;;  %v5387_v15 = vrot.slane %v5386_v8, 1  ;;  %v5190_v61 = vmax.f32 %v5188_v11, %v5189_v45 }
 0x6c8   : > { %v4625_v14 = vpop.f32.mrf.mxu2  ;;  %v5540_v39 = vadd.f32 %v7229_v9, %v5539_v41  ;;  %v5076_v18 = vmul.f32 -0.0412, %v5012_v29  ;;  %vm5044_vm9 = vcmp.gt.f32.partialorder %v5012_v29, 0.0 }
 0x6c9   : > { %v4675_v34 = vadd.f32 %v4625_v14, %v4506_v27  ;;  %v10809_v10 = vadd.f32 %v5387_v15, %v5386_v8  ;;  %v5191_v24 = vrot.slane %v5190_v61, 2 }
 0x6ca   : > { %v4459_v44 = vpop.f32.mrf.mxu1  ;;  %v5544_v50 = vsel %vm5543_vm7, %v7229_v9, %v5540_v39  ;;  %v10820_v40 = vsel %vm5044_vm9, %v5012_v29, %v5076_v18 }
 0x6cb   : > { %v4794_v32 = vpop.f32.mrf.mxu3  ;;  %7234 = vrcp.f32 %v10809_v10  ;;  %v5549_v31 = vsel %vm5546_vm8, %v5548_v3, %v5544_v50  ;;  %v5192_v43 = vmax.f32 %v5190_v61, %v5191_v24  ;;  %v10815_v16 = vpop.eup %7230  ;;  %v5559_v11 = vand.u32 2147483647, %v10809_v10 }
 0x6cc   : > { %v4844_v60 = vadd.f32 %v4794_v32, %v4675_v34  ;;  %v5676_v30 = vmul.f32 %v10757_v38, %v5549_v31  ;;  %v5677_v22 = vmul.f32 %v10762_v26, %v5549_v31  ;;  %v10817_v51 = vpop.eup %7232  ;;  %v4507_v38 = vadd.f32 %v4459_v44, %v10342_v46 }
 0x6cd   : > { %v5193_v42 = vrot.slane %v5192_v43, 1  ;;  %v5389_v12 = vadd.f32 %v10817_v51, %v10815_v16  ;;  %v5561_v37 = vand.u32 2147483648, %v10809_v10  ;;  %vm5555_vm12 = vweird.f32 %v10809_v10 }
 0x6ce   : > { %v5013_v59 = vadd.f32 %v4963_v1, %v4844_v60  ;;  %5708 = vst [vmem:[%s10563_s24 + $0x70] sm:$0xff] %v5676_v30  ;;  %vm5560_vm14 = vcmp.eq.f32.partialorder %v5559_v11, 8.507059e+37 }
 0x6cf   : > { %v4966_v47 = vpop.f32.mrf.mxu0  ;;  %5709 = vst [vmem:[%s10563_s24 + $0x78] sm:$0xff] %v5677_v22  ;;  %v5194_v0 = vmax.f32 %v5192_v43, %v5193_v42  ;;  %v5390_v5 = vrot.slane %v5389_v12, 4  ;;  %v5562_v29 = vor.u32 1.1754944e-38, %v5561_v37 }
 0x6d0   : > { %vm5045_vm10 = vcmp.gt.f32.partialorder %v5013_v59, 0.0  ;;  %v5077_v58 = vmul.f32 -0.0412, %v5013_v59  ;;  %v4628_v25 = vpop.f32.mrf.mxu2 }
 0x6d1   : > { %v7235_v57 = vpop.eup %7234  ;;  %v5250_v48 = vsub.f32 %v10796_v56, %v5194_v0  ;;  %v4676_v62 = vadd.f32 %v4628_v25, %v4507_v38  ;;  %v5251_v54 = vsub.f32 %v10798_v52, %v5194_v0  ;;  %v5391_v33 = vadd.f32 %v5390_v5, %v5389_v12 }
 0x6d2   : > { %v10826_v26 = vsel %vm5045_vm10, %v5013_v59, %v5077_v58  ;;  %v4462_v13 = vpop.f32.mrf.mxu1  ;;  %v5551_v9 = vmul.f32 %v7235_v57, %v10809_v10  ;;  %vm5556_vm11 = vweird.f32 %v7235_v57 }
 0x6d3   : > { %v5195_v49 = vmax.f32 %v10820_v40, %v10826_v26  ;;  %v4797_v35 = vpop.f32.mrf.mxu3  ;;  %v5302_v17 = vmul.f32 1.442695, %v5250_v48  ;;  %v5304_v6 = vmul.f32 1.442695, %v5251_v54  ;;  %v4508_v45 = vadd.f32 %v4462_v13, %v10353_v19  ;;  %vm5557_vm13 = vmor %vm5555_vm12, %vm5556_vm11 }
 0x6d4   : > { %v5552_v46 = vsub.f32 1.0, %v5551_v9  ;;  %v5392_v23 = vrot.slane %v5391_v33, 2  ;;  %v4845_v56 = vadd.f32 %v4797_v35, %v4676_v62 }
 0x6d5   : > { %v5196_v2 = vrot.slane %v5195_v49, 4  ;;  %7236 = vpow2.f32 %v5302_v17 }
 0x6d6   : > { %v5553_v4 = vmul.f32 %v7235_v57, %v5552_v46  ;;  %7238 = vpow2.f32 %v5304_v6  ;;  %v5393_v15 = vadd.f32 %v5392_v23, %v5391_v33  ;;  %v5014_v44 = vadd.f32 %v4966_v47, %v4845_v56 }
 0x6d7   : > { %v5197_v8 = vmax.f32 %v5195_v49, %v5196_v2  ;;  %v4969_v27 = vpop.f32.mrf.mxu0 }
 0x6d8   : > { %v4631_v41 = vpop.f32.mrf.mxu2  ;;  %v5554_v52 = vadd.f32 %v7235_v57, %v5553_v4  ;;  %v5394_v24 = vrot.slane %v5393_v15, 1  ;;  %vm5046_vm15 = vcmp.gt.f32.partialorder %v5014_v44, 0.0  ;;  %v5078_v22 = vmul.f32 -0.0412, %v5014_v44 }
 0x6d9   : > { %v5198_v1 = vrot.slane %v5197_v8, 2  ;;  %v4677_v61 = vadd.f32 %v4631_v41, %v4508_v45 }
 0x6da   : > { %v4465_v19 = vpop.f32.mrf.mxu1  ;;  %v5558_v39 = vsel %vm5557_vm13, %v7235_v57, %v5554_v52  ;;  %v10842_v31 = vadd.f32 %v5394_v24, %v5393_v15 }
 0x6db   : > { %v5199_v14 = vmax.f32 %v5197_v8, %v5198_v1  ;;  %v4800_v34 = vpop.f32.mrf.mxu3  ;;  %v5563_v3 = vsel %vm5560_vm14, %v5562_v29, %v5558_v39  ;;  %v10838_v50 = vpop.eup %7236  ;;  %v4509_v42 = vadd.f32 %v4465_v19, %v10364_v36  ;;  %v10855_v36 = vsel %vm5046_vm15, %v5014_v44, %v5078_v22 }
 0x6dc   : > { %v4846_v32 = vadd.f32 %v4800_v34, %v4677_v61  ;;  %v5678_v10 = vmul.f32 %v10784_v53, %v5563_v3  ;;  %v5679_v18 = vmul.f32 %v10786_v7, %v5563_v3  ;;  %v10844_v59 = vpop.eup %7238  ;;  %7240 = vrcp.f32 %v10842_v31 }
 0x6dd   : > { %v5200_v60 = vrot.slane %v5199_v14, 1  ;;  %v5396_v53 = vadd.f32 %v10844_v59, %v10838_v50  ;;  %v5573_v8 = vand.u32 2147483647, %v10842_v31  ;;  %v5575_v45 = vand.u32 2147483648, %v10842_v31 }
 0x6de   : > { %v5015_v43 = vadd.f32 %v4969_v27, %v4846_v32  ;;  %5710 = vst [vmem:[%s10563_s24 + $0x80] sm:$0xff] %v5678_v10  ;;  %vm5569_vm2 = vweird.f32 %v10842_v31 }
 0x6df   : > { %v5201_v30 = vmax.f32 %v5199_v14, %v5200_v60  ;;  %v4972_v58 = vpop.f32.mrf.mxu0  ;;  %5711 = vst [vmem:[%s10563_s24 + $0x88] sm:$0xff] %v5679_v18  ;;  %v5397_v38 = vrot.slane %v5396_v53, 4  ;;  %v5576_v39 = vor.u32 1.1754944e-38, %v5575_v45  ;;  %vm5574_vm4 = vcmp.eq.f32.partialorder %v5573_v8, 8.507059e+37 }
 0x6e0   : > { %vm5047_vm0 = vcmp.gt.f32.partialorder %v5015_v43, 0.0  ;;  %v4634_v25 = vpop.f32.mrf.mxu2  ;;  %v5079_v12 = vmul.f32 -0.0412, %v5015_v43 }
 0x6e1   : > { %v5252_v7 = vsub.f32 %v10820_v40, %v5201_v30  ;;  %v5253_v47 = vsub.f32 %v10826_v26, %v5201_v30  ;;  %v4678_v0 = vadd.f32 %v4634_v25, %v4509_v42  ;;  %v5398_v5 = vadd.f32 %v5397_v38, %v5396_v53 }
 0x6e2   : > { %v4468_v13 = vpop.f32.mrf.mxu1  ;;  %v10857_v9 = vsel %vm5047_vm0, %v5015_v43, %v5079_v12  ;;  %v7241_v26 = vpop.eup %7240 }
 0x6e3   : > { %v5306_v57 = vmul.f32 1.442695, %v5252_v7  ;;  %v5308_v49 = vmul.f32 1.442695, %v5253_v47  ;;  %v4803_v35 = vpop.f32.mrf.mxu3  ;;  %v5202_v40 = vmax.f32 %v10855_v36, %v10857_v9  ;;  %v5565_v62 = vmul.f32 %v7241_v26, %v10842_v31 }
 0x6e4   : > { %v4847_v48 = vadd.f32 %v4803_v35, %v4678_v0  ;;  %v5399_v11 = vrot.slane %v5398_v5, 2  ;;  %v4510_v2 = vadd.f32 %v4468_v13, %v10375_v20  ;;  %vm5570_vm1 = vweird.f32 %v7241_v26 }
 0x6e5   : > { %7242 = vpow2.f32 %v5306_v57  ;;  %v5203_v54 = vrot.slane %v5202_v40, 4  ;;  %v5566_v37 = vsub.f32 1.0, %v5565_v62  ;;  %vm5571_vm3 = vmor %vm5569_vm2, %vm5570_vm1 }
 0x6e6   : > { %7244 = vpow2.f32 %v5308_v49  ;;  %v5400_v33 = vadd.f32 %v5399_v11, %v5398_v5  ;;  %v5016_v4 = vadd.f32 %v4972_v58, %v4847_v48 }
 0x6e7   : > { %v4975_v46 = vpop.f32.mrf.mxu0  ;;  %v5204_v17 = vmax.f32 %v5202_v40, %v5203_v54  ;;  %v5567_v27 = vmul.f32 %v7241_v26, %v5566_v37 }
 0x6e8   : > { %v4637_v6 = vpop.f32.mrf.mxu2  ;;  %v5401_v1 = vrot.slane %v5400_v33, 1  ;;  %v5080_v32 = vmul.f32 -0.0412, %v5016_v4  ;;  %vm5048_vm5 = vcmp.gt.f32.partialorder %v5016_v4, 0.0 }
 0x6e9   : > { %v4679_v23 = vadd.f32 %v4637_v6, %v4510_v2  ;;  %v5205_v41 = vrot.slane %v5204_v17, 2  ;;  %v5568_v29 = vadd.f32 %v7241_v26, %v5567_v27 }
 0x6ea   : > { %v4471_v52 = vpop.f32.mrf.mxu1  ;;  %v10870_v14 = vadd.f32 %v5401_v1, %v5400_v33  ;;  %v10879_v7 = vsel %vm5048_vm5, %v5016_v4, %v5080_v32 }
 0x6eb   : > { %v10865_v56 = vpop.eup %7242  ;;  %v4806_v15 = vpop.f32.mrf.mxu3  ;;  %v5206_v34 = vmax.f32 %v5204_v17, %v5205_v41  ;;  %v5572_v44 = vsel %vm5571_vm3, %v7241_v26, %v5568_v29  ;;  %v4511_v30 = vadd.f32 %v4471_v52, %v10386_v55 }
 0x6ec   : > { %v10867_v20 = vpop.eup %7244  ;;  %v4848_v61 = vadd.f32 %v4806_v15, %v4679_v23  ;;  %7246 = vrcp.f32 %v10870_v14  ;;  %v5577_v3 = vsel %vm5574_vm4, %v5576_v39, %v5572_v44  ;;  %v5589_v54 = vand.u32 2147483648, %v10870_v14 }
 0x6ed   : > { %v5403_v19 = vadd.f32 %v10867_v20, %v10865_v56  ;;  %v5207_v10 = vrot.slane %v5206_v34, 1  ;;  %v5680_v31 = vmul.f32 %v10815_v16, %v5577_v3  ;;  %v5681_v43 = vmul.f32 %v10817_v51, %v5577_v3 }
 0x6ee   : > { %v5017_v24 = vadd.f32 %v4975_v46, %v4848_v61  ;;  %vm5583_vm8 = vweird.f32 %v10870_v14 }
 0x6ef   : > { %v5404_v60 = vrot.slane %v5403_v19, 4  ;;  %v4978_v18 = vpop.f32.mrf.mxu0  ;;  %v5208_v58 = vmax.f32 %v5206_v34, %v5207_v10  ;;  %5712 = vst [vmem:[%s10563_s24 + $0x90] sm:$0xff] %v5680_v31 }
 0x6f0   : > { %vm5049_vm6 = vcmp.gt.f32.partialorder %v5017_v24, 0.0  ;;  %v4640_v22 = vpop.f32.mrf.mxu2  ;;  %v5081_v53 = vmul.f32 -0.0412, %v5017_v24  ;;  %5713 = vst [vmem:[%s10563_s24 + $0x98] sm:$0xff] %v5681_v43 }
 0x6f1   : > { %v5405_v42 = vadd.f32 %v5404_v60, %v5403_v19  ;;  %v4680_v47 = vadd.f32 %v4640_v22, %v4511_v30  ;;  %v5254_v38 = vsub.f32 %v10855_v36, %v5208_v58  ;;  %v5255_v16 = vsub.f32 %v10857_v9, %v5208_v58 }
 0x6f2   : > { %v4474_v25 = vpop.f32.mrf.mxu1  ;;  %v10884_v51 = vsel %vm5049_vm6, %v5017_v24, %v5081_v53  ;;  %v7247_v55 = vpop.eup %7246  ;;  %v5587_v9 = vand.u32 2147483647, %v10870_v14 }
 0x6f3   : > { %v4809_v12 = vpop.f32.mrf.mxu3  ;;  %v5406_v0 = vrot.slane %v5405_v42, 2  ;;  %v5209_v57 = vmax.f32 %v10879_v7, %v10884_v51  ;;  %v5579_v49 = vmul.f32 %v7247_v55, %v10870_v14  ;;  %v5310_v35 = vmul.f32 1.442695, %v5254_v38 }
 0x6f4   : > { %v5312_v5 = vmul.f32 1.442695, %v5255_v16  ;;  %v4849_v26 = vadd.f32 %v4809_v12, %v4680_v47  ;;  %v4512_v36 = vadd.f32 %v4474_v25, %v10397_v63  ;;  %vm5584_vm7 = vweird.f32 %v7247_v55 }
 0x6f5   : > { %v5407_v13 = vadd.f32 %v5406_v0, %v5405_v42  ;;  %v5210_v40 = vrot.slane %v5209_v57, 4  ;;  %v5580_v48 = vsub.f32 1.0, %v5579_v49  ;;  %7248 = vpow2.f32 %v5310_v35  ;;  %vm5585_vm9 = vmor %vm5583_vm8, %vm5584_vm7 }
 0x6f6   : > { %7250 = vpow2.f32 %v5312_v5  ;;  %v5018_v8 = vadd.f32 %v4978_v18, %v4849_v26  ;;  %v5590_v63 = vor.u32 1.1754944e-38, %v5589_v54  ;;  %vm5588_vm10 = vcmp.eq.f32.partialorder %v5587_v9, 8.507059e+37 }
 0x6f7   : > { %v5408_v62 = vrot.slane %v5407_v13, 1  ;;  %v4981_v11 = vpop.f32.mrf.mxu0  ;;  %v5211_v2 = vmax.f32 %v5209_v57, %v5210_v40  ;;  %v5581_v37 = vmul.f32 %v7247_v55, %v5580_v48 }
 0x6f8   : > { %v4643_v46 = vpop.f32.mrf.mxu2  ;;  %v5082_v19 = vmul.f32 -0.0412, %v5018_v8  ;;  %vm5050_vm11 = vcmp.gt.f32.partialorder %v5018_v8, 0.0 }
 0x6f9   : > { %v10892_v33 = vadd.f32 %v5408_v62, %v5407_v13  ;;  %v4681_v17 = vadd.f32 %v4643_v46, %v4512_v36  ;;  %v5212_v6 = vrot.slane %v5211_v2, 2  ;;  %v5582_v23 = vadd.f32 %v7247_v55, %v5581_v37 }
 0x6fa   : > { %v4477_v45 = vpop.f32.mrf.mxu1 }
 0x6fb   : > { %v4812_v4 = vpop.f32.mrf.mxu3  ;;  %7252 = vrcp.f32 %v10892_v33  ;;  %v5213_v27 = vmax.f32 %v5211_v2, %v5212_v6  ;;  %v10896_v41 = vpop.eup %7248  ;;  %v5586_v52 = vsel %vm5585_vm9, %v7247_v55, %v5582_v23  ;;  %v4513_v44 = vadd.f32 %v4477_v45, %v10408_v21 }
 0x6fc   : > { %v4850_v1 = vadd.f32 %v4812_v4, %v4681_v17  ;;  %v10898_v15 = vpop.eup %7250  ;;  %v5591_v61 = vsel %vm5588_vm10, %v5590_v63, %v5586_v52  ;;  %v5114_v21 = vsel %vm5050_vm11, %v5018_v8, %v5082_v19  ;;  %v5601_v38 = vand.u32 2147483647, %v10892_v33 }
 0x6fd   : > { %v5214_v29 = vrot.slane %v5213_v27, 1  ;;  %v5682_v14 = vmul.f32 %v10838_v50, %v5591_v61  ;;  %v5683_v39 = vmul.f32 %v10844_v59, %v5591_v61  ;;  %v5410_v24 = vadd.f32 %v10898_v15, %v10896_v41 }
 0x6fe   : > { %v5019_v34 = vadd.f32 %v4981_v11, %v4850_v1  ;;  %v5603_v16 = vand.u32 2147483648, %v10892_v33  ;;  %vm5597_vm14 = vweird.f32 %v10892_v33  ;;  %vm5602_vm0 = vcmp.eq.f32.partialorder %v5601_v38, 8.507059e+37 }
 0x6ff   : > { %v5215_v32 = vmax.f32 %v5213_v27, %v5214_v29  ;;  %5714 = vst [vmem:[%s10563_s24 + $0xa0] sm:$0xff] %v5682_v14  ;;  %v5411_v18 = vrot.slane %v5410_v24, 4  ;;  %v4984_v43 = vpop.f32.mrf.mxu0 }
 0x700   : > { %vm5051_vm12 = vcmp.gt.f32.partialorder %v5019_v34, 0.0  ;;  %v5083_v3 = vmul.f32 -0.0412, %v5019_v34  ;;  %v4646_v60 = vpop.f32.mrf.mxu2  ;;  %5715 = vst [vmem:[%s10563_s24 + $0xa8] sm:$0xff] %v5683_v39  ;;  %v5604_v26 = vor.u32 1.1754944e-38, %v5603_v16 }
 0x701   : > { %v7253_v10 = vpop.eup %7252  ;;  %v4682_v31 = vadd.f32 %v4646_v60, %v4513_v44  ;;  %v5256_v59 = vsub.f32 %v10879_v7, %v5215_v32  ;;  %v5257_v30 = vsub.f32 %v10884_v51, %v5215_v32  ;;  %v5412_v42 = vadd.f32 %v5411_v18, %v5410_v24 }
 0x702   : > { %v5593_v50 = vmul.f32 %v7253_v10, %v10892_v33  ;;  %v5115_v58 = vsel %vm5051_vm12, %v5019_v34, %v5083_v3  ;;  %v4480_v0 = vpop.f32.mrf.mxu1  ;;  %vm5598_vm13 = vweird.f32 %v7253_v10 }
 0x703   : > { %v4815_v22 = vpop.f32.mrf.mxu3  ;;  %v5314_v47 = vmul.f32 1.442695, %v5256_v59  ;;  %v5316_v25 = vmul.f32 1.442695, %v5257_v30  ;;  %v5216_v12 = vmax.f32 %v5114_v21, %v5115_v58  ;;  %v5413_v55 = vrot.slane %v5412_v42, 2  ;;  %vm5599_vm15 = vmor %vm5597_vm14, %vm5598_vm13 }
 0x704   : > { %v5594_v53 = vsub.f32 1.0, %v5593_v50  ;;  %v4851_v57 = vadd.f32 %v4815_v22, %v4682_v31  ;;  %v4514_v13 = vadd.f32 %v4480_v0, %v10419_v28 }
 0x705   : > { %7254 = vpow2.f32 %v5314_v47  ;;  %v5217_v7 = vrot.slane %v5216_v12, 4  ;;  %v5414_v51 = vadd.f32 %v5413_v55, %v5412_v42 }
 0x706   : > { %v5595_v49 = vmul.f32 %v7253_v10, %v5594_v53  ;;  %7256 = vpow2.f32 %v5316_v25  ;;  %v5020_v62 = vadd.f32 %v4984_v43, %v4851_v57 }
 0x707   : > { %v5218_v5 = vmax.f32 %v5216_v12, %v5217_v7  ;;  %v5415_v48 = vrot.slane %v5414_v51, 1  ;;  %v4987_v28 = vpop.f32.mrf.mxu0 }
 0x708   : > { %v5596_v35 = vadd.f32 %v7253_v10, %v5595_v49  ;;  %v4649_v40 = vpop.f32.mrf.mxu2  ;;  %v5084_v4 = vmul.f32 -0.0412, %v5020_v62  ;;  %vm5052_vm1 = vcmp.gt.f32.partialorder %v5020_v62, 0.0 }
 0x709   : > { %v4683_v36 = vadd.f32 %v4649_v40, %v4514_v13  ;;  %v5219_v9 = vrot.slane %v5218_v5, 2  ;;  %v5416_v46 = vadd.f32 %v5415_v48, %v5414_v51 }
 0x70a   : > { %v5600_v11 = vsel %vm5599_vm15, %v7253_v10, %v5596_v35 }
 0x70b   : > { %v4818_v54 = vpop.f32.mrf.mxu3  ;;  %v5605_v2 = vsel %vm5602_vm0, %v5604_v26, %v5600_v11  ;;  %v10914_v17 = vpop.eup %7254  ;;  %v5220_v8 = vmax.f32 %v5218_v5, %v5219_v9  ;;  %7258 = vrcp.f32 %v5416_v46  ;;  %v5617_v31 = vand.u32 2147483648, %v5416_v46 }
 0x70c   : > { %v4852_v37 = vadd.f32 %v4818_v54, %v4683_v36  ;;  %v5684_v33 = vmul.f32 %v10865_v56, %v5605_v2  ;;  %v5685_v6 = vmul.f32 %v10867_v20, %v5605_v2  ;;  %v10918_v45 = vpop.eup %7256  ;;  %v5116_v56 = vsel %vm5052_vm1, %v5020_v62, %v5084_v4 }
 0x70d   : > { %v5417_v23 = vadd.f32 %v10918_v45, %v10914_v17  ;;  %v5221_v63 = vrot.slane %v5220_v8, 1  ;;  %v5615_v59 = vand.u32 2147483647, %v5416_v46  ;;  %vm5611_vm4 = vweird.f32 %v5416_v46 }
 0x70e   : > { %5716 = vst [vmem:[%s10563_s24 + $0xb0] sm:$0xff] %v5684_v33  ;;  %v5021_v27 = vadd.f32 %v4987_v28, %v4852_v37 }
 0x70f   : > { %5717 = vst [vmem:[%s10563_s24 + $0xb8] sm:$0xff] %v5685_v6  ;;  %v5418_v1 = vrot.slane %v5417_v23, 4  ;;  %v5222_v52 = vmax.f32 %v5220_v8, %v5221_v63  ;;  %vm5616_vm6 = vcmp.eq.f32.partialorder %v5615_v59, 8.507059e+37 }
 0x710   : > { %vm5053_vm2 = vcmp.gt.f32.partialorder %v5021_v27, 0.0  ;;  %v5085_v61 = vmul.f32 -0.0412, %v5021_v27 }
 0x711   : > { %v5419_v29 = vadd.f32 %v5418_v1, %v5417_v23  ;;  %v5258_v20 = vsub.f32 %v5114_v21, %v5222_v52  ;;  %v5259_v19 = vsub.f32 %v5115_v58, %v5222_v52  ;;  %v7259_v14 = vpop.eup %7258  ;;  %v5618_v58 = vor.u32 1.1754944e-38, %v5617_v31 }
 0x712   : > { %v5117_v34 = vsel %vm5053_vm2, %v5021_v27, %v5085_v61  ;;  %v5607_v24 = vmul.f32 %v7259_v14, %v5416_v46  ;;  %vm5612_vm3 = vweird.f32 %v7259_v14 }
 0x713   : > { %v5223_v39 = vmax.f32 %v5116_v56, %v5117_v34  ;;  %v5420_v44 = vrot.slane %v5419_v29, 2  ;;  %v5318_v32 = vmul.f32 1.442695, %v5258_v20  ;;  %v5320_v3 = vmul.f32 1.442695, %v5259_v19  ;;  %vm5613_vm5 = vmor %vm5611_vm4, %vm5612_vm3 }
 0x714   : > { %v5608_v10 = vsub.f32 1.0, %v5607_v24 }
 0x715   : > { %v5224_v60 = vrot.slane %v5223_v39, 4  ;;  %v5421_v18 = vadd.f32 %v5420_v44, %v5419_v29  ;;  %7260 = vpow2.f32 %v5318_v32 }
 0x716   : > { %7262 = vpow2.f32 %v5320_v3  ;;  %v5609_v50 = vmul.f32 %v7259_v14, %v5608_v10 }
 0x717   : > { %v5225_v43 = vmax.f32 %v5223_v39, %v5224_v60  ;;  %v5422_v30 = vrot.slane %v5421_v18, 1 }
 0x718   : > { %v5610_v42 = vadd.f32 %v7259_v14, %v5609_v50 }
 0x719   : > { %v5226_v22 = vrot.slane %v5225_v43, 2  ;;  %v5423_v21 = vadd.f32 %v5422_v30, %v5421_v18 }
 0x71a   : > { %v5614_v25 = vsel %vm5613_vm5, %v7259_v14, %v5610_v42 }
 0x71b   : > { %v5227_v53 = vmax.f32 %v5225_v43, %v5226_v22  ;;  %v10924_v47 = vpop.eup %7260  ;;  %7264 = vrcp.f32 %v5423_v21  ;;  %v5619_v0 = vsel %vm5616_vm6, %v5618_v58, %v5614_v25  ;;  %v5629_v9 = vand.u32 2147483647, %v5423_v21 }
 0x71c   : > { %v10926_v12 = vpop.eup %7262  ;;  %v5686_v16 = vmul.f32 %v10896_v41, %v5619_v0  ;;  %v5687_v55 = vmul.f32 %v10898_v15, %v5619_v0  ;;  %v5631_v41 = vand.u32 2147483648, %v5423_v21  ;;  %vm5625_vm8 = vweird.f32 %v5423_v21 }
 0x71d   : > { %v5228_v38 = vrot.slane %v5227_v53, 1  ;;  %v5424_v57 = vadd.f32 %v10926_v12, %v10924_v47  ;;  %vm5630_vm10 = vcmp.eq.f32.partialorder %v5629_v9, 8.507059e+37 }
 0x71e   : > { %5718 = vst [vmem:[%s10563_s24 + $0xc0] sm:$0xff] %v5686_v16  ;;  %v5632_v46 = vor.u32 1.1754944e-38, %v5631_v41 }
 0x71f   : > { %v5229_v49 = vmax.f32 %v5227_v53, %v5228_v38  ;;  %v5425_v7 = vrot.slane %v5424_v57, 4  ;;  %5719 = vst [vmem:[%s10563_s24 + $0xc8] sm:$0xff] %v5687_v55 }
 0x721   : > { %v5260_v51 = vsub.f32 %v5116_v56, %v5229_v49  ;;  %v5261_v13 = vsub.f32 %v5117_v34, %v5229_v49  ;;  %v7265_v35 = vpop.eup %7264  ;;  %v5426_v5 = vadd.f32 %v5425_v7, %v5424_v57 }
 0x722   : > { %v5621_v40 = vmul.f32 %v7265_v35, %v5423_v21  ;;  %vm5626_vm7 = vweird.f32 %v7265_v35 }
 0x723   : > { %v5322_v26 = vmul.f32 1.442695, %v5260_v51  ;;  %v5324_v48 = vmul.f32 1.442695, %v5261_v13  ;;  %v5427_v62 = vrot.slane %v5426_v5, 2  ;;  %vm5627_vm9 = vmor %vm5625_vm8, %vm5626_vm7 }
 0x724   : > { %v5622_v36 = vsub.f32 1.0, %v5621_v40 }
 0x725   : > { %7266 = vpow2.f32 %v5322_v26  ;;  %v5428_v11 = vadd.f32 %v5427_v62, %v5426_v5 }
 0x726   : > { %7268 = vpow2.f32 %v5324_v48  ;;  %v5623_v15 = vmul.f32 %v7265_v35, %v5622_v36 }
 0x727   : > { %v5429_v54 = vrot.slane %v5428_v11, 1 }
 0x728   : > { %v5624_v2 = vadd.f32 %v7265_v35, %v5623_v15 }
 0x729   : > { %v5430_v37 = vadd.f32 %v5429_v54, %v5428_v11 }
 0x72a   : > { %v5628_v33 = vsel %vm5627_vm9, %v7265_v35, %v5624_v2 }
 0x72b   : > { %v7267_v28 = vpop.eup %7266  ;;  %v5633_v8 = vsel %vm5630_vm10, %v5632_v46, %v5628_v33  ;;  %7270 = vrcp.f32 %v5430_v37  ;;  %v5645_v19 = vand.u32 2147483648, %v5430_v37  ;;  %v5643_v14 = vand.u32 2147483647, %v5430_v37 }
 0x72c   : > { %v7269_v6 = vpop.eup %7268  ;;  %v5688_v4 = vmul.f32 %v10914_v17, %v5633_v8  ;;  %v5689_v23 = vmul.f32 %v10918_v45, %v5633_v8  ;;  %vm5639_vm12 = vweird.f32 %v5430_v37 }
 0x72d   : > { %v5431_v63 = vadd.f32 %v7269_v6, %v7267_v28  ;;  %v5646_v24 = vor.u32 1.1754944e-38, %v5645_v19  ;;  %vm5644_vm14 = vcmp.eq.f32.partialorder %v5643_v14, 8.507059e+37 }
 0x72e   : > { %5720 = vst [vmem:[%s10563_s24 + $0xd0] sm:$0xff] %v5688_v4 }
 0x72f   : > { %v5432_v27 = vrot.slane %v5431_v63, 4  ;;  %5721 = vst [vmem:[%s10563_s24 + $0xd8] sm:$0xff] %v5689_v23 }
 0x731   : > { %v5433_v1 = vadd.f32 %v5432_v27, %v5431_v63  ;;  %v7271_v52 = vpop.eup %7270 }
 0x732   : > { %v5635_v61 = vmul.f32 %v7271_v52, %v5430_v37  ;;  %vm5640_vm11 = vweird.f32 %v7271_v52 }
 0x733   : > { %v5434_v56 = vrot.slane %v5433_v1, 2  ;;  %vm5641_vm13 = vmor %vm5639_vm12, %vm5640_vm11 }
 0x734   : > { %v5636_v29 = vsub.f32 1.0, %v5635_v61 }
 0x735   : > { %v5435_v20 = vadd.f32 %v5434_v56, %v5433_v1 }
 0x736   : > { %v5637_v34 = vmul.f32 %v7271_v52, %v5636_v29 }
 0x737   : > { %v5436_v17 = vrot.slane %v5435_v20, 1 }
 0x738   : > { %v5638_v45 = vadd.f32 %v7271_v52, %v5637_v34 }
 0x739   : > { %v5437_v39 = vadd.f32 %v5436_v17, %v5435_v20 }
 0x73a   : > { %v5642_v44 = vsel %vm5641_vm13, %v7271_v52, %v5638_v45 }
 0x73b   : > { %7272 = vrcp.f32 %v5437_v39  ;;  %v5647_v32 = vsel %vm5644_vm14, %v5646_v24, %v5642_v44  ;;  %v5659_v43 = vand.u32 2147483648, %v5437_v39  ;;  %v5657_v59 = vand.u32 2147483647, %v5437_v39 }
 0x73c   : > { %v5690_v3 = vmul.f32 %v10924_v47, %v5647_v32  ;;  %v5691_v60 = vmul.f32 %v10926_v12, %v5647_v32  ;;  %vm5653_vm0 = vweird.f32 %v5437_v39 }
 0x73d   : > { %v5660_v22 = vor.u32 1.1754944e-38, %v5659_v43  ;;  %vm5658_vm2 = vcmp.eq.f32.partialorder %v5657_v59, 8.507059e+37 }
 0x73e   : > { %5722 = vst [vmem:[%s10563_s24 + $0xe0] sm:$0xff] %v5690_v3 }
 0x73f   : > { %5723 = vst [vmem:[%s10563_s24 + $0xe8] sm:$0xff] %v5691_v60 }
 0x741   : > { %v7273_v10 = vpop.eup %7272 }
 0x742   : > { %v5649_v18 = vmul.f32 %v7273_v10, %v5437_v39  ;;  %vm5654_vm15 = vweird.f32 %v7273_v10 }
 0x743   : > { %vm5655_vm1 = vmor %vm5653_vm0, %vm5654_vm15 }
 0x744   : > { %v5650_v31 = vsub.f32 1.0, %v5649_v18 }
 0x746   : > { %v5651_v50 = vmul.f32 %v7273_v10, %v5650_v31 }
 0x748   : > { %v5652_v30 = vadd.f32 %v7273_v10, %v5651_v50 }
 0x74a   : > { %v5656_v42 = vsel %vm5655_vm1, %v7273_v10, %v5652_v30 }
 0x74b   : > { %v5661_v21 = vsel %vm5658_vm2, %v5660_v22, %v5656_v42 }
 0x74c   : > { %v5692_v58 = vmul.f32 %v7267_v28, %v5661_v21  ;;  %v5693_v53 = vmul.f32 %v7269_v6, %v5661_v21 }
 0x74e   : > { %5724 = vst [vmem:[%s10563_s24 + $0xf0] sm:$0xff] %v5692_v58 }
 0x74f   : > { %5725 = vst [vmem:[%s10563_s24 + $0xf8] sm:$0xff] %v5693_v53 }
 0x750   : > { %7333 = shalt.err (!%p7330_p1)
}
 0x751   : > { %s7433_s7 = smov 128   ;;  %s7434_s24 = smov 384  }
 0x752   : > { %s7435_s25 = smov 8  }
 0x753   : > { %7072 = dma.vmem_to_hbm [thread:$0]  (%p7541_p13), %s5744_s26, 4096, %s5746_s15, %s5727_s20, %s7433_s7, %s7434_s24, %s7435_s25  }
 0x754 PF: > { %p7083_p4 = scmp.ge.s32.totalorder %s7428_s19, 2  ;;  %s5760_s29 = sand.u32 1, %s7388_s9  }
 0x755   : > { %s5761_s30 = scalar_lea.sflag [#allocation4], %s5760_s29 }
 0x756   : > { %p7079_p5 = pnand %p7083_p4, %p7546_p2 }
 0x758   : > { %p7080_p6 = pneg %p7079_p5 }
 0x75a   : > { %7383 = dma.done.wait (%p7080_p6), %s5761_s30, 4096  }
 0x75b   : > { %7385 = vsyncadd (%p7080_p6), %s5761_s30, 4294963200  ;;  %s18_s19 = sadd.s32 1, %s7428_s19   ;;  %s11108_s15 = sld [smem:[#allocation8_spill]] }
 0x75c   : > { %p15_p7 = scmp.ge.s32.totalorder %s18_s19, 8   ;;  %s11109_s16 = sld [smem:[#allocation9_spill]] }
 0x75d   : > { %s11110_s17 = sld [smem:[#allocation10_spill]]  ;;  %s11112_s9 = smov %s7392_s10 }
 0x75e   : > { %s11111_s18 = sld [smem:[#allocation11_spill]]  ;;  %s11113_s10 = smov %s7396_s11 }
 0x75f   : > { %s11114_s11 = smov %s7539_s4  ;;  %s11115_s12 = smov %s7404_s13 }
 0x760   : > { %s11116_s13 = smov %s7408_s14  ;;  %s11117_s14 = smov %s7525_s27 }
 0x761   :  { %17 = sbr.rel (!%p15_p7) target bundleno = 9 (0x9), region = 101 }
 0x766   :  { %5767 = vsyncpa [#allocation3], 1 }
 0x767   :  { %5769 = vsyncpa [#allocation3 + $0x1], 1 }
 0x768   :  { %5770 = vsyncpa [#allocation4], 1 }
 0x769   :  { %5772 = vsyncpa [#allocation4 + $0x1], 1 }

</bundles_post_ra>
